<compile_context>
chip_gen: v6e
topology: v6e:2x2x1
jax: 0.10.0
libtpu: 0.0.40
codegen_flags: <defaults>
</compile_context>

<pallas_src>
import functools

import jax
import jax.numpy as jnp
from jax.experimental import pallas as pl
from jax.experimental.pallas import tpu as pltpu


def _focal_loss_kernel(logits_ref, labels_ref, loss_part_ref, label_part_ref,
                       *, alpha: float, gamma: float, n_rows: int,
                       block_rows: int):
    i = pl.program_id(0)

    x = logits_ref[...].astype(jnp.float32)
    t = labels_ref[...].astype(jnp.float32)
    tr, c = x.shape  # static block shape

    # Tail mask: rows past n_rows belong to the padded partial block and must
    # not contribute (a zero row is NOT loss-free for focal loss).
    row_idx = jax.lax.broadcasted_iota(jnp.int32, (tr, c), 0) + i * block_rows
    valid = row_idx < n_rows

    # Share one exp per element between sigmoid and the stable BCE term:
    #   e   = exp(-|x|)
    #   p   = sigmoid(x) = 1/(1+e)        (x >= 0)
    #                    = e/(1+e)        (x <  0)
    #   ce  = max(x,0) - x*t + log1p(e)   (stable BCE-with-logits)
    e = jnp.exp(-jnp.abs(x))
    inv_1pe = 1.0 / (1.0 + e)
    p = jnp.where(x >= 0.0, inv_1pe, e * inv_1pe)
    ce = jnp.maximum(x, 0.0) - x * t + jnp.log1p(e)

    p_t = p * t + (1.0 - p) * (1.0 - t)
    one_m_pt = 1.0 - p_t

    # gamma modulator: avoid pow (= exp+log on the single EUP slot) for the
    # common small-integer gammas (default 2.0) -> repeated VPU multiplies.
    g = float(gamma)
    if g.is_integer() and 0 <= int(g) <= 8:
        mod = jnp.ones_like(one_m_pt)
        for _ in range(int(g)):
            mod = mod * one_m_pt
    else:
        mod = jnp.power(one_m_pt, g)

    loss = ce * mod
    if alpha >= 0:
        loss = (alpha * t + (1.0 - alpha) * (1.0 - t)) * loss

    # Mask padded rows (jnp.where, not multiply, so garbage/NaN padding is
    # dropped rather than propagated).
    loss = jnp.where(valid, loss, 0.0)
    t_valid = jnp.where(valid, t, 0.0)

    # Cheap VPU-only fold: (tr, c) -> (8, c) by adding 8-row vreg bands.
    loss_fold = jnp.sum(loss.reshape(tr // 8, 8, c), axis=0)
    label_fold = jnp.sum(t_valid.reshape(tr // 8, 8, c), axis=0)

    # One lane-dense (8, c) store per grid step, per-block output (parallel-safe).
    loss_part_ref[...] = loss_fold
    label_part_ref[...] = label_fold


def edge_cls_loss(src_logits, labels, num_connection=None,
                  *, focal_alpha: float = 0.25, focal_gamma: float = 2.0,
                  tile_rows: int = 512):
    """Pallas implementation of EdgeClsLoss.forward.

    `num_connection` is accepted for signature fidelity but (as in the PyTorch
    module) unused.
    """
    del num_connection
    n, c = src_logits.shape

    # Tile sizing: multiple of 8 rows, no bigger than the (rounded-up) row
    # count, and keep the double-buffered input working set modest so the same
    # code fits the smaller v7x VMEM (2 inputs * 2 buffers * tr * c * 4B).
    tr = max(8, (int(tile_rows) // 8) * 8)
    rows_rounded = ((n + 7) // 8) * 8
    tr = min(tr, rows_rounded)
    vmem_budget_bytes = 16 * 1024 * 1024
    max_tr = max(8, (vmem_budget_bytes // (16 * c)) // 8 * 8)
    tr = min(tr, max_tr)

    num_blocks = pl.cdiv(n, tr)

    kernel = functools.partial(
        _focal_loss_kernel,
        alpha=float(focal_alpha),
        gamma=float(focal_gamma),
        n_rows=n,
        block_rows=tr,
    )

    loss_parts, label_parts = pl.pallas_call(
        kernel,
        out_shape=(jax.ShapeDtypeStruct((num_blocks, 8, c), jnp.float32),
                   jax.ShapeDtypeStruct((num_blocks, 8, c), jnp.float32)),
        grid_spec=pltpu.PrefetchScalarGridSpec(
            num_scalar_prefetch=0,
            grid=(num_blocks,),
            in_specs=[
                pl.BlockSpec((tr, c), lambda i: (i, 0)),
                pl.BlockSpec((tr, c), lambda i: (i, 0)),
            ],
            out_specs=(
                pl.BlockSpec((None, 8, c), lambda i: (i, 0, 0)),
                pl.BlockSpec((None, 8, c), lambda i: (i, 0, 0)),
            ),
        ),
        compiler_params=pltpu.CompilerParams(
            dimension_semantics=("parallel",)),
    )(src_logits, labels)

    # Tiny final reduction + normalization in the wrapper.
    loss_sum = jnp.sum(loss_parts)
    label_sum = jnp.sum(label_parts)

    # torch.isnan(loss) -> 0 ; labels.sum() == 0 -> 0 ; else loss / max(1, sum)
    # TODO(synk): the PyTorch module also logs 'NAN loss' via logging; only the
    # numerical NaN->0 guard is implemented here.
    normalized = loss_sum / jnp.maximum(jnp.float32(1.0), label_sum)
    return jnp.where(jnp.isnan(loss_sum) | (label_sum == 0.0),
                     jnp.float32(0.0), normalized)


def _reference(src_logits, labels, alpha=0.25, gamma=2.0):
    x = src_logits.astype(jnp.float32)
    t = labels.astype(jnp.float32)
    p = jax.nn.sigmoid(x)
    ce = jnp.maximum(x, 0.0) - x * t + jnp.log1p(jnp.exp(-jnp.abs(x)))
    p_t = p * t + (1 - p) * (1 - t)
    loss = ce * (1 - p_t) ** gamma
    if alpha >= 0:
        loss = (alpha * t + (1 - alpha) * (1 - t)) * loss
    loss_sum = jnp.sum(loss)
    lsum = jnp.sum(t)
    out = loss_sum / jnp.maximum(1.0, lsum)
    return jnp.where(jnp.isnan(loss_sum) | (lsum == 0), 0.0, out)


if __name__ == "__main__":
    # "cfg" parameters (standard focal-loss defaults).
    FOCAL_ALPHA = 0.25
    FOCAL_GAMMA = 2.0

    key = jax.random.PRNGKey(0)
    k1, k2 = jax.random.split(key)
    n_edges, n_classes = 1000, 128     # not a multiple of tile_rows -> tests tail mask
    src_logits = jax.random.normal(k1, (n_edges, n_classes), dtype=jnp.float32)
    labels = (jax.random.uniform(k2, (n_edges, n_classes)) < 0.1).astype(
        jnp.float32)
    num_connection = jnp.int32(n_edges)   # unused, mirrors PyTorch signature

    out = edge_cls_loss(src_logits, labels, num_connection,
                        focal_alpha=FOCAL_ALPHA, focal_gamma=FOCAL_GAMMA)
    out = jax.block_until_ready(out)

    ref = _reference(src_logits, labels, FOCAL_ALPHA, FOCAL_GAMMA)
    assert jnp.allclose(out, ref, rtol=1e-4, atol=1e-5), (out, ref)

    # zero-positive-label guard path must return exactly 0.0
    out_zero = edge_cls_loss(src_logits, jnp.zeros_like(labels), num_connection,
                             focal_alpha=FOCAL_ALPHA, focal_gamma=FOCAL_GAMMA)
    out_zero = jax.block_until_ready(out_zero)
    assert out_zero == 0.0, out_zero

    print("KERNEL_OK")
</pallas_src>

<mosaic_0001>
module attributes {stable_mosaic.version = 11 : i64} {
  func.func @_focal_loss_kernel(%arg0: i32, %arg1: memref<512x128xf32, #tpu.memory_space<vmem>>, %arg2: memref<512x128xf32, #tpu.memory_space<vmem>>, %arg3: memref<1x8x128xf32, #tpu.memory_space<vmem>>, %arg4: memref<1x8x128xf32, #tpu.memory_space<vmem>>) attributes {dimension_semantics = [#tpu.dimension_semantics<parallel>], iteration_bounds = array<i64: 2>, scalar_prefetch = 0 : i64, scratch_operands = 0 : i64, tpu.core_type = #tpu.core_type<tc>, window_params = [{transform_indices = @transform_0, window_bounds = array<i64: 512, 128>}, {transform_indices = @transform_1, window_bounds = array<i64: 512, 128>}, {transform_indices = @transform_2, window_bounds = array<i64: 1, 8, 128>}, {transform_indices = @transform_3, window_bounds = array<i64: 1, 8, 128>}]} {
    %c0 = arith.constant 0 : index
    %c0_0 = arith.constant 0 : index
    %0 = vector.load %arg1[%c0, %c0_0] : memref<512x128xf32, #tpu.memory_space<vmem>>, vector<512x128xf32>
    %c0_1 = arith.constant 0 : index
    %c0_2 = arith.constant 0 : index
    %1 = vector.load %arg2[%c0_1, %c0_2] : memref<512x128xf32, #tpu.memory_space<vmem>>, vector<512x128xf32>
    %2 = tpu.iota {dimensions = array<i32: 0>} : vector<512x128xi32>
    %c512_i32 = arith.constant 512 : i32
    %3 = arith.muli %arg0, %c512_i32 : i32
    %4 = vector.broadcast %3 : i32 to vector<512x128xi32>
    %5 = arith.addi %2, %4 : vector<512x128xi32>
    %c1000_i32 = arith.constant 1000 : i32
    %6 = vector.broadcast %c1000_i32 : i32 to vector<512x128xi32>
    %7 = arith.cmpi slt, %5, %6 : vector<512x128xi32>
    %8 = math.absf %0 : vector<512x128xf32>
    %cst = arith.constant 0.000000e+00 : f32
    %9 = vector.broadcast %cst : f32 to vector<512x128xf32>
    %10 = arith.subf %9, %8 : vector<512x128xf32>
    %11 = math.exp %10 : vector<512x128xf32>
    %cst_3 = arith.constant 1.000000e+00 : f32
    %12 = vector.broadcast %cst_3 : f32 to vector<512x128xf32>
    %13 = arith.addf %12, %11 : vector<512x128xf32>
    %cst_4 = arith.constant 1.000000e+00 : f32
    %14 = vector.broadcast %cst_4 : f32 to vector<512x128xf32>
    %15 = arith.divf %14, %13 : vector<512x128xf32>
    %cst_5 = arith.constant 0.000000e+00 : f32
    %16 = vector.broadcast %cst_5 : f32 to vector<512x128xf32>
    %17 = arith.cmpf oge, %0, %16 : vector<512x128xf32>
    %18 = arith.mulf %11, %15 : vector<512x128xf32>
    %19 = arith.select %17, %15, %18 : vector<512x128xi1>, vector<512x128xf32>
    %cst_6 = arith.constant 0.000000e+00 : f32
    %20 = vector.broadcast %cst_6 : f32 to vector<512x128xf32>
    %21 = arith.maximumf %0, %20 : vector<512x128xf32>
    %22 = arith.mulf %0, %1 : vector<512x128xf32>
    %23 = arith.subf %21, %22 : vector<512x128xf32>
    %24 = math.log1p %11 : vector<512x128xf32>
    %25 = arith.addf %23, %24 : vector<512x128xf32>
    %26 = arith.mulf %19, %1 : vector<512x128xf32>
    %cst_7 = arith.constant 1.000000e+00 : f32
    %27 = vector.broadcast %cst_7 : f32 to vector<512x128xf32>
    %28 = arith.subf %27, %19 : vector<512x128xf32>
    %cst_8 = arith.constant 1.000000e+00 : f32
    %29 = vector.broadcast %cst_8 : f32 to vector<512x128xf32>
    %30 = arith.subf %29, %1 : vector<512x128xf32>
    %31 = arith.mulf %28, %30 : vector<512x128xf32>
    %32 = arith.addf %26, %31 : vector<512x128xf32>
    %cst_9 = arith.constant 1.000000e+00 : f32
    %33 = vector.broadcast %cst_9 : f32 to vector<512x128xf32>
    %34 = arith.subf %33, %32 : vector<512x128xf32>
    %cst_10 = arith.constant 1.000000e+00 : f32
    %35 = vector.broadcast %cst_10 : f32 to vector<512x128xf32>
    %36 = arith.mulf %35, %34 : vector<512x128xf32>
    %37 = arith.mulf %36, %34 : vector<512x128xf32>
    %38 = arith.mulf %25, %37 : vector<512x128xf32>
    %cst_11 = arith.constant 2.500000e-01 : f32
    %39 = vector.broadcast %cst_11 : f32 to vector<512x128xf32>
    %40 = arith.mulf %39, %1 : vector<512x128xf32>
    %cst_12 = arith.constant 1.000000e+00 : f32
    %41 = vector.broadcast %cst_12 : f32 to vector<512x128xf32>
    %42 = arith.subf %41, %1 : vector<512x128xf32>
    %cst_13 = arith.constant 7.500000e-01 : f32
    %43 = vector.broadcast %cst_13 : f32 to vector<512x128xf32>
    %44 = arith.mulf %43, %42 : vector<512x128xf32>
    %45 = arith.addf %40, %44 : vector<512x128xf32>
    %46 = arith.mulf %45, %38 : vector<512x128xf32>
    %cst_14 = arith.constant 0.000000e+00 : f32
    %47 = vector.broadcast %cst_14 : f32 to vector<512x128xf32>
    %48 = arith.select %7, %46, %47 : vector<512x128xi1>, vector<512x128xf32>
    %cst_15 = arith.constant 0.000000e+00 : f32
    %49 = vector.broadcast %cst_15 : f32 to vector<512x128xf32>
    %50 = arith.select %7, %1, %49 : vector<512x128xi1>, vector<512x128xf32>
    %51 = vector.shape_cast %48 : vector<512x128xf32> to vector<64x8x128xf32>
    %cst_16 = arith.constant dense<0.000000e+00> : vector<8x128xf32>
    %52 = vector.multi_reduction <add>, %51, %cst_16 [0] : vector<64x8x128xf32> to vector<8x128xf32>
    %53 = vector.shape_cast %50 : vector<512x128xf32> to vector<64x8x128xf32>
    %cst_17 = arith.constant dense<0.000000e+00> : vector<8x128xf32>
    %54 = vector.multi_reduction <add>, %53, %cst_17 [0] : vector<64x8x128xf32> to vector<8x128xf32>
    %c0_18 = arith.constant 0 : index
    %c0_19 = arith.constant 0 : index
    %c0_20 = arith.constant 0 : index
    %55 = vector.load %arg3[%c0_18, %c0_19, %c0_20] : memref<1x8x128xf32, #tpu.memory_space<vmem>>, vector<1x8x128xf32>
    %56 = vector.shape_cast %55 : vector<1x8x128xf32> to vector<8x128xf32>
    %57 = vector.shape_cast %52 : vector<8x128xf32> to vector<1x8x128xf32>
    tpu.vector_store %arg3[%c0_18, %c0_19, %c0_20], %57 {strides = array<i32>} : memref<1x8x128xf32, #tpu.memory_space<vmem>>, vector<1x8x128xf32>,
    %c0_21 = arith.constant 0 : index
    %c0_22 = arith.constant 0 : index
    %c0_23 = arith.constant 0 : index
    %58 = vector.load %arg4[%c0_21, %c0_22, %c0_23] : memref<1x8x128xf32, #tpu.memory_space<vmem>>, vector<1x8x128xf32>
    %59 = vector.shape_cast %58 : vector<1x8x128xf32> to vector<8x128xf32>
    %60 = vector.shape_cast %54 : vector<8x128xf32> to vector<1x8x128xf32>
    tpu.vector_store %arg4[%c0_21, %c0_22, %c0_23], %60 {strides = array<i32>} : memref<1x8x128xf32, #tpu.memory_space<vmem>>, vector<1x8x128xf32>,
    return
  }
  func.func @transform_0(%arg0: i32) -> (i32, i32) {
    %c0_i32 = arith.constant 0 : i32
    %c0_i32_0 = arith.constant 0 : i32
    return %arg0, %c0_i32 : i32, i32
  }
  func.func @transform_1(%arg0: i32) -> (i32, i32) {
    %c0_i32 = arith.constant 0 : i32
    %c0_i32_0 = arith.constant 0 : i32
    return %arg0, %c0_i32 : i32, i32
  }
  func.func @transform_2(%arg0: i32) -> (i32, i32, i32) {
    %c0_i32 = arith.constant 0 : i32
    %c0_i32_0 = arith.constant 0 : i32
    %c0_i32_1 = arith.constant 0 : i32
    return %arg0, %c0_i32, %c0_i32_0 : i32, i32, i32
  }
  func.func @transform_3(%arg0: i32) -> (i32, i32, i32) {
    %c0_i32 = arith.constant 0 : i32
    %c0_i32_0 = arith.constant 0 : i32
    %c0_i32_1 = arith.constant 0 : i32
    return %arg0, %c0_i32, %c0_i32_0 : i32, i32, i32
  }
}

</mosaic_0001>

<bundles_post_ra>
// kernel: tpu_custom_call.1
= control target key start
LH: loop header
LB: loop body
LE: loop exit
PB: predicated region body
PF: predicated region fallthrough
CT: control target
= control target key end

     0   :  { %9 = vsyncpa [#allocation3], 0  ;;  %s10940_s0 = inlined_call_operand.hbm [shape: f32[1000,128], index: 0, kind: input, shape index: {}]   ;;  %s10941_s1 = inlined_call_operand.hbm [shape: f32[1000,128], index: 1, kind: input, shape index: {}]   ;;  %s10942_s2 = inlined_call_operand.hbm [shape: f32[2,8,128], index: 2, kind: output, shape index: {0}]   ;;  %s10943_s3 = inlined_call_operand.hbm [shape: f32[2,8,128], index: 3, kind: output, shape index: {1}]  }
   0x1   :  { %11 = vsyncpa [#allocation3 + $0x1], 0 }
   0x2   :  { %12 = vsyncpa [#allocation6], 0 }
   0x3   :  { %14 = vsyncpa [#allocation6 + $0x1], 0 }
   0x4   :  { %15 = vsyncpa [#allocation4], 0 }
   0x5   :  { %17 = vsyncpa [#allocation4 + $0x1], 0 }
   0x6   :  { %18 = vsyncpa [#allocation9], 0 }
   0x7   :  { %20 = vsyncpa [#allocation9 + $0x1], 0  ;;  %s4075_s12 = smov 0   ;;  %s4077_s13 = smov 0  }
   0x8   :  { %s4079_s14 = smov 0   ;;  %s4081_s15 = smov 0  }
   0x9 LB: > { %s4096_s16 = sadd.s32 4294967295, %s4045_s15   ;;  %s3238_s17 = sadd.s32 4294967294, %s4045_s15   ;;  %s4045_s15 = sphi %s4081_s15, %s14344_s15   ;;  %s4041_s14 = sphi %s4079_s14, %s14343_s14   ;;  %s4037_s13 = sphi %s4077_s13, %s14342_s13   ;;  %s4033_s12 = sphi %s4075_s12, %s14341_s12  }
   0xa   : > { %s4100_s18 = sadd.s32 1, %s4045_s15   ;;  %s33_s19 = sadd.s32 1, %s4041_s14 }
   0xb   : > { %s30_s20 = ssub.s32 %s4045_s15, %s4100_s18  ;;  %p40_p0 = scmp.ne.s32.totalorder %s4041_s14, %s4037_s13 }
   0xc   : > { %p31_p1 = scmp.eq.s32.totalorder %s30_s20, 0  ;;  %p41_p2 = scmp.eq.s32.totalorder %s4045_s15, 0 }
   0xd   : > { %p46_p3 = scmp.ne.s32.totalorder %s4037_s13, %s4033_s12  ;;  %p47_p4 = scmp.eq.s32.totalorder %s4096_s16, 0 }
   0xe   : > { %s4112_s21 = scalar_select %p31_p1, %s4041_s14, %s33_s19  }
   0xf   : > { %p4114_p5 = por %p41_p2, %p40_p0  ;;  %p4118_p6 = por %p47_p4, %p46_p3 }
  0x10   : > { %p96_p7 = scmp.eq.s32.totalorder %s4096_s16, 1  ;;  %p102_p8 = scmp.eq.s32.totalorder %s3238_s17, 1 }
  0x11   : > { %p10944_p11 = scmp.ge.s32.totalorder %s4045_s15, 2 }
  0x12   : > { %p4123_p9 = por %p96_p7, %p40_p0  ;;  %p4127_p10 = por %p102_p8, %p46_p3 }
  0x13   : > { %144 = sbr.rel (%p10944_p11) target bundleno = 88 (0x58), region = 16 }
  0x14   : > { %s11781_s24 = scalar_select %p4123_p9, 1, 0 }
  0x15   : > { %s11782_s25 = scalar_select %p4127_p10, 1, 0 }
  0x18   : > { %147 = sbr.rel (!%p4114_p5) target bundleno = 56 (0x38), region = 20  ;;  %s148_s26 = sand.u32 (%p4114_p5), 1, %s4041_s14  }
  0x19   : > { %s3242_s27 = sshll.u32 (%p4114_p5), %s4045_s15, 6  ;;  %s3241_s28 = sshll.u32 (%p4114_p5), %s148_s26, 9 }
  0x1a   : > { %s154_s29 = ssub.s32 (%p4114_p5), 125, %s3242_s27  ;;  %s4141_s5 = scalar_lea.sflag (%p4114_p5), [#allocation3], %s148_s26 }
  0x1b   : > { %p155_p12 = scmp.lt.s32.totalorder (%p4114_p5), %s154_s29, 64  ;;  %s152_s6 = scalar_lea.vmem (%p4114_p5), [#allocation2], %s3241_s28 }
  0x1d   : > { %s14346_s29 = smov (!%p155_p12, %s154_s29), 64 }
  0x1e   : > { %s4138_s30 = sshll.u32 %s14346_s29, 7 }
  0x1f   : > { %s159_s4 = ssub.s32 8192, %s4138_s30 }
  0x20   : > { %160 = vsyncadd %s4141_s5, %s159_s4  ;;  %p3244_p13 = scmp.ne.s32.totalorder %s4138_s30, 0  ;;  %s3267_s7 = sshll.u32 %s4045_s15, 13 }
  0x21   : > { %s4149_s10 = scalar_lea.hbm %s10940_s0, %s3267_s7  ;;  %s165_s11 = sshll.u32 %s152_s6, 4  ;;  %s4151_s11 = int_to_ptr.vmem [resolvable:$true] %s165_s11 }
  0x22   : > { %s3895_s17 = scalar_lea.hbm %s4149_s10, %s4138_s30  ;;  %s3899_s26 = scalar_lea.hbm %s10940_s0, 16000 }
  0x23   : > { %p3896_p0 = scmp.ne.s32.totalorder %s4149_s10, %s3895_s17  ;;  %p3900_p3 = scmp.lt.s32.totalorder %s4149_s10, %s10940_s0 }
  0x24   : > { %p3901_p4 = scmp.lt.s32.totalorder %s3899_s26, %s3895_s17 }
  0x25   : > { %p3897_p1 = pnand %p3896_p0, %p3244_p13 }
  0x26   : > { %p3902_p7 = por %p3901_p4, %p3900_p3 }
  0x27   : > { %p3898_p2 = pneg %p3897_p1 }
  0x29   : > { %p3903_p8 = pnand %p3902_p7, %p3898_p2 }
  0x2b   : > { %3906 = shalt.err (!%p3903_p8)
}
  0x2c   : > { %s3907_s29 = scalar_lea.vmem %s4151_s11, %s4138_s30  ;;  %s4047_s4 = smov [#allocation2]  }
  0x2d   : > { %p3908_p12 = scmp.ne.s32.totalorder %s4151_s11, %s3907_s29  ;;  %s3911_s6 = sshll.u32 %s4047_s4, 4  ;;  %s3912_s6 = int_to_ptr.vmem [resolvable:$false] %s3911_s6 }
  0x2e   : > { %s3913_s7 = scalar_lea.vmem %s3912_s6, 16384  ;;  %p3914_p11 = scmp.lt.s32.totalorder %s4151_s11, %s3912_s6 }
  0x2f   : > { %p3909_p0 = pnand %p3908_p12, %p3244_p13  ;;  %p3915_p10 = scmp.lt.s32.totalorder %s3913_s7, %s3907_s29 }
  0x31   : > { %p3910_p1 = pneg %p3909_p0  ;;  %p3916_p9 = por %p3915_p10, %p3914_p11 }
  0x33   : > { %p3917_p3 = pnand %p3916_p9, %p3910_p1 }
  0x35   : > { %3920 = shalt.err (!%p3917_p3)
}
  0x36   : > { %s4048_s8 = smov 128   ;;  %s4049_s9 = smov 8  }
  0x37   : > { %171 = dma.hbm_to_vmem [thread:$0]  (%p3244_p13), %s4149_s10, %s4138_s30, %s4151_s11, %s4141_s5, %s4048_s8, %s4048_s8, %s4049_s9  }
  0x38 PF: > { %174 = sbr.rel (!%p4114_p5) target bundleno = 88 (0x58), region = 24  ;;  %s175_s17 = sand.u32 (%p4114_p5), 1, %s4041_s14  }
  0x39   : > { %s3249_s19 = sshll.u32 (%p4114_p5), %s4045_s15, 6  ;;  %s3248_s20 = sshll.u32 (%p4114_p5), %s175_s17, 9 }
  0x3a   : > { %s181_s26 = ssub.s32 (%p4114_p5), 125, %s3249_s19  ;;  %s4184_s29 = scalar_lea.sflag (%p4114_p5), [#allocation6], %s175_s17 }
  0x3b   : > { %p182_p9 = scmp.lt.s32.totalorder (%p4114_p5), %s181_s26, 64  ;;  %s179_s30 = scalar_lea.vmem (%p4114_p5), [#allocation5], %s3248_s20 }
  0x3d   : > { %s14348_s26 = smov (!%p182_p9, %s181_s26), 64 }
  0x3e   : > { %s4181_s27 = sshll.u32 %s14348_s26, 7 }
  0x3f   : > { %s186_s28 = ssub.s32 8192, %s4181_s27 }
  0x40   : > { %187 = vsyncadd %s4184_s29, %s186_s28  ;;  %p3251_p5 = scmp.ne.s32.totalorder %s4181_s27, 0  ;;  %s3268_s22 = sshll.u32 %s4045_s15, 13 }
  0x41   : > { %s4192_s11 = scalar_lea.hbm %s10941_s1, %s3268_s22  ;;  %s192_s4 = sshll.u32 %s179_s30, 4  ;;  %s4194_s4 = int_to_ptr.vmem [resolvable:$true] %s192_s4 }
  0x42   : > { %s3921_s6 = scalar_lea.hbm %s4192_s11, %s4181_s27  ;;  %s3925_s9 = scalar_lea.hbm %s10941_s1, 16000 }
  0x43   : > { %p3922_p10 = scmp.ne.s32.totalorder %s4192_s11, %s3921_s6  ;;  %p3926_p2 = scmp.lt.s32.totalorder %s4192_s11, %s10941_s1 }
  0x44   : > { %p3927_p4 = scmp.lt.s32.totalorder %s3925_s9, %s3921_s6 }
  0x45   : > { %p3923_p11 = pnand %p3922_p10, %p3251_p5 }
  0x46   : > { %p3928_p7 = por %p3927_p4, %p3926_p2 }
  0x47   : > { %p3924_p13 = pneg %p3923_p11 }
  0x49   : > { %p3929_p8 = pnand %p3928_p7, %p3924_p13 }
  0x4b   : > { %3932 = shalt.err (!%p3929_p8)
}
  0x4c   : > { %s3933_s20 = scalar_lea.vmem %s4194_s4, %s4181_s27  ;;  %s4050_s26 = smov [#allocation5]  }
  0x4d   : > { %p3934_p12 = scmp.ne.s32.totalorder %s4194_s4, %s3933_s20  ;;  %s3937_s28 = sshll.u32 %s4050_s26, 4  ;;  %s3938_s28 = int_to_ptr.vmem [resolvable:$false] %s3937_s28 }
  0x4e   : > { %s3939_s30 = scalar_lea.vmem %s3938_s28, 16384  ;;  %p3940_p3 = scmp.lt.s32.totalorder %s4194_s4, %s3938_s28 }
  0x4f   : > { %p3935_p0 = pnand %p3934_p12, %p3251_p5  ;;  %p3941_p9 = scmp.lt.s32.totalorder %s3939_s30, %s3933_s20 }
  0x51   : > { %p3936_p1 = pneg %p3935_p0  ;;  %p3942_p10 = por %p3941_p9, %p3940_p3 }
  0x53   : > { %p3943_p11 = pnand %p3942_p10, %p3936_p1 }
  0x55   : > { %3946 = shalt.err (!%p3943_p11)
}
  0x56   : > { %s4051_s22 = smov 128   ;;  %s4052_s5 = smov 8  }
  0x57   : > { %198 = dma.hbm_to_vmem [thread:$0]  (%p3251_p5), %s4192_s11, %s4181_s27, %s4194_s4, %s4184_s29, %s4051_s22, %s4051_s22, %s4052_s5  }
  0x58 PF: > { %p3255_p13 = scmp.ge.s32.totalorder %s4045_s15, 1  ;;  %p200_p2 = scmp.lt.s32.totalorder %s4045_s15, 3 }
  0x5a   : > { %p201_p4 = pnand %p3255_p13, %p200_p2 }
  0x5c   : > { %204 = sbr.rel (%p201_p4) target bundleno = 1013 (0x3f5), region = 28 }
  0x61   : > { %s4223_s10 = sand.u32 1, %s4037_s13  }
  0x62   : > { %s3256_s6 = sshll.u32 %s4223_s10, 9  ;;  %s207_s7 = scalar_lea.sflag [#allocation3], %s4223_s10 }
  0x63   : > { %s4227_s8 = scalar_lea.vmem [#allocation2], %s3256_s6 }
  0x64   : > { %4016 = dma.done.wait (%p4118_p6), %s207_s7, 8192  }
  0x65   : > { %4018 = vsyncadd (%p4118_p6), %s207_s7, 4294959104  ;;  %s216_s27 = scalar_lea.sflag [#allocation6], %s4223_s10  ;;  %s4234_s29 = scalar_lea.vmem [#allocation5], %s3256_s6 }
  0x66   : > { %4020 = dma.done.wait (%p4118_p6), %s216_s27, 8192  }
  0x67   : > { %4022 = vsyncadd (%p4118_p6), %s216_s27, 4294959104  ;;  %v390_v0 = vlaneseq  ;;  %s3260_s11 = sshll.u32 %s4096_s16, 9  ;;  %s3258_s23 = sshll.u32 %s4223_s10, 3 }
  0x68   : > { %v4246_v5 = vstv %s3260_s11  ;;  %s3263_s4 = sshll.u32 %s4096_s16, 7  ;;  %s244_s9 = scalar_lea.vmem [#allocation7], %s3258_s23 }
  0x69   : > { %v4241_v1 = vshrl.u32 %v390_v0, 7  ;;  %s3100_s17 = sshll.u32 %s244_s9, 4  ;;  %s251_s19 = scalar_lea.vmem [#allocation8], %s3258_s23  ;;  %s10871_s17 = int_to_ptr.vmem [resolvable:$true] %s3100_s17 }
  0x6a   : > { %s3113_s20 = sshll.u32 %s251_s19, 4  ;;  %s10869_s30 = scalar_lea.hbm %s10942_s2, %s3263_s4  ;;  %s10878_s20 = int_to_ptr.vmem [resolvable:$true] %s3113_s20 }
  0x6b   : > { %v424_v2 = vadd.s32 264, %v4241_v1  ;;  %v425_v3 = vadd.s32 272, %v4241_v1  ;;  %v426_v4 = vadd.s32 280, %v4241_v1  ;;  %v427_v6 = vadd.s32 288, %v4241_v1  ;;  %s10876_s16 = scalar_lea.hbm %s10943_s3, %s3263_s4  ;;  %s3082_s6 = scalar_lea.sflag [#allocation4], %s4223_s10 }
  0x6c   : > { %v428_v7 = vadd.s32 296, %v4241_v1  ;;  %v429_v8 = vadd.s32 304, %v4241_v1  ;;  %v430_v9 = vadd.s32 312, %v4241_v1  ;;  %v431_v10 = vadd.s32 320, %v4241_v1  ;;  %s3947_s7 = scalar_lea.vmem %s10871_s17, 128  ;;  %p14338_p5 = scmp.ne.s32.totalorder %s11781_s24, 0 }
  0x6d   : > { %v432_v11 = vadd.s32 328, %v4241_v1  ;;  %v433_v12 = vadd.s32 336, %v4241_v1  ;;  %v434_v13 = vadd.s32 344, %v4241_v1  ;;  %v435_v14 = vadd.s32 352, %v4241_v1  ;;  %p3948_p6 = scmp.ne.s32.totalorder %s10871_s17, %s3947_s7 }
  0x6e   : > { %v436_v15 = vadd.s32 360, %v4241_v1  ;;  %v437_v16 = vadd.s32 368, %v4241_v1  ;;  %v438_v17 = vadd.s32 376, %v4241_v1  ;;  %v439_v18 = vadd.s32 384, %v4241_v1 }
  0x6f   : > { %v440_v19 = vadd.s32 392, %v4241_v1  ;;  %v441_v20 = vadd.s32 400, %v4241_v1  ;;  %v442_v21 = vadd.s32 408, %v4241_v1  ;;  %v443_v22 = vadd.s32 416, %v4241_v1  ;;  %p3949_p7 = pnand %p3948_p6, %p14338_p5 }
  0x70   : > { %v444_v23 = vadd.s32 424, %v4241_v1  ;;  %v445_v24 = vadd.s32 432, %v4241_v1  ;;  %v446_v25 = vadd.s32 440, %v4241_v1  ;;  %v447_v26 = vadd.s32 448, %v4241_v1 }
  0x71   : > { %v448_v27 = vadd.s32 456, %v4241_v1  ;;  %v449_v28 = vadd.s32 464, %v4241_v1  ;;  %v450_v29 = vadd.s32 472, %v4241_v1  ;;  %v451_v30 = vadd.s32 480, %v4241_v1  ;;  %p3950_p8 = pneg %p3949_p7 }
  0x72   : > { %v452_v31 = vadd.s32 488, %v4241_v1  ;;  %v453_v32 = vadd.s32 496, %v4241_v1  ;;  %v454_v33 = vadd.s32 504, %v4241_v1  ;;  %v4277_v34 = vadd.s32 %v4246_v5, %v424_v2 }
  0x73   : > { %v4280_v35 = vadd.s32 %v4246_v5, %v425_v3  ;;  %v4283_v36 = vadd.s32 %v4246_v5, %v426_v4  ;;  %v4286_v37 = vadd.s32 %v4246_v5, %v427_v6  ;;  %v4289_v38 = vadd.s32 %v4246_v5, %v428_v7 }
  0x74   : > { %11783 = vst [vmem:[#allocation14_spill] sm:$0xff] %v4277_v34  ;;  %v4292_v39 = vadd.s32 %v4246_v5, %v429_v8  ;;  %v4295_v40 = vadd.s32 %v4246_v5, %v430_v9  ;;  %v4298_v41 = vadd.s32 %v4246_v5, %v431_v10  ;;  %v4301_v42 = vadd.s32 %v4246_v5, %v432_v11  ;;  %v4579_v34 = vld [vmem:[%s4227_s8 + $0xc8] sm:$0xff] }
  0x75   : > { %11784 = vst [vmem:[#allocation15_spill] sm:$0xff] %v4280_v35  ;;  %11785 = vst [vmem:[#allocation16_spill] sm:$0xff] %v4283_v36  ;;  %v4304_v43 = vadd.s32 %v4246_v5, %v433_v12  ;;  %v4307_v44 = vadd.s32 %v4246_v5, %v434_v13  ;;  %v4310_v45 = vadd.s32 %v4246_v5, %v435_v14  ;;  %v392_v2 = vadd.s32 8, %v4241_v1  ;;  %v4576_v35 = vld [vmem:[%s4227_s8 + $0xc0] sm:$0xff] }
  0x76   : > { %11786 = vst [vmem:[#allocation17_spill] sm:$0xff] %v4286_v37  ;;  %11787 = vst [vmem:[#allocation18_spill] sm:$0xff] %v4289_v38  ;;  %v4313_v46 = vadd.s32 %v4246_v5, %v436_v15  ;;  %v4316_v47 = vadd.s32 %v4246_v5, %v437_v16  ;;  %v4319_v48 = vadd.s32 %v4246_v5, %v438_v17  ;;  %v393_v3 = vadd.s32 16, %v4241_v1  ;;  %v4561_v38 = vld [vmem:[%s4227_s8 + $0xa8] sm:$0xff]  ;;  %v4564_v37 = vld [vmem:[%s4227_s8 + $0xb0] sm:$0xff] }
  0x77   : > { %11788 = vst [vmem:[#allocation19_spill] sm:$0xff] %v4292_v39  ;;  %11789 = vst [vmem:[#allocation20_spill] sm:$0xff] %v4295_v40  ;;  %v4322_v49 = vadd.s32 %v4246_v5, %v439_v18  ;;  %v4325_v50 = vadd.s32 %v4246_v5, %v440_v19  ;;  %v4328_v51 = vadd.s32 %v4246_v5, %v441_v20  ;;  %v394_v4 = vadd.s32 24, %v4241_v1  ;;  %v4549_v40 = vld [vmem:[%s4227_s8 + $0x98] sm:$0xff] }
  0x78   : > { %11790 = vst [vmem:[#allocation21_spill] sm:$0xff] %v4298_v41  ;;  %11791 = vst [vmem:[#allocation22_spill] sm:$0xff] %v4301_v42  ;;  %v4331_v52 = vadd.s32 %v4246_v5, %v442_v21  ;;  %v4334_v53 = vadd.s32 %v4246_v5, %v443_v22  ;;  %v4337_v54 = vadd.s32 %v4246_v5, %v444_v23  ;;  %v395_v6 = vadd.s32 32, %v4241_v1  ;;  %v4543_v42 = vld [vmem:[%s4227_s8 + $0x88] sm:$0xff]  ;;  %v4546_v41 = vld [vmem:[%s4227_s8 + $0x90] sm:$0xff] }
  0x79   : > { %11792 = vst [vmem:[#allocation23_spill] sm:$0xff] %v4304_v43  ;;  %11793 = vst [vmem:[#allocation24_spill] sm:$0xff] %v4307_v44  ;;  %v4340_v55 = vadd.s32 %v4246_v5, %v445_v24  ;;  %v4343_v56 = vadd.s32 %v4246_v5, %v446_v25  ;;  %v4346_v57 = vadd.s32 %v4246_v5, %v447_v26  ;;  %v396_v7 = vadd.s32 40, %v4241_v1  ;;  %v4529_v44 = vld [vmem:[%s4227_s8 + $0x78] sm:$0xff]  ;;  %v4532_v43 = vld [vmem:[%s4227_s8 + $0x80] sm:$0xff] }
  0x7a   : > { %11794 = vst [vmem:[#allocation25_spill] sm:$0xff] %v4310_v45  ;;  %11795 = vst [vmem:[#allocation26_spill] sm:$0xff] %v4313_v46  ;;  %v4349_v58 = vadd.s32 %v4246_v5, %v448_v27  ;;  %v4352_v59 = vadd.s32 %v4246_v5, %v449_v28  ;;  %v4355_v60 = vadd.s32 %v4246_v5, %v450_v29  ;;  %v397_v8 = vadd.s32 48, %v4241_v1  ;;  %v4511_v46 = vld [vmem:[%s4227_s8 + $0x68] sm:$0xff]  ;;  %v4526_v45 = vld [vmem:[%s4227_s8 + $0x70] sm:$0xff] }
  0x7b   : > { %11796 = vst [vmem:[#allocation27_spill] sm:$0xff] %v4316_v47  ;;  %11797 = vst [vmem:[#allocation28_spill] sm:$0xff] %v4319_v48  ;;  %v4358_v61 = vadd.s32 %v4246_v5, %v451_v30  ;;  %v4361_v62 = vadd.s32 %v4246_v5, %v452_v31  ;;  %v4364_v63 = vadd.s32 %v4246_v5, %v453_v32  ;;  %v398_v9 = vadd.s32 56, %v4241_v1  ;;  %v4505_v48 = vld [vmem:[%s4227_s8 + $0x58] sm:$0xff]  ;;  %v4508_v47 = vld [vmem:[%s4227_s8 + $0x60] sm:$0xff] }
  0x7c   : > { %11798 = vst [vmem:[#allocation29_spill] sm:$0xff] %v4322_v49  ;;  %11799 = vst [vmem:[#allocation30_spill] sm:$0xff] %v4325_v50  ;;  %v4367_v0 = vadd.s32 %v4246_v5, %v454_v33  ;;  %v399_v10 = vadd.s32 64, %v4241_v1  ;;  %v400_v11 = vadd.s32 72, %v4241_v1  ;;  %v401_v12 = vadd.s32 80, %v4241_v1  ;;  %v4487_v50 = vld [vmem:[%s4227_s8 + $0x48] sm:$0xff] }
  0x7d   : > { %11800 = vst [vmem:[#allocation31_spill] sm:$0xff] %v4328_v51  ;;  %11801 = vst [vmem:[#allocation32_spill] sm:$0xff] %v4331_v52  ;;  %v402_v13 = vadd.s32 88, %v4241_v1  ;;  %v403_v14 = vadd.s32 96, %v4241_v1  ;;  %v404_v15 = vadd.s32 104, %v4241_v1  ;;  %v405_v16 = vadd.s32 112, %v4241_v1 }
  0x7e   : > { %11802 = vst [vmem:[#allocation33_spill] sm:$0xff] %v4334_v53  ;;  %11803 = vst [vmem:[#allocation34_spill] sm:$0xff] %v4337_v54  ;;  %v406_v17 = vadd.s32 120, %v4241_v1  ;;  %v407_v18 = vadd.s32 128, %v4241_v1  ;;  %v408_v19 = vadd.s32 136, %v4241_v1  ;;  %v409_v20 = vadd.s32 144, %v4241_v1 }
  0x7f   : > { %11804 = vst [vmem:[#allocation35_spill] sm:$0xff] %v4340_v55  ;;  %11805 = vst [vmem:[#allocation36_spill] sm:$0xff] %v4343_v56  ;;  %v4389_v21 = vadd.s32 %v4246_v5, %v4241_v1  ;;  %v410_v22 = vadd.s32 152, %v4241_v1  ;;  %v411_v23 = vadd.s32 160, %v4241_v1  ;;  %v412_v24 = vadd.s32 168, %v4241_v1  ;;  %v4448_v56 = vld [vmem:[%s4227_s8 + $0x20] sm:$0xff] }
  0x80   : > { %11806 = vst [vmem:[#allocation37_spill] sm:$0xff] %v4346_v57  ;;  %11807 = vst [vmem:[#allocation38_spill] sm:$0xff] %v4349_v58  ;;  %v4395_v25 = vadd.s32 %v4246_v5, %v392_v2  ;;  %v413_v26 = vadd.s32 176, %v4241_v1  ;;  %v414_v27 = vadd.s32 184, %v4241_v1  ;;  %v415_v28 = vadd.s32 192, %v4241_v1  ;;  %v4445_v57 = vld [vmem:[%s4227_s8 + $0x18] sm:$0xff] }
  0x81   : > { %11808 = vst [vmem:[#allocation39_spill] sm:$0xff] %v4352_v59  ;;  %11809 = vst [vmem:[#allocation40_spill] sm:$0xff] %v4355_v60  ;;  %v4401_v29 = vadd.s32 %v4246_v5, %v393_v3  ;;  %v416_v30 = vadd.s32 200, %v4241_v1  ;;  %v417_v31 = vadd.s32 208, %v4241_v1  ;;  %v4406_v32 = vadd.s32 216, %v4241_v1  ;;  %v4463_v54 = vld [vmem:[%s4227_s8 + $0x28] sm:$0xff] }
  0x82   : > { %11810 = vst [vmem:[#allocation41_spill] sm:$0xff] %v4358_v61  ;;  %11811 = vst [vmem:[#allocation42_spill] sm:$0xff] %v4361_v62  ;;  %v4409_v33 = vadd.s32 %v4246_v5, %v394_v4  ;;  %v4412_v2 = vadd.s32 224, %v4241_v1  ;;  %v4418_v3 = vadd.s32 240, %v4241_v1  ;;  %v4424_v62 = vld [vmem:[%s4227_s8] sm:$0xff]  ;;  %v4427_v61 = vld [vmem:[%s4227_s8 + $0x8] sm:$0xff]  ;;  %v4436_v59 = vadd.s32 %v4246_v5, %v396_v7 }
  0x83   : > { %11812 = vst [vmem:[#allocation43_spill] sm:$0xff] %v4364_v63  ;;  %11813 = vst [vmem:[#allocation44_spill] sm:$0xff] %v4367_v0  ;;  %v4415_v0 = vadd.s32 232, %v4241_v1  ;;  %v4421_v63 = vadd.s32 %v4246_v5, %v395_v6  ;;  %v4430_v4 = vadd.s32 248, %v4241_v1  ;;  %v4433_v60 = vadd.s32 256, %v4241_v1  ;;  %v4442_v6 = vld [vmem:[%s4227_s8 + $0x10] sm:$0xff] }
  0x84   : > { %11814 = vst [vmem:[#allocation45_spill] sm:$0xff] %v4389_v21  ;;  %11815 = vst [vmem:[#allocation46_spill] sm:$0xff] %v4395_v25  ;;  %v4439_v58 = vadd.s32 %v4246_v5, %v397_v8  ;;  %v4451_v55 = vadd.s32 %v4246_v5, %v398_v9  ;;  %v4454_v1 = vadd.s32 %v4246_v5, %v399_v10  ;;  %v4466_v53 = vld [vmem:[%s4227_s8 + $0x30] sm:$0xff]  ;;  %v4469_v52 = vld [vmem:[%s4227_s8 + $0x38] sm:$0xff]  ;;  %v11903_v21 = vand.u32 2147483647, %v4448_v56 }
  0x85   : > { %11816 = vst [vmem:[#allocation47_spill] sm:$0xff] %v4401_v29  ;;  %11817 = vst [vmem:[#allocation48_spill] sm:$0xff] %v4409_v33  ;;  %v4457_v7 = vadd.s32 %v4246_v5, %v400_v11  ;;  %v4460_v8 = vadd.s32 %v4246_v5, %v401_v12  ;;  %v4472_v9 = vadd.s32 %v4246_v5, %v402_v13  ;;  %v4484_v51 = vld [vmem:[%s4227_s8 + $0x40] sm:$0xff]  ;;  %v4490_v49 = vld [vmem:[%s4227_s8 + $0x50] sm:$0xff]  ;;  %v11900_v29 = vand.u32 2147483647, %v4445_v57 }
  0x86   : > { %11818 = vst [vmem:[#allocation49_spill] sm:$0xff] %v4421_v63  ;;  %11819 = vst [vmem:[#allocation50_spill] sm:$0xff] %v4424_v62  ;;  %v4475_v10 = vadd.s32 %v4246_v5, %v403_v14  ;;  %v4478_v11 = vadd.s32 %v4246_v5, %v404_v15  ;;  %v4481_v12 = vadd.s32 %v4246_v5, %v405_v16  ;;  %v4717_v63 = vld [vmem:[%s4227_s8 + $0x160] sm:$0xff] }
  0x87   : > { %11820 = vst [vmem:[#allocation51_spill] sm:$0xff] %v4427_v61  ;;  %11821 = vst [vmem:[#allocation52_spill] sm:$0xff] %v4436_v59  ;;  %v4493_v13 = vadd.s32 %v4246_v5, %v406_v17  ;;  %v4496_v14 = vadd.s32 %v4246_v5, %v407_v18  ;;  %v4499_v15 = vadd.s32 %v4246_v5, %v408_v19  ;;  %v334_v33 = vld [vmem:[%s4234_s29 + $0x40] sm:$0xff] }
  0x88   : > { %11822 = vst [vmem:[#allocation53_spill] sm:$0xff] %v4439_v58  ;;  %11823 = vst [vmem:[#allocation54_spill] sm:$0xff] %v4442_v6  ;;  %v4502_v16 = vadd.s32 %v4246_v5, %v409_v20  ;;  %v4514_v17 = vadd.s32 %v4246_v5, %v410_v22  ;;  %v4517_v18 = vadd.s32 %v4246_v5, %v411_v23  ;;  %v4728_v58 = vld [vmem:[%s4227_s8 + $0x168] sm:$0xff] }
  0x89   : > { %11824 = vst [vmem:[#allocation55_spill] sm:$0xff] %v4445_v57  ;;  %11825 = vst [vmem:[#allocation56_spill] sm:$0xff] %v4448_v56  ;;  %v4520_v19 = vadd.s32 %v4246_v5, %v412_v24  ;;  %v4523_v20 = vadd.s32 %v4246_v5, %v413_v26  ;;  %v4535_v22 = vadd.s32 %v4246_v5, %v414_v27  ;;  %v4558_v26 = vld [vmem:[%s4227_s8 + $0xa0] sm:$0xff]  ;;  %v4573_v24 = vld [vmem:[%s4227_s8 + $0xb8] sm:$0xff] }
  0x8a   : > { %11826 = vst [vmem:[#allocation57_spill] sm:$0xff] %v4451_v55  ;;  %11827 = vst [vmem:[#allocation58_spill] sm:$0xff] %v4454_v1  ;;  %v4538_v23 = vadd.s32 %v4246_v5, %v415_v28  ;;  %v4552_v39 = vadd.s32 %v4246_v5, %v416_v30  ;;  %v4567_v36 = vadd.s32 %v4246_v5, %v417_v31  ;;  %v4589_v28 = vld [vmem:[%s4227_s8 + $0xd0] sm:$0xff]  ;;  %v4605_v27 = vld [vmem:[%s4227_s8 + $0xe8] sm:$0xff] }
  0x8b   : > { %11828 = vst [vmem:[#allocation59_spill] sm:$0xff] %v4457_v7  ;;  %11829 = vst [vmem:[#allocation60_spill] sm:$0xff] %v4460_v8  ;;  %v4621_v30 = vld [vmem:[%s4227_s8 + $0x100] sm:$0xff]  ;;  %v4635_v31 = vld [vmem:[%s4227_s8 + $0x110] sm:$0xff] }
  0x8c   : > { %11830 = vst [vmem:[#allocation61_spill] sm:$0xff] %v4463_v54  ;;  %11831 = vst [vmem:[#allocation62_spill] sm:$0xff] %v4466_v53  ;;  %v4695_v8 = vld [vmem:[%s4227_s8 + $0x150] sm:$0xff]  ;;  %v4706_v55 = vld [vmem:[%s4227_s8 + $0x158] sm:$0xff] }
  0x8d   : > { %11832 = vst [vmem:[#allocation63_spill] sm:$0xff] %v4469_v52  ;;  %11833 = vst [vmem:[#allocation64_spill] sm:$0xff] %v4472_v9  ;;  %v11891_v9 = vand.u32 2147483647, %v4424_v62 }
  0x8e   : > { %11834 = vst [vmem:[#allocation65_spill] sm:$0xff] %v4475_v10  ;;  %11835 = vst [vmem:[#allocation66_spill] sm:$0xff] %v4478_v11  ;;  %v4684_v10 = vld [vmem:[%s4227_s8 + $0x148] sm:$0xff]  ;;  %v329_v11 = vld [vmem:[%s4234_s29 + $0x18] sm:$0xff] }
  0x8f   : > { %11836 = vst [vmem:[#allocation67_spill] sm:$0xff] %v4481_v12  ;;  %11837 = vst [vmem:[#allocation68_spill] sm:$0xff] %v4484_v51 }
  0x90   : > { %11838 = vst [vmem:[#allocation69_spill] sm:$0xff] %v4487_v50  ;;  %11839 = vst [vmem:[#allocation70_spill] sm:$0xff] %v4490_v49 }
  0x91   : > { %11840 = vst [vmem:[#allocation71_spill] sm:$0xff] %v4493_v13  ;;  %11841 = vst [vmem:[#allocation72_spill] sm:$0xff] %v4496_v14  ;;  %v328_v14 = vld [vmem:[%s4234_s29 + $0x10] sm:$0xff]  ;;  %v4657_v13 = vadd.s32 %v4246_v5, %v4433_v60 }
  0x92   : > { %11842 = vst [vmem:[#allocation73_spill] sm:$0xff] %v4499_v15  ;;  %11843 = vst [vmem:[#allocation74_spill] sm:$0xff] %v4502_v16  ;;  %v327_v16 = vld [vmem:[%s4234_s29 + $0x8] sm:$0xff]  ;;  %v4643_v15 = vadd.s32 %v4246_v5, %v4430_v4  ;;  %v4675_v4 = vld [vmem:[%s4227_s8 + $0x140] sm:$0xff] }
  0x93   : > { %11844 = vst [vmem:[#allocation75_spill] sm:$0xff] %v4505_v48  ;;  %11845 = vst [vmem:[#allocation76_spill] sm:$0xff] %v4508_v47  ;;  %v4681_v12 = vmul.f32 %v327_v16, %v4427_v61  ;;  %v11897_v16 = vand.u32 2147483647, %v4442_v6 }
  0x94   : > { %11846 = vst [vmem:[#allocation77_spill] sm:$0xff] %v4511_v46  ;;  %11847 = vst [vmem:[#allocation78_spill] sm:$0xff] %v4514_v17  ;;  %v4629_v17 = vadd.s32 %v4246_v5, %v4418_v3  ;;  %v649_v3 = vsub.f32 0.0, %v11891_v9  ;;  %v331_v9 = vld [vmem:[%s4234_s29 + $0x28] sm:$0xff] }
  0x95   : > { %11848 = vst [vmem:[#allocation79_spill] sm:$0xff] %v4517_v18  ;;  %11849 = vst [vmem:[#allocation80_spill] sm:$0xff] %v4520_v19  ;;  %v4615_v19 = vadd.s32 %v4246_v5, %v4415_v0  ;;  %v326_v18 = vld [vmem:[%s4234_s29] sm:$0xff]  ;;  %v4663_v0 = vld [vmem:[%s4227_s8 + $0x130] sm:$0xff]  ;;  %v651_v59 = vsub.f32 0.0, %v11897_v16  ;;  %v4725_v25 = vmul.f32 %v331_v9, %v4463_v54 }
  0x96   : > { %11850 = vst [vmem:[#allocation81_spill] sm:$0xff] %v4523_v20  ;;  %11851 = vst [vmem:[#allocation82_spill] sm:$0xff] %v4526_v45  ;;  %v4611_v20 = vld [vmem:[%s4227_s8 + $0xf8] sm:$0xff]  ;;  %v4672_v60 = vmul.f32 %v326_v18, %v4424_v62  ;;  %v4703_v18 = vmul.f32 %v329_v11, %v4445_v57  ;;  %v11905_v9 = vand.u32 2147483647, %v4463_v54  ;;  %v4879_v62 = vld [vmem:[%s4227_s8 + $0x1f0] sm:$0xff] }
  0x97   : > { %11852 = vst [vmem:[#allocation83_spill] sm:$0xff] %v4529_v44  ;;  %11853 = vst [vmem:[#allocation84_spill] sm:$0xff] %v4532_v43  ;;  %v333_v16 = vld [vmem:[%s4234_s29 + $0x38] sm:$0xff]  ;;  %v11937_v57 = vand.u32 2147483647, %v4558_v26 }
  0x98   : > { %11854 = vst [vmem:[#allocation85_spill] sm:$0xff] %v4535_v22  ;;  %11855 = vst [vmem:[#allocation86_spill] sm:$0xff] %v4538_v23  ;;  %v4595_v23 = vld [vmem:[%s4227_s8 + $0xe0] sm:$0xff]  ;;  %v4599_v22 = vadd.s32 %v4246_v5, %v4412_v2  ;;  %v4666_v2 = vld [vmem:[%s4227_s8 + $0x138] sm:$0xff] }
  0x99   : > { %11856 = vst [vmem:[#allocation87_spill] sm:$0xff] %v4543_v42  ;;  %11857 = vst [vmem:[#allocation88_spill] sm:$0xff] %v4546_v41 }
  0x9a   : > { %11858 = vst [vmem:[#allocation89_spill] sm:$0xff] %v4549_v40  ;;  %11859 = vst [vmem:[#allocation90_spill] sm:$0xff] %v4552_v39  ;;  %v4583_v39 = vadd.s32 %v4246_v5, %v4406_v32  ;;  %v4652_v32 = vld [vmem:[%s4227_s8 + $0x128] sm:$0xff]  ;;  %v11894_v5 = vand.u32 2147483647, %v4427_v61 }
  0x9b   : > { %11860 = vst [vmem:[#allocation91_spill] sm:$0xff] %v4558_v26  ;;  %11861 = vst [vmem:[#allocation92_spill] sm:$0xff] %v4561_v38 }
  0x9c   : > { %11862 = vst [vmem:[#allocation93_spill] sm:$0xff] %v4564_v37  ;;  %11863 = vst [vmem:[#allocation94_spill] sm:$0xff] %v4567_v36  ;;  %v4592_v36 = vld [vmem:[%s4227_s8 + $0xd8] sm:$0xff]  ;;  %v650_v1 = vsub.f32 0.0, %v11894_v5  ;;  %v332_v5 = vld [vmem:[%s4234_s29 + $0x30] sm:$0xff] }
  0x9d   : > { %11864 = vst [vmem:[#allocation95_spill] sm:$0xff] %v4573_v24  ;;  %11865 = vst [vmem:[#allocation96_spill] sm:$0xff] %v4576_v35  ;;  %v4735_v11 = vmul.f32 %v332_v5, %v4466_v53  ;;  %v717_v5 = vmul.f32 1.442695, %v651_v59 }
  0x9e   : > { %11866 = vst [vmem:[#allocation97_spill] sm:$0xff] %v4579_v34  ;;  %11867 = vst [vmem:[#allocation98_spill] sm:$0xff] %v4583_v39  ;;  %v4608_v39 = vld [vmem:[%s4227_s8 + $0xf0] sm:$0xff] }
  0x9f   : > { %11868 = vst [vmem:[#allocation99_spill] sm:$0xff] %v4589_v28  ;;  %11869 = vst [vmem:[#allocation100_spill] sm:$0xff] %v4592_v36 }
  0xa0   : > { %11870 = vst [vmem:[#allocation101_spill] sm:$0xff] %v4595_v23  ;;  %11871 = vst [vmem:[#allocation102_spill] sm:$0xff] %v4599_v22  ;;  %v4624_v22 = vld [vmem:[%s4227_s8 + $0x108] sm:$0xff] }
  0xa1   : > { %11872 = vst [vmem:[#allocation103_spill] sm:$0xff] %v4605_v27  ;;  %11873 = vst [vmem:[#allocation104_spill] sm:$0xff] %v4608_v39 }
  0xa2   : > { %11874 = vst [vmem:[#allocation105_spill] sm:$0xff] %v4611_v20  ;;  %11875 = vst [vmem:[#allocation106_spill] sm:$0xff] %v4615_v19  ;;  %v4638_v19 = vld [vmem:[%s4227_s8 + $0x118] sm:$0xff] }
  0xa3   : > { %11876 = vst [vmem:[#allocation107_spill] sm:$0xff] %v4621_v30  ;;  %11877 = vst [vmem:[#allocation108_spill] sm:$0xff] %v4624_v22 }
  0xa4   : > { %11878 = vst [vmem:[#allocation109_spill] sm:$0xff] %v4629_v17  ;;  %11879 = vst [vmem:[#allocation110_spill] sm:$0xff] %v4635_v31  ;;  %v4649_v17 = vld [vmem:[%s4227_s8 + $0x120] sm:$0xff] }
  0xa5   : > { %11880 = vst [vmem:[#allocation111_spill] sm:$0xff] %v4638_v19  ;;  %11881 = vst [vmem:[#allocation112_spill] sm:$0xff] %v4643_v15  ;;  %v4692_v15 = vmul.f32 %v328_v14, %v4442_v6  ;;  %v652_v14 = vsub.f32 0.0, %v11900_v29  ;;  %v4752_v29 = vld [vmem:[%s4227_s8 + $0x170] sm:$0xff] }
  0xa6   : > { %11882 = vst [vmem:[#allocation113_spill] sm:$0xff] %v4649_v17  ;;  %11883 = vst [vmem:[#allocation114_spill] sm:$0xff] %v4652_v32 }
  0xa7   : > { %11884 = vst [vmem:[#allocation115_spill] sm:$0xff] %v4657_v13  ;;  %11885 = vst [vmem:[#allocation116_spill] sm:$0xff] %v4663_v0  ;;  %v330_v13 = vld [vmem:[%s4234_s29 + $0x20] sm:$0xff] }
  0xa8   : > { %11886 = vst [vmem:[#allocation117_spill] sm:$0xff] %v4666_v2  ;;  %11887 = vst [vmem:[#allocation118_spill] sm:$0xff] %v4672_v60  ;;  %v4714_v7 = vmul.f32 %v330_v13, %v4448_v56  ;;  %v335_v13 = vld [vmem:[%s4234_s29 + $0x48] sm:$0xff]  ;;  %v4761_v60 = vld [vmem:[%s4227_s8 + $0x178] sm:$0xff] }
  0xa9   : > { %11888 = vst [vmem:[#allocation119_spill] sm:$0xff] %v4675_v4  ;;  %11889 = vst [vmem:[#allocation120_spill] sm:$0xff] %v4681_v12  ;;  %v4742_v12 = vmul.f32 %v333_v16, %v4469_v52  ;;  %v4758_v54 = vmul.f32 %v335_v13, %v4487_v50 }
  0xaa   : > { %11890 = vst [vmem:[#allocation121_spill] sm:$0xff] %v4684_v10  ;;  %11892 = vst [vmem:[#allocation122_spill] sm:$0xff] %v4692_v15  ;;  %v715_v15 = vmul.f32 1.442695, %v650_v1  ;;  %v11910_v1 = vand.u32 2147483647, %v4469_v52 }
  0xab   : > { %11893 = vst [vmem:[#allocation123_spill] sm:$0xff] %v4695_v8  ;;  %11895 = vst [vmem:[#allocation124_spill] sm:$0xff] %v4703_v18  ;;  %v713_v18 = vmul.f32 1.442695, %v649_v3  ;;  %v4797_v52 = vld [vmem:[%s4227_s8 + $0x1a0] sm:$0xff] }
  0xac   : > { %11896 = vst [vmem:[#allocation125_spill] sm:$0xff] %v4706_v55  ;;  %11898 = vst [vmem:[#allocation126_spill] sm:$0xff] %v4714_v7  ;;  %v653_v7 = vsub.f32 0.0, %v11903_v21  ;;  %v11907_v21 = vand.u32 2147483647, %v4466_v53  ;;  %v656_v16 = vsub.f32 0.0, %v11910_v1 }
  0xad   : > { %11899 = vst [vmem:[#allocation127_spill] sm:$0xff] %v4717_v63  ;;  %11901 = vst [vmem:[#allocation128_spill] sm:$0xff] %v4725_v25  ;;  %v654_v25 = vsub.f32 0.0, %v11905_v9  ;;  %3319 = vpow2.f32 %v713_v18  ;;  %v4767_v53 = vld [vmem:[%s4227_s8 + $0x180] sm:$0xff]  ;;  %v336_v18 = vld [vmem:[%s4234_s29 + $0x50] sm:$0xff] }
  0xae   : > { %11902 = vst [vmem:[#allocation129_spill] sm:$0xff] %v4728_v58  ;;  %11904 = vst [vmem:[#allocation130_spill] sm:$0xff] %v4735_v11  ;;  %v655_v3 = vsub.f32 0.0, %v11907_v21  ;;  %v4749_v11 = vmul.f32 %v334_v33, %v4484_v51  ;;  %v11913_v33 = vand.u32 2147483647, %v4484_v51  ;;  %3321 = vpow2.f32 %v715_v15 }
  0xaf   : > { %11906 = vst [vmem:[#allocation131_spill] sm:$0xff] %v4742_v12  ;;  %11909 = vst [vmem:[#allocation133_spill] sm:$0xff] %v4752_v29  ;;  %v719_v12 = vmul.f32 1.442695, %v652_v14  ;;  %v11915_v14 = vand.u32 2147483647, %v4487_v50  ;;  %3323 = vpow2.f32 %v717_v5 }
  0xb0   : > { %11908 = vst [vmem:[#allocation132_spill] sm:$0xff] %v4749_v11  ;;  %11911 = vst [vmem:[#allocation134_spill] sm:$0xff] %v4758_v54  ;;  %v657_v21 = vsub.f32 0.0, %v11913_v33  ;;  %v721_v11 = vmul.f32 1.442695, %v653_v7  ;;  %v4773_v54 = vld [vmem:[%s4227_s8 + $0x188] sm:$0xff] }
  0xb1   : > { %11912 = vst [vmem:[#allocation135_spill] sm:$0xff] %v4761_v60  ;;  %11914 = vst [vmem:[#allocation136_spill] sm:$0xff] %v4767_v53  ;;  %v658_v1 = vsub.f32 0.0, %v11915_v14  ;;  %v723_v13 = vmul.f32 1.442695, %v654_v25  ;;  %3325 = vpow2.f32 %v719_v12  ;;  %v4783_v25 = vld [vmem:[%s4227_s8 + $0x190] sm:$0xff] }
  0xb2   : > { %11916 = vst [vmem:[#allocation137_spill] sm:$0xff] %v4773_v54  ;;  %v11917_v51 = vand.u32 2147483647, %v4490_v49  ;;  %v725_v7 = vmul.f32 1.442695, %v655_v3  ;;  %11919 = vst [vmem:[#allocation138_spill] sm:$0xff] %v4783_v25  ;;  %3327 = vpow2.f32 %v721_v11 }
  0xb3   : > { %v11918_v9 = vand.u32 2147483647, %v4505_v48  ;;  %v727_v15 = vmul.f32 1.442695, %v656_v16  ;;  %v11920_v14 = vand.u32 2147483647, %v4508_v47  ;;  %3329 = vpow2.f32 %v723_v13 }
  0xb4   : > { %v659_v33 = vsub.f32 0.0, %v11917_v51  ;;  %v729_v56 = vmul.f32 1.442695, %v657_v21  ;;  %v4788_v51 = vmul.f32 %v336_v18, %v4490_v49  ;;  %v4791_v3 = vld [vmem:[%s4227_s8 + $0x198] sm:$0xff]  ;;  %v731_v16 = vmul.f32 1.442695, %v658_v1 }
  0xb5   : > { %v660_v50 = vsub.f32 0.0, %v11918_v9  ;;  %v661_v59 = vsub.f32 0.0, %v11920_v14  ;;  %11922 = vst [vmem:[#allocation140_spill] sm:$0xff] %v4791_v3  ;;  %v11923_v9 = vand.u32 2147483647, %v4511_v46  ;;  %11924 = vst [vmem:[#allocation141_spill] sm:$0xff] %v4797_v52  ;;  %3331 = vpow2.f32 %v725_v7 }
  0xb6   : > { %11921 = vst [vmem:[#allocation139_spill] sm:$0xff] %v4788_v51  ;;  %v11925_v11 = vand.u32 2147483647, %v4526_v45  ;;  %v733_v18 = vmul.f32 1.442695, %v659_v33  ;;  %v4803_v51 = vld [vmem:[%s4227_s8 + $0x1a8] sm:$0xff]  ;;  %3333 = vpow2.f32 %v727_v15 }
  0xb7   : > { %v662_v12 = vsub.f32 0.0, %v11923_v9  ;;  %11926 = vst [vmem:[#allocation142_spill] sm:$0xff] %v4803_v51  ;;  %v11927_v49 = vand.u32 2147483647, %v4529_v44  ;;  %v735_v1 = vmul.f32 1.442695, %v660_v50  ;;  %3335 = vpow2.f32 %v729_v56 }
  0xb8   : > { %v663_v21 = vsub.f32 0.0, %v11925_v11  ;;  %v4809_v13 = vld [vmem:[%s4227_s8 + $0x1b0] sm:$0xff]  ;;  %v11929_v45 = vand.u32 2147483647, %v4532_v43  ;;  %v737_v33 = vmul.f32 1.442695, %v661_v59  ;;  %3337 = vpow2.f32 %v731_v16 }
  0xb9   : > { %v664_v9 = vsub.f32 0.0, %v11927_v49  ;;  %11928 = vst [vmem:[#allocation143_spill] sm:$0xff] %v4809_v13  ;;  %v4815_v7 = vld [vmem:[%s4227_s8 + $0x1b8] sm:$0xff]  ;;  %v11931_v44 = vand.u32 2147483647, %v4543_v42  ;;  %3339 = vpow2.f32 %v733_v18  ;;  %v4825_v56 = vld [vmem:[%s4227_s8 + $0x1c0] sm:$0xff] }
  0xba   : > { %v665_v11 = vsub.f32 0.0, %v11929_v45  ;;  %11930 = vst [vmem:[#allocation144_spill] sm:$0xff] %v4815_v7  ;;  %v739_v50 = vmul.f32 1.442695, %v662_v12  ;;  %v337_v15 = vld [vmem:[%s4234_s29 + $0x58] sm:$0xff]  ;;  %11933 = vst [vmem:[#allocation145_spill] sm:$0xff] %v4825_v56  ;;  %3341 = vpow2.f32 %v735_v1  ;;  %v4838_v18 = vpop.eup %3319 }
  0xbb   : > { %v666_v49 = vsub.f32 0.0, %v11931_v44  ;;  %v11932_v14 = vand.u32 2147483647, %v4546_v41  ;;  %v741_v45 = vmul.f32 1.442695, %v663_v21  ;;  %v4830_v44 = vmul.f32 %v337_v15, %v4505_v48  ;;  %v4833_v12 = vld [vmem:[%s4227_s8 + $0x1c8] sm:$0xff] }
  0xbc   : > { %v11934_v59 = vand.u32 2147483647, %v4549_v40  ;;  %v743_v5 = vmul.f32 1.442695, %v664_v9  ;;  %11936 = vst [vmem:[#allocation147_spill] sm:$0xff] %v4833_v12  ;;  %3343 = vpow2.f32 %v737_v33  ;;  %11938 = vst [vmem:[#allocation148_spill] sm:$0xff] %v4838_v18 }
  0xbd   : > { %v667_v43 = vsub.f32 0.0, %v11932_v14  ;;  %11935 = vst [vmem:[#allocation146_spill] sm:$0xff] %v4830_v44  ;;  %v669_v14 = vsub.f32 0.0, %v11937_v57  ;;  %v745_v21 = vmul.f32 1.442695, %v665_v11  ;;  %v4841_v40 = vld [vmem:[%s4227_s8 + $0x1d0] sm:$0xff]  ;;  %3345 = vpow2.f32 %v739_v50  ;;  %v4846_v44 = vpop.eup %3321 }
  0xbe   : > { %v668_v6 = vsub.f32 0.0, %v11934_v59  ;;  %11939 = vst [vmem:[#allocation149_spill] sm:$0xff] %v4841_v40  ;;  %v11940_v9 = vand.u32 2147483647, %v4561_v38  ;;  %v747_v59 = vmul.f32 1.442695, %v666_v49  ;;  %3347 = vpow2.f32 %v741_v45  ;;  %v4854_v41 = vpop.eup %3323 }
  0xbf   : > { %11941 = vst [vmem:[#allocation150_spill] sm:$0xff] %v4846_v44  ;;  %v4849_v16 = vld [vmem:[%s4227_s8 + $0x1d8] sm:$0xff]  ;;  %v11943_v11 = vand.u32 2147483647, %v4564_v37  ;;  %v749_v26 = vmul.f32 1.442695, %v667_v43  ;;  %3349 = vpow2.f32 %v743_v5  ;;  %v4862_v42 = vpop.eup %3325 }
  0xc0   : > { %v670_v15 = vsub.f32 0.0, %v11940_v9  ;;  %11942 = vst [vmem:[#allocation151_spill] sm:$0xff] %v4849_v16  ;;  %11944 = vst [vmem:[#allocation152_spill] sm:$0xff] %v4854_v41  ;;  %v4857_v1 = vld [vmem:[%s4227_s8 + $0x1e0] sm:$0xff]  ;;  %v11946_v49 = vand.u32 2147483647, %v4573_v24  ;;  %3351 = vpow2.f32 %v745_v21  ;;  %v4870_v48 = vpop.eup %3327 }
  0xc1   : > { %v671_v33 = vsub.f32 0.0, %v11943_v11  ;;  %11945 = vst [vmem:[#allocation153_spill] sm:$0xff] %v4857_v1  ;;  %v751_v38 = vmul.f32 1.442695, %v668_v6  ;;  %11947 = vst [vmem:[#allocation154_spill] sm:$0xff] %v4862_v42  ;;  %v4865_v57 = vld [vmem:[%s4227_s8 + $0x1e8] sm:$0xff]  ;;  %3353 = vpow2.f32 %v747_v59  ;;  %v4876_v61 = vpop.eup %3329 }
  0xc2   : > { %v672_v50 = vsub.f32 0.0, %v11946_v49  ;;  %11948 = vst [vmem:[#allocation155_spill] sm:$0xff] %v4865_v57  ;;  %v11949_v43 = vand.u32 2147483647, %v4576_v35  ;;  %v753_v37 = vmul.f32 1.442695, %v669_v14  ;;  %3355 = vpow2.f32 %v749_v26  ;;  %v4886_v35 = vpop.eup %3331 }
  0xc3   : > { %11950 = vst [vmem:[#allocation156_spill] sm:$0xff] %v4870_v48  ;;  %v338_v9 = vld [vmem:[%s4234_s29 + $0x60] sm:$0xff]  ;;  %v11951_v5 = vand.u32 2147483647, %v4579_v34  ;;  %v755_v24 = vmul.f32 1.442695, %v670_v15  ;;  %3357 = vpow2.f32 %v751_v38 }
  0xc4   : > { %v673_v45 = vsub.f32 0.0, %v11949_v43  ;;  %11952 = vst [vmem:[#allocation157_spill] sm:$0xff] %v4876_v61  ;;  %11953 = vst [vmem:[#allocation158_spill] sm:$0xff] %v4879_v62  ;;  %v11954_v11 = vand.u32 2147483647, %v4589_v28  ;;  %v4884_v14 = vmul.f32 %v338_v9, %v4508_v47  ;;  %v4889_v49 = vld [vmem:[%s4227_s8 + $0x1f8] sm:$0xff]  ;;  %v4894_v61 = vpop.eup %3333  ;;  %3359 = vpow2.f32 %v753_v37 }
  0xc5   : > { %v674_v6 = vsub.f32 0.0, %v11951_v5  ;;  %v757_v21 = vmul.f32 1.442695, %v671_v33  ;;  %11956 = vst [vmem:[#allocation160_spill] sm:$0xff] %v4886_v35  ;;  %11957 = vst [vmem:[#allocation161_spill] sm:$0xff] %v4889_v49  ;;  %3361 = vpow2.f32 %v755_v24 }
  0xc6   : > { %v675_v43 = vsub.f32 0.0, %v11954_v11  ;;  %11955 = vst [vmem:[#allocation159_spill] sm:$0xff] %v4884_v14  ;;  %v11958_v15 = vand.u32 2147483647, %v4592_v36  ;;  %v759_v34 = vmul.f32 1.442695, %v672_v50  ;;  %v4899_v14 = vpop.eup %3335 }
  0xc7   : > { %11959 = vst [vmem:[#allocation162_spill] sm:$0xff] %v4894_v61  ;;  %v11960_v26 = vand.u32 2147483647, %v4595_v23  ;;  %v761_v9 = vmul.f32 1.442695, %v673_v45  ;;  %11961 = vst [vmem:[#allocation163_spill] sm:$0xff] %v4899_v14  ;;  %v4904_v38 = vpop.eup %3337  ;;  %3363 = vpow2.f32 %v757_v21 }
  0xc8   : > { %v676_v59 = vsub.f32 0.0, %v11958_v15  ;;  %v11962_v5 = vand.u32 2147483647, %v4605_v27  ;;  %v763_v15 = vmul.f32 1.442695, %v674_v6  ;;  %11963 = vst [vmem:[#allocation164_spill] sm:$0xff] %v4904_v38  ;;  %v4909_v37 = vpop.eup %3339  ;;  %3365 = vpow2.f32 %v759_v34 }
  0xc9   : > { %v677_v33 = vsub.f32 0.0, %v11960_v26  ;;  %v11964_v11 = vand.u32 2147483647, %v4608_v39  ;;  %v765_v26 = vmul.f32 1.442695, %v675_v43  ;;  %11965 = vst [vmem:[#allocation165_spill] sm:$0xff] %v4909_v37  ;;  %v4915_v6 = vpop.eup %3341  ;;  %3367 = vpow2.f32 %v761_v9 }
  0xca   : > { %v678_v47 = vsub.f32 0.0, %v11962_v5  ;;  %v11966_v45 = vand.u32 2147483647, %v4611_v20  ;;  %v11967_v28 = vand.u32 2147483647, %v4621_v30  ;;  %11968 = vst [vmem:[#allocation166_spill] sm:$0xff] %v4915_v6  ;;  %v4921_v21 = vpop.eup %3343  ;;  %3369 = vpow2.f32 %v763_v15 }
  0xcb   : > { %v679_v36 = vsub.f32 0.0, %v11964_v11  ;;  %v767_v24 = vmul.f32 1.442695, %v676_v59  ;;  %v11969_v5 = vand.u32 2147483647, %v4624_v22  ;;  %11971 = vst [vmem:[#allocation167_spill] sm:$0xff] %v4921_v21  ;;  %v4927_v59 = vpop.eup %3345  ;;  %3371 = vpow2.f32 %v765_v26 }
  0xcc   : > { %v680_v23 = vsub.f32 0.0, %v11966_v45  ;;  %v681_v27 = vsub.f32 0.0, %v11967_v28  ;;  %v11970_v39 = vand.u32 2147483647, %v4635_v31  ;;  %v769_v43 = vmul.f32 1.442695, %v677_v33  ;;  %v4933_v9 = vpop.eup %3347 }
  0xcd   : > { %v682_v50 = vsub.f32 0.0, %v11969_v5  ;;  %v11972_v20 = vand.u32 2147483647, %v4638_v19  ;;  %v11973_v30 = vand.u32 2147483647, %v4649_v17  ;;  %11974 = vst [vmem:[#allocation168_spill] sm:$0xff] %v4927_v59  ;;  %3373 = vpow2.f32 %v767_v24  ;;  %v4939_v15 = vpop.eup %3349 }
  0xce   : > { %v683_v11 = vsub.f32 0.0, %v11970_v39  ;;  %v771_v34 = vmul.f32 1.442695, %v678_v47  ;;  %v11975_v22 = vand.u32 2147483647, %v4652_v32  ;;  %11977 = vst [vmem:[#allocation169_spill] sm:$0xff] %v4933_v9  ;;  %3375 = vpow2.f32 %v769_v43  ;;  %v4945_v26 = vpop.eup %3351 }
  0xcf   : > { %v684_v45 = vsub.f32 0.0, %v11972_v20  ;;  %v685_v28 = vsub.f32 0.0, %v11973_v30  ;;  %v11976_v31 = vand.u32 2147483647, %v4663_v0  ;;  %v773_v33 = vmul.f32 1.442695, %v679_v36  ;;  %v4951_v24 = vpop.eup %3353 }
  0xd0   : > { %v686_v5 = vsub.f32 0.0, %v11975_v22  ;;  %v11978_v19 = vand.u32 2147483647, %v4666_v2  ;;  %v11979_v17 = vand.u32 2147483647, %v4675_v4  ;;  %11980 = vst [vmem:[#allocation170_spill] sm:$0xff] %v4939_v15  ;;  %3377 = vpow2.f32 %v771_v34  ;;  %v4957_v43 = vpop.eup %3355 }
  0xd1   : > { %v687_v39 = vsub.f32 0.0, %v11976_v31  ;;  %v775_v47 = vmul.f32 1.442695, %v680_v23  ;;  %v11981_v32 = vand.u32 2147483647, %v4684_v10  ;;  %11983 = vst [vmem:[#allocation171_spill] sm:$0xff] %v4945_v26  ;;  %3379 = vpow2.f32 %v773_v33  ;;  %v4963_v34 = vpop.eup %3357 }
  0xd2   : > { %v688_v20 = vsub.f32 0.0, %v11978_v19  ;;  %v689_v30 = vsub.f32 0.0, %v11979_v17  ;;  %v11982_v0 = vand.u32 2147483647, %v4695_v8  ;;  %v777_v36 = vmul.f32 1.442695, %v681_v27  ;;  %v4969_v33 = vpop.eup %3359 }
  0xd3   : > { %v690_v22 = vsub.f32 0.0, %v11981_v32  ;;  %v11984_v2 = vand.u32 2147483647, %v4706_v55  ;;  %v11985_v4 = vand.u32 2147483647, %v4717_v63  ;;  %11986 = vst [vmem:[#allocation172_spill] sm:$0xff] %v4951_v24  ;;  %3381 = vpow2.f32 %v775_v47  ;;  %v4975_v47 = vpop.eup %3361 }
  0xd4   : > { %v691_v31 = vsub.f32 0.0, %v11982_v0  ;;  %v779_v23 = vmul.f32 1.442695, %v682_v50  ;;  %v11987_v10 = vand.u32 2147483647, %v4728_v58  ;;  %11989 = vst [vmem:[#allocation173_spill] sm:$0xff] %v4957_v43  ;;  %3383 = vpow2.f32 %v777_v36  ;;  %v4981_v36 = vpop.eup %3363 }
  0xd5   : > { %v692_v19 = vsub.f32 0.0, %v11984_v2  ;;  %v693_v17 = vsub.f32 0.0, %v11985_v4  ;;  %v11988_v8 = vand.u32 2147483647, %v4752_v29  ;;  %v781_v27 = vmul.f32 1.442695, %v683_v11 }
  0xd6   : > { %v694_v32 = vsub.f32 0.0, %v11987_v10  ;;  %v11990_v55 = vand.u32 2147483647, %v4761_v60  ;;  %v11991_v63 = vand.u32 2147483647, %v4767_v53  ;;  %11992 = vst [vmem:[#allocation174_spill] sm:$0xff] %v4963_v34  ;;  %3385 = vpow2.f32 %v779_v23 }
  0xd7   : > { %v695_v0 = vsub.f32 0.0, %v11988_v8  ;;  %v783_v50 = vmul.f32 1.442695, %v684_v45  ;;  %v11993_v58 = vand.u32 2147483647, %v4773_v54  ;;  %11995 = vst [vmem:[#allocation175_spill] sm:$0xff] %v4969_v33  ;;  %3387 = vpow2.f32 %v781_v27 }
  0xd8   : > { %v696_v2 = vsub.f32 0.0, %v11990_v55  ;;  %v697_v4 = vsub.f32 0.0, %v11991_v63  ;;  %v11994_v29 = vand.u32 2147483647, %v4783_v25  ;;  %v785_v11 = vmul.f32 1.442695, %v685_v28 }
  0xd9   : > { %v698_v10 = vsub.f32 0.0, %v11993_v58  ;;  %v11996_v60 = vand.u32 2147483647, %v4791_v3  ;;  %v11997_v53 = vand.u32 2147483647, %v4797_v52  ;;  %11998 = vst [vmem:[#allocation176_spill] sm:$0xff] %v4975_v47  ;;  %3389 = vpow2.f32 %v783_v50  ;;  %v4987_v52 = vpop.eup %3365 }
  0xda   : > { %v699_v8 = vsub.f32 0.0, %v11994_v29  ;;  %v787_v45 = vmul.f32 1.442695, %v686_v5  ;;  %v11999_v54 = vand.u32 2147483647, %v4803_v51  ;;  %12001 = vst [vmem:[#allocation177_spill] sm:$0xff] %v4981_v36  ;;  %3391 = vpow2.f32 %v785_v11 }
  0xdb   : > { %v700_v55 = vsub.f32 0.0, %v11996_v60  ;;  %v701_v63 = vsub.f32 0.0, %v11997_v53  ;;  %v12000_v25 = vand.u32 2147483647, %v4809_v13  ;;  %v789_v28 = vmul.f32 1.442695, %v687_v39  ;;  %v4993_v13 = vpop.eup %3367 }
  0xdc   : > { %v702_v58 = vsub.f32 0.0, %v11999_v54  ;;  %v12002_v3 = vand.u32 2147483647, %v4815_v7  ;;  %v12003_v53 = vand.u32 2147483647, %v4825_v56  ;;  %12004 = vst [vmem:[#allocation178_spill] sm:$0xff] %v4987_v52  ;;  %3393 = vpow2.f32 %v787_v45  ;;  %v4999_v50 = vpop.eup %3369 }
  0xdd   : > { %v703_v29 = vsub.f32 0.0, %v12000_v25  ;;  %v791_v5 = vmul.f32 1.442695, %v688_v20  ;;  %v12005_v54 = vand.u32 2147483647, %v4833_v12  ;;  %12007 = vst [vmem:[#allocation179_spill] sm:$0xff] %v4993_v13  ;;  %3395 = vpow2.f32 %v789_v28 }
  0xde   : > { %v704_v60 = vsub.f32 0.0, %v12002_v3  ;;  %v705_v23 = vsub.f32 0.0, %v12003_v53  ;;  %v12006_v25 = vand.u32 2147483647, %v4841_v40  ;;  %v793_v39 = vmul.f32 1.442695, %v689_v30  ;;  %v5006_v40 = vpop.eup %3371 }
  0xdf   : > { %v706_v51 = vsub.f32 0.0, %v12005_v54  ;;  %v12008_v7 = vand.u32 2147483647, %v4849_v16  ;;  %v12009_v56 = vand.u32 2147483647, %v4857_v1  ;;  %12010 = vst [vmem:[#allocation180_spill] sm:$0xff] %v4999_v50  ;;  %3397 = vpow2.f32 %v791_v5  ;;  %v5013_v45 = vpop.eup %3373 }
  0xe0   : > { %v707_v27 = vsub.f32 0.0, %v12006_v25  ;;  %v795_v20 = vmul.f32 1.442695, %v690_v22  ;;  %v339_v52 = vld [vmem:[%s4234_s29 + $0x68] sm:$0xff]  ;;  %v12011_v54 = vand.u32 2147483647, %v4865_v57  ;;  %3399 = vpow2.f32 %v793_v39 }
  0xe1   : > { %v708_v3 = vsub.f32 0.0, %v12008_v7  ;;  %v709_v53 = vsub.f32 0.0, %v12009_v56  ;;  %v12012_v25 = vand.u32 2147483647, %v4879_v62  ;;  %v797_v30 = vmul.f32 1.442695, %v691_v31  ;;  %v5015_v62 = vpop.eup %3375 }
  0xe2   : > { %v710_v12 = vsub.f32 0.0, %v12011_v54  ;;  %12013 = vst [vmem:[#allocation181_spill] sm:$0xff] %v5006_v40  ;;  %v12014_v7 = vand.u32 2147483647, %v4889_v49  ;;  %v799_v56 = vmul.f32 1.442695, %v692_v19  ;;  %v5011_v22 = vmul.f32 %v339_v52, %v4511_v46  ;;  %v5017_v40 = vpop.eup %3377 }
  0xe3   : > { %v711_v11 = vsub.f32 0.0, %v12012_v25  ;;  %12016 = vst [vmem:[#allocation183_spill] sm:$0xff] %v5013_v45  ;;  %v801_v57 = vmul.f32 1.442695, %v693_v17  ;;  %v803_v54 = vmul.f32 1.442695, %v694_v32  ;;  %3401 = vpow2.f32 %v795_v20  ;;  %v5019_v52 = vpop.eup %3379 }
  0xe4   : > { %v712_v16 = vsub.f32 0.0, %v12014_v7  ;;  %12015 = vst [vmem:[#allocation182_spill] sm:$0xff] %v5011_v22  ;;  %v805_v1 = vmul.f32 1.442695, %v695_v0  ;;  %12017 = vst [vmem:[#allocation184_spill] sm:$0xff] %v5015_v62  ;;  %3403 = vpow2.f32 %v797_v30  ;;  %v5021_v32 = vpop.eup %3381  ;;  %v5067_v30 = vadd.f32 1.0, %v4894_v61 }
  0xe5   : > { %v807_v31 = vmul.f32 1.442695, %v696_v2  ;;  %v809_v28 = vmul.f32 1.442695, %v697_v4  ;;  %v811_v25 = vmul.f32 1.442695, %v698_v10  ;;  %3405 = vpow2.f32 %v799_v56  ;;  %v5025_v4 = vpop.eup %3383 }
  0xe6   : > { %12018 = vst [vmem:[#allocation185_spill] sm:$0xff] %v5017_v40  ;;  %v813_v5 = vmul.f32 1.442695, %v699_v8  ;;  %v815_v19 = vmul.f32 1.442695, %v700_v55  ;;  %12019 = vst [vmem:[#allocation186_spill] sm:$0xff] %v5019_v52  ;;  %3407 = vpow2.f32 %v801_v57 }
  0xe7   : > { %v817_v7 = vmul.f32 1.442695, %v701_v63  ;;  %v819_v22 = vmul.f32 1.442695, %v702_v58  ;;  %v821_v39 = vmul.f32 1.442695, %v703_v29  ;;  %3409 = vpow2.f32 %v803_v54  ;;  %v5033_v63 = vpop.eup %3385 }
  0xe8   : > { %v823_v17 = vmul.f32 1.442695, %v704_v60  ;;  %12020 = vst [vmem:[#allocation187_spill] sm:$0xff] %v5021_v32  ;;  %v825_v0 = vmul.f32 1.442695, %v705_v23  ;;  %12021 = vst [vmem:[#allocation188_spill] sm:$0xff] %v5025_v4  ;;  %3411 = vpow2.f32 %v805_v1  ;;  %v5042_v57 = vpop.eup %3387 }
  0xe9   : > { %v827_v20 = vmul.f32 1.442695, %v706_v51  ;;  %v5023_v2 = vmul.f32 1.442695, %v707_v27  ;;  %v5027_v10 = vmul.f32 1.442695, %v708_v3  ;;  %3413 = vpow2.f32 %v807_v31  ;;  %v5053_v1 = vpop.eup %3389 }
  0xea   : > { %v5029_v8 = vmul.f32 1.442695, %v709_v53  ;;  %v5031_v55 = vmul.f32 1.442695, %v710_v12  ;;  %12022 = vst [vmem:[#allocation189_spill] sm:$0xff] %v5033_v63  ;;  %v5040_v51 = vadd.f32 1.0, %v4838_v18  ;;  %3415 = vpow2.f32 %v809_v28 }
  0xeb   : > { %v5035_v58 = vmul.f32 1.442695, %v711_v11  ;;  %v5037_v29 = vmul.f32 1.442695, %v712_v16  ;;  %12024 = vst [vmem:[#allocation191_spill] sm:$0xff] %v5042_v57  ;;  %v5045_v60 = vadd.f32 1.0, %v4846_v44  ;;  %v5064_v11 = vpop.eup %3391  ;;  %3417 = vpow2.f32 %v811_v25 }
  0xec   : > { %12023 = vst [vmem:[#allocation190_spill] sm:$0xff] %v5040_v51  ;;  %v5048_v23 = vadd.f32 1.0, %v4854_v41  ;;  %v5051_v12 = vadd.f32 1.0, %v4862_v42  ;;  %12028 = vst [vmem:[#allocation195_spill] sm:$0xff] %v5053_v1  ;;  %v5056_v16 = vadd.f32 1.0, %v4870_v48  ;;  %v12030_v27 = vld [vmem:[#allocation157_spill] sm:$0xff]  ;;  %v5075_v31 = vpop.eup %3393  ;;  %3419 = vpow2.f32 %v813_v5 }
  0xed   : > { %12025 = vst [vmem:[#allocation192_spill] sm:$0xff] %v5045_v60  ;;  %v5059_v3 = vadd.f32 1.0, %v12030_v27  ;;  %v5062_v53 = vadd.f32 1.0, %v4886_v35  ;;  %12033 = vst [vmem:[#allocation199_spill] sm:$0xff] %v5064_v11  ;;  %v5070_v56 = vadd.f32 1.0, %v4899_v14  ;;  %v5073_v54 = vadd.f32 1.0, %v4904_v38  ;;  %v5086_v61 = vpop.eup %3395 }
  0xee   : > { %12026 = vst [vmem:[#allocation193_spill] sm:$0xff] %v5048_v23  ;;  %12027 = vst [vmem:[#allocation194_spill] sm:$0xff] %v5051_v12  ;;  %v5078_v28 = vadd.f32 1.0, %v4909_v37  ;;  %v5081_v49 = vadd.f32 1.0, %v4915_v6  ;;  %v5084_v25 = vadd.f32 1.0, %v4921_v21  ;;  %3421 = vpow2.f32 %v815_v19  ;;  %v5097_v37 = vpop.eup %3397  ;;  %v5322_v46 = vld [vmem:[%s4227_s8] sm:$0xff] }
  0xef   : > { %12029 = vst [vmem:[#allocation196_spill] sm:$0xff] %v5056_v16  ;;  %12031 = vst [vmem:[#allocation197_spill] sm:$0xff] %v5059_v3  ;;  %v5089_v14 = vadd.f32 1.0, %v4927_v59  ;;  %v5092_v38 = vadd.f32 1.0, %v4933_v9  ;;  %v5095_v5 = vadd.f32 1.0, %v4939_v15  ;;  %3423 = vpow2.f32 %v817_v7  ;;  %v5108_v59 = vpop.eup %3399 }
  0xf0   : > { %12032 = vst [vmem:[#allocation198_spill] sm:$0xff] %v5062_v53  ;;  %12034 = vst [vmem:[#allocation200_spill] sm:$0xff] %v5067_v30  ;;  %v5100_v6 = vadd.f32 1.0, %v4945_v26  ;;  %v5103_v21 = vadd.f32 1.0, %v4951_v24  ;;  %v5106_v19 = vadd.f32 1.0, %v4957_v43  ;;  %3425 = vpow2.f32 %v819_v22  ;;  %v5119_v26 = vpop.eup %3401  ;;  %v12055_v43 = vld [vmem:[#allocation178_spill] sm:$0xff] }
  0xf1   : > { %12035 = vst [vmem:[#allocation201_spill] sm:$0xff] %v5070_v56  ;;  %12036 = vst [vmem:[#allocation202_spill] sm:$0xff] %v5073_v54  ;;  %v5111_v9 = vadd.f32 1.0, %v4963_v34  ;;  %v5114_v15 = vadd.f32 1.0, %v4969_v33  ;;  %v5117_v7 = vadd.f32 1.0, %v4975_v47  ;;  %3427 = vpow2.f32 %v821_v39  ;;  %v5130_v34 = vpop.eup %3403  ;;  %v12060_v47 = vld [vmem:[#allocation181_spill] sm:$0xff] }
  0xf2   : > { %12037 = vst [vmem:[#allocation203_spill] sm:$0xff] %v5075_v31  ;;  %12038 = vst [vmem:[#allocation204_spill] sm:$0xff] %v5078_v28  ;;  %v5122_v24 = vadd.f32 1.0, %v4981_v36  ;;  %v5125_v35 = vadd.f32 1.0, %v12055_v43  ;;  %v5128_v22 = vadd.f32 1.0, %v4993_v13  ;;  %3429 = vpow2.f32 %v823_v17  ;;  %v5141_v36 = vpop.eup %3405 }
  0xf3   : > { %12039 = vst [vmem:[#allocation205_spill] sm:$0xff] %v5081_v49  ;;  %12040 = vst [vmem:[#allocation206_spill] sm:$0xff] %v5084_v25  ;;  %v5133_v33 = vadd.f32 1.0, %v4999_v50  ;;  %v5136_v27 = vadd.f32 1.0, %v12060_v47  ;;  %v5139_v39 = vadd.f32 1.0, %v5013_v45  ;;  %3431 = vpow2.f32 %v825_v0  ;;  %v5152_v50 = vpop.eup %3407 }
  0xf4   : > { %12041 = vst [vmem:[#allocation207_spill] sm:$0xff] %v5086_v61  ;;  %12042 = vst [vmem:[#allocation208_spill] sm:$0xff] %v5089_v14  ;;  %v5144_v43 = vadd.f32 1.0, %v5015_v62  ;;  %v5147_v13 = vadd.f32 1.0, %v5017_v40  ;;  %v5150_v17 = vadd.f32 1.0, %v5019_v52  ;;  %3433 = vpow2.f32 %v827_v20  ;;  %v5163_v62 = vpop.eup %3409 }
  0xf5   : > { %12043 = vst [vmem:[#allocation209_spill] sm:$0xff] %v5092_v38  ;;  %12044 = vst [vmem:[#allocation210_spill] sm:$0xff] %v5095_v5  ;;  %v5155_v47 = vadd.f32 1.0, %v5021_v32  ;;  %v5158_v45 = vadd.f32 1.0, %v5025_v4  ;;  %v5161_v0 = vadd.f32 1.0, %v5033_v63  ;;  %3435 = vpow2.f32 %v5023_v2  ;;  %v5175_v32 = vpop.eup %3411 }
  0xf6   : > { %12045 = vst [vmem:[#allocation211_spill] sm:$0xff] %v5097_v37  ;;  %12046 = vst [vmem:[#allocation212_spill] sm:$0xff] %v5100_v6  ;;  %v5167_v40 = vadd.f32 1.0, %v5042_v57  ;;  %v5170_v52 = vadd.f32 1.0, %v5053_v1  ;;  %v5173_v20 = vadd.f32 1.0, %v5064_v11  ;;  %3437 = vpow2.f32 %v5027_v10  ;;  %v5187_v57 = vpop.eup %3413 }
  0xf7   : > { %12047 = vst [vmem:[#allocation213_spill] sm:$0xff] %v5103_v21  ;;  %12048 = vst [vmem:[#allocation214_spill] sm:$0xff] %v5106_v19  ;;  %v5179_v63 = vadd.f32 1.0, %v5075_v31  ;;  %v5182_v4 = vadd.f32 1.0, %v5086_v61  ;;  %v5185_v2 = vadd.f32 1.0, %v5097_v37  ;;  %3439 = vpow2.f32 %v5029_v8 }
  0xf8   : > { %12049 = vst [vmem:[#allocation215_spill] sm:$0xff] %v5108_v59  ;;  %12050 = vst [vmem:[#allocation216_spill] sm:$0xff] %v5111_v9  ;;  %v5191_v11 = vadd.f32 1.0, %v5108_v59  ;;  %3441 = vpow2.f32 %v5031_v55  ;;  %v5199_v61 = vadd.f32 1.0, %v5119_v26  ;;  %v5207_v8 = vadd.f32 1.0, %v5130_v34 }
  0xf9   : > { %12051 = vst [vmem:[#allocation217_spill] sm:$0xff] %v5114_v15  ;;  %12052 = vst [vmem:[#allocation218_spill] sm:$0xff] %v5117_v7  ;;  %3443 = vpow2.f32 %v5035_v58  ;;  %v5215_v55 = vadd.f32 1.0, %v5141_v36  ;;  %v5222_v58 = vadd.f32 1.0, %v5152_v50  ;;  %v5246_v10 = vadd.f32 1.0, %v5187_v57 }
  0xfa   : > { %12053 = vst [vmem:[#allocation219_spill] sm:$0xff] %v5119_v26  ;;  %12054 = vst [vmem:[#allocation220_spill] sm:$0xff] %v5122_v24  ;;  %3445 = vpow2.f32 %v5037_v29  ;;  %v5230_v29 = vadd.f32 1.0, %v5163_v62  ;;  %vm1033_vm0 = vcmp.ge.f32.partialorder %v5322_v46, 0.0 }
  0xfb   : > { %12056 = vst [vmem:[#allocation221_spill] sm:$0xff] %v5125_v35  ;;  %12057 = vst [vmem:[#allocation222_spill] sm:$0xff] %v5128_v22 }
  0xfc   : > { %12058 = vst [vmem:[#allocation223_spill] sm:$0xff] %v5130_v34  ;;  %12059 = vst [vmem:[#allocation224_spill] sm:$0xff] %v5133_v33 }
  0xfd   : > { %12061 = vst [vmem:[#allocation225_spill] sm:$0xff] %v5136_v27  ;;  %12062 = vst [vmem:[#allocation226_spill] sm:$0xff] %v5139_v39 }
  0xfe   : > { %12063 = vst [vmem:[#allocation227_spill] sm:$0xff] %v5141_v36  ;;  %12064 = vst [vmem:[#allocation228_spill] sm:$0xff] %v5144_v43 }
  0xff   : > { %12065 = vst [vmem:[#allocation229_spill] sm:$0xff] %v5147_v13  ;;  %12066 = vst [vmem:[#allocation230_spill] sm:$0xff] %v5150_v17 }
 0x100   : > { %12067 = vst [vmem:[#allocation231_spill] sm:$0xff] %v5152_v50  ;;  %12068 = vst [vmem:[#allocation232_spill] sm:$0xff] %v5155_v47  ;;  %v5238_v50 = vadd.f32 1.0, %v5175_v32 }
 0x101   : > { %12069 = vst [vmem:[#allocation233_spill] sm:$0xff] %v5158_v45  ;;  %12070 = vst [vmem:[#allocation234_spill] sm:$0xff] %v5161_v0 }
 0x102   : > { %12071 = vst [vmem:[#allocation235_spill] sm:$0xff] %v5163_v62  ;;  %12072 = vst [vmem:[#allocation236_spill] sm:$0xff] %v5167_v40  ;;  %v5195_v40 = vpop.eup %3415  ;;  %3447 = vrcp.f32 %v5040_v51 }
 0x103   : > { %12073 = vst [vmem:[#allocation237_spill] sm:$0xff] %v5170_v52  ;;  %12074 = vst [vmem:[#allocation238_spill] sm:$0xff] %v5173_v20 }
 0x104   : > { %12075 = vst [vmem:[#allocation239_spill] sm:$0xff] %v5175_v32  ;;  %12076 = vst [vmem:[#allocation240_spill] sm:$0xff] %v5179_v63  ;;  %v5203_v63 = vpop.eup %3417  ;;  %3449 = vrcp.f32 %v5045_v60  ;;  %v5254_v32 = vadd.f32 1.0, %v5195_v40 }
 0x105   : > { %12077 = vst [vmem:[#allocation241_spill] sm:$0xff] %v5182_v4  ;;  %12078 = vst [vmem:[#allocation242_spill] sm:$0xff] %v5185_v2  ;;  %v5211_v59 = vpop.eup %3419  ;;  %3451 = vrcp.f32 %v5048_v23 }
 0x106   : > { %12079 = vst [vmem:[#allocation243_spill] sm:$0xff] %v5187_v57  ;;  %12080 = vst [vmem:[#allocation244_spill] sm:$0xff] %v5191_v11  ;;  %v5219_v26 = vpop.eup %3421  ;;  %3453 = vrcp.f32 %v5051_v12  ;;  %v5262_v57 = vadd.f32 1.0, %v5203_v63 }
 0x107   : > { %12083 = vst [vmem:[#allocation245_spill] sm:$0xff] %v5195_v40  ;;  %12084 = vst [vmem:[#allocation246_spill] sm:$0xff] %v5199_v61  ;;  %v5227_v34 = vpop.eup %3423  ;;  %3455 = vrcp.f32 %v5056_v16  ;;  %v5270_v40 = vadd.f32 1.0, %v5211_v59  ;;  %v12280_v46 = vld [vmem:[#allocation231_spill] sm:$0xff] }
 0x108   : > { %12087 = vst [vmem:[#allocation247_spill] sm:$0xff] %v5203_v63  ;;  %12088 = vst [vmem:[#allocation248_spill] sm:$0xff] %v5207_v8  ;;  %v5235_v36 = vpop.eup %3425  ;;  %3457 = vrcp.f32 %v5059_v3  ;;  %v5278_v63 = vadd.f32 1.0, %v5219_v26  ;;  %v5374_v3 = vld [vmem:[%s4227_s8 + $0x28] sm:$0xff] }
 0x109   : > { %12091 = vst [vmem:[#allocation249_spill] sm:$0xff] %v5211_v59  ;;  %12092 = vst [vmem:[#allocation250_spill] sm:$0xff] %v5215_v55  ;;  %v5243_v52 = vpop.eup %3427  ;;  %3459 = vrcp.f32 %v5062_v53  ;;  %v5286_v59 = vadd.f32 1.0, %v5227_v34  ;;  %v5346_v53 = vld [vmem:[%s4227_s8 + $0x10] sm:$0xff]  ;;  %vm1038_vm5 = vcmp.ge.f32.partialorder %v5374_v3, 0.0 }
 0x10a   : > { %12095 = vst [vmem:[#allocation251_spill] sm:$0xff] %v5219_v26  ;;  %12096 = vst [vmem:[#allocation252_spill] sm:$0xff] %v5222_v58  ;;  %v5251_v4 = vpop.eup %3429  ;;  %3461 = vrcp.f32 %v5067_v30  ;;  %v5294_v26 = vadd.f32 1.0, %v5235_v36  ;;  %v5334_v30 = vld [vmem:[%s4227_s8 + $0x8] sm:$0xff]  ;;  %vm1035_vm2 = vcmp.ge.f32.partialorder %v5346_v53, 0.0 }
 0x10b   : > { %12099 = vst [vmem:[#allocation253_spill] sm:$0xff] %v5227_v34  ;;  %12100 = vst [vmem:[#allocation254_spill] sm:$0xff] %v5230_v29  ;;  %v5259_v1 = vpop.eup %3431  ;;  %3463 = vrcp.f32 %v5070_v56  ;;  %v5302_v56 = vadd.f32 1.0, %v5243_v52  ;;  %vm1034_vm1 = vcmp.ge.f32.partialorder %v5334_v30, 0.0 }
 0x10c   : > { %12103 = vst [vmem:[#allocation255_spill] sm:$0xff] %v5235_v36  ;;  %12104 = vst [vmem:[#allocation256_spill] sm:$0xff] %v5238_v50  ;;  %v5267_v37 = vpop.eup %3433  ;;  %3465 = vrcp.f32 %v5073_v54  ;;  %v5310_v54 = vadd.f32 1.0, %v5251_v4 }
 0x10d   : > { %12106 = vst [vmem:[#allocation257_spill] sm:$0xff] %v5243_v52  ;;  %12107 = vst [vmem:[#allocation258_spill] sm:$0xff] %v5246_v10  ;;  %v5275_v20 = vpop.eup %3435  ;;  %3467 = vrcp.f32 %v5078_v28  ;;  %v5318_v28 = vadd.f32 1.0, %v5259_v1  ;;  %v5330_v60 = vadd.f32 1.0, %v5267_v37 }
 0x10e   : > { %12110 = vst [vmem:[#allocation259_spill] sm:$0xff] %v5251_v4  ;;  %12111 = vst [vmem:[#allocation260_spill] sm:$0xff] %v5254_v32  ;;  %v5283_v31 = vpop.eup %3437  ;;  %3469 = vrcp.f32 %v5081_v49  ;;  %v5342_v16 = vadd.f32 1.0, %v5275_v20 }
 0x10f   : > { %12114 = vst [vmem:[#allocation261_spill] sm:$0xff] %v5259_v1  ;;  %12115 = vst [vmem:[#allocation262_spill] sm:$0xff] %v5262_v57  ;;  %v5291_v51 = vpop.eup %3439  ;;  %3471 = vrcp.f32 %v5084_v25  ;;  %v5358_v23 = vadd.f32 1.0, %v5283_v31 }
 0x110   : > { %12118 = vst [vmem:[#allocation263_spill] sm:$0xff] %v5267_v37  ;;  %12119 = vst [vmem:[#allocation264_spill] sm:$0xff] %v5270_v40  ;;  %v5299_v2 = vpop.eup %3441  ;;  %3473 = vrcp.f32 %v5089_v14  ;;  %v5350_v14 = vld [vmem:[%s4227_s8 + $0x18] sm:$0xff]  ;;  %v5370_v4 = vadd.f32 1.0, %v5291_v51  ;;  %v5386_v37 = vld [vmem:[%s4227_s8 + $0x30] sm:$0xff] }
 0x111   : > { %12122 = vst [vmem:[#allocation265_spill] sm:$0xff] %v5275_v20  ;;  %12123 = vst [vmem:[#allocation266_spill] sm:$0xff] %v5278_v63  ;;  %v5307_v36 = vpop.eup %3443  ;;  %3475 = vrcp.f32 %v5092_v38  ;;  %vm1036_vm3 = vcmp.ge.f32.partialorder %v5350_v14, 0.0  ;;  %v5362_v38 = vld [vmem:[%s4227_s8 + $0x20] sm:$0xff]  ;;  %vm1039_vm6 = vcmp.ge.f32.partialorder %v5386_v37, 0.0  ;;  %v5427_v20 = vld [vmem:[%s4227_s8 + $0x48] sm:$0xff] }
 0x112   : > { %12126 = vst [vmem:[#allocation267_spill] sm:$0xff] %v5283_v31  ;;  %12127 = vst [vmem:[#allocation268_spill] sm:$0xff] %v5286_v59  ;;  %v5315_v52 = vpop.eup %3445  ;;  %3477 = vrcp.f32 %v5095_v5  ;;  %vm1037_vm4 = vcmp.ge.f32.partialorder %v5362_v38, 0.0  ;;  %v5394_v31 = vadd.f32 1.0, %v5307_v36  ;;  %vm1042_vm9 = vcmp.ge.f32.partialorder %v5427_v20, 0.0  ;;  %v5635_v20 = vld [vmem:[%s4227_s8 + $0xb8] sm:$0xff] }
 0x113   : > { %12130 = vst [vmem:[#allocation269_spill] sm:$0xff] %v5291_v51  ;;  %12131 = vst [vmem:[#allocation270_spill] sm:$0xff] %v5294_v26  ;;  %v5327_v12 = vpop.eup %3447  ;;  %3479 = vrcp.f32 %v5100_v6  ;;  %v5406_v51 = vld [vmem:[%s4227_s8 + $0x38] sm:$0xff]  ;;  %v5484_v6 = vld [vmem:[%s4227_s8 + $0x70] sm:$0xff] }
 0x114   : > { %12134 = vst [vmem:[#allocation271_spill] sm:$0xff] %v5299_v2  ;;  %12135 = vst [vmem:[#allocation272_spill] sm:$0xff] %v5302_v56  ;;  %v5339_v34 = vpop.eup %3449  ;;  %3481 = vrcp.f32 %v5103_v21  ;;  %vm1040_vm7 = vcmp.ge.f32.partialorder %v5406_v51, 0.0  ;;  %v1097_v62 = vmul.f32 %v5327_v12, %v4838_v18  ;;  %v5416_v21 = vld [vmem:[%s4227_s8 + $0x40] sm:$0xff]  ;;  %vm1047_vm14 = vcmp.ge.f32.partialorder %v5484_v6, 0.0 }
 0x115   : > { %12138 = vst [vmem:[#allocation273_spill] sm:$0xff] %v5307_v36  ;;  %12139 = vst [vmem:[#allocation274_spill] sm:$0xff] %v5310_v54  ;;  %v5355_v1 = vpop.eup %3451  ;;  %3483 = vrcp.f32 %v5106_v19  ;;  %vm1041_vm8 = vcmp.ge.f32.partialorder %v5416_v21, 0.0  ;;  %v5708_v37 = vld [vmem:[%s4227_s8 + $0xe0] sm:$0xff] }
 0x116   : > { %12142 = vst [vmem:[#allocation275_spill] sm:$0xff] %v5315_v52  ;;  %12143 = vst [vmem:[#allocation276_spill] sm:$0xff] %v5318_v28 }
 0x117   : > { %12146 = vst [vmem:[#allocation277_spill] sm:$0xff] %v5330_v60  ;;  %12149 = vst [vmem:[#allocation278_spill] sm:$0xff] %v5342_v16  ;;  %v5367_v60 = vpop.eup %3453  ;;  %v5382_v16 = vadd.f32 1.0, %v5299_v2  ;;  %3485 = vrcp.f32 %v5111_v9  ;;  %v1098_v9 = vmul.f32 %v5339_v34, %v4846_v44  ;;  %v5469_v2 = vld [vmem:[%s4227_s8 + $0x68] sm:$0xff] }
 0x118   : > { %12152 = vst [vmem:[#allocation279_spill] sm:$0xff] %v5358_v23  ;;  %12155 = vst [vmem:[#allocation280_spill] sm:$0xff] %v5370_v4  ;;  %v5379_v23 = vpop.eup %3455  ;;  %v5402_v4 = vadd.f32 1.0, %v5315_v52  ;;  %3487 = vrcp.f32 %v5114_v15  ;;  %v1099_v15 = vmul.f32 %v5355_v1, %v4854_v41  ;;  %v1100_v19 = vmul.f32 %v5367_v60, %v4862_v42  ;;  %v5439_v52 = vld [vmem:[%s4227_s8 + $0x50] sm:$0xff] }
 0x119   : > { %12158 = vst [vmem:[#allocation281_spill] sm:$0xff] %v5382_v16  ;;  %v5391_v25 = vpop.eup %3457  ;;  %12161 = vst [vmem:[#allocation282_spill] sm:$0xff] %v5394_v31  ;;  %3489 = vrcp.f32 %v5117_v7  ;;  %vm1043_vm10 = vcmp.ge.f32.partialorder %v5439_v52, 0.0  ;;  %v5443_v7 = vld [vmem:[%s4227_s8 + $0x58] sm:$0xff]  ;;  %v1101_v41 = vmul.f32 %v5379_v23, %v4870_v48  ;;  %v5462_v48 = vsel %vm1033_vm0, %v5327_v12, %v1097_v62 }
 0x11a   : > { %v5399_v16 = vpop.eup %3459  ;;  %12164 = vst [vmem:[#allocation283_spill] sm:$0xff] %v5402_v4  ;;  %3491 = vrcp.f32 %v5122_v24  ;;  %vm1044_vm11 = vcmp.ge.f32.partialorder %v5443_v7, 0.0  ;;  %v5454_v24 = vld [vmem:[%s4227_s8 + $0x60] sm:$0xff]  ;;  %v12171_v4 = vld [vmem:[#allocation157_spill] sm:$0xff]  ;;  %12172 = vst [vmem:[#allocation284_spill] sm:$0xff] %v5462_v48  ;;  %vm1046_vm13 = vcmp.ge.f32.partialorder %v5469_v2, 0.0  ;;  %v5490_v48 = vsel %vm1035_vm2, %v5355_v1, %v1099_v15 }
 0x11b   : > { %v5412_v5 = vpop.eup %3461  ;;  %3493 = vrcp.f32 %v5125_v35  ;;  %vm1045_vm12 = vcmp.ge.f32.partialorder %v5454_v24, 0.0  ;;  %v1102_v31 = vmul.f32 %v5391_v25, %v12171_v4  ;;  %v12174_v35 = vld [vmem:[#allocation160_spill] sm:$0xff]  ;;  %v5477_v4 = vsel %vm1034_vm1, %v5339_v34, %v1098_v9  ;;  %12177 = vst [vmem:[#allocation286_spill] sm:$0xff] %v5490_v48  ;;  %v12217_v52 = vld [vmem:[#allocation241_spill] sm:$0xff] }
 0x11c   : > { %v5423_v18 = vpop.eup %3463  ;;  %3495 = vrcp.f32 %v5128_v22  ;;  %v1103_v28 = vmul.f32 %v5399_v16, %v12174_v35  ;;  %12175 = vst [vmem:[#allocation285_spill] sm:$0xff] %v5477_v4  ;;  %v5495_v9 = vsel %vm1036_vm3, %v5367_v60, %v1100_v19  ;;  %v12180_v4 = vld [vmem:[#allocation162_spill] sm:$0xff]  ;;  %v5506_v15 = vsel %vm1037_vm4, %v5379_v23, %v1101_v41  ;;  %v5513_v60 = vld [vmem:[%s4227_s8 + $0x78] sm:$0xff]  ;;  %v12183_v19 = vld [vmem:[#allocation163_spill] sm:$0xff] }
 0x11d   : > { %v5435_v49 = vpop.eup %3465  ;;  %3497 = vrcp.f32 %v5133_v33  ;;  %12178 = vst [vmem:[#allocation287_spill] sm:$0xff] %v5495_v9  ;;  %v1104_v33 = vmul.f32 %v5412_v5, %v12180_v4  ;;  %12181 = vst [vmem:[#allocation288_spill] sm:$0xff] %v5506_v15  ;;  %vm1048_vm15 = vcmp.ge.f32.partialorder %v5513_v60, 0.0  ;;  %v1105_v30 = vmul.f32 %v5423_v18, %v12183_v19  ;;  %v5528_v15 = vld [vmem:[%s4227_s8 + $0x80] sm:$0xff]  ;;  %v12186_v9 = vld [vmem:[#allocation164_spill] sm:$0xff] }
 0x11e   : > { %v5450_v44 = vpop.eup %3467  ;;  %3499 = vrcp.f32 %v5136_v27  ;;  %v5521_v38 = vsel %vm1038_vm5, %v5391_v25, %v1102_v31  ;;  %vm1049_vm0 = vcmp.ge.f32.partialorder %v5528_v15, 0.0  ;;  %v1106_v48 = vmul.f32 %v5435_v49, %v12186_v9  ;;  %v12190_v27 = vld [vmem:[#allocation166_spill] sm:$0xff]  ;;  %v5555_v25 = vld [vmem:[%s4227_s8 + $0x90] sm:$0xff]  ;;  %v12259_v41 = vld [vmem:[#allocation277_spill] sm:$0xff] }
 0x11f   : > { %v5465_v36 = vpop.eup %3469  ;;  %3501 = vrcp.f32 %v5139_v39  ;;  %12184 = vst [vmem:[#allocation289_spill] sm:$0xff] %v5521_v38  ;;  %v5536_v3 = vsel %vm1039_vm6, %v5399_v16, %v1103_v28  ;;  %v5543_v38 = vld [vmem:[%s4227_s8 + $0x88] sm:$0xff]  ;;  %vm1051_vm2 = vcmp.ge.f32.partialorder %v5555_v25, 0.0  ;;  %v5567_v16 = vsel %vm1040_vm7, %v5412_v5, %v1104_v33  ;;  %v5574_v19 = vld [vmem:[%s4227_s8 + $0xa0] sm:$0xff]  ;;  %v12195_v4 = vld [vmem:[#allocation168_spill] sm:$0xff] }
 0x120   : > { %v5480_v12 = vpop.eup %3471  ;;  %3503 = vrcp.f32 %v5144_v43  ;;  %12187 = vst [vmem:[#allocation290_spill] sm:$0xff] %v5536_v3  ;;  %vm1050_vm1 = vcmp.ge.f32.partialorder %v5543_v38, 0.0  ;;  %v12189_v43 = vld [vmem:[#allocation165_spill] sm:$0xff]  ;;  %v1108_v22 = vmul.f32 %v5465_v36, %v12190_v27  ;;  %12193 = vst [vmem:[#allocation291_spill] sm:$0xff] %v5567_v16  ;;  %vm1053_vm4 = vcmp.ge.f32.partialorder %v5574_v19, 0.0  ;;  %v5589_v16 = vld [vmem:[%s4227_s8 + $0xa8] sm:$0xff] }
 0x121   : > { %v5498_v62 = vpop.eup %3473  ;;  %3505 = vrcp.f32 %v5147_v13  ;;  %v1107_v39 = vmul.f32 %v5450_v44, %v12189_v43  ;;  %v5559_v3 = vld [vmem:[%s4227_s8 + $0x98] sm:$0xff]  ;;  %v12192_v13 = vld [vmem:[#allocation167_spill] sm:$0xff]  ;;  %v5582_v51 = vsel %vm1041_vm8, %v5423_v18, %v1105_v30  ;;  %vm1054_vm5 = vcmp.ge.f32.partialorder %v5589_v16, 0.0  ;;  %v12220_v27 = vld [vmem:[#allocation242_spill] sm:$0xff] }
 0x122   : > { %v5509_v14 = vpop.eup %3475  ;;  %3507 = vrcp.f32 %v5150_v17  ;;  %vm1052_vm3 = vcmp.ge.f32.partialorder %v5559_v3, 0.0  ;;  %v1109_v43 = vmul.f32 %v5480_v12, %v12192_v13  ;;  %v1110_v35 = vmul.f32 %v5498_v62, %v12195_v4  ;;  %12196 = vst [vmem:[#allocation292_spill] sm:$0xff] %v5582_v51  ;;  %v5604_v51 = vld [vmem:[%s4227_s8 + $0xb0] sm:$0xff]  ;;  %v345_v33 = vld [vmem:[%s4234_s29 + $0x98] sm:$0xff]  ;;  %v12279_v34 = vld [vmem:[#allocation282_spill] sm:$0xff] }
 0x123   : > { %v5524_v53 = vpop.eup %3477  ;;  %3509 = vrcp.f32 %v5155_v47  ;;  %v12198_v47 = vld [vmem:[#allocation169_spill] sm:$0xff]  ;;  %v5597_v21 = vsel %vm1042_vm9, %v5435_v49, %v1106_v48  ;;  %vm1055_vm6 = vcmp.ge.f32.partialorder %v5604_v51, 0.0  ;;  %v5615_v48 = vsel %vm1044_vm11, %v5465_v36, %v1108_v22  ;;  %v342_v36 = vld [vmem:[%s4234_s29 + $0x80] sm:$0xff] }
 0x124   : > { %v5539_v23 = vpop.eup %3479  ;;  %3511 = vrcp.f32 %v5158_v45  ;;  %v1111_v13 = vmul.f32 %v5509_v14, %v12198_v47  ;;  %12199 = vst [vmem:[#allocation293_spill] sm:$0xff] %v5597_v21  ;;  %v5610_v45 = vsel %vm1043_vm10, %v5450_v44, %v1107_v39  ;;  %12202 = vst [vmem:[#allocation295_spill] sm:$0xff] %v5615_v48  ;;  %v340_v21 = vld [vmem:[%s4234_s29 + $0x70] sm:$0xff]  ;;  %v12205_v47 = vld [vmem:[#allocation170_spill] sm:$0xff]  ;;  %v5627_v44 = vsel %vm1045_vm12, %v5480_v12, %v1109_v43 }
 0x125   : > { %v5551_v28 = vpop.eup %3481  ;;  %3513 = vrcp.f32 %v5161_v0  ;;  %12201 = vst [vmem:[#allocation294_spill] sm:$0xff] %v5610_v45  ;;  %v12204_v0 = vld [vmem:[#allocation236_spill] sm:$0xff]  ;;  %v1112_v4 = vmul.f32 %v5524_v53, %v12205_v47  ;;  %12206 = vst [vmem:[#allocation296_spill] sm:$0xff] %v5627_v44  ;;  %v341_v22 = vld [vmem:[%s4234_s29 + $0x78] sm:$0xff]  ;;  %vm1056_vm7 = vcmp.ge.f32.partialorder %v5635_v20, 0.0  ;;  %v5643_v24 = vsel %vm1046_vm13, %v5498_v62, %v1110_v35 }
 0x126   : > { %v5570_v17 = vpop.eup %3483  ;;  %3515 = vrcp.f32 %v12204_v0  ;;  %v12208_v39 = vld [vmem:[#allocation237_spill] sm:$0xff]  ;;  %v12209_v48 = vld [vmem:[#allocation171_spill] sm:$0xff]  ;;  %12210 = vst [vmem:[#allocation297_spill] sm:$0xff] %v5643_v24  ;;  %v5646_v43 = vmul.f32 %v5484_v6, %v340_v21  ;;  %v12211_v44 = vld [vmem:[#allocation238_spill] sm:$0xff]  ;;  %v5661_v35 = vsel %vm1047_vm14, %v5509_v14, %v1111_v13  ;;  %v5664_v2 = vmul.f32 %v5513_v60, %v341_v22 }
 0x127   : > { %v5585_v9 = vpop.eup %3485  ;;  %3517 = vrcp.f32 %v12208_v39  ;;  %v1113_v45 = vmul.f32 %v5539_v23, %v12209_v48  ;;  %v5653_v39 = vld [vmem:[%s4227_s8 + $0xc0] sm:$0xff]  ;;  %v12212_v0 = vld [vmem:[#allocation172_spill] sm:$0xff]  ;;  %12213 = vst [vmem:[#allocation298_spill] sm:$0xff] %v5661_v35  ;;  %v343_v21 = vld [vmem:[%s4234_s29 + $0x88] sm:$0xff]  ;;  %v5679_v14 = vmul.f32 %v5528_v15, %v342_v36  ;;  %v5698_v36 = vsel %vm1048_vm15, %v5524_v53, %v1112_v4 }
 0x128   : > { %v5600_v5 = vpop.eup %3487  ;;  %3519 = vrcp.f32 %v12211_v44  ;;  %vm1057_vm8 = vcmp.ge.f32.partialorder %v5653_v39, 0.0  ;;  %v1114_v48 = vmul.f32 %v5551_v28, %v12212_v0  ;;  %v12214_v24 = vld [vmem:[#allocation240_spill] sm:$0xff]  ;;  %v5671_v44 = vld [vmem:[%s4227_s8 + $0xc8] sm:$0xff]  ;;  %v12215_v0 = vld [vmem:[#allocation173_spill] sm:$0xff]  ;;  %12219 = vst [vmem:[#allocation299_spill] sm:$0xff] %v5698_v36  ;;  %vm1061_vm12 = vcmp.ge.f32.partialorder %v5708_v37, 0.0 }
 0x129   : > { %v5618_v30 = vpop.eup %3489  ;;  %3521 = vrcp.f32 %v12214_v24  ;;  %vm1058_vm9 = vcmp.ge.f32.partialorder %v5671_v44, 0.0  ;;  %v1115_v47 = vmul.f32 %v5570_v17, %v12215_v0  ;;  %v12216_v6 = vld [vmem:[#allocation174_spill] sm:$0xff]  ;;  %v344_v35 = vld [vmem:[%s4234_s29 + $0x90] sm:$0xff]  ;;  %v5690_v49 = vld [vmem:[%s4227_s8 + $0xd8] sm:$0xff]  ;;  %v5716_v4 = vsel %vm1049_vm0, %v5539_v23, %v1113_v45 }
 0x12a   : > { %v5630_v7 = vpop.eup %3491  ;;  %v1116_v13 = vmul.f32 %v5585_v9, %v12216_v6  ;;  %3523 = vrcp.f32 %v12217_v52  ;;  %v5686_v24 = vld [vmem:[%s4227_s8 + $0xd0] sm:$0xff]  ;;  %vm1060_vm11 = vcmp.ge.f32.partialorder %v5690_v49, 0.0  ;;  %v12218_v0 = vld [vmem:[#allocation175_spill] sm:$0xff]  ;;  %v5701_v52 = vmul.f32 %v5543_v38, %v343_v21  ;;  %12222 = vst [vmem:[#allocation300_spill] sm:$0xff] %v5716_v4  ;;  %v346_v21 = vld [vmem:[%s4234_s29 + $0xa0] sm:$0xff] }
 0x12b   : > { %v5648_v12 = vpop.eup %3493  ;;  %vm1059_vm10 = vcmp.ge.f32.partialorder %v5686_v24, 0.0  ;;  %v1117_v6 = vmul.f32 %v5600_v5, %v12218_v0  ;;  %3525 = vrcp.f32 %v12220_v27  ;;  %v12221_v0 = vld [vmem:[#allocation176_spill] sm:$0xff]  ;;  %v5719_v53 = vmul.f32 %v5555_v25, %v344_v35  ;;  %v5726_v36 = vld [vmem:[%s4227_s8 + $0xe8] sm:$0xff]  ;;  %v12223_v27 = vld [vmem:[#allocation177_spill] sm:$0xff] }
 0x12c   : > { %v5666_v62 = vpop.eup %3495  ;;  %v1118_v31 = vmul.f32 %v5618_v30, %v12221_v0  ;;  %3527 = vrcp.f32 %v5191_v11  ;;  %vm1062_vm13 = vcmp.ge.f32.partialorder %v5726_v36, 0.0  ;;  %v1119_v0 = vmul.f32 %v5630_v7, %v12223_v27  ;;  %v347_v35 = vld [vmem:[%s4234_s29 + $0xa8] sm:$0xff]  ;;  %v5744_v4 = vld [vmem:[%s4227_s8 + $0xf0] sm:$0xff]  ;;  %v5834_v11 = vld [vmem:[%s4227_s8 + $0x118] sm:$0xff] }
 0x12d   : > { %v5681_v22 = vpop.eup %3497  ;;  %v5734_v45 = vsel %vm1050_vm1, %v5551_v28, %v1114_v48  ;;  %v5737_v15 = vmul.f32 %v5559_v3, %v345_v33  ;;  %3529 = vrcp.f32 %v5199_v61  ;;  %vm1063_vm14 = vcmp.ge.f32.partialorder %v5744_v4, 0.0  ;;  %v12227_v61 = vld [vmem:[#allocation178_spill] sm:$0xff]  ;;  %v349_v3 = vld [vmem:[%s4234_s29 + $0xb8] sm:$0xff] }
 0x12e   : > { %v5703_v18 = vpop.eup %3499  ;;  %12224 = vst [vmem:[#allocation301_spill] sm:$0xff] %v5734_v45  ;;  %v5750_v38 = vsel %vm1051_vm2, %v5570_v17, %v1115_v47  ;;  %v5755_v28 = vsel %vm1052_vm3, %v5585_v9, %v1116_v13  ;;  %v5758_v33 = vmul.f32 %v5574_v19, %v346_v21  ;;  %v348_v45 = vld [vmem:[%s4234_s29 + $0xb0] sm:$0xff]  ;;  %3531 = vrcp.f32 %v5207_v8  ;;  %v5779_v13 = vld [vmem:[%s4227_s8 + $0xf8] sm:$0xff]  ;;  %v12229_v21 = vld [vmem:[#allocation179_spill] sm:$0xff] }
 0x12f   : > { %v5721_v60 = vpop.eup %3501  ;;  %12225 = vst [vmem:[#allocation302_spill] sm:$0xff] %v5750_v38  ;;  %12226 = vst [vmem:[#allocation303_spill] sm:$0xff] %v5755_v28  ;;  %v1120_v25 = vmul.f32 %v5648_v12, %v12227_v61  ;;  %v5769_v47 = vsel %vm1053_vm4, %v5600_v5, %v1117_v6  ;;  %v5772_v17 = vmul.f32 %v5589_v16, %v347_v35  ;;  %3533 = vrcp.f32 %v5215_v55  ;;  %v350_v35 = vld [vmem:[%s4234_s29 + $0xc0] sm:$0xff]  ;;  %v12231_v38 = vld [vmem:[#allocation180_spill] sm:$0xff] }
 0x130   : > { %v5739_v23 = vpop.eup %3503  ;;  %12228 = vst [vmem:[#allocation304_spill] sm:$0xff] %v5769_v47  ;;  %vm1064_vm15 = vcmp.ge.f32.partialorder %v5779_v13, 0.0  ;;  %v1121_v28 = vmul.f32 %v5666_v62, %v12229_v21  ;;  %v5787_v19 = vsel %vm1054_vm5, %v5618_v30, %v1118_v31  ;;  %v5790_v5 = vmul.f32 %v5604_v51, %v348_v45  ;;  %v5797_v47 = vld [vmem:[%s4227_s8 + $0x100] sm:$0xff]  ;;  %v351_v45 = vld [vmem:[%s4234_s29 + $0xc8] sm:$0xff]  ;;  %v353_v21 = vld [vmem:[%s4234_s29 + $0xd8] sm:$0xff] }
 0x131   : > { %v5760_v48 = vpop.eup %3505  ;;  %12230 = vst [vmem:[#allocation305_spill] sm:$0xff] %v5787_v19  ;;  %3535 = vrcp.f32 %v5222_v58  ;;  %vm1065_vm0 = vcmp.ge.f32.partialorder %v5797_v47, 0.0  ;;  %v1122_v55 = vmul.f32 %v5681_v22, %v12231_v38  ;;  %v5805_v31 = vsel %vm1055_vm6, %v5630_v7, %v1119_v0  ;;  %v5815_v19 = vld [vmem:[%s4227_s8 + $0x108] sm:$0xff]  ;;  %v12233_v58 = vld [vmem:[#allocation181_spill] sm:$0xff]  ;;  %v5852_v61 = vld [vmem:[%s4227_s8 + $0x120] sm:$0xff] }
 0x132   : > { %v5774_v9 = vpop.eup %3507  ;;  %12232 = vst [vmem:[#allocation306_spill] sm:$0xff] %v5805_v31  ;;  %v5808_v16 = vmul.f32 %v5635_v20, %v349_v3  ;;  %3537 = vrcp.f32 %v5230_v29  ;;  %vm1066_vm1 = vcmp.ge.f32.partialorder %v5815_v19, 0.0  ;;  %v1123_v8 = vmul.f32 %v5703_v18, %v12233_v58  ;;  %v12234_v51 = vld [vmem:[#allocation183_spill] sm:$0xff]  ;;  %v352_v31 = vld [vmem:[%s4234_s29 + $0xd0] sm:$0xff]  ;;  %v6036_v1 = vld [vmem:[%s4227_s8 + $0x178] sm:$0xff] }
 0x133   : > { %v5792_v6 = vpop.eup %3509  ;;  %v1124_v0 = vmul.f32 %v5721_v60, %v12234_v51  ;;  %v5823_v7 = vmul.f32 %v5653_v39, %v350_v35  ;;  %3539 = vrcp.f32 %v5238_v50  ;;  %v5830_v29 = vld [vmem:[%s4227_s8 + $0x110] sm:$0xff]  ;;  %vm1068_vm3 = vcmp.ge.f32.partialorder %v5834_v11, 0.0 }
 0x134   : > { %v5810_v30 = vpop.eup %3511  ;;  %vm1067_vm2 = vcmp.ge.f32.partialorder %v5830_v29, 0.0  ;;  %v12235_v58 = vld [vmem:[#allocation184_spill] sm:$0xff]  ;;  %v5842_v35 = vsel %vm1056_vm7, %v5648_v12, %v1120_v25  ;;  %v5845_v50 = vmul.f32 %v5671_v44, %v351_v45  ;;  %3541 = vrcp.f32 %v5246_v10  ;;  %v354_v45 = vld [vmem:[%s4234_s29 + $0xe0] sm:$0xff] }
 0x135   : > { %v5825_v3 = vpop.eup %3513  ;;  %v1125_v51 = vmul.f32 %v5739_v23, %v12235_v58  ;;  %12236 = vst [vmem:[#allocation307_spill] sm:$0xff] %v5842_v35  ;;  %vm1069_vm4 = vcmp.ge.f32.partialorder %v5852_v61, 0.0  ;;  %v12237_v58 = vld [vmem:[#allocation185_spill] sm:$0xff]  ;;  %v5860_v20 = vsel %vm1057_vm8, %v5666_v62, %v1121_v28  ;;  %v5863_v12 = vmul.f32 %v5686_v24, %v352_v31  ;;  %v5870_v35 = vld [vmem:[%s4227_s8 + $0x128] sm:$0xff]  ;;  %v12239_v10 = vld [vmem:[#allocation186_spill] sm:$0xff] }
 0x136   : > { %v5847_v38 = vpop.eup %3515  ;;  %v1126_v27 = vmul.f32 %v5760_v48, %v12237_v58  ;;  %12238 = vst [vmem:[#allocation308_spill] sm:$0xff] %v5860_v20  ;;  %3543 = vrcp.f32 %v5254_v32  ;;  %vm1070_vm5 = vcmp.ge.f32.partialorder %v5870_v35, 0.0  ;;  %v1127_v58 = vmul.f32 %v5774_v9, %v12239_v10  ;;  %v355_v31 = vld [vmem:[%s4234_s29 + $0xe8] sm:$0xff]  ;;  %v5888_v20 = vld [vmem:[%s4227_s8 + $0x130] sm:$0xff]  ;;  %v5978_v32 = vld [vmem:[%s4227_s8 + $0x158] sm:$0xff] }
 0x137   : > { %v5865_v25 = vpop.eup %3517  ;;  %v5878_v39 = vsel %vm1058_vm9, %v5681_v22, %v1122_v55  ;;  %v5881_v62 = vmul.f32 %v5690_v49, %v353_v21  ;;  %3545 = vrcp.f32 %v5262_v57  ;;  %vm1071_vm6 = vcmp.ge.f32.partialorder %v5888_v20, 0.0  ;;  %v12243_v57 = vld [vmem:[#allocation187_spill] sm:$0xff] }
 0x138   : > { %12240 = vst [vmem:[#allocation309_spill] sm:$0xff] %v5878_v39  ;;  %v5883_v28 = vpop.eup %3519  ;;  %v5894_v44 = vsel %vm1059_vm10, %v5703_v18, %v1123_v8  ;;  %v5899_v55 = vsel %vm1060_vm11, %v5721_v60, %v1124_v0  ;;  %v5902_v22 = vmul.f32 %v5708_v37, %v354_v45  ;;  %v356_v39 = vld [vmem:[%s4234_s29 + $0xf0] sm:$0xff]  ;;  %3547 = vrcp.f32 %v5270_v40  ;;  %v357_v60 = vld [vmem:[%s4234_s29 + $0xf8] sm:$0xff] }
 0x139   : > { %12241 = vst [vmem:[#allocation310_spill] sm:$0xff] %v5894_v44  ;;  %12242 = vst [vmem:[#allocation311_spill] sm:$0xff] %v5899_v55  ;;  %v5904_v21 = vpop.eup %3521  ;;  %v1128_v24 = vmul.f32 %v5792_v6, %v12243_v57  ;;  %v5913_v8 = vsel %vm1061_vm12, %v5739_v23, %v1125_v51  ;;  %v5916_v18 = vmul.f32 %v5726_v36, %v355_v31  ;;  %3549 = vrcp.f32 %v5278_v63  ;;  %v5923_v0 = vld [vmem:[%s4227_s8 + $0x138] sm:$0xff]  ;;  %v12245_v45 = vld [vmem:[#allocation188_spill] sm:$0xff] }
 0x13a   : > { %12244 = vst [vmem:[#allocation312_spill] sm:$0xff] %v5913_v8  ;;  %v5918_v49 = vpop.eup %3523  ;;  %vm1072_vm7 = vcmp.ge.f32.partialorder %v5923_v0, 0.0  ;;  %v1129_v55 = vmul.f32 %v5810_v30, %v12245_v45  ;;  %v5931_v37 = vsel %vm1062_vm13, %v5760_v48, %v1126_v27  ;;  %v5934_v23 = vmul.f32 %v5744_v4, %v356_v39  ;;  %v358_v31 = vld [vmem:[%s4234_s29 + $0x100] sm:$0xff]  ;;  %v12247_v44 = vld [vmem:[#allocation189_spill] sm:$0xff]  ;;  %v359_v39 = vld [vmem:[%s4234_s29 + $0x108] sm:$0xff] }
 0x13b   : > { %12246 = vst [vmem:[#allocation313_spill] sm:$0xff] %v5931_v37  ;;  %v5936_v51 = vpop.eup %3525  ;;  %3551 = vrcp.f32 %v5286_v59  ;;  %v5941_v8 = vld [vmem:[%s4227_s8 + $0x140] sm:$0xff]  ;;  %v1130_v63 = vmul.f32 %v5825_v3, %v12247_v44  ;;  %v5949_v27 = vsel %vm1063_vm14, %v5774_v9, %v1127_v58  ;;  %v5952_v36 = vmul.f32 %v5779_v13, %v357_v60  ;;  %v5959_v37 = vld [vmem:[%s4227_s8 + $0x148] sm:$0xff]  ;;  %v361_v45 = vld [vmem:[%s4234_s29 + $0x118] sm:$0xff] }
 0x13c   : > { %vm1073_vm8 = vcmp.ge.f32.partialorder %v5941_v8, 0.0  ;;  %12248 = vst [vmem:[#allocation314_spill] sm:$0xff] %v5949_v27  ;;  %v5954_v48 = vpop.eup %3527  ;;  %3553 = vrcp.f32 %v5294_v26  ;;  %vm1074_vm9 = vcmp.ge.f32.partialorder %v5959_v37, 0.0  ;;  %v12249_v59 = vld [vmem:[#allocation191_spill] sm:$0xff]  ;;  %v5967_v9 = vmul.f32 %v5797_v47, %v358_v31  ;;  %v360_v27 = vld [vmem:[%s4234_s29 + $0x110] sm:$0xff]  ;;  %v5996_v57 = vld [vmem:[%s4227_s8 + $0x160] sm:$0xff] }
 0x13d   : > { %v1131_v40 = vmul.f32 %v5847_v38, %v12249_v59  ;;  %v12250_v4 = vld [vmem:[#allocation195_spill] sm:$0xff]  ;;  %v5969_v60 = vpop.eup %3529  ;;  %3555 = vrcp.f32 %v5302_v56  ;;  %v5974_v26 = vld [vmem:[%s4227_s8 + $0x150] sm:$0xff]  ;;  %vm1076_vm11 = vcmp.ge.f32.partialorder %v5978_v32, 0.0  ;;  %v5986_v31 = vsel %vm1064_vm15, %v5792_v6, %v1128_v24 }
 0x13e   : > { %v1132_v58 = vmul.f32 %v5865_v25, %v12250_v4  ;;  %vm1075_vm10 = vcmp.ge.f32.partialorder %v5974_v26, 0.0  ;;  %v12251_v59 = vld [vmem:[#allocation199_spill] sm:$0xff]  ;;  %12252 = vst [vmem:[#allocation315_spill] sm:$0xff] %v5986_v31  ;;  %v5989_v56 = vmul.f32 %v5815_v19, %v359_v39  ;;  %v5991_v44 = vpop.eup %3531  ;;  %3557 = vrcp.f32 %v5310_v54  ;;  %v362_v39 = vld [vmem:[%s4234_s29 + $0x120] sm:$0xff]  ;;  %v12255_v31 = vld [vmem:[#allocation276_spill] sm:$0xff] }
 0x13f   : > { %v1133_v4 = vmul.f32 %v5883_v28, %v12251_v59  ;;  %vm1077_vm12 = vcmp.ge.f32.partialorder %v5996_v57, 0.0  ;;  %v12253_v59 = vld [vmem:[#allocation203_spill] sm:$0xff]  ;;  %v6004_v13 = vsel %vm1065_vm0, %v5810_v30, %v1129_v55  ;;  %v6007_v6 = vmul.f32 %v5830_v29, %v360_v27  ;;  %v6009_v24 = vpop.eup %3533 }
 0x140   : > { %v1134_v10 = vmul.f32 %v5904_v21, %v12253_v59  ;;  %12254 = vst [vmem:[#allocation316_spill] sm:$0xff] %v6004_v13  ;;  %3559 = vrcp.f32 %v12255_v31  ;;  %v6014_v54 = vld [vmem:[%s4227_s8 + $0x168] sm:$0xff]  ;;  %v6018_v59 = vld [vmem:[%s4227_s8 + $0x170] sm:$0xff]  ;;  %v6026_v55 = vsel %vm1066_vm1, %v5825_v3, %v1130_v63  ;;  %v6029_v27 = vmul.f32 %v5834_v11, %v361_v45  ;;  %v6031_v13 = vpop.eup %3535 }
 0x141   : > { %vm1078_vm13 = vcmp.ge.f32.partialorder %v6014_v54, 0.0  ;;  %vm1079_vm14 = vcmp.ge.f32.partialorder %v6018_v59, 0.0  ;;  %v12256_v47 = vld [vmem:[#allocation207_spill] sm:$0xff]  ;;  %12257 = vst [vmem:[#allocation317_spill] sm:$0xff] %v6026_v55  ;;  %3561 = vrcp.f32 %v12259_v41  ;;  %vm1080_vm15 = vcmp.ge.f32.partialorder %v6036_v1, 0.0  ;;  %v6052_v45 = vpop.eup %3537  ;;  %v364_v55 = vld [vmem:[%s4234_s29 + $0x130] sm:$0xff] }
 0x142   : > { %v1135_v30 = vmul.f32 %v5918_v49, %v12256_v47  ;;  %12258 = vst [vmem:[#allocation318_spill] sm:$0xff] %v6029_v27  ;;  %v363_v31 = vld [vmem:[%s4234_s29 + $0x128] sm:$0xff]  ;;  %v6042_v19 = vsel %vm1067_vm2, %v5847_v38, %v1131_v40  ;;  %v6047_v63 = vsel %vm1068_vm3, %v5865_v25, %v1132_v58  ;;  %v6050_v3 = vmul.f32 %v5852_v61, %v362_v39  ;;  %v12263_v41 = vld [vmem:[#allocation278_spill] sm:$0xff]  ;;  %v6070_v25 = vpop.eup %3539  ;;  %v365_v58 = vld [vmem:[%s4234_s29 + $0x138] sm:$0xff] }
 0x143   : > { %12260 = vst [vmem:[#allocation319_spill] sm:$0xff] %v6042_v19  ;;  %12261 = vst [vmem:[#allocation320_spill] sm:$0xff] %v6047_v63  ;;  %3563 = vrcp.f32 %v12263_v41  ;;  %v6057_v47 = vld [vmem:[%s4227_s8 + $0x180] sm:$0xff]  ;;  %v12264_v40 = vld [vmem:[#allocation211_spill] sm:$0xff]  ;;  %v6065_v11 = vsel %vm1069_vm4, %v5883_v28, %v1133_v4  ;;  %v6068_v38 = vmul.f32 %v5870_v35, %v363_v31  ;;  %v6083_v61 = vsel %vm1070_vm5, %v5904_v21, %v1134_v10  ;;  %v6088_v4 = vpop.eup %3541 }
 0x144   : > { %12262 = vst [vmem:[#allocation321_spill] sm:$0xff] %v6050_v3  ;;  %vm1081_vm0 = vcmp.ge.f32.partialorder %v6057_v47, 0.0  ;;  %v1136_v29 = vmul.f32 %v5936_v51, %v12264_v40  ;;  %12265 = vst [vmem:[#allocation322_spill] sm:$0xff] %v6065_v11  ;;  %v12267_v39 = vld [vmem:[#allocation279_spill] sm:$0xff]  ;;  %v6086_v28 = vmul.f32 %v5888_v20, %v364_v55  ;;  %v366_v31 = vld [vmem:[%s4234_s29 + $0x140] sm:$0xff]  ;;  %v6101_v10 = vsel %vm1071_vm6, %v5918_v49, %v1135_v30  ;;  %v6106_v21 = vpop.eup %3543 }
 0x145   : > { %12266 = vst [vmem:[#allocation323_spill] sm:$0xff] %v6068_v38  ;;  %3565 = vrcp.f32 %v12267_v39  ;;  %v6075_v63 = vld [vmem:[%s4227_s8 + $0x188] sm:$0xff]  ;;  %12269 = vst [vmem:[#allocation324_spill] sm:$0xff] %v6083_v61  ;;  %v12271_v11 = vld [vmem:[#allocation280_spill] sm:$0xff]  ;;  %v6104_v35 = vmul.f32 %v5923_v0, %v365_v58  ;;  %v6119_v58 = vmul.f32 %v5941_v8, %v366_v31  ;;  %v1141_v42 = vmul.f32 %v6031_v13, %v12280_v46 }
 0x146   : > { %vm1082_vm1 = vcmp.ge.f32.partialorder %v6075_v63, 0.0  ;;  %v12268_v19 = vld [vmem:[#allocation215_spill] sm:$0xff]  ;;  %12270 = vst [vmem:[#allocation325_spill] sm:$0xff] %v6086_v28  ;;  %3567 = vrcp.f32 %v12271_v11  ;;  %v6093_v39 = vld [vmem:[%s4227_s8 + $0x190] sm:$0xff]  ;;  %12273 = vst [vmem:[#allocation326_spill] sm:$0xff] %v6101_v10  ;;  %v6121_v10 = vpop.eup %3545 }
 0x147   : > { %v1137_v41 = vmul.f32 %v5954_v48, %v12268_v19  ;;  %vm1083_vm2 = vcmp.ge.f32.partialorder %v6093_v39, 0.0  ;;  %v12272_v40 = vld [vmem:[#allocation219_spill] sm:$0xff]  ;;  %12274 = vst [vmem:[#allocation327_spill] sm:$0xff] %v6104_v35  ;;  %v12275_v61 = vld [vmem:[#allocation281_spill] sm:$0xff]  ;;  %12278 = vst [vmem:[#allocation328_spill] sm:$0xff] %v6119_v58 }
 0x148   : > { %v1138_v19 = vmul.f32 %v5969_v60, %v12272_v40  ;;  %v367_v55 = vld [vmem:[%s4234_s29 + $0x148] sm:$0xff]  ;;  %3569 = vrcp.f32 %v12275_v61  ;;  %v6111_v11 = vld [vmem:[%s4227_s8 + $0x198] sm:$0xff]  ;;  %v6125_v61 = vld [vmem:[%s4227_s8 + $0x1a0] sm:$0xff] }
 0x149   : > { %vm1084_vm3 = vcmp.ge.f32.partialorder %v6111_v11, 0.0  ;;  %v12276_v40 = vld [vmem:[#allocation223_spill] sm:$0xff]  ;;  %3571 = vrcp.f32 %v12279_v34  ;;  %vm1085_vm4 = vcmp.ge.f32.partialorder %v6125_v61, 0.0  ;;  %v6136_v31 = vmul.f32 %v5959_v37, %v367_v55  ;;  %v368_v34 = vld [vmem:[%s4234_s29 + $0x150] sm:$0xff]  ;;  %v369_v58 = vld [vmem:[%s4234_s29 + $0x158] sm:$0xff] }
 0x14a   : > { %v1139_v20 = vmul.f32 %v5991_v44, %v12276_v40  ;;  %v12277_v49 = vld [vmem:[#allocation227_spill] sm:$0xff]  ;;  %v6138_v40 = vpop.eup %3547  ;;  %v6154_v55 = vsel %vm1073_vm8, %v5954_v48, %v1137_v41  ;;  %v6171_v41 = vmul.f32 %v5974_v26, %v368_v34  ;;  %v6174_v8 = vmul.f32 %v5978_v32, %v369_v58  ;;  %v372_v3 = vld [vmem:[%s4234_s29 + $0x170] sm:$0xff]  ;;  %v6181_v27 = vld [vmem:[%s4227_s8 + $0x1b8] sm:$0xff] }
 0x14b   : > { %v1140_v30 = vmul.f32 %v6009_v24, %v12277_v49  ;;  %v6133_v49 = vsel %vm1072_vm7, %v5936_v51, %v1136_v29  ;;  %12282 = vst [vmem:[#allocation330_spill] sm:$0xff] %v6136_v31  ;;  %v12283_v35 = vld [vmem:[#allocation283_spill] sm:$0xff]  ;;  %12286 = vst [vmem:[#allocation331_spill] sm:$0xff] %v6154_v55  ;;  %v6160_v31 = vld [vmem:[%s4227_s8 + $0x1b0] sm:$0xff]  ;;  %vm1088_vm7 = vcmp.ge.f32.partialorder %v6181_v27, 0.0  ;;  %v6211_v32 = vsel %vm1077_vm12, %v6031_v13, %v1141_v42 }
 0x14c   : > { %12281 = vst [vmem:[#allocation329_spill] sm:$0xff] %v6133_v49  ;;  %3573 = vrcp.f32 %v12283_v35  ;;  %v6144_v28 = vld [vmem:[%s4227_s8 + $0x1a8] sm:$0xff]  ;;  %v6156_v49 = vpop.eup %3549  ;;  %v370_v35 = vld [vmem:[%s4234_s29 + $0x160] sm:$0xff]  ;;  %vm1087_vm6 = vcmp.ge.f32.partialorder %v6160_v31, 0.0  ;;  %12289 = vst [vmem:[#allocation333_spill] sm:$0xff] %v6174_v8  ;;  %v6189_v34 = vsel %vm1075_vm10, %v5991_v44, %v1139_v20 }
 0x14d   : > { %vm1086_vm5 = vcmp.ge.f32.partialorder %v6144_v28, 0.0  ;;  %v12284_v46 = vld [vmem:[#allocation235_spill] sm:$0xff]  ;;  %v6176_v48 = vpop.eup %3551  ;;  %12291 = vst [vmem:[#allocation334_spill] sm:$0xff] %v6189_v34  ;;  %v6203_v8 = vld [vmem:[%s4227_s8 + $0x1c0] sm:$0xff]  ;;  %12294 = vst [vmem:[#allocation336_spill] sm:$0xff] %v6211_v32 }
 0x14e   : > { %v1142_v0 = vmul.f32 %v6052_v45, %v12284_v46  ;;  %v12285_v51 = vld [vmem:[#allocation239_spill] sm:$0xff]  ;;  %v6199_v58 = vpop.eup %3553  ;;  %vm1089_vm8 = vcmp.ge.f32.partialorder %v6203_v8, 0.0  ;;  %v374_v20 = vld [vmem:[%s4234_s29 + $0x180] sm:$0xff]  ;;  %v12296_v34 = vld [vmem:[#allocation249_spill] sm:$0xff] }
 0x14f   : > { %v1143_v29 = vmul.f32 %v6070_v25, %v12285_v51  ;;  %v12287_v38 = vld [vmem:[#allocation243_spill] sm:$0xff]  ;;  %v6168_v51 = vsel %vm1074_vm9, %v5969_v60, %v1138_v19  ;;  %v6194_v60 = vsel %vm1076_vm11, %v6009_v24, %v1140_v30  ;;  %v6197_v19 = vmul.f32 %v5996_v57, %v370_v35  ;;  %v6219_v35 = vpop.eup %3555  ;;  %v376_v32 = vld [vmem:[%s4234_s29 + $0x190] sm:$0xff] }
 0x150   : > { %v1144_v46 = vmul.f32 %v6088_v4, %v12287_v38  ;;  %12288 = vst [vmem:[#allocation332_spill] sm:$0xff] %v6168_v51  ;;  %v371_v55 = vld [vmem:[%s4234_s29 + $0x168] sm:$0xff]  ;;  %v12290_v38 = vld [vmem:[#allocation245_spill] sm:$0xff]  ;;  %12292 = vst [vmem:[#allocation335_spill] sm:$0xff] %v6194_v60  ;;  %v6217_v24 = vmul.f32 %v6018_v59, %v372_v3  ;;  %v1147_v42 = vmul.f32 %v6138_v40, %v12296_v34 }
 0x151   : > { %v1145_v37 = vmul.f32 %v6106_v21, %v12290_v38  ;;  %v373_v51 = vld [vmem:[%s4234_s29 + $0x178] sm:$0xff]  ;;  %v12293_v38 = vld [vmem:[#allocation247_spill] sm:$0xff]  ;;  %v6214_v44 = vmul.f32 %v6014_v54, %v371_v55  ;;  %v6232_v57 = vsel %vm1078_vm13, %v6052_v45, %v1142_v0  ;;  %v6237_v13 = vsel %vm1079_vm14, %v6070_v25, %v1143_v29  ;;  %v6242_v55 = vpop.eup %3557  ;;  %v378_v29 = vld [vmem:[%s4234_s29 + $0x1a0] sm:$0xff] }
 0x152   : > { %v1146_v26 = vmul.f32 %v6121_v10, %v12293_v38  ;;  %12295 = vst [vmem:[#allocation337_spill] sm:$0xff] %v6217_v24  ;;  %v375_v30 = vld [vmem:[%s4234_s29 + $0x188] sm:$0xff]  ;;  %12297 = vst [vmem:[#allocation338_spill] sm:$0xff] %v6232_v57  ;;  %v6240_v3 = vmul.f32 %v6036_v1, %v373_v51  ;;  %v377_v38 = vld [vmem:[%s4234_s29 + $0x198] sm:$0xff]  ;;  %v6255_v59 = vsel %vm1080_vm15, %v6088_v4, %v1144_v46  ;;  %v6263_v51 = vpop.eup %3559 }
 0x153   : > { %v6224_v60 = vld [vmem:[%s4227_s8 + $0x1c8] sm:$0xff]  ;;  %12298 = vst [vmem:[#allocation339_spill] sm:$0xff] %v6237_v13  ;;  %v6247_v24 = vld [vmem:[%s4227_s8 + $0x1d0] sm:$0xff]  ;;  %12301 = vst [vmem:[#allocation341_spill] sm:$0xff] %v6255_v59  ;;  %v6258_v25 = vmul.f32 %v6057_v47, %v374_v20  ;;  %v6261_v0 = vmul.f32 %v6075_v63, %v375_v30  ;;  %v6276_v46 = vsel %vm1081_vm0, %v6106_v21, %v1145_v37  ;;  %v3562_v30 = vpop.eup %3561 }
 0x154   : > { %vm1090_vm9 = vcmp.ge.f32.partialorder %v6224_v60, 0.0  ;;  %12299 = vst [vmem:[#allocation340_spill] sm:$0xff] %v6240_v3  ;;  %vm1091_vm10 = vcmp.ge.f32.partialorder %v6247_v24, 0.0  ;;  %v12300_v54 = vld [vmem:[#allocation251_spill] sm:$0xff]  ;;  %v6268_v57 = vld [vmem:[%s4227_s8 + $0x1d8] sm:$0xff]  ;;  %12305 = vst [vmem:[#allocation344_spill] sm:$0xff] %v6276_v46  ;;  %v6279_v4 = vmul.f32 %v6093_v39, %v376_v32  ;;  %v6282_v20 = vmul.f32 %v6111_v11, %v377_v38  ;;  %v3564_v46 = vpop.eup %3563 }
 0x155   : > { %v1148_v45 = vmul.f32 %v6156_v49, %v12300_v54  ;;  %12302 = vst [vmem:[#allocation342_spill] sm:$0xff] %v6258_v25  ;;  %12303 = vst [vmem:[#allocation343_spill] sm:$0xff] %v6261_v0  ;;  %v379_v13 = vld [vmem:[%s4234_s29 + $0x1a8] sm:$0xff]  ;;  %vm1092_vm11 = vcmp.ge.f32.partialorder %v6268_v57, 0.0  ;;  %v12304_v54 = vld [vmem:[#allocation253_spill] sm:$0xff]  ;;  %v6299_v38 = vsel %vm1082_vm1, %v6121_v10, %v1146_v26  ;;  %v6302_v37 = vmul.f32 %v6125_v61, %v378_v29 }
 0x156   : > { %v1149_v1 = vmul.f32 %v6176_v48, %v12304_v54  ;;  %12306 = vst [vmem:[#allocation345_spill] sm:$0xff] %v6279_v4  ;;  %12307 = vst [vmem:[#allocation346_spill] sm:$0xff] %v6282_v20  ;;  %v380_v59 = vld [vmem:[%s4234_s29 + $0x1b0] sm:$0xff]  ;;  %v381_v34 = vld [vmem:[%s4234_s29 + $0x1b8] sm:$0xff]  ;;  %v6305_v32 = vmul.f32 %v6144_v28, %v379_v13  ;;  %v6315_v63 = vsel %vm1083_vm2, %v6138_v40, %v1147_v42  ;;  %v3566_v13 = vpop.eup %3565 }
 0x157   : > { %v6287_v0 = vld [vmem:[%s4227_s8 + $0x1e0] sm:$0xff]  ;;  %v6291_v54 = vld [vmem:[%s4227_s8 + $0x1e8] sm:$0xff]  ;;  %12309 = vst [vmem:[#allocation347_spill] sm:$0xff] %v6299_v38  ;;  %12310 = vst [vmem:[#allocation348_spill] sm:$0xff] %v6302_v37  ;;  %v6318_v10 = vmul.f32 %v6160_v31, %v380_v59  ;;  %v6321_v26 = vmul.f32 %v6181_v27, %v381_v34  ;;  %v6331_v40 = vsel %vm1084_vm3, %v6156_v49, %v1148_v45  ;;  %v3568_v42 = vpop.eup %3567 }
 0x158   : > { %vm1093_vm12 = vcmp.ge.f32.partialorder %v6287_v0, 0.0  ;;  %vm1094_vm13 = vcmp.ge.f32.partialorder %v6291_v54, 0.0  ;;  %v12308_v47 = vld [vmem:[#allocation255_spill] sm:$0xff]  ;;  %12311 = vst [vmem:[#allocation349_spill] sm:$0xff] %v6305_v32  ;;  %v382_v20 = vld [vmem:[%s4234_s29 + $0x1c0] sm:$0xff]  ;;  %v3765_v25 = vld [vmem:[%s4227_s8 + $0x1f0] sm:$0xff]  ;;  %v3570_v45 = vpop.eup %3569 }
 0x159   : > { %v1150_v21 = vmul.f32 %v6199_v58, %v12308_v47  ;;  %v383_v4 = vld [vmem:[%s4234_s29 + $0x1c8] sm:$0xff]  ;;  %vm1095_vm14 = vcmp.ge.f32.partialorder %v3765_v25, 0.0  ;;  %v12312_v3 = vld [vmem:[#allocation257_spill] sm:$0xff]  ;;  %12313 = vst [vmem:[#allocation350_spill] sm:$0xff] %v6315_v63  ;;  %12314 = vst [vmem:[#allocation351_spill] sm:$0xff] %v6318_v10  ;;  %v6334_v39 = vmul.f32 %v6203_v8, %v382_v20 }
 0x15a   : > { %v1151_v47 = vmul.f32 %v6219_v35, %v12312_v3  ;;  %12315 = vst [vmem:[#allocation352_spill] sm:$0xff] %v6321_v26  ;;  %v384_v29 = vld [vmem:[%s4234_s29 + $0x1d0] sm:$0xff]  ;;  %v385_v38 = vld [vmem:[%s4234_s29 + $0x1d8] sm:$0xff]  ;;  %v12316_v37 = vld [vmem:[#allocation259_spill] sm:$0xff]  ;;  %v6337_v34 = vmul.f32 %v6224_v60, %v383_v4 }
 0x15b   : > { %v3766_v32 = vld [vmem:[%s4227_s8 + $0x1f8] sm:$0xff]  ;;  %v1152_v3 = vmul.f32 %v6242_v55, %v12316_v37  ;;  %12317 = vst [vmem:[#allocation353_spill] sm:$0xff] %v6331_v40  ;;  %v386_v59 = vld [vmem:[%s4234_s29 + $0x1e0] sm:$0xff]  ;;  %v387_v63 = vld [vmem:[%s4234_s29 + $0x1e8] sm:$0xff]  ;;  %v6346_v37 = vsel %vm1085_vm4, %v6176_v48, %v1149_v1  ;;  %v6349_v11 = vmul.f32 %v6247_v24, %v384_v29  ;;  %v6352_v49 = vmul.f32 %v6268_v57, %v385_v38  ;;  %v3572_v1 = vpop.eup %3571  ;;  %s4053_s8 = smov [#allocation7]  }
 0x15c   : > { %vm1096_vm15 = vcmp.ge.f32.partialorder %v3766_v32, 0.0  ;;  %12318 = vst [vmem:[#allocation354_spill] sm:$0xff] %v6337_v34  ;;  %v12319_v26 = vld [vmem:[#allocation261_spill] sm:$0xff]  ;;  %12320 = vst [vmem:[#allocation355_spill] sm:$0xff] %v6346_v37  ;;  %v388_v4 = vld [vmem:[%s4234_s29 + $0x1f0] sm:$0xff]  ;;  %v6363_v61 = vmul.f32 %v6287_v0, %v386_v59  ;;  %v6366_v48 = vmul.f32 %v6291_v54, %v387_v63  ;;  %v6372_v37 = vsel %vm1087_vm6, %v6219_v35, %v1151_v47  ;;  %v3574_v28 = vpop.eup %3573  ;;  %s3951_s27 = sshll.u32 %s4053_s8, 4  ;;  %s3952_s27 = int_to_ptr.vmem [resolvable:$false] %s3951_s27 }
 0x15d   : > { %v1153_v10 = vmul.f32 %v6263_v51, %v12319_v26  ;;  %12321 = vst [vmem:[#allocation356_spill] sm:$0xff] %v6352_v49  ;;  %v389_v20 = vld [vmem:[%s4234_s29 + $0x1f8] sm:$0xff]  ;;  %v12322_v40 = vld [vmem:[#allocation263_spill] sm:$0xff]  ;;  %v6360_v26 = vsel %vm1086_vm5, %v6199_v58, %v1150_v21  ;;  %12326 = vst [vmem:[#allocation359_spill] sm:$0xff] %v6372_v37  ;;  %v6382_v63 = vsel %vm1088_vm7, %v6242_v55, %v1152_v3  ;;  %p3954_p12 = scmp.lt.s32.totalorder %s10871_s17, %s3952_s27 }
 0x15e   : > { %v1154_v34 = vmul.f32 %v3562_v30, %v12322_v40  ;;  %12323 = vst [vmem:[#allocation357_spill] sm:$0xff] %v6360_v26  ;;  %12324 = vst [vmem:[#allocation358_spill] sm:$0xff] %v6366_v48  ;;  %v12325_v29 = vld [vmem:[#allocation265_spill] sm:$0xff]  ;;  %v6374_v40 = vmul.f32 %v3765_v25, %v388_v4  ;;  %v6376_v49 = vmul.f32 %v3766_v32, %v389_v20  ;;  %v12329_v58 = vld [vmem:[#allocation267_spill] sm:$0xff] }
 0x15f   : > { %v1155_v38 = vmul.f32 %v3564_v46, %v12325_v29  ;;  %v1156_v21 = vmul.f32 %v3566_v13, %v12329_v58  ;;  %12330 = vst [vmem:[#allocation267_spill] sm:$0xff] %v6382_v63  ;;  %v12331_v59 = vld [vmem:[#allocation118_spill] sm:$0xff]  ;;  %v12335_v31 = vld [vmem:[#allocation120_spill] sm:$0xff]  ;;  %v12336_v35 = vld [vmem:[#allocation51_spill] sm:$0xff]  ;;  %v6399_v27 = vsel %vm1089_vm8, %v6263_v51, %v1153_v10 }
 0x160   : > { %12327 = vst [vmem:[#allocation360_spill] sm:$0xff] %v6374_v40  ;;  %12328 = vst [vmem:[#allocation361_spill] sm:$0xff] %v6376_v49  ;;  %v12332_v26 = vld [vmem:[#allocation50_spill] sm:$0xff]  ;;  %v12337_v47 = vmax.f32 %v12336_v35, 0.0  ;;  %v12339_v20 = vld [vmem:[#allocation269_spill] sm:$0xff] }
 0x161   : > { %v12333_v29 = vmax.f32 %v12332_v26, 0.0  ;;  %v1157_v37 = vmul.f32 %v3568_v42, %v12339_v20  ;;  %v12340_v49 = vld [vmem:[#allocation271_spill] sm:$0xff]  ;;  %12341 = vst [vmem:[#allocation120_spill] sm:$0xff] %v6399_v27  ;;  %v12342_v3 = vld [vmem:[#allocation122_spill] sm:$0xff]  ;;  %v12347_v35 = vld [vmem:[#allocation124_spill] sm:$0xff] }
 0x162   : > { %v6392_v4 = vsub.f32 %v12337_v47, %v12335_v31  ;;  %v1158_v40 = vmul.f32 %v3570_v45, %v12340_v49  ;;  %v12343_v55 = vld [vmem:[#allocation54_spill] sm:$0xff]  ;;  %v6409_v31 = vsel %vm1090_vm9, %v3562_v30, %v1154_v34  ;;  %v12348_v47 = vld [vmem:[#allocation55_spill] sm:$0xff]  ;;  %v12351_v8 = vld [vmem:[#allocation56_spill] sm:$0xff] }
 0x163   : > { %v6387_v48 = vsub.f32 %v12333_v29, %v12331_v59  ;;  %v12344_v63 = vmax.f32 %v12343_v55, 0.0  ;;  %v12345_v29 = vld [vmem:[#allocation273_spill] sm:$0xff]  ;;  %12346 = vst [vmem:[#allocation51_spill] sm:$0xff] %v6409_v31  ;;  %v12350_v49 = vld [vmem:[#allocation126_spill] sm:$0xff]  ;;  %v12352_v51 = vmax.f32 %v12351_v8, 0.0  ;;  %v12354_v27 = vld [vmem:[#allocation275_spill] sm:$0xff]  ;;  %v6457_v57 = vsel %vm1093_vm12, %v3568_v42, %v1157_v37 }
 0x164   : > { %12338 = vst [vmem:[#allocation50_spill] sm:$0xff] %v6392_v4  ;;  %v1159_v59 = vmul.f32 %v3572_v1, %v12345_v29  ;;  %v12349_v4 = vmax.f32 %v12348_v47, 0.0  ;;  %v1160_v55 = vmul.f32 %v3574_v28, %v12354_v27  ;;  %v12357_v60 = vld [vmem:[#allocation61_spill] sm:$0xff]  ;;  %v12360_v31 = vld [vmem:[#allocation130_spill] sm:$0xff]  ;;  %v12365_v8 = vld [vmem:[#allocation131_spill] sm:$0xff] }
 0x165   : > { %12334 = vst [vmem:[#allocation118_spill] sm:$0xff] %v6387_v48  ;;  %v6404_v26 = vsub.f32 %v12344_v63, %v12342_v3  ;;  %v6419_v10 = vsub.f32 %v12352_v51, %v12350_v49  ;;  %v6424_v63 = vsel %vm1091_vm10, %v3564_v46, %v1155_v38  ;;  %v12356_v3 = vld [vmem:[#allocation128_spill] sm:$0xff]  ;;  %v12358_v30 = vmax.f32 %v12357_v60, 0.0  ;;  %v12361_v47 = vld [vmem:[#allocation62_spill] sm:$0xff]  ;;  %v12366_v51 = vld [vmem:[#allocation63_spill] sm:$0xff] }
 0x166   : > { %v6414_v48 = vsub.f32 %v12349_v4, %v12347_v35  ;;  %12355 = vst [vmem:[#allocation122_spill] sm:$0xff] %v6424_v63  ;;  %v12362_v4 = vmax.f32 %v12361_v47, 0.0  ;;  %v6438_v49 = vsel %vm1092_vm11, %v3566_v13, %v1156_v21  ;;  %v12369_v46 = vld [vmem:[#allocation132_spill] sm:$0xff]  ;;  %12377 = vst [vmem:[#allocation275_spill] sm:$0xff] %v6457_v57  ;;  %v6461_v13 = vsel %vm1094_vm13, %v3570_v45, %v1158_v40  ;;  %v12379_v21 = vld [vmem:[#allocation139_spill] sm:$0xff] }
 0x167   : > { %12353 = vst [vmem:[#allocation269_spill] sm:$0xff] %v6419_v10  ;;  %v6429_v34 = vsub.f32 %v12358_v30, %v12356_v3  ;;  %12364 = vst [vmem:[#allocation124_spill] sm:$0xff] %v6438_v49  ;;  %v12367_v10 = vmax.f32 %v12366_v51, 0.0  ;;  %v12370_v38 = vld [vmem:[#allocation68_spill] sm:$0xff]  ;;  %v12373_v3 = vld [vmem:[#allocation134_spill] sm:$0xff] }
 0x168   : > { %v6434_v35 = vsub.f32 %v12362_v4, %v12360_v31  ;;  %v12371_v63 = vmax.f32 %v12370_v38, 0.0  ;;  %v12374_v30 = vld [vmem:[#allocation69_spill] sm:$0xff]  ;;  %12378 = vst [vmem:[#allocation128_spill] sm:$0xff] %v6461_v13  ;;  %v12380_v31 = vld [vmem:[#allocation70_spill] sm:$0xff]  ;;  %v12388_v0 = vld [vmem:[#allocation159_spill] sm:$0xff] }
 0x169   : > { %12359 = vst [vmem:[#allocation54_spill] sm:$0xff] %v6429_v34  ;;  %v6443_v24 = vsub.f32 %v12367_v10, %v12365_v8  ;;  %v12375_v34 = vmax.f32 %v12374_v30, 0.0  ;;  %v12381_v10 = vmax.f32 %v12380_v31, 0.0  ;;  %v12384_v8 = vld [vmem:[#allocation75_spill] sm:$0xff]  ;;  %v12389_v37 = vld [vmem:[#allocation76_spill] sm:$0xff]  ;;  %v12392_v54 = vld [vmem:[#allocation182_spill] sm:$0xff] }
 0x16a   : > { %12363 = vst [vmem:[#allocation273_spill] sm:$0xff] %v6434_v35  ;;  %v6448_v60 = vsub.f32 %v12371_v63, %v12369_v46  ;;  %v12383_v63 = vld [vmem:[#allocation146_spill] sm:$0xff]  ;;  %v12385_v51 = vmax.f32 %v12384_v8, 0.0  ;;  %v12390_v42 = vmax.f32 %v12389_v37, 0.0  ;;  %v12393_v40 = vld [vmem:[#allocation77_spill] sm:$0xff]  ;;  %v12400_v25 = vld [vmem:[#allocation83_spill] sm:$0xff] }
 0x16b   : > { %12368 = vst [vmem:[#allocation55_spill] sm:$0xff] %v6443_v24  ;;  %v6453_v47 = vsub.f32 %v12375_v34, %v12373_v3  ;;  %v6466_v4 = vsub.f32 %v12381_v10, %v12379_v21  ;;  %v6474_v34 = vsel %vm1095_vm14, %v3572_v1, %v1159_v59  ;;  %v12394_v45 = vmax.f32 %v12393_v40, 0.0  ;;  %v12396_v30 = vld [vmem:[#allocation82_spill] sm:$0xff]  ;;  %v12415_v40 = vld [vmem:[#allocation91_spill] sm:$0xff]  ;;  %v12492_v13 = vld [vmem:[#allocation125_spill] sm:$0xff] }
 0x16c   : > { %12372 = vst [vmem:[#allocation126_spill] sm:$0xff] %v6448_v60  ;;  %v6471_v46 = vsub.f32 %v12385_v51, %v12383_v63  ;;  %12387 = vst [vmem:[#allocation62_spill] sm:$0xff] %v6474_v34  ;;  %v6479_v38 = vsub.f32 %v12390_v42, %v12388_v0  ;;  %v12397_v21 = vmax.f32 %v12396_v30, 0.0  ;;  %v6492_v10 = vsel %vm1096_vm15, %v3574_v28, %v1160_v55  ;;  %v12403_v63 = vld [vmem:[#allocation84_spill] sm:$0xff]  ;;  %v12406_v0 = vld [vmem:[#allocation87_spill] sm:$0xff] }
 0x16d   : > { %12376 = vst [vmem:[#allocation56_spill] sm:$0xff] %v6453_v47  ;;  %12382 = vst [vmem:[#allocation61_spill] sm:$0xff] %v6466_v4  ;;  %v6484_v3 = vsub.f32 %v12394_v45, %v12392_v54  ;;  %v12401_v1 = vmax.f32 %v12400_v25, 0.0  ;;  %v12404_v8 = vmax.f32 %v12403_v63, 0.0  ;;  %v12407_v37 = vmax.f32 %v12406_v0, 0.0  ;;  %v12412_v55 = vld [vmem:[#allocation89_spill] sm:$0xff] }
 0x16e   : > { %12386 = vst [vmem:[#allocation130_spill] sm:$0xff] %v6471_v46  ;;  %12391 = vst [vmem:[#allocation131_spill] sm:$0xff] %v6479_v38  ;;  %v6489_v31 = vsub.f32 %v12397_v21, %v5646_v43  ;;  %v12409_v43 = vld [vmem:[#allocation88_spill] sm:$0xff]  ;;  %v12413_v54 = vmax.f32 %v12412_v55, 0.0  ;;  %v12416_v45 = vmax.f32 %v12415_v40, 0.0  ;;  %v12421_v25 = vld [vmem:[#allocation93_spill] sm:$0xff] }
 0x16f   : > { %12395 = vst [vmem:[#allocation63_spill] sm:$0xff] %v6484_v3  ;;  %12399 = vst [vmem:[#allocation68_spill] sm:$0xff] %v6492_v10  ;;  %v6497_v59 = vsub.f32 %v12401_v1, %v5664_v2  ;;  %v6502_v51 = vsub.f32 %v12404_v8, %v5679_v14  ;;  %v6507_v42 = vsub.f32 %v12407_v37, %v5701_v52  ;;  %v12410_v32 = vmax.f32 %v12409_v43, 0.0  ;;  %v12418_v30 = vld [vmem:[#allocation92_spill] sm:$0xff]  ;;  %v12424_v63 = vld [vmem:[#allocation95_spill] sm:$0xff] }
 0x170   : > { %12398 = vst [vmem:[#allocation132_spill] sm:$0xff] %v6489_v31  ;;  %v6517_v2 = vsub.f32 %v12413_v54, %v5737_v15  ;;  %v6522_v14 = vsub.f32 %v12416_v45, %v5758_v33  ;;  %v12419_v21 = vmax.f32 %v12418_v30, 0.0  ;;  %v12422_v1 = vmax.f32 %v12421_v25, 0.0  ;;  %v12427_v0 = vld [vmem:[#allocation96_spill] sm:$0xff]  ;;  %v12430_v43 = vld [vmem:[#allocation97_spill] sm:$0xff]  ;;  %v12433_v55 = vld [vmem:[#allocation99_spill] sm:$0xff] }
 0x171   : > { %12402 = vst [vmem:[#allocation134_spill] sm:$0xff] %v6497_v59  ;;  %12405 = vst [vmem:[#allocation69_spill] sm:$0xff] %v6502_v51  ;;  %v6512_v28 = vsub.f32 %v12410_v32, %v5719_v53  ;;  %v12425_v8 = vmax.f32 %v12424_v63, 0.0  ;;  %v12428_v37 = vmax.f32 %v12427_v0, 0.0  ;;  %v12431_v32 = vmax.f32 %v12430_v43, 0.0  ;;  %v12436_v40 = vld [vmem:[#allocation100_spill] sm:$0xff] }
 0x172   : > { %12408 = vst [vmem:[#allocation139_spill] sm:$0xff] %v6507_v42  ;;  %12414 = vst [vmem:[#allocation146_spill] sm:$0xff] %v6517_v2  ;;  %v6527_v52 = vsub.f32 %v12419_v21, %v5772_v17  ;;  %v6532_v53 = vsub.f32 %v12422_v1, %v5790_v5  ;;  %v12434_v54 = vmax.f32 %v12433_v55, 0.0  ;;  %v12437_v45 = vmax.f32 %v12436_v40, 0.0  ;;  %v12439_v30 = vld [vmem:[#allocation101_spill] sm:$0xff]  ;;  %v12442_v25 = vld [vmem:[#allocation103_spill] sm:$0xff] }
 0x173   : > { %12411 = vst [vmem:[#allocation70_spill] sm:$0xff] %v6512_v28  ;;  %12417 = vst [vmem:[#allocation75_spill] sm:$0xff] %v6522_v14  ;;  %v6537_v15 = vsub.f32 %v12425_v8, %v5808_v16  ;;  %v6542_v33 = vsub.f32 %v12428_v37, %v5823_v7  ;;  %v6547_v17 = vsub.f32 %v12431_v32, %v5845_v50  ;;  %v12440_v21 = vmax.f32 %v12439_v30, 0.0  ;;  %v12445_v63 = vld [vmem:[#allocation104_spill] sm:$0xff]  ;;  %v12448_v0 = vld [vmem:[#allocation105_spill] sm:$0xff] }
 0x174   : > { %12420 = vst [vmem:[#allocation159_spill] sm:$0xff] %v6527_v52  ;;  %12423 = vst [vmem:[#allocation76_spill] sm:$0xff] %v6532_v53  ;;  %v6552_v5 = vsub.f32 %v12434_v54, %v5863_v12  ;;  %v6557_v16 = vsub.f32 %v12437_v45, %v5881_v62  ;;  %v12443_v1 = vmax.f32 %v12442_v25, 0.0  ;;  %v12446_v8 = vmax.f32 %v12445_v63, 0.0  ;;  %v12451_v43 = vld [vmem:[#allocation107_spill] sm:$0xff]  ;;  %v12454_v55 = vld [vmem:[#allocation108_spill] sm:$0xff] }
 0x175   : > { %12426 = vst [vmem:[#allocation182_spill] sm:$0xff] %v6537_v15  ;;  %12429 = vst [vmem:[#allocation77_spill] sm:$0xff] %v6542_v33  ;;  %v6562_v7 = vsub.f32 %v12440_v21, %v5902_v22  ;;  %v12449_v37 = vmax.f32 %v12448_v0, 0.0  ;;  %v12452_v32 = vmax.f32 %v12451_v43, 0.0  ;;  %v12455_v54 = vmax.f32 %v12454_v55, 0.0  ;;  %v12457_v40 = vld [vmem:[#allocation110_spill] sm:$0xff] }
 0x176   : > { %12432 = vst [vmem:[#allocation82_spill] sm:$0xff] %v6547_v17  ;;  %12435 = vst [vmem:[#allocation83_spill] sm:$0xff] %v6552_v5  ;;  %v6567_v50 = vsub.f32 %v12443_v1, %v5916_v18  ;;  %v6572_v12 = vsub.f32 %v12446_v8, %v5934_v23  ;;  %v12458_v45 = vmax.f32 %v12457_v40, 0.0  ;;  %v12460_v30 = vld [vmem:[#allocation318_spill] sm:$0xff]  ;;  %v12461_v21 = vld [vmem:[#allocation111_spill] sm:$0xff]  ;;  %v12609_v5 = vmov 0 }
 0x177   : > { %12438 = vst [vmem:[#allocation84_spill] sm:$0xff] %v6557_v16  ;;  %12441 = vst [vmem:[#allocation87_spill] sm:$0xff] %v6562_v7  ;;  %v6577_v62 = vsub.f32 %v12449_v37, %v5952_v36  ;;  %v6582_v22 = vsub.f32 %v12452_v32, %v5967_v9  ;;  %v6587_v18 = vsub.f32 %v12455_v54, %v5989_v56  ;;  %v12462_v25 = vmax.f32 %v12461_v21, 0.0  ;;  %v12464_v1 = vld [vmem:[#allocation321_spill] sm:$0xff]  ;;  %v12468_v0 = vld [vmem:[#allocation323_spill] sm:$0xff] }
 0x178   : > { %12444 = vst [vmem:[#allocation88_spill] sm:$0xff] %v6567_v50  ;;  %12447 = vst [vmem:[#allocation89_spill] sm:$0xff] %v6572_v12  ;;  %v6592_v23 = vsub.f32 %v12458_v45, %v6007_v6  ;;  %v12465_v63 = vld [vmem:[#allocation113_spill] sm:$0xff]  ;;  %v12469_v37 = vld [vmem:[#allocation114_spill] sm:$0xff]  ;;  %v12632_v59 = vmov 0 }
 0x179   : > { %12450 = vst [vmem:[#allocation91_spill] sm:$0xff] %v6577_v62  ;;  %12453 = vst [vmem:[#allocation92_spill] sm:$0xff] %v6582_v22  ;;  %v6597_v36 = vsub.f32 %v12462_v25, %v12460_v30  ;;  %v12466_v8 = vmax.f32 %v12465_v63, 0.0  ;;  %v12470_v43 = vmax.f32 %v12469_v37, 0.0  ;;  %v12472_v32 = vld [vmem:[#allocation325_spill] sm:$0xff]  ;;  %v12473_v55 = vld [vmem:[#allocation116_spill] sm:$0xff] }
 0x17a   : > { %12456 = vst [vmem:[#allocation93_spill] sm:$0xff] %v6587_v18  ;;  %12459 = vst [vmem:[#allocation95_spill] sm:$0xff] %v6592_v23  ;;  %v12474_v54 = vmax.f32 %v12473_v55, 0.0  ;;  %v12476_v40 = vld [vmem:[#allocation327_spill] sm:$0xff]  ;;  %v12477_v45 = vld [vmem:[#allocation117_spill] sm:$0xff] }
 0x17b   : > { %12463 = vst [vmem:[#allocation96_spill] sm:$0xff] %v6597_v36  ;;  %v6602_v9 = vsub.f32 %v12466_v8, %v12464_v1  ;;  %v6607_v56 = vsub.f32 %v12470_v43, %v12468_v0  ;;  %v12478_v21 = vmax.f32 %v12477_v45, 0.0  ;;  %v12480_v25 = vld [vmem:[#allocation328_spill] sm:$0xff]  ;;  %v12481_v10 = vld [vmem:[#allocation119_spill] sm:$0xff]  ;;  %v12484_v8 = vld [vmem:[#allocation330_spill] sm:$0xff]  ;;  %v12493_v45 = vmax.f32 %v12492_v13, 0.0 }
 0x17c   : > { %v6612_v6 = vsub.f32 %v12474_v54, %v12472_v32  ;;  %v12482_v63 = vmax.f32 %v12481_v10, 0.0  ;;  %v12485_v34 = vld [vmem:[#allocation121_spill] sm:$0xff]  ;;  %v12488_v43 = vld [vmem:[#allocation123_spill] sm:$0xff]  ;;  %v12586_v23 = vld [vmem:[#allocation202_spill] sm:$0xff] }
 0x17d   : > { %12467 = vst [vmem:[#allocation97_spill] sm:$0xff] %v6602_v9  ;;  %12471 = vst [vmem:[#allocation99_spill] sm:$0xff] %v6607_v56  ;;  %v6617_v30 = vsub.f32 %v12478_v21, %v12476_v40  ;;  %v12486_v37 = vmax.f32 %v12485_v34, 0.0  ;;  %v12489_v55 = vmax.f32 %v12488_v43, 0.0  ;;  %v12491_v54 = vld [vmem:[#allocation333_spill] sm:$0xff]  ;;  %v12495_v21 = vld [vmem:[#allocation127_spill] sm:$0xff] }
 0x17e   : > { %12475 = vst [vmem:[#allocation100_spill] sm:$0xff] %v6612_v6  ;;  %v6622_v1 = vsub.f32 %v12482_v63, %v12480_v25  ;;  %v6637_v40 = vsub.f32 %v12493_v45, %v12491_v54  ;;  %v12496_v10 = vmax.f32 %v12495_v21, 0.0  ;;  %v12498_v63 = vld [vmem:[#allocation129_spill] sm:$0xff]  ;;  %v12506_v49 = vld [vmem:[#allocation135_spill] sm:$0xff]  ;;  %v12509_v45 = vld [vmem:[#allocation342_spill] sm:$0xff] }
 0x17f   : > { %12479 = vst [vmem:[#allocation101_spill] sm:$0xff] %v6617_v30  ;;  %v6627_v0 = vsub.f32 %v12486_v37, %v12484_v8  ;;  %v6632_v32 = vsub.f32 %v12489_v55, %v6171_v41  ;;  %v12499_v34 = vmax.f32 %v12498_v63, 0.0  ;;  %v12501_v37 = vld [vmem:[#allocation337_spill] sm:$0xff]  ;;  %v12505_v55 = vld [vmem:[#allocation340_spill] sm:$0xff]  ;;  %v12507_v13 = vmax.f32 %v12506_v49, 0.0  ;;  %v12514_v63 = vld [vmem:[#allocation343_spill] sm:$0xff] }
 0x180   : > { %12483 = vst [vmem:[#allocation103_spill] sm:$0xff] %v6622_v1  ;;  %12494 = vst [vmem:[#allocation107_spill] sm:$0xff] %v6637_v40  ;;  %v6642_v25 = vsub.f32 %v12496_v10, %v6197_v19  ;;  %v12502_v57 = vld [vmem:[#allocation133_spill] sm:$0xff]  ;;  %v12510_v40 = vld [vmem:[#allocation136_spill] sm:$0xff] }
 0x181   : > { %12487 = vst [vmem:[#allocation104_spill] sm:$0xff] %v6627_v0  ;;  %12490 = vst [vmem:[#allocation105_spill] sm:$0xff] %v6632_v32  ;;  %v6647_v8 = vsub.f32 %v12499_v34, %v6214_v44  ;;  %v12503_v43 = vmax.f32 %v12502_v57, 0.0  ;;  %v6657_v54 = vsub.f32 %v12507_v13, %v12505_v55  ;;  %v12511_v21 = vmax.f32 %v12510_v40, 0.0  ;;  %v12513_v10 = vld [vmem:[#allocation190_spill] sm:$0xff]  ;;  %v12515_v44 = vld [vmem:[#allocation137_spill] sm:$0xff] }
 0x182   : > { %12497 = vst [vmem:[#allocation108_spill] sm:$0xff] %v6642_v25  ;;  %3575 = vlog2.f32 %v12513_v10  ;;  %v12516_v34 = vmax.f32 %v12515_v44, 0.0  ;;  %v12518_v57 = vld [vmem:[#allocation345_spill] sm:$0xff]  ;;  %v12522_v49 = vld [vmem:[#allocation346_spill] sm:$0xff]  ;;  %v12523_v55 = vld [vmem:[#allocation140_spill] sm:$0xff] }
 0x183   : > { %12500 = vst [vmem:[#allocation110_spill] sm:$0xff] %v6647_v8  ;;  %v6652_v41 = vsub.f32 %v12503_v43, %v12501_v37  ;;  %12508 = vst [vmem:[#allocation111_spill] sm:$0xff] %v6657_v54  ;;  %v6662_v19 = vsub.f32 %v12511_v21, %v12509_v45  ;;  %v12519_v37 = vld [vmem:[#allocation138_spill] sm:$0xff]  ;;  %v12524_v13 = vmax.f32 %v12523_v55, 0.0  ;;  %v12526_v40 = vld [vmem:[#allocation192_spill] sm:$0xff] }
 0x184   : > { %v6668_v8 = vsub.f32 %v12516_v34, %v12514_v63  ;;  %v12520_v43 = vmax.f32 %v12519_v37, 0.0  ;;  %3577 = vlog2.f32 %v12526_v40  ;;  %v12527_v45 = vld [vmem:[#allocation348_spill] sm:$0xff]  ;;  %v12528_v21 = vld [vmem:[#allocation141_spill] sm:$0xff]  ;;  %v12532_v63 = vld [vmem:[#allocation142_spill] sm:$0xff] }
 0x185   : > { %12504 = vst [vmem:[#allocation318_spill] sm:$0xff] %v6652_v41  ;;  %12512 = vst [vmem:[#allocation321_spill] sm:$0xff] %v6662_v19  ;;  %v6678_v54 = vsub.f32 %v12524_v13, %v12522_v49  ;;  %v12529_v10 = vmax.f32 %v12528_v21, 0.0  ;;  %v12531_v44 = vld [vmem:[#allocation349_spill] sm:$0xff]  ;;  %v12533_v34 = vmax.f32 %v12532_v63, 0.0  ;;  %v12535_v37 = vld [vmem:[#allocation351_spill] sm:$0xff] }
 0x186   : > { %12517 = vst [vmem:[#allocation113_spill] sm:$0xff] %v6668_v8  ;;  %v6673_v41 = vsub.f32 %v12520_v43, %v12518_v57  ;;  %v12536_v57 = vld [vmem:[#allocation143_spill] sm:$0xff]  ;;  %v12539_v55 = vld [vmem:[#allocation352_spill] sm:$0xff]  ;;  %v12543_v40 = vld [vmem:[#allocation145_spill] sm:$0xff] }
 0x187   : > { %12525 = vst [vmem:[#allocation114_spill] sm:$0xff] %v6678_v54  ;;  %v6684_v19 = vsub.f32 %v12529_v10, %v12527_v45  ;;  %v6689_v8 = vsub.f32 %v12533_v34, %v12531_v44  ;;  %v12537_v43 = vmax.f32 %v12536_v57, 0.0  ;;  %v12540_v49 = vld [vmem:[#allocation144_spill] sm:$0xff]  ;;  %v12544_v21 = vmax.f32 %v12543_v40, 0.0  ;;  %v12546_v10 = vld [vmem:[#allocation354_spill] sm:$0xff]  ;;  %v12550_v34 = vld [vmem:[#allocation149_spill] sm:$0xff] }
 0x188   : > { %12521 = vst [vmem:[#allocation323_spill] sm:$0xff] %v6673_v41  ;;  %v12541_v13 = vmax.f32 %v12540_v49, 0.0  ;;  %v12551_v57 = vmax.f32 %v12550_v34, 0.0  ;;  %v12554_v49 = vld [vmem:[#allocation148_spill] sm:$0xff]  ;;  %v12578_v1 = vld [vmem:[#allocation198_spill] sm:$0xff]  ;;  %v12585_v9 = vld [vmem:[#allocation163_spill] sm:$0xff] }
 0x189   : > { %12530 = vst [vmem:[#allocation325_spill] sm:$0xff] %v6684_v19  ;;  %12534 = vst [vmem:[#allocation116_spill] sm:$0xff] %v6689_v8  ;;  %v6694_v41 = vsub.f32 %v12537_v43, %v12535_v37  ;;  %v6704_v45 = vsub.f32 %v12544_v21, %v6334_v39  ;;  %v12547_v19 = vld [vmem:[#allocation147_spill] sm:$0xff]  ;;  %v12553_v43 = vld [vmem:[#allocation193_spill] sm:$0xff]  ;;  %v1492_v36 = vmul.f32 -0.5, %v12585_v9 }
 0x18a   : > { %v6699_v54 = vsub.f32 %v12541_v13, %v12539_v55  ;;  %v12548_v63 = vmax.f32 %v12547_v19, 0.0  ;;  %v6714_v37 = vsub.f32 %v12551_v57, %v6349_v11  ;;  %3579 = vlog2.f32 %v12553_v43  ;;  %v12555_v13 = vld [vmem:[#allocation150_spill] sm:$0xff]  ;;  %v12558_v21 = vld [vmem:[#allocation356_spill] sm:$0xff]  ;;  %v12568_v8 = vld [vmem:[#allocation155_spill] sm:$0xff] }
 0x18b   : > { %12538 = vst [vmem:[#allocation327_spill] sm:$0xff] %v6694_v41  ;;  %12545 = vst [vmem:[#allocation328_spill] sm:$0xff] %v6704_v45  ;;  %v1420_v55 = vmul.f32 -0.5, %v12554_v49  ;;  %v12556_v41 = vld [vmem:[#allocation152_spill] sm:$0xff]  ;;  %v12557_v39 = vld [vmem:[#allocation194_spill] sm:$0xff]  ;;  %v12569_v25 = vmax.f32 %v12568_v8, 0.0 }
 0x18c   : > { %12542 = vst [vmem:[#allocation117_spill] sm:$0xff] %v6699_v54  ;;  %v6709_v44 = vsub.f32 %v12548_v63, %v12546_v10  ;;  %12552 = vst [vmem:[#allocation330_spill] sm:$0xff] %v6714_v37  ;;  %v1429_v54 = vmul.f32 -0.5, %v12555_v13  ;;  %v1438_v40 = vmul.f32 -0.5, %v12556_v41  ;;  %3581 = vlog2.f32 %v12557_v39  ;;  %v12559_v45 = vld [vmem:[#allocation151_spill] sm:$0xff]  ;;  %v12562_v63 = vld [vmem:[#allocation153_spill] sm:$0xff] }
 0x18d   : > { %v12560_v19 = vmax.f32 %v12559_v45, 0.0  ;;  %v12563_v34 = vmax.f32 %v12562_v63, 0.0  ;;  %v12565_v57 = vld [vmem:[#allocation154_spill] sm:$0xff]  ;;  %v12566_v37 = vld [vmem:[#allocation196_spill] sm:$0xff]  ;;  %v1423_v39 = vand.u32 2147483647, %v12554_v49 }
 0x18e   : > { %12549 = vst [vmem:[#allocation119_spill] sm:$0xff] %v6709_v44  ;;  %v1447_v43 = vmul.f32 -0.5, %v12565_v57  ;;  %3583 = vlog2.f32 %v12566_v37  ;;  %v12567_v44 = vld [vmem:[#allocation358_spill] sm:$0xff]  ;;  %v12571_v0 = vld [vmem:[#allocation156_spill] sm:$0xff]  ;;  %v1421_v8 = vadd.f32 1.0, %v1420_v55  ;;  %v12587_v18 = vld [vmem:[#allocation361_spill] sm:$0xff] }
 0x18f   : > { %v6724_v10 = vsub.f32 %v12560_v19, %v12558_v21  ;;  %v6729_v11 = vsub.f32 %v12563_v34, %v6363_v61  ;;  %v6736_v32 = vsub.f32 %v12569_v25, %v12567_v44  ;;  %v1456_v45 = vmul.f32 -0.5, %v12571_v0  ;;  %v12572_v21 = vld [vmem:[#allocation197_spill] sm:$0xff]  ;;  %v12573_v19 = vld [vmem:[#allocation360_spill] sm:$0xff]  ;;  %v12612_v17 = vld [vmem:[#allocation166_spill] sm:$0xff] }
 0x190   : > { %3585 = vlog2.f32 %v12572_v21  ;;  %v1432_v34 = vand.u32 2147483647, %v12555_v13  ;;  %v1430_v25 = vadd.f32 1.0, %v1429_v54  ;;  %v1439_v44 = vadd.f32 1.0, %v1438_v40  ;;  %v12579_v56 = vld [vmem:[#allocation200_spill] sm:$0xff]  ;;  %v12583_v54 = vld [vmem:[#allocation201_spill] sm:$0xff] }
 0x191   : > { %12561 = vst [vmem:[#allocation121_spill] sm:$0xff] %v6724_v10  ;;  %12564 = vst [vmem:[#allocation123_spill] sm:$0xff] %v6729_v11  ;;  %v12574_v10 = vld [vmem:[#allocation158_spill] sm:$0xff]  ;;  %v12577_v11 = vld [vmem:[#allocation157_spill] sm:$0xff]  ;;  %3587 = vlog2.f32 %v12578_v1  ;;  %v1448_v30 = vadd.f32 1.0, %v1447_v43  ;;  %v6778_v12 = vmul.f32 %v12554_v49, %v1421_v8 }
 0x192   : > { %12570 = vst [vmem:[#allocation333_spill] sm:$0xff] %v6736_v32  ;;  %v12575_v63 = vmax.f32 %v12574_v10, 0.0  ;;  %v1465_v37 = vmul.f32 -0.5, %v12577_v11  ;;  %v1441_v32 = vand.u32 2147483647, %v12556_v41  ;;  %3589 = vlog2.f32 %v12579_v56  ;;  %v12582_v1 = vld [vmem:[#allocation160_spill] sm:$0xff] }
 0x193   : > { %v1450_v6 = vand.u32 2147483647, %v12565_v57  ;;  %v1459_v21 = vand.u32 2147483647, %v12571_v0  ;;  %vm6753_vm0 = vcmp.lt.f32.partialorder %v1423_v39, 0.0004427343  ;;  %3591 = vlog2.f32 %v12583_v54  ;;  %v3576_v54 = vpop.eup %3575 }
 0x194   : > { %v6744_v61 = vsub.f32 %v12575_v63, %v12573_v19  ;;  %v1457_v19 = vadd.f32 1.0, %v1456_v45  ;;  %v1468_v63 = vand.u32 2147483647, %v12577_v11  ;;  %v1474_v55 = vmul.f32 -0.5, %v12582_v1  ;;  %v12588_v56 = vld [vmem:[#allocation161_spill] sm:$0xff]  ;;  %v12613_v33 = vld [vmem:[#allocation206_spill] sm:$0xff] }
 0x195   : > { %v1466_v40 = vadd.f32 1.0, %v1465_v37  ;;  %3593 = vlog2.f32 %v12586_v23  ;;  %v12589_v39 = vmax.f32 %v12588_v56, 0.0  ;;  %vm6768_vm1 = vcmp.lt.f32.partialorder %v1432_v34, 0.0004427343  ;;  %v12595_v34 = vld [vmem:[#allocation164_spill] sm:$0xff]  ;;  %v12623_v53 = vld [vmem:[#allocation167_spill] sm:$0xff] }
 0x196   : > { %12576 = vst [vmem:[#allocation125_spill] sm:$0xff] %v6744_v61  ;;  %v12584_v61 = vld [vmem:[#allocation162_spill] sm:$0xff]  ;;  %vm6772_vm2 = vcmp.lt.f32.partialorder %v1441_v32, 0.0004427343  ;;  %v1477_v37 = vand.u32 2147483647, %v12582_v1  ;;  %v6781_v23 = vmul.f32 %v12555_v13, %v1430_v25  ;;  %v6788_v32 = vmul.f32 %v12565_v57, %v1448_v30 }
 0x197   : > { %v1483_v43 = vmul.f32 -0.5, %v12584_v61  ;;  %v6766_v22 = vsub.f32 %v12589_v39, %v12587_v18  ;;  %v6784_v18 = vmul.f32 %v12556_v41, %v1439_v44  ;;  %v1501_v56 = vmul.f32 -0.5, %v12595_v34  ;;  %v3578_v39 = vpop.eup %3577  ;;  %v12625_v14 = vld [vmem:[#allocation168_spill] sm:$0xff]  ;;  %v12630_v51 = vld [vmem:[#allocation210_spill] sm:$0xff]  ;;  %v12643_v38 = vld [vmem:[#allocation213_spill] sm:$0xff] }
 0x198   : > { %vm6790_vm3 = vcmp.lt.f32.partialorder %v1450_v6, 0.0004427343  ;;  %v6795_v50 = vmul.f32 %v12571_v0, %v1457_v19  ;;  %v1475_v49 = vadd.f32 1.0, %v1474_v55  ;;  %v1486_v13 = vand.u32 2147483647, %v12584_v61  ;;  %v3580_v25 = vpop.eup %3579  ;;  %v12605_v19 = vld [vmem:[#allocation204_spill] sm:$0xff] }
 0x199   : > { %12590 = vst [vmem:[#allocation127_spill] sm:$0xff] %v6766_v22  ;;  %vm6798_vm4 = vcmp.lt.f32.partialorder %v1459_v21, 0.0004427343  ;;  %v6803_v41 = vmul.f32 %v12577_v11, %v1466_v40  ;;  %vm6805_vm5 = vcmp.lt.f32.partialorder %v1468_v63, 0.0004427343  ;;  %v1484_v6 = vadd.f32 1.0, %v1483_v43  ;;  %v3582_v40 = vpop.eup %3581 }
 0x19a   : > { %v1493_v57 = vadd.f32 1.0, %v1492_v36  ;;  %vm6809_vm6 = vcmp.lt.f32.partialorder %v1477_v37, 0.0004427343  ;;  %v12602_v0 = vmov 0  ;;  %v1495_v44 = vand.u32 2147483647, %v12585_v9 }
 0x19b   : > { %v12603_v0 = vsel %vm6809_vm6, 4294967295, %v12602_v0  ;;  %v1504_v21 = vand.u32 2147483647, %v12595_v34  ;;  %3595 = vlog2.f32 %v12605_v19  ;;  %v12606_v55 = vld [vmem:[#allocation165_spill] sm:$0xff]  ;;  %v6817_v63 = vmul.f32 0.6931472, %v3576_v54  ;;  %v3584_v37 = vpop.eup %3583 }
 0x19c   : > { %12604 = vst [vmem:[#allocation129_spill] sm:$0xff] %v12603_v0  ;;  %v1510_v11 = vmul.f32 -0.5, %v12606_v55  ;;  %v6819_v7 = vmul.f32 0.6931472, %v3578_v39  ;;  %v1502_v43 = vadd.f32 1.0, %v1501_v56  ;;  %v12607_v36 = vld [vmem:[#allocation205_spill] sm:$0xff]  ;;  %v6823_v16 = vmul.f32 %v12582_v1, %v1475_v49 }
 0x19d   : > { %3597 = vlog2.f32 %v12607_v36  ;;  %vm6825_vm7 = vcmp.lt.f32.partialorder %v1486_v13, 0.0004427343  ;;  %v1519_v19 = vmul.f32 -0.5, %v12612_v17  ;;  %v3586_v15 = vpop.eup %3585  ;;  %v6831_v54 = vmul.f32 0.6931472, %v3580_v25  ;;  %v12616_v36 = vld [vmem:[#allocation208_spill] sm:$0xff] }
 0x19e   : > { %12608 = vst [vmem:[#allocation337_spill] sm:$0xff] %v6823_v16  ;;  %v12610_v5 = vsel %vm6825_vm7, 4294967295, %v12609_v5  ;;  %3599 = vlog2.f32 %v12613_v33  ;;  %v6834_v39 = vmul.f32 %v12584_v61, %v1484_v6  ;;  %v6837_v56 = vmul.f32 %v12585_v9, %v1493_v57  ;;  %v3588_v1 = vpop.eup %3587  ;;  %v12641_v3 = vld [vmem:[#allocation212_spill] sm:$0xff]  ;;  %v12972_v22 = vld [vmem:[#allocation54_spill] sm:$0xff] }
 0x19f   : > { %12611 = vst [vmem:[#allocation133_spill] sm:$0xff] %v12610_v5  ;;  %3601 = vlog2.f32 %v12616_v36  ;;  %vm6840_vm8 = vcmp.lt.f32.partialorder %v1495_v44, 0.0004427343  ;;  %v12617_v49 = vmov 0  ;;  %vm6844_vm9 = vcmp.lt.f32.partialorder %v1504_v21, 0.0004427343  ;;  %v3590_v21 = vpop.eup %3589 }
 0x1a0   : > { %12614 = vst [vmem:[#allocation340_spill] sm:$0xff] %v6834_v39  ;;  %12615 = vst [vmem:[#allocation135_spill] sm:$0xff] %v6837_v56  ;;  %v12618_v49 = vsel %vm6840_vm8, 4294967295, %v12617_v49  ;;  %v12620_v13 = vmov 0  ;;  %v1511_v33 = vadd.f32 1.0, %v1510_v11  ;;  %v1528_v61 = vmul.f32 -0.5, %v12623_v53  ;;  %v3592_v28 = vpop.eup %3591 }
 0x1a1   : > { %12619 = vst [vmem:[#allocation342_spill] sm:$0xff] %v12618_v49  ;;  %v12621_v13 = vsel %vm6844_vm9, 4294967295, %v12620_v13  ;;  %v1513_v25 = vand.u32 2147483647, %v12606_v55  ;;  %v6858_v57 = vmul.f32 0.6931472, %v3582_v40  ;;  %v6861_v44 = vmul.f32 %v12595_v34, %v1502_v43 }
 0x1a2   : > { %12622 = vst [vmem:[#allocation136_spill] sm:$0xff] %v12621_v13  ;;  %v6863_v11 = vmul.f32 0.6931472, %v3584_v37  ;;  %v6865_v36 = vmul.f32 0.6931472, %v3586_v15  ;;  %v1520_v52 = vadd.f32 1.0, %v1519_v19  ;;  %v3594_v43 = vpop.eup %3593  ;;  %v6877_v37 = vmul.f32 %v12606_v55, %v1511_v33 }
 0x1a3   : > { %12624 = vst [vmem:[#allocation190_spill] sm:$0xff] %v6861_v44  ;;  %v1537_v2 = vmul.f32 -0.5, %v12625_v14  ;;  %v6872_v6 = vmul.f32 0.6931472, %v3588_v1  ;;  %v1522_v40 = vand.u32 2147483647, %v12612_v17  ;;  %v12961_v10 = vsel %vm6768_vm1, %v6781_v23, %v6819_v7 }
 0x1a4   : > { %v12627_v34 = vld [vmem:[#allocation209_spill] sm:$0xff]  ;;  %12628 = vst [vmem:[#allocation137_spill] sm:$0xff] %v6877_v37  ;;  %v1529_v15 = vadd.f32 1.0, %v1528_v61  ;;  %v6885_v1 = vmul.f32 0.6931472, %v3590_v21  ;;  %v6902_v61 = vmul.f32 %v12612_v17, %v1520_v52  ;;  %v12642_v17 = vld [vmem:[#allocation170_spill] sm:$0xff]  ;;  %v12967_v7 = vsel %vm6790_vm3, %v6788_v32, %v6858_v57 }
 0x1a5   : > { %12626 = vst [vmem:[#allocation343_spill] sm:$0xff] %v6872_v6  ;;  %3603 = vlog2.f32 %v12627_v34  ;;  %v12629_v19 = vld [vmem:[#allocation169_spill] sm:$0xff]  ;;  %vm6887_vm10 = vcmp.lt.f32.partialorder %v1513_v25, 0.0004427343  ;;  %v1531_v34 = vand.u32 2147483647, %v12623_v53  ;;  %v7761_v62 = vadd.f32 %v12967_v7, %v6414_v48 }
 0x1a6   : > { %v1546_v42 = vmul.f32 -0.5, %v12629_v19  ;;  %3605 = vlog2.f32 %v12630_v51  ;;  %12631 = vst [vmem:[#allocation345_spill] sm:$0xff] %v6885_v1  ;;  %v12633_v59 = vsel %vm6887_vm10, 4294967295, %v12632_v59  ;;  %v1540_v55 = vand.u32 2147483647, %v12625_v14  ;;  %12635 = vst [vmem:[#allocation346_spill] sm:$0xff] %v6902_v61 }
 0x1a7   : > { %12634 = vst [vmem:[#allocation138_spill] sm:$0xff] %v12633_v59  ;;  %v1538_v25 = vadd.f32 1.0, %v1537_v2  ;;  %v6908_v9 = vmul.f32 0.6931472, %v3592_v28  ;;  %v6910_v31 = vmul.f32 0.6931472, %v3594_v43  ;;  %3607 = vlog2.f32 %v12641_v3 }
 0x1a8   : > { %vm6912_vm11 = vcmp.lt.f32.partialorder %v1522_v40, 0.0004427343  ;;  %v12638_v51 = vmov 0  ;;  %v1547_v33 = vadd.f32 1.0, %v1546_v42  ;;  %v1549_v52 = vand.u32 2147483647, %v12629_v19  ;;  %v3596_v46 = vpop.eup %3595 }
 0x1a9   : > { %12636 = vst [vmem:[#allocation140_spill] sm:$0xff] %v6908_v9  ;;  %12637 = vst [vmem:[#allocation192_spill] sm:$0xff] %v6910_v31  ;;  %v12639_v51 = vsel %vm6912_vm11, 4294967295, %v12638_v51  ;;  %v1555_v2 = vmul.f32 -0.5, %v12642_v17  ;;  %3609 = vlog2.f32 %v12643_v38  ;;  %v6925_v40 = vmul.f32 %v12623_v53, %v1529_v15  ;;  %v12652_v21 = vld [vmem:[#allocation171_spill] sm:$0xff]  ;;  %v12653_v47 = vld [vmem:[#allocation172_spill] sm:$0xff] }
 0x1aa   : > { %12640 = vst [vmem:[#allocation348_spill] sm:$0xff] %v12639_v51  ;;  %vm6927_vm12 = vcmp.lt.f32.partialorder %v1531_v34, 0.0004427343  ;;  %v12645_v43 = vmov 0  ;;  %vm6931_vm13 = vcmp.lt.f32.partialorder %v1540_v55, 0.0004427343  ;;  %v3598_v42 = vpop.eup %3597  ;;  %v6936_v38 = vmul.f32 %v12625_v14, %v1538_v25 }
 0x1ab   : > { %12644 = vst [vmem:[#allocation141_spill] sm:$0xff] %v6925_v40  ;;  %v12646_v43 = vsel %vm6927_vm12, 4294967295, %v12645_v43  ;;  %v12648_v3 = vmov 0  ;;  %v1564_v4 = vmul.f32 -0.5, %v12652_v21  ;;  %v1573_v60 = vmul.f32 -0.5, %v12653_v47  ;;  %v12654_v28 = vld [vmem:[#allocation214_spill] sm:$0xff]  ;;  %v3600_v53 = vpop.eup %3599 }
 0x1ac   : > { %12647 = vst [vmem:[#allocation349_spill] sm:$0xff] %v12646_v43  ;;  %v12649_v3 = vsel %vm6931_vm13, 4294967295, %v12648_v3  ;;  %12651 = vst [vmem:[#allocation351_spill] sm:$0xff] %v6936_v38  ;;  %3611 = vlog2.f32 %v12654_v28  ;;  %v1558_v14 = vand.u32 2147483647, %v12642_v17  ;;  %v12655_v55 = vld [vmem:[#allocation216_spill] sm:$0xff]  ;;  %v3602_v25 = vpop.eup %3601  ;;  %v6954_v28 = vmul.f32 %v12629_v19, %v1547_v33 }
 0x1ad   : > { %12650 = vst [vmem:[#allocation142_spill] sm:$0xff] %v12649_v3  ;;  %3613 = vlog2.f32 %v12655_v55  ;;  %v6951_v1 = vmul.f32 0.6931472, %v3596_v46  ;;  %vm6956_vm14 = vcmp.lt.f32.partialorder %v1549_v52, 0.0004427343  ;;  %v12658_v39 = vmov 0 }
 0x1ae   : > { %12657 = vst [vmem:[#allocation352_spill] sm:$0xff] %v6954_v28  ;;  %v12659_v39 = vsel %vm6956_vm14, 4294967295, %v12658_v39  ;;  %v1556_v15 = vadd.f32 1.0, %v1555_v2  ;;  %v1567_v9 = vand.u32 2147483647, %v12652_v21  ;;  %v12662_v31 = vld [vmem:[#allocation173_spill] sm:$0xff]  ;;  %v12973_v48 = vsel %vm6805_vm5, %v6803_v41, %v6865_v36 }
 0x1af   : > { %12656 = vst [vmem:[#allocation143_spill] sm:$0xff] %v6951_v1  ;;  %12660 = vst [vmem:[#allocation144_spill] sm:$0xff] %v12659_v39  ;;  %v6961_v56 = vmul.f32 0.6931472, %v3598_v42  ;;  %v1576_v34 = vand.u32 2147483647, %v12653_v47  ;;  %v7781_v32 = vadd.f32 %v12973_v48, %v12972_v22 }
 0x1b0   : > { %v1582_v44 = vmul.f32 -0.5, %v12662_v31  ;;  %v12663_v55 = vld [vmem:[#allocation174_spill] sm:$0xff]  ;;  %v1565_v46 = vadd.f32 1.0, %v1564_v4  ;;  %v1574_v49 = vadd.f32 1.0, %v1573_v60  ;;  %v1585_v19 = vand.u32 2147483647, %v12662_v31 }
 0x1b1   : > { %12661 = vst [vmem:[#allocation145_spill] sm:$0xff] %v6961_v56  ;;  %v1591_v13 = vmul.f32 -0.5, %v12663_v55  ;;  %v12664_v33 = vld [vmem:[#allocation217_spill] sm:$0xff]  ;;  %v6968_v52 = vmul.f32 0.6931472, %v3600_v53  ;;  %v12667_v2 = vld [vmem:[#allocation175_spill] sm:$0xff]  ;;  %v6979_v60 = vmul.f32 %v12642_v17, %v1556_v15 }
 0x1b2   : > { %3615 = vlog2.f32 %v12664_v33  ;;  %v6970_v5 = vmul.f32 0.6931472, %v3602_v25  ;;  %v1600_v24 = vmul.f32 -0.5, %v12667_v2  ;;  %v12668_v42 = vld [vmem:[#allocation218_spill] sm:$0xff]  ;;  %v3604_v6 = vpop.eup %3603  ;;  %vm6981_vm15 = vcmp.lt.f32.partialorder %v1558_v14, 0.0004427343 }
 0x1b3   : > { %12665 = vst [vmem:[#allocation354_spill] sm:$0xff] %v6968_v52  ;;  %3617 = vlog2.f32 %v12668_v42  ;;  %12669 = vst [vmem:[#allocation149_spill] sm:$0xff] %v6979_v60  ;;  %v12670_v4 = vmov 0  ;;  %v12673_v53 = vld [vmem:[#allocation220_spill] sm:$0xff]  ;;  %v3606_v25 = vpop.eup %3605  ;;  %vm6986_vm9 = vcmp.lt.f32.partialorder %v1567_v9, 0.0004427343  ;;  %v7000_v14 = vmul.f32 %v12652_v21, %v1565_v46 }
 0x1b4   : > { %12666 = vst [vmem:[#allocation147_spill] sm:$0xff] %v6970_v5  ;;  %v12671_v4 = vsel %vm6981_vm15, 4294967295, %v12670_v4  ;;  %3619 = vlog2.f32 %v12673_v53  ;;  %v12674_v33 = vmov 0  ;;  %vm6990_vm8 = vcmp.lt.f32.partialorder %v1576_v34, 0.0004427343  ;;  %v12682_v53 = vld [vmem:[#allocation176_spill] sm:$0xff] }
 0x1b5   : > { %12672 = vst [vmem:[#allocation193_spill] sm:$0xff] %v12671_v4  ;;  %v12675_v33 = vsel %vm6986_vm9, 4294967295, %v12674_v33  ;;  %v12677_v42 = vmov 0  ;;  %v1583_v59 = vadd.f32 1.0, %v1582_v44  ;;  %v1592_v16 = vadd.f32 1.0, %v1591_v13  ;;  %12680 = vst [vmem:[#allocation152_spill] sm:$0xff] %v7000_v14 }
 0x1b6   : > { %12676 = vst [vmem:[#allocation148_spill] sm:$0xff] %v12675_v33  ;;  %v12678_v42 = vsel %vm6990_vm8, 4294967295, %v12677_v42  ;;  %v1594_v17 = vand.u32 2147483647, %v12663_v55  ;;  %v7003_v9 = vmul.f32 %v12653_v47, %v1574_v49  ;;  %v1609_v34 = vmul.f32 -0.5, %v12682_v53  ;;  %v3608_v49 = vpop.eup %3607  ;;  %v12688_v56 = vld [vmem:[#allocation177_spill] sm:$0xff] }
 0x1b7   : > { %12679 = vst [vmem:[#allocation150_spill] sm:$0xff] %v12678_v42  ;;  %v7014_v51 = vmul.f32 0.6931472, %v3604_v6  ;;  %vm7016_vm11 = vcmp.lt.f32.partialorder %v1585_v19, 0.0004427343  ;;  %v12684_v21 = vmov 0  ;;  %v3610_v52 = vpop.eup %3609  ;;  %v7026_v3 = vmul.f32 %v12662_v31, %v1583_v59 }
 0x1b8   : > { %12681 = vst [vmem:[#allocation194_spill] sm:$0xff] %v7003_v9  ;;  %v12685_v21 = vsel %vm7016_vm11, 4294967295, %v12684_v21  ;;  %v1601_v47 = vadd.f32 1.0, %v1600_v24  ;;  %v7020_v46 = vmul.f32 0.6931472, %v3606_v25  ;;  %v1618_v43 = vmul.f32 -0.5, %v12688_v56 }
 0x1b9   : > { %12683 = vst [vmem:[#allocation356_spill] sm:$0xff] %v7014_v51  ;;  %12686 = vst [vmem:[#allocation151_spill] sm:$0xff] %v12685_v21  ;;  %v1603_v15 = vand.u32 2147483647, %v12667_v2  ;;  %v12689_v13 = vld [vmem:[#allocation221_spill] sm:$0xff]  ;;  %v7029_v6 = vmul.f32 %v12663_v55, %v1592_v16  ;;  %v12692_v19 = vmov 0  ;;  %v3612_v61 = vpop.eup %3611 }
 0x1ba   : > { %12687 = vst [vmem:[#allocation153_spill] sm:$0xff] %v7020_v46  ;;  %3621 = vlog2.f32 %v12689_v13  ;;  %12690 = vst [vmem:[#allocation154_spill] sm:$0xff] %v7026_v3  ;;  %vm7031_vm13 = vcmp.lt.f32.partialorder %v1594_v17, 0.0004427343  ;;  %v12695_v24 = vld [vmem:[#allocation178_spill] sm:$0xff]  ;;  %v1610_v44 = vadd.f32 1.0, %v1609_v34  ;;  %v7044_v59 = vmul.f32 %v12667_v2, %v1601_v47  ;;  %v3614_v17 = vpop.eup %3613 }
 0x1bb   : > { %12691 = vst [vmem:[#allocation196_spill] sm:$0xff] %v7029_v6  ;;  %v12693_v19 = vsel %vm7031_vm13, 4294967295, %v12692_v19  ;;  %v1627_v25 = vmul.f32 -0.5, %v12695_v24  ;;  %v1612_v5 = vand.u32 2147483647, %v12682_v53  ;;  %v12696_v38 = vld [vmem:[#allocation222_spill] sm:$0xff] }
 0x1bc   : > { %12694 = vst [vmem:[#allocation358_spill] sm:$0xff] %v12693_v19  ;;  %3623 = vlog2.f32 %v12696_v38  ;;  %v12697_v40 = vld [vmem:[#allocation179_spill] sm:$0xff]  ;;  %12698 = vst [vmem:[#allocation155_spill] sm:$0xff] %v7044_v59  ;;  %v1621_v16 = vand.u32 2147483647, %v12688_v56  ;;  %v12699_v55 = vld [vmem:[#allocation224_spill] sm:$0xff]  ;;  %v7066_v38 = vmul.f32 %v12682_v53, %v1610_v44 }
 0x1bd   : > { %v1636_v13 = vmul.f32 -0.5, %v12697_v40  ;;  %3625 = vlog2.f32 %v12699_v55  ;;  %v7052_v34 = vmul.f32 0.6931472, %v3608_v49  ;;  %v7054_v1 = vmul.f32 0.6931472, %v3610_v52  ;;  %v12705_v51 = vld [vmem:[#allocation180_spill] sm:$0xff] }
 0x1be   : > { %vm7056_vm12 = vcmp.lt.f32.partialorder %v1603_v15, 0.0004427343  ;;  %v12702_v39 = vmov 0  ;;  %v1619_v2 = vadd.f32 1.0, %v1618_v43  ;;  %v1628_v47 = vadd.f32 1.0, %v1627_v25  ;;  %v12706_v28 = vld [vmem:[#allocation225_spill] sm:$0xff] }
 0x1bf   : > { %12700 = vst [vmem:[#allocation156_spill] sm:$0xff] %v7052_v34  ;;  %12701 = vst [vmem:[#allocation197_spill] sm:$0xff] %v7054_v1  ;;  %v12703_v39 = vsel %vm7056_vm12, 4294967295, %v12702_v39  ;;  %v1630_v31 = vand.u32 2147483647, %v12695_v24  ;;  %v1645_v55 = vmul.f32 -0.5, %v12705_v51  ;;  %3627 = vlog2.f32 %v12706_v28  ;;  %v3616_v49 = vpop.eup %3615 }
 0x1c0   : > { %12704 = vst [vmem:[#allocation360_spill] sm:$0xff] %v12703_v39  ;;  %v7063_v37 = vmul.f32 0.6931472, %v3612_v61  ;;  %12708 = vst [vmem:[#allocation157_spill] sm:$0xff] %v7066_v38  ;;  %vm7068_vm15 = vcmp.lt.f32.partialorder %v1612_v5, 0.0004427343  ;;  %v3618_v28 = vpop.eup %3617  ;;  %v7086_v53 = vmul.f32 %v12688_v56, %v1619_v2 }
 0x1c1   : > { %v12709_v52 = vmov 0  ;;  %v1637_v15 = vadd.f32 1.0, %v1636_v13  ;;  %v7072_v46 = vmul.f32 0.6931472, %v3614_v17  ;;  %v1639_v43 = vand.u32 2147483647, %v12697_v40  ;;  %v3620_v13 = vpop.eup %3619 }
 0x1c2   : > { %12707 = vst [vmem:[#allocation158_spill] sm:$0xff] %v7063_v37  ;;  %v12710_v52 = vsel %vm7068_vm15, 4294967295, %v12709_v52  ;;  %v12713_v25 = vld [vmem:[#allocation181_spill] sm:$0xff]  ;;  %v12714_v4 = vld [vmem:[#allocation226_spill] sm:$0xff]  ;;  %12715 = vst [vmem:[#allocation160_spill] sm:$0xff] %v7086_v53  ;;  %v12716_v44 = vmov 0 }
 0x1c3   : > { %12711 = vst [vmem:[#allocation198_spill] sm:$0xff] %v12710_v52  ;;  %12712 = vst [vmem:[#allocation200_spill] sm:$0xff] %v7072_v46  ;;  %v1654_v60 = vmul.f32 -0.5, %v12713_v25  ;;  %3629 = vlog2.f32 %v12714_v4  ;;  %vm7088_vm14 = vcmp.lt.f32.partialorder %v1621_v16, 0.0004427343  ;;  %v7093_v4 = vmul.f32 %v12695_v24, %v1628_v47  ;;  %v12723_v42 = vld [vmem:[#allocation228_spill] sm:$0xff] }
 0x1c4   : > { %v12717_v44 = vsel %vm7088_vm14, 4294967295, %v12716_v44  ;;  %vm7095_vm10 = vcmp.lt.f32.partialorder %v1630_v31, 0.0004427343  ;;  %v12720_v17 = vmov 0  ;;  %v1646_v61 = vadd.f32 1.0, %v1645_v55  ;;  %v12725_v2 = vld [vmem:[#allocation183_spill] sm:$0xff] }
 0x1c5   : > { %12718 = vst [vmem:[#allocation201_spill] sm:$0xff] %v12717_v44  ;;  %12719 = vst [vmem:[#allocation162_spill] sm:$0xff] %v7093_v4  ;;  %v12721_v17 = vsel %vm7095_vm10, 4294967295, %v12720_v17  ;;  %v1648_v34 = vand.u32 2147483647, %v12705_v51  ;;  %3631 = vlog2.f32 %v12723_v42  ;;  %v7106_v16 = vmul.f32 %v12697_v40, %v1637_v15  ;;  %v12732_v37 = vld [vmem:[#allocation184_spill] sm:$0xff] }
 0x1c6   : > { %12722 = vst [vmem:[#allocation163_spill] sm:$0xff] %v12721_v17  ;;  %v1657_v24 = vand.u32 2147483647, %v12713_v25  ;;  %v1663_v31 = vmul.f32 -0.5, %v12725_v2  ;;  %v7114_v55 = vmul.f32 0.6931472, %v3616_v49  ;;  %v7128_v47 = vmul.f32 %v12705_v51, %v1646_v61 }
 0x1c7   : > { %12724 = vst [vmem:[#allocation202_spill] sm:$0xff] %v7106_v16  ;;  %v7116_v42 = vmul.f32 0.6931472, %v3618_v28  ;;  %vm7118_vm8 = vcmp.lt.f32.partialorder %v1639_v43, 0.0004427343  ;;  %v12728_v5 = vmov 0  ;;  %v3622_v1 = vpop.eup %3621 }
 0x1c8   : > { %12726 = vst [vmem:[#allocation361_spill] sm:$0xff] %v7114_v55  ;;  %v12729_v5 = vsel %vm7118_vm8, 4294967295, %v12728_v5  ;;  %v1655_v56 = vadd.f32 1.0, %v1654_v60  ;;  %v7122_v40 = vmul.f32 0.6931472, %v3620_v13  ;;  %v1672_v3 = vmul.f32 -0.5, %v12732_v37 }
 0x1c9   : > { %12727 = vst [vmem:[#allocation161_spill] sm:$0xff] %v7116_v42  ;;  %12730 = vst [vmem:[#allocation164_spill] sm:$0xff] %v12729_v5  ;;  %v1666_v15 = vand.u32 2147483647, %v12725_v2  ;;  %v12733_v21 = vld [vmem:[#allocation229_spill] sm:$0xff]  ;;  %v12735_v49 = vmov 0 }
 0x1ca   : > { %12731 = vst [vmem:[#allocation204_spill] sm:$0xff] %v7122_v40  ;;  %3633 = vlog2.f32 %v12733_v21  ;;  %12734 = vst [vmem:[#allocation165_spill] sm:$0xff] %v7128_v47  ;;  %vm7130_vm13 = vcmp.lt.f32.partialorder %v1648_v34, 0.0004427343  ;;  %v12738_v43 = vld [vmem:[#allocation185_spill] sm:$0xff]  ;;  %v12739_v46 = vld [vmem:[#allocation230_spill] sm:$0xff]  ;;  %v3624_v21 = vpop.eup %3623 }
 0x1cb   : > { %v12736_v49 = vsel %vm7130_vm13, 4294967295, %v12735_v49  ;;  %v1681_v28 = vmul.f32 -0.5, %v12738_v43  ;;  %3635 = vlog2.f32 %v12739_v46  ;;  %v1664_v60 = vadd.f32 1.0, %v1663_v31  ;;  %v12740_v6 = vld [vmem:[#allocation186_spill] sm:$0xff]  ;;  %v12741_v9 = vld [vmem:[#allocation232_spill] sm:$0xff]  ;;  %v3626_v31 = vpop.eup %3625  ;;  %v12751_v38 = vld [vmem:[#allocation233_spill] sm:$0xff] }
 0x1cc   : > { %12737 = vst [vmem:[#allocation205_spill] sm:$0xff] %v12736_v49  ;;  %v1675_v13 = vand.u32 2147483647, %v12732_v37  ;;  %v1690_v19 = vmul.f32 -0.5, %v12740_v6  ;;  %3637 = vlog2.f32 %v12741_v9  ;;  %v7148_v46 = vmul.f32 %v12713_v25, %v1655_v56  ;;  %v12750_v56 = vld [vmem:[#allocation187_spill] sm:$0xff]  ;;  %v3628_v52 = vpop.eup %3627  ;;  %v12759_v53 = vld [vmem:[#allocation234_spill] sm:$0xff] }
 0x1cd   : > { %vm7150_vm11 = vcmp.lt.f32.partialorder %v1657_v24, 0.0004427343  ;;  %v12743_v61 = vmov 0  ;;  %v7158_v39 = vmul.f32 0.6931472, %v3622_v1  ;;  %v12747_v51 = vmov 0 }
 0x1ce   : > { %12742 = vst [vmem:[#allocation166_spill] sm:$0xff] %v7148_v46  ;;  %v12744_v61 = vsel %vm7150_vm11, 4294967295, %v12743_v61  ;;  %vm7160_vm12 = vcmp.lt.f32.partialorder %v1666_v15, 0.0004427343  ;;  %v1673_v34 = vadd.f32 1.0, %v1672_v3  ;;  %v1682_v42 = vadd.f32 1.0, %v1681_v28 }
 0x1cf   : > { %12745 = vst [vmem:[#allocation206_spill] sm:$0xff] %v12744_v61  ;;  %12746 = vst [vmem:[#allocation208_spill] sm:$0xff] %v7158_v39  ;;  %v12748_v51 = vsel %vm7160_vm12, 4294967295, %v12747_v51  ;;  %v1684_v25 = vand.u32 2147483647, %v12738_v43  ;;  %v1699_v24 = vmul.f32 -0.5, %v12750_v56  ;;  %3639 = vlog2.f32 %v12751_v38 }
 0x1d0   : > { %12749 = vst [vmem:[#allocation167_spill] sm:$0xff] %v12748_v51  ;;  %v7167_v55 = vmul.f32 0.6931472, %v3624_v21  ;;  %v7170_v44 = vmul.f32 %v12725_v2, %v1664_v60  ;;  %vm7172_vm14 = vcmp.lt.f32.partialorder %v1675_v13, 0.0004427343  ;;  %v12754_v1 = vmov 0  ;;  %v3630_v38 = vpop.eup %3629 }
 0x1d1   : > { %v12755_v1 = vsel %vm7172_vm14, 4294967295, %v12754_v1  ;;  %v1691_v15 = vadd.f32 1.0, %v1690_v19  ;;  %v7176_v9 = vmul.f32 0.6931472, %v3626_v31  ;;  %v1693_v3 = vand.u32 2147483647, %v12740_v6 }
 0x1d2   : > { %12752 = vst [vmem:[#allocation168_spill] sm:$0xff] %v7167_v55  ;;  %12753 = vst [vmem:[#allocation209_spill] sm:$0xff] %v7170_v44  ;;  %v12758_v28 = vld [vmem:[#allocation188_spill] sm:$0xff]  ;;  %3641 = vlog2.f32 %v12759_v53  ;;  %v7186_v60 = vmul.f32 %v12732_v37, %v1673_v34  ;;  %v1702_v13 = vand.u32 2147483647, %v12750_v56  ;;  %v12761_v19 = vld [vmem:[#allocation189_spill] sm:$0xff]  ;;  %v7193_v59 = vmul.f32 %v12738_v43, %v1682_v42  ;;  %v3632_v2 = vpop.eup %3631 }
 0x1d3   : > { %12756 = vst [vmem:[#allocation169_spill] sm:$0xff] %v12755_v1  ;;  %12757 = vst [vmem:[#allocation210_spill] sm:$0xff] %v7176_v9  ;;  %v1708_v40 = vmul.f32 -0.5, %v12758_v28  ;;  %v1717_v21 = vmul.f32 -0.5, %v12761_v19  ;;  %v7190_v31 = vmul.f32 0.6931472, %v3628_v52  ;;  %v7205_v34 = vmul.f32 %v12740_v6, %v1691_v15 }
 0x1d4   : > { %12760 = vst [vmem:[#allocation212_spill] sm:$0xff] %v7186_v60  ;;  %12763 = vst [vmem:[#allocation213_spill] sm:$0xff] %v7193_v59  ;;  %vm7195_vm15 = vcmp.lt.f32.partialorder %v1684_v25, 0.0004427343  ;;  %v12764_v53 = vmov 0  ;;  %v1700_v14 = vadd.f32 1.0, %v1699_v24 }
 0x1d5   : > { %12762 = vst [vmem:[#allocation170_spill] sm:$0xff] %v7190_v31  ;;  %v12765_v53 = vsel %vm7195_vm15, 4294967295, %v12764_v53  ;;  %v12767_v33 = vld [vmem:[#allocation236_spill] sm:$0xff]  ;;  %12768 = vst [vmem:[#allocation172_spill] sm:$0xff] %v7205_v34  ;;  %v1711_v52 = vand.u32 2147483647, %v12758_v28 }
 0x1d6   : > { %12766 = vst [vmem:[#allocation171_spill] sm:$0xff] %v12765_v53  ;;  %3643 = vlog2.f32 %v12767_v33  ;;  %v12769_v42 = vld [vmem:[#allocation191_spill] sm:$0xff]  ;;  %v7213_v24 = vmul.f32 0.6931472, %v3630_v38  ;;  %vm7215_vm10 = vcmp.lt.f32.partialorder %v1693_v3, 0.0004427343 }
 0x1d7   : > { %v1726_v43 = vmul.f32 -0.5, %v12769_v42  ;;  %v12771_v33 = vmov 0  ;;  %v1709_v5 = vadd.f32 1.0, %v1708_v40  ;;  %v12774_v37 = vld [vmem:[#allocation237_spill] sm:$0xff]  ;;  %vm7220_vm8 = vcmp.lt.f32.partialorder %v1702_v13, 0.0004427343  ;;  %v3634_v49 = vpop.eup %3633 }
 0x1d8   : > { %12770 = vst [vmem:[#allocation214_spill] sm:$0xff] %v7213_v24  ;;  %v12772_v33 = vsel %vm7215_vm10, 4294967295, %v12771_v33  ;;  %3645 = vlog2.f32 %v12774_v37  ;;  %v12775_v6 = vmov 0  ;;  %v1718_v15 = vadd.f32 1.0, %v1717_v21  ;;  %v12778_v16 = vld [vmem:[#allocation238_spill] sm:$0xff]  ;;  %v12781_v13 = vld [vmem:[#allocation195_spill] sm:$0xff]  ;;  %v3636_v25 = vpop.eup %3635 }
 0x1d9   : > { %12773 = vst [vmem:[#allocation216_spill] sm:$0xff] %v12772_v33  ;;  %v12776_v6 = vsel %vm7220_vm8, 4294967295, %v12775_v6  ;;  %v1720_v55 = vand.u32 2147483647, %v12761_v19  ;;  %3647 = vlog2.f32 %v12778_v16  ;;  %v7230_v38 = vmul.f32 0.6931472, %v3632_v2  ;;  %v3638_v3 = vpop.eup %3637 }
 0x1da   : > { %12777 = vst [vmem:[#allocation173_spill] sm:$0xff] %v12776_v6  ;;  %v7233_v40 = vmul.f32 %v12750_v56, %v1700_v14  ;;  %v1735_v37 = vmul.f32 -0.5, %v12781_v13  ;;  %vm7236_vm13 = vcmp.lt.f32.partialorder %v1711_v52, 0.0004427343  ;;  %v12782_v21 = vmov 0  ;;  %v12785_v47 = vld [vmem:[#allocation199_spill] sm:$0xff] }
 0x1db   : > { %12779 = vst [vmem:[#allocation174_spill] sm:$0xff] %v7230_v38  ;;  %v12783_v21 = vsel %vm7236_vm13, 4294967295, %v12782_v21  ;;  %v1727_v9 = vadd.f32 1.0, %v1726_v43  ;;  %v1729_v16 = vand.u32 2147483647, %v12769_v42  ;;  %v1744_v39 = vmul.f32 -0.5, %v12785_v47 }
 0x1dc   : > { %12780 = vst [vmem:[#allocation217_spill] sm:$0xff] %v7233_v40  ;;  %12784 = vst [vmem:[#allocation175_spill] sm:$0xff] %v12783_v21  ;;  %v12786_v4 = vld [vmem:[#allocation240_spill] sm:$0xff]  ;;  %v7248_v56 = vmul.f32 %v12758_v28, %v1709_v5  ;;  %v12788_v2 = vld [vmem:[#allocation203_spill] sm:$0xff]  ;;  %v7252_v43 = vmul.f32 0.6931472, %v3634_v49  ;;  %v7255_v46 = vmul.f32 %v12761_v19, %v1718_v15 }
 0x1dd   : > { %3649 = vlog2.f32 %v12786_v4  ;;  %v1753_v52 = vmul.f32 -0.5, %v12788_v2  ;;  %v12789_v31 = vld [vmem:[#allocation241_spill] sm:$0xff]  ;;  %vm7257_vm11 = vcmp.lt.f32.partialorder %v1720_v55, 0.0004427343  ;;  %v12792_v4 = vmov 0  ;;  %v12801_v5 = vld [vmem:[#allocation207_spill] sm:$0xff] }
 0x1de   : > { %12787 = vst [vmem:[#allocation218_spill] sm:$0xff] %v7248_v56  ;;  %3651 = vlog2.f32 %v12789_v31  ;;  %12790 = vst [vmem:[#allocation220_spill] sm:$0xff] %v7252_v43  ;;  %v12793_v4 = vsel %vm7257_vm11, 4294967295, %v12792_v4  ;;  %v1738_v61 = vand.u32 2147483647, %v12781_v13  ;;  %v1736_v14 = vadd.f32 1.0, %v1735_v37  ;;  %v3640_v31 = vpop.eup %3639 }
 0x1df   : > { %12791 = vst [vmem:[#allocation176_spill] sm:$0xff] %v7255_v46  ;;  %12794 = vst [vmem:[#allocation177_spill] sm:$0xff] %v12793_v4  ;;  %v7266_v28 = vmul.f32 0.6931472, %v3636_v25  ;;  %v1747_v49 = vand.u32 2147483647, %v12785_v47  ;;  %v7272_v55 = vmul.f32 %v12769_v42, %v1727_v9  ;;  %v3642_v51 = vpop.eup %3641 }
 0x1e0   : > { %v7269_v24 = vmul.f32 0.6931472, %v3638_v3  ;;  %vm7274_vm12 = vcmp.lt.f32.partialorder %v1729_v16, 0.0004427343  ;;  %v12798_v19 = vmov 0  ;;  %v1745_v15 = vadd.f32 1.0, %v1744_v39 }
 0x1e1   : > { %12795 = vst [vmem:[#allocation221_spill] sm:$0xff] %v7266_v28  ;;  %12797 = vst [vmem:[#allocation222_spill] sm:$0xff] %v7272_v55  ;;  %v12799_v19 = vsel %vm7274_vm12, 4294967295, %v12798_v19  ;;  %v1756_v44 = vand.u32 2147483647, %v12788_v2  ;;  %v1754_v1 = vadd.f32 1.0, %v1753_v52 }
 0x1e2   : > { %12796 = vst [vmem:[#allocation178_spill] sm:$0xff] %v7269_v24  ;;  %12800 = vst [vmem:[#allocation179_spill] sm:$0xff] %v12799_v19  ;;  %v1762_v25 = vmul.f32 -0.5, %v12801_v5  ;;  %v12802_v38 = vld [vmem:[#allocation242_spill] sm:$0xff]  ;;  %v12803_v37 = vld [vmem:[#allocation211_spill] sm:$0xff]  ;;  %v12804_v42 = vmov 0 }
 0x1e3   : > { %3653 = vlog2.f32 %v12802_v38  ;;  %v1771_v60 = vmul.f32 -0.5, %v12803_v37  ;;  %vm7286_vm14 = vcmp.lt.f32.partialorder %v1738_v61, 0.0004427343  ;;  %v1765_v39 = vand.u32 2147483647, %v12801_v5  ;;  %v12807_v3 = vld [vmem:[#allocation244_spill] sm:$0xff]  ;;  %v3644_v9 = vpop.eup %3643 }
 0x1e4   : > { %v12805_v42 = vsel %vm7286_vm14, 4294967295, %v12804_v42  ;;  %3655 = vlog2.f32 %v12807_v3  ;;  %v7292_v16 = vmul.f32 0.6931472, %v3640_v31  ;;  %v7295_v38 = vmul.f32 %v12781_v13, %v1736_v14  ;;  %v12813_v17 = vld [vmem:[#allocation246_spill] sm:$0xff]  ;;  %v12815_v14 = vld [vmem:[#allocation215_spill] sm:$0xff]  ;;  %v12830_v53 = vld [vmem:[#allocation252_spill] sm:$0xff] }
 0x1e5   : > { %12806 = vst [vmem:[#allocation224_spill] sm:$0xff] %v12805_v42  ;;  %vm7297_vm9 = vcmp.lt.f32.partialorder %v1747_v49, 0.0004427343  ;;  %v12810_v52 = vmov 0  ;;  %3657 = vlog2.f32 %v12813_v17  ;;  %v7311_v13 = vmul.f32 %v12785_v47, %v1745_v15  ;;  %v3646_v34 = vpop.eup %3645  ;;  %v12824_v15 = vld [vmem:[#allocation219_spill] sm:$0xff]  ;;  %v12837_v4 = vld [vmem:[#allocation254_spill] sm:$0xff] }
 0x1e6   : > { %12808 = vst [vmem:[#allocation180_spill] sm:$0xff] %v7292_v16  ;;  %12809 = vst [vmem:[#allocation225_spill] sm:$0xff] %v7295_v38  ;;  %v12811_v52 = vsel %vm7297_vm9, 4294967295, %v12810_v52  ;;  %v1780_v49 = vmul.f32 -0.5, %v12815_v14  ;;  %v7314_v3 = vmul.f32 0.6931472, %v3642_v51  ;;  %v7317_v17 = vmul.f32 %v12788_v2, %v1754_v1  ;;  %v3648_v24 = vpop.eup %3647 }
 0x1e7   : > { %12812 = vst [vmem:[#allocation181_spill] sm:$0xff] %v12811_v52  ;;  %12814 = vst [vmem:[#allocation226_spill] sm:$0xff] %v7311_v13  ;;  %vm7319_vm15 = vcmp.lt.f32.partialorder %v1756_v44, 0.0004427343  ;;  %v12818_v43 = vmov 0  ;;  %v1763_v61 = vadd.f32 1.0, %v1762_v25 }
 0x1e8   : > { %12816 = vst [vmem:[#allocation228_spill] sm:$0xff] %v7314_v3  ;;  %12817 = vst [vmem:[#allocation183_spill] sm:$0xff] %v7317_v17  ;;  %v12819_v43 = vsel %vm7319_vm15, 4294967295, %v12818_v43  ;;  %v1772_v28 = vadd.f32 1.0, %v1771_v60  ;;  %vm7323_vm10 = vcmp.lt.f32.partialorder %v1765_v39, 0.0004427343 }
 0x1e9   : > { %12820 = vst [vmem:[#allocation184_spill] sm:$0xff] %v12819_v43  ;;  %v12821_v6 = vmov 0  ;;  %v1774_v47 = vand.u32 2147483647, %v12803_v37  ;;  %v1789_v31 = vmul.f32 -0.5, %v12824_v15  ;;  %v12825_v51 = vld [vmem:[#allocation248_spill] sm:$0xff] }
 0x1ea   : > { %v12822_v6 = vsel %vm7323_vm10, 4294967295, %v12821_v6  ;;  %3659 = vlog2.f32 %v12825_v51  ;;  %v7334_v1 = vmul.f32 0.6931472, %v3644_v9  ;;  %v12827_v60 = vld [vmem:[#allocation223_spill] sm:$0xff]  ;;  %v12828_v25 = vld [vmem:[#allocation250_spill] sm:$0xff]  ;;  %v1781_v39 = vadd.f32 1.0, %v1780_v49  ;;  %v3650_v51 = vpop.eup %3649 }
 0x1eb   : > { %12823 = vst [vmem:[#allocation229_spill] sm:$0xff] %v12822_v6  ;;  %v1798_v2 = vmul.f32 -0.5, %v12827_v60  ;;  %3661 = vlog2.f32 %v12828_v25  ;;  %v1783_v40 = vand.u32 2147483647, %v12815_v14  ;;  %v12829_v33 = vld [vmem:[#allocation227_spill] sm:$0xff]  ;;  %v7348_v9 = vmul.f32 %v12801_v5, %v1763_v61  ;;  %v3652_v49 = vpop.eup %3651  ;;  %v12868_v43 = vld [vmem:[#allocation262_spill] sm:$0xff] }
 0x1ec   : > { %12826 = vst [vmem:[#allocation185_spill] sm:$0xff] %v7334_v1  ;;  %v1807_v59 = vmul.f32 -0.5, %v12829_v33  ;;  %3663 = vlog2.f32 %v12830_v53  ;;  %v7345_v44 = vmul.f32 0.6931472, %v3646_v34  ;;  %v7351_v25 = vmul.f32 %v12803_v37, %v1772_v28  ;;  %v12838_v37 = vld [vmem:[#allocation231_spill] sm:$0xff]  ;;  %v12845_v1 = vld [vmem:[#allocation256_spill] sm:$0xff] }
 0x1ed   : > { %12832 = vst [vmem:[#allocation186_spill] sm:$0xff] %v7348_v9  ;;  %v7353_v16 = vmul.f32 0.6931472, %v3648_v24  ;;  %vm7355_vm13 = vcmp.lt.f32.partialorder %v1774_v47, 0.0004427343  ;;  %v12835_v56 = vmov 0  ;;  %3665 = vlog2.f32 %v12837_v4 }
 0x1ee   : > { %12831 = vst [vmem:[#allocation230_spill] sm:$0xff] %v7345_v44  ;;  %12833 = vst [vmem:[#allocation232_spill] sm:$0xff] %v7351_v25  ;;  %v12836_v56 = vsel %vm7355_vm13, 4294967295, %v12835_v56  ;;  %v1790_v53 = vadd.f32 1.0, %v1789_v31  ;;  %v1792_v0 = vand.u32 2147483647, %v12824_v15  ;;  %v7370_v47 = vmul.f32 %v12815_v14, %v1781_v39 }
 0x1ef   : > { %12834 = vst [vmem:[#allocation187_spill] sm:$0xff] %v7353_v16  ;;  %v1799_v5 = vadd.f32 1.0, %v1798_v2  ;;  %v1801_v28 = vand.u32 2147483647, %v12827_v60  ;;  %v1816_v24 = vmul.f32 -0.5, %v12838_v37  ;;  %v12841_v31 = vmov 0 }
 0x1f0   : > { %v7367_v61 = vmul.f32 0.6931472, %v3650_v51  ;;  %12840 = vst [vmem:[#allocation188_spill] sm:$0xff] %v7370_v47  ;;  %vm7372_vm11 = vcmp.lt.f32.partialorder %v1783_v40, 0.0004427343  ;;  %v1808_v4 = vadd.f32 1.0, %v1807_v59  ;;  %3667 = vlog2.f32 %v12845_v1  ;;  %v3654_v14 = vpop.eup %3653 }
 0x1f1   : > { %v12842_v31 = vsel %vm7372_vm11, 4294967295, %v12841_v31  ;;  %v1810_v21 = vand.u32 2147483647, %v12829_v33  ;;  %v7381_v34 = vmul.f32 0.6931472, %v3652_v49  ;;  %v7390_v59 = vmul.f32 %v12824_v15, %v1790_v53  ;;  %v12850_v2 = vld [vmem:[#allocation235_spill] sm:$0xff]  ;;  %v3656_v44 = vpop.eup %3655 }
 0x1f2   : > { %12839 = vst [vmem:[#allocation233_spill] sm:$0xff] %v7367_v61  ;;  %12843 = vst [vmem:[#allocation234_spill] sm:$0xff] %v12842_v31  ;;  %v1819_v51 = vand.u32 2147483647, %v12838_v37  ;;  %vm7392_vm12 = vcmp.lt.f32.partialorder %v1792_v0, 0.0004427343  ;;  %v7398_v38 = vmul.f32 %v12827_v60, %v1799_v5  ;;  %v3658_v15 = vpop.eup %3657  ;;  %v7411_v53 = vmul.f32 %v12829_v33, %v1808_v4 }
 0x1f3   : > { %12844 = vst [vmem:[#allocation189_spill] sm:$0xff] %v7381_v34  ;;  %12846 = vst [vmem:[#allocation236_spill] sm:$0xff] %v7390_v59  ;;  %v12847_v39 = vmov 0  ;;  %v1825_v49 = vmul.f32 -0.5, %v12850_v2  ;;  %vm7400_vm14 = vcmp.lt.f32.partialorder %v1801_v28, 0.0004427343 }
 0x1f4   : > { %v12848_v39 = vsel %vm7392_vm12, 4294967295, %v12847_v39  ;;  %12851 = vst [vmem:[#allocation237_spill] sm:$0xff] %v7398_v38  ;;  %v12852_v1 = vmov 0  ;;  %v1817_v42 = vadd.f32 1.0, %v1816_v24  ;;  %v12855_v52 = vld [vmem:[#allocation239_spill] sm:$0xff]  ;;  %v12856_v16 = vld [vmem:[#allocation258_spill] sm:$0xff] }
 0x1f5   : > { %12849 = vst [vmem:[#allocation191_spill] sm:$0xff] %v12848_v39  ;;  %v12853_v1 = vsel %vm7400_vm14, 4294967295, %v12852_v1  ;;  %v1834_v40 = vmul.f32 -0.5, %v12855_v52  ;;  %3669 = vlog2.f32 %v12856_v16  ;;  %12857 = vst [vmem:[#allocation195_spill] sm:$0xff] %v7411_v53  ;;  %vm7413_vm9 = vcmp.lt.f32.partialorder %v1810_v21, 0.0004427343 }
 0x1f6   : > { %12854 = vst [vmem:[#allocation238_spill] sm:$0xff] %v12853_v1  ;;  %v12858_v60 = vmov 0  ;;  %v12861_v5 = vld [vmem:[#allocation243_spill] sm:$0xff]  ;;  %v7422_v24 = vmul.f32 0.6931472, %v3654_v14  ;;  %v12863_v13 = vmov 0 }
 0x1f7   : > { %v12859_v60 = vsel %vm7413_vm9, 4294967295, %v12858_v60  ;;  %v1843_v28 = vmul.f32 -0.5, %v12861_v5  ;;  %vm7424_vm8 = vcmp.lt.f32.partialorder %v1819_v51, 0.0004427343  ;;  %v1828_v33 = vand.u32 2147483647, %v12850_v2  ;;  %v3660_v55 = vpop.eup %3659 }
 0x1f8   : > { %12860 = vst [vmem:[#allocation199_spill] sm:$0xff] %v12859_v60  ;;  %12862 = vst [vmem:[#allocation240_spill] sm:$0xff] %v7422_v24  ;;  %v12864_v13 = vsel %vm7424_vm8, 4294967295, %v12863_v13  ;;  %v12866_v4 = vld [vmem:[#allocation260_spill] sm:$0xff]  ;;  %v1826_v21 = vadd.f32 1.0, %v1825_v49  ;;  %v12867_v61 = vld [vmem:[#allocation245_spill] sm:$0xff]  ;;  %v7438_v51 = vmul.f32 %v12838_v37, %v1817_v42  ;;  %v3662_v34 = vpop.eup %3661 }
 0x1f9   : > { %12865 = vst [vmem:[#allocation203_spill] sm:$0xff] %v12864_v13  ;;  %3671 = vlog2.f32 %v12866_v4  ;;  %v1837_v0 = vand.u32 2147483647, %v12855_v52  ;;  %v1852_v17 = vmul.f32 -0.5, %v12867_v61  ;;  %v7433_v6 = vmul.f32 0.6931472, %v3656_v44  ;;  %v3664_v46 = vpop.eup %3663 }
 0x1fa   : > { %3673 = vlog2.f32 %v12868_v43  ;;  %v7435_v14 = vmul.f32 0.6931472, %v3658_v15  ;;  %12871 = vst [vmem:[#allocation242_spill] sm:$0xff] %v7438_v51  ;;  %v1835_v16 = vadd.f32 1.0, %v1834_v40  ;;  %v1844_v9 = vadd.f32 1.0, %v1843_v28  ;;  %v12872_v49 = vld [vmem:[#allocation247_spill] sm:$0xff] }
 0x1fb   : > { %12869 = vst [vmem:[#allocation241_spill] sm:$0xff] %v7433_v6  ;;  %v1846_v4 = vand.u32 2147483647, %v12861_v5  ;;  %v1861_v19 = vmul.f32 -0.5, %v12872_v49  ;;  %v12873_v3 = vld [vmem:[#allocation264_spill] sm:$0xff]  ;;  %v12874_v44 = vmov 0  ;;  %v7456_v28 = vmul.f32 %v12850_v2, %v1826_v21 }
 0x1fc   : > { %12870 = vst [vmem:[#allocation207_spill] sm:$0xff] %v7435_v14  ;;  %3675 = vlog2.f32 %v12873_v3  ;;  %vm7447_vm10 = vcmp.lt.f32.partialorder %v1828_v33, 0.0004427343  ;;  %v12877_v42 = vld [vmem:[#allocation249_spill] sm:$0xff]  ;;  %v12878_v40 = vld [vmem:[#allocation266_spill] sm:$0xff]  ;;  %v12881_v3 = vmov 0  ;;  %v3666_v33 = vpop.eup %3665 }
 0x1fd   : > { %v12875_v44 = vsel %vm7447_vm10, 4294967295, %v12874_v44  ;;  %v1870_v37 = vmul.f32 -0.5, %v12877_v42  ;;  %3677 = vlog2.f32 %v12878_v40  ;;  %v7453_v15 = vmul.f32 0.6931472, %v3660_v55  ;;  %12880 = vst [vmem:[#allocation246_spill] sm:$0xff] %v7456_v28  ;;  %v12889_v59 = vld [vmem:[#allocation268_spill] sm:$0xff] }
 0x1fe   : > { %12876 = vst [vmem:[#allocation211_spill] sm:$0xff] %v12875_v44  ;;  %vm7458_vm15 = vcmp.lt.f32.partialorder %v1837_v0, 0.0004427343  ;;  %v1853_v35 = vadd.f32 1.0, %v1852_v17  ;;  %v1855_v43 = vand.u32 2147483647, %v12867_v61  ;;  %v7474_v0 = vmul.f32 %v12855_v52, %v1835_v16  ;;  %v3668_v52 = vpop.eup %3667 }
 0x1ff   : > { %12879 = vst [vmem:[#allocation244_spill] sm:$0xff] %v7453_v15  ;;  %v12882_v3 = vsel %vm7458_vm15, 4294967295, %v12881_v3  ;;  %v7471_v2 = vmul.f32 0.6931472, %v3662_v34  ;;  %v7476_v21 = vmul.f32 0.6931472, %v3664_v46  ;;  %v7479_v17 = vmul.f32 %v12861_v5, %v1844_v9 }
 0x200   : > { %vm7481_vm13 = vcmp.lt.f32.partialorder %v1846_v4, 0.0004427343  ;;  %v12885_v40 = vmov 0  ;;  %v1862_v24 = vadd.f32 1.0, %v1861_v19  ;;  %v1864_v6 = vand.u32 2147483647, %v12872_v49 }
 0x201   : > { %12883 = vst [vmem:[#allocation215_spill] sm:$0xff] %v7471_v2  ;;  %12884 = vst [vmem:[#allocation219_spill] sm:$0xff] %v7476_v21  ;;  %v12886_v40 = vsel %vm7481_vm13, 4294967295, %v12885_v40  ;;  %v1871_v47 = vadd.f32 1.0, %v1870_v37  ;;  %v1873_v55 = vand.u32 2147483647, %v12877_v42  ;;  %3679 = vlog2.f32 %v12889_v59 }
 0x202   : > { %12887 = vst [vmem:[#allocation248_spill] sm:$0xff] %v12886_v40  ;;  %v12888_v34 = vld [vmem:[#allocation251_spill] sm:$0xff]  ;;  %v7493_v9 = vmul.f32 0.6931472, %v3666_v33  ;;  %v7496_v5 = vmul.f32 %v12867_v61, %v1853_v35  ;;  %vm7498_vm12 = vcmp.lt.f32.partialorder %v1855_v43, 0.0004427343  ;;  %v3670_v33 = vpop.eup %3669  ;;  %v7514_v61 = vmul.f32 %v12872_v49, %v1862_v24 }
 0x203   : > { %v1879_v14 = vmul.f32 -0.5, %v12888_v34  ;;  %v12892_v19 = vmov 0  ;;  %v1882_v16 = vand.u32 2147483647, %v12888_v34  ;;  %v12895_v4 = vld [vmem:[#allocation253_spill] sm:$0xff]  ;;  %v12896_v1 = vld [vmem:[#allocation270_spill] sm:$0xff]  ;;  %v7524_v53 = vmul.f32 %v12877_v42, %v1871_v47 }
 0x204   : > { %12890 = vst [vmem:[#allocation223_spill] sm:$0xff] %v7493_v9  ;;  %12891 = vst [vmem:[#allocation250_spill] sm:$0xff] %v7496_v5  ;;  %v12893_v19 = vsel %vm7498_vm12, 4294967295, %v12892_v19  ;;  %v1888_v37 = vmul.f32 -0.5, %v12895_v4  ;;  %3681 = vlog2.f32 %v12896_v1  ;;  %vm7516_vm14 = vcmp.lt.f32.partialorder %v1864_v6, 0.0004427343 }
 0x205   : > { %12894 = vst [vmem:[#allocation227_spill] sm:$0xff] %v12893_v19  ;;  %12897 = vst [vmem:[#allocation252_spill] sm:$0xff] %v7514_v61  ;;  %v12898_v43 = vmov 0  ;;  %v12901_v59 = vld [vmem:[#allocation255_spill] sm:$0xff]  ;;  %v7521_v2 = vmul.f32 0.6931472, %v3668_v52 }
 0x206   : > { %v12899_v43 = vsel %vm7516_vm14, 4294967295, %v12898_v43  ;;  %v1897_v46 = vmul.f32 -0.5, %v12901_v59  ;;  %12903 = vst [vmem:[#allocation256_spill] sm:$0xff] %v7524_v53  ;;  %vm7526_vm9 = vcmp.lt.f32.partialorder %v1873_v55, 0.0004427343  ;;  %v12904_v1 = vmov 0  ;;  %v3672_v24 = vpop.eup %3671 }
 0x207   : > { %12900 = vst [vmem:[#allocation254_spill] sm:$0xff] %v12899_v43  ;;  %12902 = vst [vmem:[#allocation231_spill] sm:$0xff] %v7521_v2  ;;  %v12905_v1 = vsel %vm7526_vm9, 4294967295, %v12904_v1  ;;  %v1880_v13 = vadd.f32 1.0, %v1879_v14  ;;  %v12907_v35 = vld [vmem:[#allocation272_spill] sm:$0xff]  ;;  %v12908_v52 = vld [vmem:[#allocation257_spill] sm:$0xff]  ;;  %v3674_v47 = vpop.eup %3673 }
 0x208   : > { %12906 = vst [vmem:[#allocation235_spill] sm:$0xff] %v12905_v1  ;;  %3683 = vlog2.f32 %v12907_v35  ;;  %v1891_v49 = vand.u32 2147483647, %v12895_v4  ;;  %v1906_v21 = vmul.f32 -0.5, %v12908_v52  ;;  %v12909_v51 = vld [vmem:[#allocation274_spill] sm:$0xff]  ;;  %v12911_v55 = vmov 0 }
 0x209   : > { %3685 = vlog2.f32 %v12909_v51  ;;  %v7538_v42 = vmul.f32 0.6931472, %v3670_v33  ;;  %vm7540_vm8 = vcmp.lt.f32.partialorder %v1882_v16, 0.0004427343  ;;  %v1889_v14 = vadd.f32 1.0, %v1888_v37  ;;  %v12914_v35 = vld [vmem:[#allocation276_spill] sm:$0xff]  ;;  %v3676_v15 = vpop.eup %3675 }
 0x20a   : > { %v12912_v55 = vsel %vm7540_vm8, 4294967295, %v12911_v55  ;;  %3687 = vlog2.f32 %v12914_v35  ;;  %v1898_v60 = vadd.f32 1.0, %v1897_v46  ;;  %v1900_v44 = vand.u32 2147483647, %v12901_v59  ;;  %v12915_v6 = vld [vmem:[#allocation259_spill] sm:$0xff]  ;;  %v12916_v28 = vld [vmem:[#allocation277_spill] sm:$0xff]  ;;  %v3678_v46 = vpop.eup %3677 }
 0x20b   : > { %12910 = vst [vmem:[#allocation239_spill] sm:$0xff] %v7538_v42  ;;  %12913 = vst [vmem:[#allocation258_spill] sm:$0xff] %v12912_v55  ;;  %v1915_v9 = vmul.f32 -0.5, %v12915_v6  ;;  %3689 = vlog2.f32 %v12916_v28  ;;  %v7552_v16 = vmul.f32 0.6931472, %v3672_v24  ;;  %v7555_v33 = vmul.f32 %v12888_v34, %v1880_v13  ;;  %v12919_v37 = vld [vmem:[#allocation261_spill] sm:$0xff] }
 0x20c   : > { %v1924_v35 = vmul.f32 -0.5, %v12919_v37  ;;  %v7558_v38 = vmul.f32 0.6931472, %v3674_v47  ;;  %vm7560_vm10 = vcmp.lt.f32.partialorder %v1891_v49, 0.0004427343  ;;  %v12921_v39 = vmov 0 }
 0x20d   : > { %12917 = vst [vmem:[#allocation243_spill] sm:$0xff] %v7552_v16  ;;  %12918 = vst [vmem:[#allocation260_spill] sm:$0xff] %v7555_v33  ;;  %v12922_v39 = vsel %vm7560_vm10, 4294967295, %v12921_v39  ;;  %v1907_v28 = vadd.f32 1.0, %v1906_v21  ;;  %v1909_v31 = vand.u32 2147483647, %v12908_v52  ;;  %v7571_v34 = vmul.f32 %v12895_v4, %v1889_v14 }
 0x20e   : > { %12920 = vst [vmem:[#allocation245_spill] sm:$0xff] %v7558_v38  ;;  %12923 = vst [vmem:[#allocation262_spill] sm:$0xff] %v12922_v39  ;;  %v12924_v25 = vld [vmem:[#allocation278_spill] sm:$0xff]  ;;  %v1918_v24 = vand.u32 2147483647, %v12915_v6  ;;  %v12926_v47 = vld [vmem:[#allocation263_spill] sm:$0xff]  ;;  %v7578_v21 = vmul.f32 %v12901_v59, %v1898_v60  ;;  %v3680_v42 = vpop.eup %3679 }
 0x20f   : > { %3691 = vlog2.f32 %v12924_v25  ;;  %12925 = vst [vmem:[#allocation247_spill] sm:$0xff] %v7571_v34  ;;  %v1933_v49 = vmul.f32 -0.5, %v12926_v47  ;;  %v7575_v51 = vmul.f32 0.6931472, %v3676_v15  ;;  %vm7580_vm15 = vcmp.lt.f32.partialorder %v1900_v44, 0.0004427343 }
 0x210   : > { %v12928_v2 = vmov 0  ;;  %v1916_v25 = vadd.f32 1.0, %v1915_v9  ;;  %v1927_v40 = vand.u32 2147483647, %v12919_v37  ;;  %v7589_v14 = vmul.f32 0.6931472, %v3678_v46 }
 0x211   : > { %12927 = vst [vmem:[#allocation264_spill] sm:$0xff] %v7575_v51  ;;  %v12929_v2 = vsel %vm7580_vm15, 4294967295, %v12928_v2  ;;  %v1925_v13 = vadd.f32 1.0, %v1924_v35  ;;  %v12931_v15 = vld [vmem:[#allocation279_spill] sm:$0xff]  ;;  %v7597_v44 = vmul.f32 %v12908_v52, %v1907_v28  ;;  %vm7599_vm13 = vcmp.lt.f32.partialorder %v1909_v31, 0.0004427343  ;;  %v3682_v60 = vpop.eup %3681 }
 0x212   : > { %12930 = vst [vmem:[#allocation249_spill] sm:$0xff] %v7589_v14  ;;  %3693 = vlog2.f32 %v12931_v15  ;;  %v12932_v9 = vmov 0  ;;  %v1936_v59 = vand.u32 2147483647, %v12926_v47  ;;  %v12934_v46 = vld [vmem:[#allocation265_spill] sm:$0xff]  ;;  %v1934_v15 = vadd.f32 1.0, %v1933_v49 }
 0x213   : > { %v12933_v9 = vsel %vm7599_vm13, 4294967295, %v12932_v9  ;;  %v1942_v4 = vmul.f32 -0.5, %v12934_v46  ;;  %vm7605_vm12 = vcmp.lt.f32.partialorder %v1918_v24, 0.0004427343  ;;  %v1945_v16 = vand.u32 2147483647, %v12934_v46 }
 0x214   : > { %v12937_v43 = vld [vmem:[#allocation280_spill] sm:$0xff]  ;;  %v7616_v52 = vmul.f32 %v12915_v6, %v1916_v25  ;;  %vm7618_vm14 = vcmp.lt.f32.partialorder %v1927_v40, 0.0004427343  ;;  %v1951_v24 = vmul.f32 -0.5, %v12329_v58  ;;  %v7627_v49 = vmul.f32 0.6931472, %v3680_v42 }
 0x215   : > { %3695 = vlog2.f32 %v12937_v43  ;;  %v7630_v38 = vmul.f32 %v12919_v37, %v1925_v13  ;;  %v12941_v31 = vld [vmem:[#allocation281_spill] sm:$0xff]  ;;  %v3684_v6 = vpop.eup %3683  ;;  %vm7633_vm9 = vcmp.lt.f32.partialorder %v1936_v59, 0.0004427343  ;;  %v1943_v25 = vadd.f32 1.0, %v1942_v4  ;;  %v12944_v53 = vld [vmem:[#allocation282_spill] sm:$0xff]  ;;  %v12947_v13 = vld [vmem:[#allocation271_spill] sm:$0xff] }
 0x216   : > { %12940 = vst [vmem:[#allocation266_spill] sm:$0xff] %v7627_v49  ;;  %3697 = vlog2.f32 %v12941_v31  ;;  %v1960_v51 = vmul.f32 -0.5, %v12339_v20  ;;  %v3686_v1 = vpop.eup %3685  ;;  %v7639_v55 = vmul.f32 0.6931472, %v3682_v60  ;;  %v7642_v42 = vmul.f32 %v12926_v47, %v1934_v15  ;;  %v12948_v33 = vld [vmem:[#allocation283_spill] sm:$0xff]  ;;  %12968 = vst [vmem:[#allocation270_spill] sm:$0xff] %v7761_v62 }
 0x217   : > { %3699 = vlog2.f32 %v12944_v53  ;;  %vm7644_vm8 = vcmp.lt.f32.partialorder %v1945_v16, 0.0004427343  ;;  %v1969_v59 = vmul.f32 -0.5, %v12947_v13  ;;  %v3688_v31 = vpop.eup %3687  ;;  %v1952_v43 = vadd.f32 1.0, %v1951_v24  ;;  %12974 = vst [vmem:[#allocation272_spill] sm:$0xff] %v7781_v32  ;;  %v12975_v57 = vld [vmem:[#allocation273_spill] sm:$0xff] }
 0x218   : > { %v1954_v4 = vand.u32 2147483647, %v12329_v58  ;;  %v1978_v14 = vmul.f32 -0.5, %v12345_v29  ;;  %3701 = vlog2.f32 %v12948_v33  ;;  %v3690_v53 = vpop.eup %3689  ;;  %v7656_v16 = vmul.f32 0.6931472, %v3684_v6  ;;  %v12983_v30 = vld [vmem:[#allocation340_spill] sm:$0xff] }
 0x219   : > { %v1963_v60 = vand.u32 2147483647, %v12339_v20  ;;  %v1987_v15 = vmul.f32 -0.5, %v12354_v27  ;;  %v7660_v61 = vmul.f32 0.6931472, %v3686_v1  ;;  %v7663_v24 = vmul.f32 %v12934_v46, %v1943_v25  ;;  %v12987_v36 = vld [vmem:[#allocation126_spill] sm:$0xff] }
 0x21a   : > { %v1961_v5 = vadd.f32 1.0, %v1960_v51  ;;  %v1972_v33 = vand.u32 2147483647, %v12947_v13  ;;  %v7670_v6 = vmul.f32 0.6931472, %v3688_v31  ;;  %v1970_v49 = vadd.f32 1.0, %v1969_v59 }
 0x21b   : > { %v1981_v34 = vand.u32 2147483647, %v12345_v29  ;;  %v7673_v39 = vmul.f32 0.6931472, %v3690_v53  ;;  %v7676_v1 = vmul.f32 %v12329_v58, %v1952_v43  ;;  %vm7678_vm10 = vcmp.lt.f32.partialorder %v1954_v4, 0.0004427343 }
 0x21c   : > { %v3692_v19 = vpop.eup %3691  ;;  %v1979_v46 = vadd.f32 1.0, %v1978_v14  ;;  %vm7686_vm15 = vcmp.lt.f32.partialorder %v1963_v60, 0.0004427343  ;;  %v1988_v59 = vadd.f32 1.0, %v1987_v15  ;;  %v1990_v53 = vand.u32 2147483647, %v12354_v27 }
 0x21d   : > { %v7695_v43 = vmul.f32 0.6931472, %v3692_v19  ;;  %v7698_v14 = vmul.f32 %v12339_v20, %v1961_v5  ;;  %vm7700_vm11 = vcmp.lt.f32.partialorder %v1972_v33, 0.0004427343  ;;  %v7709_v15 = vmul.f32 %v12947_v13, %v1970_v49  ;;  %v12957_v19 = vld [vmem:[#allocation118_spill] sm:$0xff]  ;;  %v13015_v60 = vld [vmem:[#allocation131_spill] sm:$0xff] }
 0x21e   : > { %vm7711_vm13 = vcmp.lt.f32.partialorder %v1981_v34, 0.0004427343  ;;  %v12958_v20 = vsel %vm6753_vm0, %v6778_v12, %v6817_v63  ;;  %v7728_v49 = vmul.f32 %v12345_v29, %v1979_v46  ;;  %v12960_v34 = vld [vmem:[#allocation50_spill] sm:$0xff]  ;;  %v12963_v12 = vsel %vm6772_vm2, %v6784_v18, %v6831_v54  ;;  %v12977_v46 = vld [vmem:[#allocation337_spill] sm:$0xff]  ;;  %v13022_v58 = vld [vmem:[#allocation63_spill] sm:$0xff] }
 0x21f   : > { %v3694_v47 = vpop.eup %3693  ;;  %v7721_v5 = vadd.f32 %v12958_v20, %v12957_v19  ;;  %v7736_v13 = vadd.f32 %v12961_v10, %v12960_v34  ;;  %v7744_v63 = vadd.f32 %v12963_v12, %v6404_v26  ;;  %v7749_v29 = vmul.f32 %v12354_v27, %v1988_v59  ;;  %v12969_v27 = vld [vmem:[#allocation269_spill] sm:$0xff]  ;;  %v12978_v59 = vld [vmem:[#allocation343_spill] sm:$0xff]  ;;  %v12988_v7 = vld [vmem:[#allocation342_spill] sm:$0xff] }
 0x220   : > { %v7746_v19 = vmul.f32 0.6931472, %v3694_v47  ;;  %vm7751_vm0 = vcmp.lt.f32.partialorder %v1990_v53, 0.0004427343  ;;  %v12970_v18 = vsel %vm6798_vm4, %v6795_v50, %v6863_v11  ;;  %v12979_v53 = vsel %vm6809_vm6, %v12977_v46, %v12978_v59  ;;  %v12981_v11 = vld [vmem:[#allocation55_spill] sm:$0xff]  ;;  %v12984_v10 = vld [vmem:[#allocation345_spill] sm:$0xff] }
 0x221   : > { %12959 = vst [vmem:[#allocation251_spill] sm:$0xff] %v7721_v5  ;;  %12962 = vst [vmem:[#allocation268_spill] sm:$0xff] %v7736_v13  ;;  %v7773_v54 = vadd.f32 %v12970_v18, %v12969_v27  ;;  %v7789_v8 = vadd.f32 %v12979_v53, %v12975_v57  ;;  %v12985_v12 = vsel %vm6825_vm7, %v12983_v30, %v12984_v10  ;;  %vm12989_vm1 = vnez %v12988_v7  ;;  %v12990_v27 = vld [vmem:[#allocation135_spill] sm:$0xff]  ;;  %v12991_v18 = vld [vmem:[#allocation140_spill] sm:$0xff] }
 0x222   : > { %v3696_v33 = vpop.eup %3695  ;;  %12964 = vst [vmem:[#allocation253_spill] sm:$0xff] %v7744_v63  ;;  %v7799_v41 = vadd.f32 %v12985_v12, %v12981_v11  ;;  %v12992_v22 = vsel %vm12989_vm1, %v12990_v27, %v12991_v18  ;;  %v12994_v57 = vld [vmem:[#allocation56_spill] sm:$0xff]  ;;  %v13001_v34 = vld [vmem:[#allocation61_spill] sm:$0xff]  ;;  %v13002_v30 = vld [vmem:[#allocation138_spill] sm:$0xff]  ;;  %v13313_v35 = vsel %vm7633_vm9, %v7642_v42, %v7673_v39 }
 0x223   : > { %v3698_v23 = vpop.eup %3697  ;;  %12971 = vst [vmem:[#allocation255_spill] sm:$0xff] %v7773_v54  ;;  %12980 = vst [vmem:[#allocation257_spill] sm:$0xff] %v7789_v8  ;;  %v7791_v50 = vmul.f32 0.6931472, %v3696_v33  ;;  %v7807_v48 = vadd.f32 %v12992_v22, %v12987_v36  ;;  %v12995_v47 = vld [vmem:[#allocation136_spill] sm:$0xff]  ;;  %v12997_v33 = vld [vmem:[#allocation190_spill] sm:$0xff]  ;;  %vm13003_vm3 = vnez %v13002_v30 }
 0x224   : > { %v3700_v20 = vpop.eup %3699  ;;  %12986 = vst [vmem:[#allocation274_spill] sm:$0xff] %v7799_v41  ;;  %vm12996_vm2 = vnez %v12995_v47  ;;  %v12998_v46 = vld [vmem:[#allocation192_spill] sm:$0xff]  ;;  %v13004_v11 = vld [vmem:[#allocation137_spill] sm:$0xff]  ;;  %v13005_v10 = vld [vmem:[#allocation143_spill] sm:$0xff] }
 0x225   : > { %12993 = vst [vmem:[#allocation276_spill] sm:$0xff] %v7807_v48  ;;  %v12999_v59 = vsel %vm12996_vm2, %v12997_v33, %v12998_v46  ;;  %v13006_v12 = vsel %vm13003_vm3, %v13004_v11, %v13005_v10  ;;  %v13008_v26 = vld [vmem:[#allocation130_spill] sm:$0xff]  ;;  %v13009_v27 = vld [vmem:[#allocation348_spill] sm:$0xff]  ;;  %v13012_v18 = vld [vmem:[#allocation145_spill] sm:$0xff] }
 0x226   : > { %v7815_v53 = vadd.f32 %v12999_v59, %v12994_v57  ;;  %v7823_v7 = vadd.f32 %v13006_v12, %v13001_v34  ;;  %vm13010_vm4 = vnez %v13009_v27  ;;  %v13011_v36 = vld [vmem:[#allocation346_spill] sm:$0xff]  ;;  %v13016_v33 = vld [vmem:[#allocation349_spill] sm:$0xff]  ;;  %v13025_v34 = vld [vmem:[#allocation351_spill] sm:$0xff] }
 0x227   : > { %v13013_v22 = vsel %vm13010_vm4, %v13011_v36, %v13012_v18  ;;  %vm13017_vm5 = vnez %v13016_v33  ;;  %v13018_v57 = vld [vmem:[#allocation141_spill] sm:$0xff]  ;;  %v13019_v46 = vld [vmem:[#allocation354_spill] sm:$0xff]  ;;  %v13026_v10 = vld [vmem:[#allocation147_spill] sm:$0xff]  ;;  %v1968_v36 = vmul.f32 0.6931472, %v3698_v23 }
 0x228   : > { %13000 = vst [vmem:[#allocation259_spill] sm:$0xff] %v7815_v53  ;;  %13007 = vst [vmem:[#allocation277_spill] sm:$0xff] %v7823_v7  ;;  %v7831_v47 = vadd.f32 %v13013_v22, %v13008_v26  ;;  %v13020_v59 = vsel %vm13017_vm5, %v13018_v57, %v13019_v46  ;;  %v13023_v11 = vld [vmem:[#allocation142_spill] sm:$0xff]  ;;  %v3702_v7 = vpop.eup %3701  ;;  %v1956_v26 = vsel %vm7678_vm10, %v7676_v1, %v7746_v19  ;;  %v13029_v18 = vld [vmem:[#allocation132_spill] sm:$0xff] }
 0x229   : > { %v7839_v30 = vadd.f32 %v13020_v59, %v13015_v60  ;;  %vm13024_vm6 = vnez %v13023_v11  ;;  %v13030_v22 = vld [vmem:[#allocation144_spill] sm:$0xff]  ;;  %v13036_v59 = vld [vmem:[#allocation134_spill] sm:$0xff]  ;;  %v13037_v11 = vld [vmem:[#allocation193_spill] sm:$0xff] }
 0x22a   : > { %13014 = vst [vmem:[#allocation261_spill] sm:$0xff] %v7831_v47  ;;  %v13027_v12 = vsel %vm13024_vm6, %v13025_v34, %v13026_v10  ;;  %vm13031_vm7 = vnez %v13030_v22  ;;  %v13032_v60 = vld [vmem:[#allocation352_spill] sm:$0xff]  ;;  %vm13038_vm1 = vnez %v13037_v11  ;;  %v13040_v34 = vld [vmem:[#allocation153_spill] sm:$0xff]  ;;  %v13326_v37 = vld [vmem:[#allocation127_spill] sm:$0xff] }
 0x22b   : > { %13021 = vst [vmem:[#allocation278_spill] sm:$0xff] %v7839_v30  ;;  %v7847_v27 = vadd.f32 %v13027_v12, %v13022_v58  ;;  %v13033_v33 = vld [vmem:[#allocation356_spill] sm:$0xff]  ;;  %v13039_v58 = vld [vmem:[#allocation149_spill] sm:$0xff]  ;;  %v13383_v48 = vld [vmem:[#allocation302_spill] sm:$0xff] }
 0x22c   : > { %v13034_v57 = vsel %vm13031_vm7, %v13032_v60, %v13033_v33  ;;  %v13041_v10 = vsel %vm13038_vm1, %v13039_v58, %v13040_v34  ;;  %v13043_v51 = vld [vmem:[#allocation69_spill] sm:$0xff]  ;;  %v13044_v1 = vld [vmem:[#allocation148_spill] sm:$0xff]  ;;  %v13050_v60 = vld [vmem:[#allocation139_spill] sm:$0xff] }
 0x22d   : > { %13028 = vst [vmem:[#allocation263_spill] sm:$0xff] %v7847_v27  ;;  %v7859_v46 = vadd.f32 %v13034_v57, %v13029_v18  ;;  %v7867_v12 = vadd.f32 %v13041_v10, %v13036_v59  ;;  %v1977_v27 = vmul.f32 0.6931472, %v3700_v20  ;;  %vm13045_vm10 = vnez %v13044_v1  ;;  %v13046_v19 = vld [vmem:[#allocation152_spill] sm:$0xff]  ;;  %v13051_v18 = vld [vmem:[#allocation150_spill] sm:$0xff]  ;;  %v13054_v57 = vld [vmem:[#allocation197_spill] sm:$0xff] }
 0x22e   : > { %v13047_v23 = vld [vmem:[#allocation156_spill] sm:$0xff]  ;;  %vm13052_vm2 = vnez %v13051_v18  ;;  %v13053_v33 = vld [vmem:[#allocation194_spill] sm:$0xff]  ;;  %v13058_v59 = vld [vmem:[#allocation151_spill] sm:$0xff] }
 0x22f   : > { %13035 = vst [vmem:[#allocation279_spill] sm:$0xff] %v7859_v46  ;;  %13042 = vst [vmem:[#allocation265_spill] sm:$0xff] %v7867_v12  ;;  %v13048_v22 = vsel %vm13045_vm10, %v13046_v19, %v13047_v23  ;;  %v13055_v11 = vsel %vm13052_vm2, %v13053_v33, %v13054_v57  ;;  %v13057_v58 = vld [vmem:[#allocation70_spill] sm:$0xff]  ;;  %vm13059_vm3 = vnez %v13058_v59  ;;  %v13068_v18 = vld [vmem:[#allocation200_spill] sm:$0xff] }
 0x230   : > { %v7875_v30 = vadd.f32 %v13048_v22, %v13043_v51  ;;  %v7883_v46 = vadd.f32 %v13055_v11, %v13050_v60  ;;  %v13060_v20 = vld [vmem:[#allocation154_spill] sm:$0xff]  ;;  %v1965_v51 = vsel %vm7686_vm15, %v7698_v14, %v7791_v50  ;;  %v13067_v22 = vld [vmem:[#allocation196_spill] sm:$0xff]  ;;  %v13071_v57 = vld [vmem:[#allocation75_spill] sm:$0xff] }
 0x231   : > { %v13061_v34 = vld [vmem:[#allocation158_spill] sm:$0xff]  ;;  %v13072_v11 = vld [vmem:[#allocation360_spill] sm:$0xff]  ;;  %v13074_v59 = vld [vmem:[#allocation155_spill] sm:$0xff] }
 0x232   : > { %13049 = vst [vmem:[#allocation280_spill] sm:$0xff] %v7875_v30  ;;  %13056 = vst [vmem:[#allocation281_spill] sm:$0xff] %v7883_v46  ;;  %v13062_v10 = vsel %vm13059_vm3, %v13060_v20, %v13061_v34  ;;  %v13064_v19 = vld [vmem:[#allocation146_spill] sm:$0xff]  ;;  %vm13073_vm5 = vnez %v13072_v11  ;;  %v13075_v20 = vld [vmem:[#allocation361_spill] sm:$0xff]  ;;  %v1986_v46 = vmul.f32 0.6931472, %v3702_v7 }
 0x233   : > { %v7891_v1 = vadd.f32 %v13062_v10, %v13057_v58  ;;  %v13065_v23 = vld [vmem:[#allocation358_spill] sm:$0xff]  ;;  %v13076_v58 = vsel %vm13073_vm5, %v13074_v59, %v13075_v20  ;;  %v13078_v10 = vld [vmem:[#allocation159_spill] sm:$0xff]  ;;  %v13081_v31 = vld [vmem:[#allocation157_spill] sm:$0xff] }
 0x234   : > { %vm13066_vm4 = vnez %v13065_v23  ;;  %v7911_v34 = vadd.f32 %v13076_v58, %v13071_v57  ;;  %v13082_v14 = vld [vmem:[#allocation161_spill] sm:$0xff]  ;;  %v13092_v59 = vld [vmem:[#allocation182_spill] sm:$0xff]  ;;  %v13093_v57 = vld [vmem:[#allocation163_spill] sm:$0xff] }
 0x235   : > { %13063 = vst [vmem:[#allocation282_spill] sm:$0xff] %v7891_v1  ;;  %v13069_v60 = vsel %vm13066_vm4, %v13067_v22, %v13068_v18  ;;  %v13079_v1 = vld [vmem:[#allocation198_spill] sm:$0xff]  ;;  %v13085_v22 = vld [vmem:[#allocation76_spill] sm:$0xff]  ;;  %vm13094_vm7 = vnez %v13093_v57  ;;  %v13123_v4 = vld [vmem:[#allocation209_spill] sm:$0xff] }
 0x236   : > { %v7903_v33 = vadd.f32 %v13069_v60, %v13064_v19  ;;  %13077 = vst [vmem:[#allocation283_spill] sm:$0xff] %v7911_v34  ;;  %vm13080_vm6 = vnez %v13079_v1  ;;  %v13086_v19 = vld [vmem:[#allocation201_spill] sm:$0xff]  ;;  %v13088_v18 = vld [vmem:[#allocation160_spill] sm:$0xff]  ;;  %v13095_v20 = vld [vmem:[#allocation162_spill] sm:$0xff] }
 0x237   : > { %v13083_v50 = vsel %vm13080_vm6, %v13081_v31, %v13082_v14  ;;  %vm13087_vm15 = vnez %v13086_v19  ;;  %v13089_v60 = vld [vmem:[#allocation204_spill] sm:$0xff]  ;;  %v13099_v31 = vld [vmem:[#allocation77_spill] sm:$0xff]  ;;  %v13102_v7 = vld [vmem:[#allocation202_spill] sm:$0xff] }
 0x238   : > { %13070 = vst [vmem:[#allocation271_spill] sm:$0xff] %v7903_v33  ;;  %v7919_v23 = vadd.f32 %v13083_v50, %v13078_v10  ;;  %v13090_v11 = vsel %vm13087_vm15, %v13088_v18, %v13089_v60  ;;  %v13096_v58 = vld [vmem:[#allocation208_spill] sm:$0xff]  ;;  %v13106_v18 = vld [vmem:[#allocation82_spill] sm:$0xff]  ;;  %v13107_v60 = vld [vmem:[#allocation205_spill] sm:$0xff] }
 0x239   : > { %v7927_v33 = vadd.f32 %v13090_v11, %v13085_v22  ;;  %v13097_v1 = vsel %vm13094_vm7, %v13095_v20, %v13096_v58  ;;  %v13100_v10 = vld [vmem:[#allocation164_spill] sm:$0xff]  ;;  %v1974_v22 = vsel %vm7700_vm11, %v7709_v15, %v1968_v36  ;;  %vm13108_vm10 = vnez %v13107_v60  ;;  %v13109_v11 = vld [vmem:[#allocation165_spill] sm:$0xff]  ;;  %v13110_v57 = vld [vmem:[#allocation210_spill] sm:$0xff] }
 0x23a   : > { %13084 = vst [vmem:[#allocation118_spill] sm:$0xff] %v7919_v23  ;;  %v7935_v34 = vadd.f32 %v13097_v1, %v13092_v59  ;;  %vm13101_vm1 = vnez %v13100_v10  ;;  %v13103_v14 = vld [vmem:[#allocation168_spill] sm:$0xff]  ;;  %v13111_v20 = vsel %vm13108_vm10, %v13109_v11, %v13110_v57  ;;  %v13113_v58 = vld [vmem:[#allocation83_spill] sm:$0xff]  ;;  %v13114_v1 = vld [vmem:[#allocation206_spill] sm:$0xff] }
 0x23b   : > { %13091 = vst [vmem:[#allocation50_spill] sm:$0xff] %v7927_v33  ;;  %v13104_v50 = vsel %vm13101_vm1, %v13102_v7, %v13103_v14  ;;  %v7954_v59 = vadd.f32 %v13111_v20, %v13106_v18  ;;  %vm13115_vm2 = vnez %v13114_v1  ;;  %v13116_v10 = vld [vmem:[#allocation166_spill] sm:$0xff]  ;;  %v13120_v14 = vld [vmem:[#allocation84_spill] sm:$0xff]  ;;  %v1983_v18 = vsel %vm7711_vm13, %v7728_v49, %v1977_v27  ;;  %v13127_v11 = vld [vmem:[#allocation87_spill] sm:$0xff] }
 0x23c   : > { %13098 = vst [vmem:[#allocation269_spill] sm:$0xff] %v7935_v34  ;;  %v7943_v19 = vadd.f32 %v13104_v50, %v13099_v31  ;;  %v13117_v34 = vld [vmem:[#allocation170_spill] sm:$0xff]  ;;  %v13121_v50 = vld [vmem:[#allocation167_spill] sm:$0xff]  ;;  %v13128_v57 = vld [vmem:[#allocation169_spill] sm:$0xff] }
 0x23d   : > { %13112 = vst [vmem:[#allocation273_spill] sm:$0xff] %v7954_v59  ;;  %v13118_v7 = vsel %vm13115_vm2, %v13116_v10, %v13117_v34  ;;  %vm13122_vm3 = vnez %v13121_v50  ;;  %v13124_v15 = vld [vmem:[#allocation214_spill] sm:$0xff]  ;;  %vm13129_vm11 = vnez %v13128_v57  ;;  %v13130_v20 = vld [vmem:[#allocation212_spill] sm:$0xff]  ;;  %v13137_v50 = vld [vmem:[#allocation213_spill] sm:$0xff] }
 0x23e   : > { %13105 = vst [vmem:[#allocation54_spill] sm:$0xff] %v7943_v19  ;;  %v7962_v31 = vadd.f32 %v13118_v7, %v13113_v58  ;;  %v13125_v36 = vsel %vm13122_vm3, %v13123_v4, %v13124_v15  ;;  %v13131_v1 = vld [vmem:[#allocation174_spill] sm:$0xff]  ;;  %v13134_v10 = vld [vmem:[#allocation88_spill] sm:$0xff]  ;;  %v13135_v7 = vld [vmem:[#allocation171_spill] sm:$0xff]  ;;  %vm13205_vm3 = vnez %v12836_v56 }
 0x23f   : > { %v7970_v60 = vadd.f32 %v13125_v36, %v13120_v14  ;;  %v13132_v34 = vsel %vm13129_vm11, %v13130_v20, %v13131_v1  ;;  %vm13136_vm4 = vnez %v13135_v7  ;;  %v13141_v15 = vld [vmem:[#allocation89_spill] sm:$0xff]  ;;  %v13142_v36 = vld [vmem:[#allocation216_spill] sm:$0xff]  ;;  %v13152_v1 = vld [vmem:[#allocation178_spill] sm:$0xff] }
 0x240   : > { %13119 = vst [vmem:[#allocation129_spill] sm:$0xff] %v7962_v31  ;;  %v7981_v58 = vadd.f32 %v13132_v34, %v13127_v11  ;;  %v13138_v31 = vld [vmem:[#allocation220_spill] sm:$0xff]  ;;  %vm13143_vm5 = vnez %v13142_v36  ;;  %v13145_v49 = vld [vmem:[#allocation221_spill] sm:$0xff]  ;;  %v8354_v19 = vld [vmem:[%s4234_s29 + $0x80] sm:$0xff] }
 0x241   : > { %13126 = vst [vmem:[#allocation337_spill] sm:$0xff] %v7970_v60  ;;  %v13139_v4 = vsel %vm13136_vm4, %v13137_v50, %v13138_v31  ;;  %v13144_v25 = vld [vmem:[#allocation172_spill] sm:$0xff]  ;;  %v13148_v60 = vld [vmem:[#allocation91_spill] sm:$0xff]  ;;  %v13149_v20 = vld [vmem:[#allocation173_spill] sm:$0xff] }
 0x242   : > { %13133 = vst [vmem:[#allocation343_spill] sm:$0xff] %v7981_v58  ;;  %v7989_v14 = vadd.f32 %v13139_v4, %v13134_v10  ;;  %v13146_v27 = vsel %vm13143_vm5, %v13144_v25, %v13145_v49  ;;  %vm13150_vm13 = vnez %v13149_v20  ;;  %v13151_v11 = vld [vmem:[#allocation217_spill] sm:$0xff]  ;;  %v13155_v58 = vld [vmem:[#allocation92_spill] sm:$0xff]  ;;  %v13156_v31 = vld [vmem:[#allocation175_spill] sm:$0xff] }
 0x243   : > { %v7997_v57 = vadd.f32 %v13146_v27, %v13141_v15  ;;  %v13153_v34 = vsel %vm13150_vm13, %v13151_v11, %v13152_v1  ;;  %vm13157_vm6 = vnez %v13156_v31  ;;  %v13158_v10 = vld [vmem:[#allocation218_spill] sm:$0xff]  ;;  %v13159_v50 = vld [vmem:[#allocation180_spill] sm:$0xff]  ;;  %v13163_v25 = vld [vmem:[#allocation177_spill] sm:$0xff]  ;;  %13376 = vst [vmem:[#allocation208_spill] sm:$0xff] %v8354_v19 }
 0x244   : > { %13140 = vst [vmem:[#allocation55_spill] sm:$0xff] %v7989_v14  ;;  %v8005_v7 = vadd.f32 %v13153_v34, %v13148_v60  ;;  %v13160_v4 = vsel %vm13157_vm6, %v13158_v10, %v13159_v50  ;;  %v13162_v14 = vld [vmem:[#allocation93_spill] sm:$0xff]  ;;  %vm13164_vm15 = vnez %v13163_v25  ;;  %v13165_v15 = vld [vmem:[#allocation176_spill] sm:$0xff]  ;;  %v13170_v11 = vld [vmem:[#allocation179_spill] sm:$0xff] }
 0x245   : > { %13147 = vst [vmem:[#allocation133_spill] sm:$0xff] %v7997_v57  ;;  %v8013_v36 = vadd.f32 %v13160_v4, %v13155_v58  ;;  %v13166_v49 = vld [vmem:[#allocation228_spill] sm:$0xff]  ;;  %v13169_v57 = vld [vmem:[#allocation95_spill] sm:$0xff]  ;;  %vm13171_vm7 = vnez %v13170_v11  ;;  %v13172_v60 = vld [vmem:[#allocation222_spill] sm:$0xff]  ;;  %v1992_v58 = vsel %vm7751_vm0, %v7749_v29, %v1986_v46 }
 0x246   : > { %13154 = vst [vmem:[#allocation340_spill] sm:$0xff] %v8005_v7  ;;  %v13167_v27 = vsel %vm13164_vm15, %v13165_v15, %v13166_v49  ;;  %v13173_v1 = vld [vmem:[#allocation185_spill] sm:$0xff]  ;;  %v13176_v10 = vld [vmem:[#allocation96_spill] sm:$0xff]  ;;  %v13180_v25 = vld [vmem:[#allocation230_spill] sm:$0xff] }
 0x247   : > { %13161 = vst [vmem:[#allocation345_spill] sm:$0xff] %v8013_v36  ;;  %v8021_v20 = vadd.f32 %v13167_v27, %v13162_v14  ;;  %v13174_v34 = vsel %vm13171_vm7, %v13172_v60, %v13173_v1  ;;  %v13177_v50 = vld [vmem:[#allocation224_spill] sm:$0xff]  ;;  %v13179_v4 = vld [vmem:[#allocation225_spill] sm:$0xff]  ;;  %v13186_v11 = vld [vmem:[#allocation226_spill] sm:$0xff]  ;;  %vm13253_vm7 = vnez %v12882_v3 }
 0x248   : > { %v8029_v31 = vadd.f32 %v13174_v34, %v13169_v57  ;;  %vm13178_vm1 = vnez %v13177_v50  ;;  %v13183_v49 = vld [vmem:[#allocation97_spill] sm:$0xff]  ;;  %v13190_v1 = vld [vmem:[#allocation99_spill] sm:$0xff]  ;;  %v13191_v34 = vld [vmem:[#allocation184_spill] sm:$0xff] }
 0x249   : > { %13168 = vst [vmem:[#allocation126_spill] sm:$0xff] %v8021_v20  ;;  %v13181_v15 = vsel %vm13178_vm1, %v13179_v4, %v13180_v25  ;;  %v13184_v27 = vld [vmem:[#allocation181_spill] sm:$0xff]  ;;  %v13187_v20 = vld [vmem:[#allocation187_spill] sm:$0xff]  ;;  %vm13192_vm2 = vnez %v13191_v34  ;;  %v13377_v33 = vld [vmem:[#allocation300_spill] sm:$0xff] }
 0x24a   : > { %13175 = vst [vmem:[#allocation342_spill] sm:$0xff] %v8029_v31  ;;  %v8040_v14 = vadd.f32 %v13181_v15, %v13176_v10  ;;  %vm13185_vm10 = vnez %v13184_v27  ;;  %v13193_v29 = vld [vmem:[#allocation183_spill] sm:$0xff]  ;;  %v13194_v45 = vld [vmem:[#allocation233_spill] sm:$0xff]  ;;  %v13197_v31 = vld [vmem:[#allocation100_spill] sm:$0xff]  ;;  %v8358_v23 = vmul.f32 %v8354_v19, %v13377_v33 }
 0x24b   : > { %v13188_v60 = vsel %vm13185_vm10, %v13186_v11, %v13187_v20  ;;  %v13195_v46 = vsel %vm13192_vm2, %v13193_v29, %v13194_v45  ;;  %v13198_v4 = vld [vmem:[#allocation229_spill] sm:$0xff]  ;;  %v13200_v10 = vld [vmem:[#allocation186_spill] sm:$0xff]  ;;  %v13206_v20 = vld [vmem:[#allocation232_spill] sm:$0xff] }
 0x24c   : > { %13182 = vst [vmem:[#allocation135_spill] sm:$0xff] %v8040_v14  ;;  %v8048_v57 = vadd.f32 %v13188_v60, %v13183_v49  ;;  %v8056_v50 = vadd.f32 %v13195_v46, %v13190_v1  ;;  %vm13199_vm0 = vnez %v13198_v4  ;;  %v13201_v25 = vld [vmem:[#allocation189_spill] sm:$0xff]  ;;  %v13207_v49 = vld [vmem:[#allocation240_spill] sm:$0xff]  ;;  %v13210_v34 = vld [vmem:[#allocation103_spill] sm:$0xff] }
 0x24d   : > { %v13202_v15 = vsel %vm13199_vm0, %v13200_v10, %v13201_v25  ;;  %v13204_v14 = vld [vmem:[#allocation101_spill] sm:$0xff]  ;;  %v13208_v11 = vsel %vm13205_vm3, %v13206_v20, %v13207_v49  ;;  %v13211_v29 = vld [vmem:[#allocation234_spill] sm:$0xff]  ;;  %v13213_v1 = vld [vmem:[#allocation188_spill] sm:$0xff]  ;;  %13378 = vst [vmem:[#allocation77_spill] sm:$0xff] %v8358_v23 }
 0x24e   : > { %13189 = vst [vmem:[#allocation140_spill] sm:$0xff] %v8048_v57  ;;  %13196 = vst [vmem:[#allocation56_spill] sm:$0xff] %v8056_v50  ;;  %v8064_v27 = vadd.f32 %v13202_v15, %v13197_v31  ;;  %v8072_v60 = vadd.f32 %v13208_v11, %v13204_v14  ;;  %vm13212_vm11 = vnez %v13211_v29  ;;  %v13214_v45 = vld [vmem:[#allocation241_spill] sm:$0xff]  ;;  %v13217_v50 = vld [vmem:[#allocation104_spill] sm:$0xff] }
 0x24f   : > { %v13215_v46 = vsel %vm13212_vm11, %v13213_v1, %v13214_v45  ;;  %v13218_v10 = vld [vmem:[#allocation191_spill] sm:$0xff]  ;;  %v13220_v31 = vld [vmem:[#allocation236_spill] sm:$0xff]  ;;  %v13225_v20 = vld [vmem:[#allocation238_spill] sm:$0xff] }
 0x250   : > { %13203 = vst [vmem:[#allocation136_spill] sm:$0xff] %v8064_v27  ;;  %13209 = vst [vmem:[#allocation190_spill] sm:$0xff] %v8072_v60  ;;  %v8080_v4 = vadd.f32 %v13215_v46, %v13210_v34  ;;  %vm13219_vm4 = vnez %v13218_v10  ;;  %v13221_v25 = vld [vmem:[#allocation207_spill] sm:$0xff]  ;;  %v13224_v27 = vld [vmem:[#allocation105_spill] sm:$0xff]  ;;  %vm13226_vm5 = vnez %v13225_v20 }
 0x251   : > { %v13222_v15 = vsel %vm13219_vm4, %v13220_v31, %v13221_v25  ;;  %v13227_v14 = vld [vmem:[#allocation237_spill] sm:$0xff]  ;;  %v13228_v49 = vld [vmem:[#allocation244_spill] sm:$0xff]  ;;  %v13231_v60 = vld [vmem:[#allocation107_spill] sm:$0xff]  ;;  %vm13299_vm4 = vnez %v12929_v2  ;;  %v13307_v2 = vsel %vm7605_vm12, %v7616_v52, %v7660_v61  ;;  %v13316_v52 = vsel %vm7644_vm8, %v7663_v24, %v7695_v43 }
 0x252   : > { %13216 = vst [vmem:[#allocation192_spill] sm:$0xff] %v8080_v4  ;;  %v8088_v56 = vadd.f32 %v13222_v15, %v13217_v50  ;;  %v13229_v11 = vsel %vm13226_vm5, %v13227_v14, %v13228_v49  ;;  %v13232_v1 = vld [vmem:[#allocation199_spill] sm:$0xff]  ;;  %v13238_v4 = vld [vmem:[#allocation108_spill] sm:$0xff]  ;;  %v13241_v50 = vld [vmem:[#allocation242_spill] sm:$0xff]  ;;  %vm13303_vm5 = vnez %v12933_v9 }
 0x253   : > { %v8096_v29 = vadd.f32 %v13229_v11, %v13224_v27  ;;  %vm13233_vm13 = vnez %v13232_v1  ;;  %v13234_v34 = vld [vmem:[#allocation195_spill] sm:$0xff]  ;;  %v13248_v27 = vld [vmem:[#allocation246_spill] sm:$0xff]  ;;  %v13324_v42 = vld [vmem:[#allocation125_spill] sm:$0xff] }
 0x254   : > { %13223 = vst [vmem:[#allocation61_spill] sm:$0xff] %v8088_v56  ;;  %v13235_v45 = vld [vmem:[#allocation215_spill] sm:$0xff]  ;;  %v13245_v56 = vld [vmem:[#allocation110_spill] sm:$0xff]  ;;  %v13329_v43 = vld [vmem:[#allocation284_spill] sm:$0xff] }
 0x255   : > { %13230 = vst [vmem:[#allocation138_spill] sm:$0xff] %v8096_v29  ;;  %v13236_v46 = vsel %vm13233_vm13, %v13234_v34, %v13235_v45  ;;  %v13239_v31 = vld [vmem:[#allocation203_spill] sm:$0xff]  ;;  %v13252_v29 = vld [vmem:[#allocation318_spill] sm:$0xff]  ;;  %v8347_v36 = vld [vmem:[%s4234_s29 + $0x78] sm:$0xff] }
 0x256   : > { %v8104_v10 = vadd.f32 %v13236_v46, %v13231_v60  ;;  %vm13240_vm6 = vnez %v13239_v31  ;;  %v13242_v25 = vld [vmem:[#allocation219_spill] sm:$0xff]  ;;  %v13258_v31 = vld [vmem:[#allocation248_spill] sm:$0xff]  ;;  %v13315_v61 = vld [vmem:[#allocation330_spill] sm:$0xff]  ;;  %13373 = vst [vmem:[#allocation163_spill] sm:$0xff] %v8347_v36 }
 0x257   : > { %v13243_v15 = vsel %vm13240_vm6, %v13241_v50, %v13242_v25  ;;  %v13246_v14 = vld [vmem:[#allocation211_spill] sm:$0xff]  ;;  %vm13259_vm1 = vnez %v13258_v31  ;;  %v8224_v28 = vadd.f32 %v13316_v52, %v13315_v61  ;;  %v8242_v24 = vld [vmem:[%s4234_s29] sm:$0xff]  ;;  %v13380_v12 = vld [vmem:[#allocation301_spill] sm:$0xff] }
 0x258   : > { %13237 = vst [vmem:[#allocation137_spill] sm:$0xff] %v8104_v10  ;;  %v8112_v20 = vadd.f32 %v13243_v15, %v13238_v4  ;;  %vm13247_vm15 = vnez %v13246_v14  ;;  %v13249_v49 = vld [vmem:[#allocation223_spill] sm:$0xff]  ;;  %v13263_v15 = vld [vmem:[#allocation321_spill] sm:$0xff]  ;;  %13328 = vst [vmem:[#allocation153_spill] sm:$0xff] %v8242_v24 }
 0x259   : > { %v13250_v11 = vsel %vm13247_vm15, %v13248_v27, %v13249_v49  ;;  %v13254_v60 = vld [vmem:[#allocation231_spill] sm:$0xff]  ;;  %13317 = vst [vmem:[#allocation144_spill] sm:$0xff] %v8224_v28  ;;  %v13347_v61 = vld [vmem:[#allocation290_spill] sm:$0xff]  ;;  %v8368_v53 = vld [vmem:[%s4234_s29 + $0x90] sm:$0xff] }
 0x25a   : > { %13244 = vst [vmem:[#allocation143_spill] sm:$0xff] %v8112_v20  ;;  %v8120_v1 = vadd.f32 %v13250_v11, %v13245_v56  ;;  %v13255_v34 = vsel %vm13253_vm7, %v7474_v0, %v13254_v60  ;;  %v13257_v46 = vld [vmem:[#allocation111_spill] sm:$0xff]  ;;  %v13266_v56 = vld [vmem:[#allocation250_spill] sm:$0xff]  ;;  %v13270_v11 = vld [vmem:[#allocation113_spill] sm:$0xff]  ;;  %v8372_v41 = vmul.f32 %v8368_v53, %v13383_v48 }
 0x25b   : > { %v8128_v45 = vadd.f32 %v13255_v34, %v13252_v29  ;;  %v13260_v4 = vld [vmem:[#allocation239_spill] sm:$0xff]  ;;  %v13271_v0 = vld [vmem:[#allocation254_spill] sm:$0xff]  ;;  %v13273_v29 = vld [vmem:[#allocation252_spill] sm:$0xff]  ;;  %13382 = vst [vmem:[#allocation168_spill] sm:$0xff] %v8368_v53 }
 0x25c   : > { %13251 = vst [vmem:[#allocation130_spill] sm:$0xff] %v8120_v1  ;;  %v13261_v50 = vsel %vm13259_vm1, %v7479_v17, %v13260_v4  ;;  %v13264_v14 = vld [vmem:[#allocation227_spill] sm:$0xff]  ;;  %vm13272_vm2 = vnez %v13271_v0  ;;  %v13274_v60 = vld [vmem:[#allocation245_spill] sm:$0xff]  ;;  %v13280_v4 = vld [vmem:[#allocation256_spill] sm:$0xff] }
 0x25d   : > { %13256 = vst [vmem:[#allocation348_spill] sm:$0xff] %v8128_v45  ;;  %v8136_v25 = vadd.f32 %v13261_v50, %v13257_v46  ;;  %vm13265_vm10 = vnez %v13264_v14  ;;  %v13267_v27 = vld [vmem:[#allocation243_spill] sm:$0xff]  ;;  %v13275_v34 = vsel %vm13272_vm2, %v13273_v29, %v13274_v60  ;;  %v13281_v50 = vld [vmem:[#allocation264_spill] sm:$0xff]  ;;  %v13291_v29 = vld [vmem:[#allocation325_spill] sm:$0xff] }
 0x25e   : > { %v13268_v49 = vsel %vm13265_vm10, %v13266_v56, %v13267_v27  ;;  %v8152_v31 = vadd.f32 %v13275_v34, %v13270_v11  ;;  %v13277_v17 = vld [vmem:[#allocation323_spill] sm:$0xff]  ;;  %v13284_v56 = vld [vmem:[#allocation114_spill] sm:$0xff]  ;;  %v13287_v27 = vld [vmem:[#allocation260_spill] sm:$0xff]  ;;  %13384 = vst [vmem:[#allocation82_spill] sm:$0xff] %v8372_v41 }
 0x25f   : > { %13262 = vst [vmem:[#allocation346_spill] sm:$0xff] %v8136_v25  ;;  %v8144_v3 = vadd.f32 %v13268_v49, %v13263_v15  ;;  %v13278_v46 = vld [vmem:[#allocation235_spill] sm:$0xff]  ;;  %v13285_v15 = vld [vmem:[#allocation258_spill] sm:$0xff]  ;;  %v13288_v49 = vld [vmem:[#allocation249_spill] sm:$0xff] }
 0x260   : > { %13276 = vst [vmem:[#allocation131_spill] sm:$0xff] %v8152_v31  ;;  %vm13279_vm0 = vnez %v13278_v46  ;;  %vm13286_vm3 = vnez %v13285_v15  ;;  %v13292_v11 = vld [vmem:[#allocation262_spill] sm:$0xff]  ;;  %v13294_v60 = vld [vmem:[#allocation247_spill] sm:$0xff]  ;;  %v13368_v45 = vld [vmem:[#allocation297_spill] sm:$0xff] }
 0x261   : > { %13269 = vst [vmem:[#allocation145_spill] sm:$0xff] %v8144_v3  ;;  %v13282_v14 = vsel %vm13279_vm0, %v13280_v4, %v13281_v50  ;;  %v13289_v0 = vsel %vm13286_vm3, %v13287_v27, %v13288_v49  ;;  %vm13293_vm11 = vnez %v13292_v11  ;;  %v13295_v34 = vld [vmem:[#allocation266_spill] sm:$0xff]  ;;  %v13298_v4 = vld [vmem:[#allocation116_spill] sm:$0xff]  ;;  %v13306_v27 = vld [vmem:[#allocation117_spill] sm:$0xff]  ;;  %v8236_v11 = vadd.f32 %v1983_v18, %v13324_v42 }
 0x262   : > { %v8160_v25 = vadd.f32 %v13282_v14, %v13277_v17  ;;  %v8168_v3 = vadd.f32 %v13289_v0, %v13284_v56  ;;  %v13296_v46 = vsel %vm13293_vm11, %v13294_v60, %v13295_v34  ;;  %v13300_v17 = vsel %vm13299_vm4, %v7578_v21, %v7639_v55  ;;  %v13302_v14 = vld [vmem:[#allocation327_spill] sm:$0xff]  ;;  %v13309_v55 = vld [vmem:[#allocation328_spill] sm:$0xff]  ;;  %v13332_v34 = vld [vmem:[#allocation285_spill] sm:$0xff] }
 0x263   : > { %v8176_v31 = vadd.f32 %v13296_v46, %v13291_v29  ;;  %v8184_v50 = vadd.f32 %v13300_v17, %v13298_v4  ;;  %v13304_v56 = vsel %vm13303_vm5, %v7597_v44, %v7656_v16  ;;  %v8200_v49 = vadd.f32 %v13307_v2, %v13306_v27  ;;  %v13312_v44 = vld [vmem:[#allocation119_spill] sm:$0xff]  ;;  %v13322_v29 = vld [vmem:[#allocation333_spill] sm:$0xff]  ;;  %13325 = vst [vmem:[#allocation193_spill] sm:$0xff] %v8236_v11  ;;  %v8256_v18 = vld [vmem:[%s4234_s29 + $0x10] sm:$0xff] }
 0x264   : > { %13283 = vst [vmem:[#allocation349_spill] sm:$0xff] %v8160_v25  ;;  %13290 = vst [vmem:[#allocation141_spill] sm:$0xff] %v8168_v3  ;;  %v8192_v15 = vadd.f32 %v13304_v56, %v13302_v14  ;;  %v13310_v21 = vsel %vm7618_vm14, %v7630_v38, %v7670_v6  ;;  %v8216_v16 = vadd.f32 %v13313_v35, %v13312_v44  ;;  %v13318_v38 = vld [vmem:[#allocation121_spill] sm:$0xff]  ;;  %v13320_v0 = vld [vmem:[#allocation123_spill] sm:$0xff] }
 0x265   : > { %13297 = vst [vmem:[#allocation354_spill] sm:$0xff] %v8176_v31  ;;  %13301 = vst [vmem:[#allocation63_spill] sm:$0xff] %v8184_v50  ;;  %v8208_v9 = vadd.f32 %v13310_v21, %v13309_v55  ;;  %v8227_v6 = vadd.f32 %v1956_v26, %v13318_v38  ;;  %v8230_v40 = vadd.f32 %v1965_v51, %v13320_v0  ;;  %v8249_v51 = vld [vmem:[%s4234_s29 + $0x8] sm:$0xff]  ;;  %v13335_v46 = vld [vmem:[#allocation286_spill] sm:$0xff] }
 0x266   : > { %13305 = vst [vmem:[#allocation142_spill] sm:$0xff] %v8192_v15  ;;  %13308 = vst [vmem:[#allocation351_spill] sm:$0xff] %v8200_v49  ;;  %v8233_v39 = vadd.f32 %v1974_v22, %v13322_v29  ;;  %v8239_v60 = vadd.f32 %v1992_v58, %v13326_v37  ;;  %v8246_v26 = vmul.f32 %v8242_v24, %v13329_v43  ;;  %v8263_v4 = vld [vmem:[%s4234_s29 + $0x18] sm:$0xff]  ;;  %v13338_v17 = vld [vmem:[#allocation287_spill] sm:$0xff] }
 0x267   : > { %13311 = vst [vmem:[#allocation147_spill] sm:$0xff] %v8208_v9  ;;  %13314 = vst [vmem:[#allocation132_spill] sm:$0xff] %v8216_v16  ;;  %v8253_v22 = vmul.f32 %v8249_v51, %v13332_v34  ;;  %v8260_v58 = vmul.f32 %v8256_v18, %v13335_v46  ;;  %v8267_v14 = vmul.f32 %v8263_v4, %v13338_v17  ;;  %v8270_v56 = vld [vmem:[%s4234_s29 + $0x20] sm:$0xff]  ;;  %v13341_v27 = vld [vmem:[#allocation288_spill] sm:$0xff] }
 0x268   : > { %13319 = vst [vmem:[#allocation352_spill] sm:$0xff] %v8227_v6  ;;  %13321 = vst [vmem:[#allocation356_spill] sm:$0xff] %v8230_v40  ;;  %v8274_v2 = vmul.f32 %v8270_v56, %v13341_v27  ;;  %v8277_v55 = vld [vmem:[%s4234_s29 + $0x28] sm:$0xff]  ;;  %v13344_v21 = vld [vmem:[#allocation289_spill] sm:$0xff] }
 0x269   : > { %13323 = vst [vmem:[#allocation134_spill] sm:$0xff] %v8233_v39  ;;  %13327 = vst [vmem:[#allocation149_spill] sm:$0xff] %v8239_v60  ;;  %v8281_v44 = vmul.f32 %v8277_v55, %v13344_v21  ;;  %v8284_v35 = vld [vmem:[%s4234_s29 + $0x30] sm:$0xff]  ;;  %v8291_v38 = vld [vmem:[%s4234_s29 + $0x38] sm:$0xff] }
 0x26a   : > { %13330 = vst [vmem:[#allocation69_spill] sm:$0xff] %v8246_v26  ;;  %13331 = vst [vmem:[#allocation148_spill] sm:$0xff] %v8249_v51  ;;  %v8288_v52 = vmul.f32 %v8284_v35, %v13347_v61  ;;  %v13350_v0 = vld [vmem:[#allocation291_spill] sm:$0xff]  ;;  %v8298_v42 = vld [vmem:[%s4234_s29 + $0x40] sm:$0xff] }
 0x26b   : > { %13333 = vst [vmem:[#allocation152_spill] sm:$0xff] %v8253_v22  ;;  %13334 = vst [vmem:[#allocation156_spill] sm:$0xff] %v8256_v18  ;;  %v8295_v29 = vmul.f32 %v8291_v38, %v13350_v0  ;;  %v13353_v37 = vld [vmem:[#allocation292_spill] sm:$0xff]  ;;  %v8305_v11 = vld [vmem:[%s4234_s29 + $0x48] sm:$0xff] }
 0x26c   : > { %13336 = vst [vmem:[#allocation139_spill] sm:$0xff] %v8260_v58  ;;  %13337 = vst [vmem:[#allocation150_spill] sm:$0xff] %v8263_v4  ;;  %v8302_v60 = vmul.f32 %v8298_v42, %v13353_v37  ;;  %v13356_v39 = vld [vmem:[#allocation293_spill] sm:$0xff]  ;;  %v8312_v6 = vld [vmem:[%s4234_s29 + $0x50] sm:$0xff] }
 0x26d   : > { %13339 = vst [vmem:[#allocation194_spill] sm:$0xff] %v8267_v14  ;;  %13340 = vst [vmem:[#allocation197_spill] sm:$0xff] %v8270_v56  ;;  %v8309_v40 = vmul.f32 %v8305_v11, %v13356_v39  ;;  %v13359_v28 = vld [vmem:[#allocation294_spill] sm:$0xff]  ;;  %v8319_v9 = vld [vmem:[%s4234_s29 + $0x58] sm:$0xff] }
 0x26e   : > { %13342 = vst [vmem:[#allocation70_spill] sm:$0xff] %v8274_v2  ;;  %13343 = vst [vmem:[#allocation151_spill] sm:$0xff] %v8277_v55  ;;  %v8316_v16 = vmul.f32 %v8312_v6, %v13359_v28  ;;  %v13362_v49 = vld [vmem:[#allocation295_spill] sm:$0xff]  ;;  %v8326_v50 = vld [vmem:[%s4234_s29 + $0x60] sm:$0xff] }
 0x26f   : > { %13345 = vst [vmem:[#allocation154_spill] sm:$0xff] %v8281_v44  ;;  %13346 = vst [vmem:[#allocation158_spill] sm:$0xff] %v8284_v35  ;;  %v8323_v15 = vmul.f32 %v8319_v9, %v13362_v49  ;;  %v13365_v31 = vld [vmem:[#allocation296_spill] sm:$0xff]  ;;  %v8333_v25 = vld [vmem:[%s4234_s29 + $0x68] sm:$0xff] }
 0x270   : > { %13348 = vst [vmem:[#allocation146_spill] sm:$0xff] %v8288_v52  ;;  %13349 = vst [vmem:[#allocation358_spill] sm:$0xff] %v8291_v38  ;;  %v8330_v3 = vmul.f32 %v8326_v50, %v13365_v31  ;;  %v8337_v1 = vmul.f32 %v8333_v25, %v13368_v45  ;;  %v8340_v20 = vld [vmem:[%s4234_s29 + $0x70] sm:$0xff]  ;;  %v13371_v10 = vld [vmem:[#allocation298_spill] sm:$0xff] }
 0x271   : > { %13351 = vst [vmem:[#allocation196_spill] sm:$0xff] %v8295_v29  ;;  %13352 = vst [vmem:[#allocation200_spill] sm:$0xff] %v8298_v42  ;;  %v8344_v57 = vmul.f32 %v8340_v20, %v13371_v10  ;;  %v13374_v7 = vld [vmem:[#allocation299_spill] sm:$0xff]  ;;  %v8375_v8 = vld [vmem:[%s4234_s29 + $0x98] sm:$0xff] }
 0x272   : > { %13354 = vst [vmem:[#allocation75_spill] sm:$0xff] %v8302_v60  ;;  %13355 = vst [vmem:[#allocation360_spill] sm:$0xff] %v8305_v11  ;;  %v8351_v59 = vmul.f32 %v8347_v36, %v13374_v7  ;;  %v8361_v30 = vld [vmem:[%s4234_s29 + $0x88] sm:$0xff]  ;;  %v8382_v62 = vld [vmem:[%s4234_s29 + $0xa0] sm:$0xff] }
 0x273   : > { %13357 = vst [vmem:[#allocation155_spill] sm:$0xff] %v8309_v40  ;;  %13358 = vst [vmem:[#allocation361_spill] sm:$0xff] %v8312_v6  ;;  %v8365_v47 = vmul.f32 %v8361_v30, %v13380_v12  ;;  %v13386_v32 = vld [vmem:[#allocation303_spill] sm:$0xff]  ;;  %v13389_v63 = vld [vmem:[#allocation304_spill] sm:$0xff] }
 0x274   : > { %13360 = vst [vmem:[#allocation159_spill] sm:$0xff] %v8316_v16  ;;  %13361 = vst [vmem:[#allocation198_spill] sm:$0xff] %v8319_v9  ;;  %v8379_v54 = vmul.f32 %v8375_v8, %v13386_v32  ;;  %v8386_v13 = vmul.f32 %v8382_v62, %v13389_v63  ;;  %v8389_v5 = vld [vmem:[%s4234_s29 + $0xa8] sm:$0xff]  ;;  %v8396_v23 = vld [vmem:[%s4234_s29 + $0xb0] sm:$0xff] }
 0x275   : > { %13363 = vst [vmem:[#allocation157_spill] sm:$0xff] %v8323_v15  ;;  %13364 = vst [vmem:[#allocation161_spill] sm:$0xff] %v8326_v50  ;;  %v13401_v15 = vld [vmem:[#allocation308_spill] sm:$0xff]  ;;  %v8417_v16 = vld [vmem:[%s4234_s29 + $0xc8] sm:$0xff] }
 0x276   : > { %13366 = vst [vmem:[#allocation76_spill] sm:$0xff] %v8330_v3  ;;  %13367 = vst [vmem:[#allocation201_spill] sm:$0xff] %v8333_v25  ;;  %v8410_v3 = vld [vmem:[%s4234_s29 + $0xc0] sm:$0xff]  ;;  %v13404_v40 = vld [vmem:[#allocation309_spill] sm:$0xff] }
 0x277   : > { %13369 = vst [vmem:[#allocation160_spill] sm:$0xff] %v8337_v1  ;;  %13370 = vst [vmem:[#allocation204_spill] sm:$0xff] %v8340_v20  ;;  %v13398_v1 = vld [vmem:[#allocation307_spill] sm:$0xff]  ;;  %v8424_v60 = vld [vmem:[%s4234_s29 + $0xd0] sm:$0xff] }
 0x278   : > { %13372 = vst [vmem:[#allocation182_spill] sm:$0xff] %v8344_v57  ;;  %13375 = vst [vmem:[#allocation162_spill] sm:$0xff] %v8351_v59  ;;  %v13395_v59 = vld [vmem:[#allocation306_spill] sm:$0xff]  ;;  %v8403_v57 = vld [vmem:[%s4234_s29 + $0xb8] sm:$0xff] }
 0x279   : > { %13379 = vst [vmem:[#allocation164_spill] sm:$0xff] %v8361_v30  ;;  %13381 = vst [vmem:[#allocation202_spill] sm:$0xff] %v8365_v47  ;;  %v13392_v47 = vld [vmem:[#allocation305_spill] sm:$0xff]  ;;  %v13407_v29 = vld [vmem:[#allocation310_spill] sm:$0xff] }
 0x27a   : > { %13385 = vst [vmem:[#allocation205_spill] sm:$0xff] %v8375_v8  ;;  %13387 = vst [vmem:[#allocation165_spill] sm:$0xff] %v8379_v54  ;;  %v8393_v41 = vmul.f32 %v8389_v5, %v13392_v47  ;;  %v8400_v54 = vmul.f32 %v8396_v23, %v13395_v59  ;;  %v8431_v52 = vld [vmem:[%s4234_s29 + $0xd8] sm:$0xff]  ;;  %v13410_v44 = vld [vmem:[#allocation311_spill] sm:$0xff] }
 0x27b   : > { %13388 = vst [vmem:[#allocation210_spill] sm:$0xff] %v8382_v62  ;;  %13390 = vst [vmem:[#allocation83_spill] sm:$0xff] %v8386_v13  ;;  %v8407_v13 = vmul.f32 %v8403_v57, %v13398_v1  ;;  %v8438_v2 = vld [vmem:[%s4234_s29 + $0xe0] sm:$0xff]  ;;  %v13413_v14 = vld [vmem:[#allocation312_spill] sm:$0xff] }
 0x27c   : > { %13391 = vst [vmem:[#allocation206_spill] sm:$0xff] %v8389_v5  ;;  %13393 = vst [vmem:[#allocation166_spill] sm:$0xff] %v8393_v41  ;;  %v8414_v41 = vmul.f32 %v8410_v3, %v13401_v15  ;;  %v8445_v58 = vld [vmem:[%s4234_s29 + $0xe8] sm:$0xff]  ;;  %v13416_v22 = vld [vmem:[#allocation313_spill] sm:$0xff] }
 0x27d   : > { %13394 = vst [vmem:[#allocation170_spill] sm:$0xff] %v8396_v23  ;;  %13396 = vst [vmem:[#allocation84_spill] sm:$0xff] %v8400_v54  ;;  %v8421_v54 = vmul.f32 %v8417_v16, %v13404_v40  ;;  %v8452_v26 = vld [vmem:[%s4234_s29 + $0xf0] sm:$0xff]  ;;  %v13431_v23 = vld [vmem:[#allocation319_spill] sm:$0xff] }
 0x27e   : > { %13397 = vst [vmem:[#allocation167_spill] sm:$0xff] %v8403_v57  ;;  %13399 = vst [vmem:[#allocation209_spill] sm:$0xff] %v8407_v13  ;;  %v8428_v13 = vmul.f32 %v8424_v60, %v13407_v29  ;;  %v13428_v57 = vld [vmem:[#allocation317_spill] sm:$0xff]  ;;  %v13434_v5 = vld [vmem:[#allocation320_spill] sm:$0xff] }
 0x27f   : > { %13400 = vst [vmem:[#allocation214_spill] sm:$0xff] %v8410_v3  ;;  %13402 = vst [vmem:[#allocation87_spill] sm:$0xff] %v8414_v41  ;;  %v8435_v41 = vmul.f32 %v8431_v52, %v13410_v44  ;;  %v13425_v3 = vld [vmem:[#allocation316_spill] sm:$0xff]  ;;  %v13437_v62 = vld [vmem:[#allocation322_spill] sm:$0xff] }
 0x280   : > { %13403 = vst [vmem:[#allocation169_spill] sm:$0xff] %v8417_v16  ;;  %13405 = vst [vmem:[#allocation212_spill] sm:$0xff] %v8421_v54  ;;  %v8442_v54 = vmul.f32 %v8438_v2, %v13413_v14  ;;  %v13422_v16 = vld [vmem:[#allocation315_spill] sm:$0xff]  ;;  %v13440_v8 = vld [vmem:[#allocation324_spill] sm:$0xff] }
 0x281   : > { %13406 = vst [vmem:[#allocation174_spill] sm:$0xff] %v8424_v60  ;;  %13408 = vst [vmem:[#allocation88_spill] sm:$0xff] %v8428_v13  ;;  %v8449_v13 = vmul.f32 %v8445_v58, %v13416_v22  ;;  %v13419_v60 = vld [vmem:[#allocation314_spill] sm:$0xff]  ;;  %v13446_v30 = vld [vmem:[#allocation329_spill] sm:$0xff] }
 0x282   : > { %13409 = vst [vmem:[#allocation171_spill] sm:$0xff] %v8431_v52  ;;  %13411 = vst [vmem:[#allocation213_spill] sm:$0xff] %v8435_v41  ;;  %v8456_v41 = vmul.f32 %v8452_v26, %v13419_v60  ;;  %v8459_v52 = vld [vmem:[%s4234_s29 + $0xf8] sm:$0xff]  ;;  %v13443_v53 = vld [vmem:[#allocation326_spill] sm:$0xff] }
 0x283   : > { %13412 = vst [vmem:[#allocation220_spill] sm:$0xff] %v8438_v2  ;;  %13414 = vst [vmem:[#allocation89_spill] sm:$0xff] %v8442_v54  ;;  %v8463_v54 = vmul.f32 %v8459_v52, %v13422_v16  ;;  %v8466_v2 = vld [vmem:[%s4234_s29 + $0x100] sm:$0xff]  ;;  %v13449_v19 = vld [vmem:[#allocation331_spill] sm:$0xff] }
 0x284   : > { %13415 = vst [vmem:[#allocation216_spill] sm:$0xff] %v8445_v58  ;;  %13417 = vst [vmem:[#allocation172_spill] sm:$0xff] %v8449_v13  ;;  %v8470_v13 = vmul.f32 %v8466_v2, %v13425_v3  ;;  %v8473_v58 = vld [vmem:[%s4234_s29 + $0x108] sm:$0xff]  ;;  %v13452_v36 = vld [vmem:[#allocation332_spill] sm:$0xff] }
 0x285   : > { %13418 = vst [vmem:[#allocation221_spill] sm:$0xff] %v8452_v26  ;;  %13420 = vst [vmem:[#allocation91_spill] sm:$0xff] %v8456_v41  ;;  %v8477_v41 = vmul.f32 %v8473_v58, %v13428_v57  ;;  %v8480_v26 = vld [vmem:[%s4234_s29 + $0x110] sm:$0xff]  ;;  %v13455_v20 = vld [vmem:[#allocation334_spill] sm:$0xff] }
 0x286   : > { %13421 = vst [vmem:[#allocation173_spill] sm:$0xff] %v8459_v52  ;;  %13423 = vst [vmem:[#allocation217_spill] sm:$0xff] %v8463_v54  ;;  %v8484_v54 = vmul.f32 %v8480_v26, %v13431_v23  ;;  %v8487_v52 = vld [vmem:[%s4234_s29 + $0x118] sm:$0xff]  ;;  %v13458_v25 = vld [vmem:[#allocation335_spill] sm:$0xff] }
 0x287   : > { %13424 = vst [vmem:[#allocation178_spill] sm:$0xff] %v8466_v2  ;;  %13426 = vst [vmem:[#allocation92_spill] sm:$0xff] %v8470_v13  ;;  %v8491_v13 = vmul.f32 %v8487_v52, %v13434_v5  ;;  %v8494_v2 = vld [vmem:[%s4234_s29 + $0x120] sm:$0xff]  ;;  %v13461_v50 = vld [vmem:[#allocation336_spill] sm:$0xff] }
 0x288   : > { %13427 = vst [vmem:[#allocation175_spill] sm:$0xff] %v8473_v58  ;;  %13429 = vst [vmem:[#allocation218_spill] sm:$0xff] %v8477_v41  ;;  %v8498_v41 = vmul.f32 %v8494_v2, %v13437_v62  ;;  %v8501_v58 = vld [vmem:[%s4234_s29 + $0x128] sm:$0xff]  ;;  %v13464_v9 = vld [vmem:[#allocation338_spill] sm:$0xff] }
 0x289   : > { %13430 = vst [vmem:[#allocation180_spill] sm:$0xff] %v8480_v26  ;;  %13432 = vst [vmem:[#allocation93_spill] sm:$0xff] %v8484_v54  ;;  %v8505_v54 = vmul.f32 %v8501_v58, %v13440_v8  ;;  %v8508_v26 = vld [vmem:[%s4234_s29 + $0x130] sm:$0xff]  ;;  %v13467_v6 = vld [vmem:[#allocation339_spill] sm:$0xff] }
 0x28a   : > { %13433 = vst [vmem:[#allocation177_spill] sm:$0xff] %v8487_v52  ;;  %13435 = vst [vmem:[#allocation176_spill] sm:$0xff] %v8491_v13  ;;  %v8512_v13 = vmul.f32 %v8508_v26, %v13443_v53  ;;  %v8515_v52 = vld [vmem:[%s4234_s29 + $0x138] sm:$0xff]  ;;  %v13473_v42 = vld [vmem:[#allocation344_spill] sm:$0xff] }
 0x28b   : > { %13436 = vst [vmem:[#allocation228_spill] sm:$0xff] %v8494_v2  ;;  %13438 = vst [vmem:[#allocation95_spill] sm:$0xff] %v8498_v41  ;;  %v8519_v41 = vmul.f32 %v8515_v52, %v13446_v30  ;;  %v8522_v2 = vld [vmem:[%s4234_s29 + $0x140] sm:$0xff]  ;;  %v13470_v11 = vld [vmem:[#allocation341_spill] sm:$0xff] }
 0x28c   : > { %13439 = vst [vmem:[#allocation179_spill] sm:$0xff] %v8501_v58  ;;  %13441 = vst [vmem:[#allocation222_spill] sm:$0xff] %v8505_v54  ;;  %v8526_v54 = vmul.f32 %v8522_v2, %v13449_v19  ;;  %v8529_v58 = vld [vmem:[%s4234_s29 + $0x148] sm:$0xff]  ;;  %v13479_v35 = vld [vmem:[#allocation350_spill] sm:$0xff] }
 0x28d   : > { %13442 = vst [vmem:[#allocation185_spill] sm:$0xff] %v8508_v26  ;;  %13444 = vst [vmem:[#allocation96_spill] sm:$0xff] %v8512_v13  ;;  %v8533_v13 = vmul.f32 %v8529_v58, %v13452_v36  ;;  %v8536_v26 = vld [vmem:[%s4234_s29 + $0x150] sm:$0xff]  ;;  %v13476_v38 = vld [vmem:[#allocation347_spill] sm:$0xff] }
 0x28e   : > { %13445 = vst [vmem:[#allocation224_spill] sm:$0xff] %v8515_v52  ;;  %13447 = vst [vmem:[#allocation225_spill] sm:$0xff] %v8519_v41  ;;  %v8540_v41 = vmul.f32 %v8536_v26, %v13455_v20  ;;  %v8543_v52 = vld [vmem:[%s4234_s29 + $0x158] sm:$0xff]  ;;  %v13485_v56 = vld [vmem:[#allocation355_spill] sm:$0xff] }
 0x28f   : > { %13448 = vst [vmem:[#allocation230_spill] sm:$0xff] %v8522_v2  ;;  %13450 = vst [vmem:[#allocation97_spill] sm:$0xff] %v8526_v54  ;;  %v8547_v54 = vmul.f32 %v8543_v52, %v13458_v25  ;;  %v8550_v2 = vld [vmem:[%s4234_s29 + $0x160] sm:$0xff]  ;;  %v13482_v55 = vld [vmem:[#allocation353_spill] sm:$0xff] }
 0x290   : > { %13451 = vst [vmem:[#allocation181_spill] sm:$0xff] %v8529_v58  ;;  %13453 = vst [vmem:[#allocation226_spill] sm:$0xff] %v8533_v13  ;;  %v8554_v13 = vmul.f32 %v8550_v2, %v13461_v50  ;;  %v8557_v58 = vld [vmem:[%s4234_s29 + $0x168] sm:$0xff]  ;;  %v13488_v4 = vld [vmem:[#allocation357_spill] sm:$0xff] }
 0x291   : > { %13454 = vst [vmem:[#allocation187_spill] sm:$0xff] %v8536_v26  ;;  %13456 = vst [vmem:[#allocation99_spill] sm:$0xff] %v8540_v41  ;;  %v8561_v41 = vmul.f32 %v8557_v58, %v13464_v9  ;;  %v8564_v26 = vld [vmem:[%s4234_s29 + $0x170] sm:$0xff]  ;;  %v13491_v18 = vld [vmem:[#allocation359_spill] sm:$0xff] }
 0x292   : > { %13457 = vst [vmem:[#allocation184_spill] sm:$0xff] %v8543_v52  ;;  %13459 = vst [vmem:[#allocation183_spill] sm:$0xff] %v8547_v54  ;;  %v8568_v54 = vmul.f32 %v8564_v26, %v13467_v6  ;;  %v8571_v52 = vld [vmem:[%s4234_s29 + $0x178] sm:$0xff]  ;;  %v13494_v51 = vld [vmem:[#allocation267_spill] sm:$0xff] }
 0x293   : > { %13460 = vst [vmem:[#allocation233_spill] sm:$0xff] %v8550_v2  ;;  %13462 = vst [vmem:[#allocation100_spill] sm:$0xff] %v8554_v13  ;;  %v8575_v13 = vmul.f32 %v8571_v52, %v13470_v11  ;;  %v8578_v2 = vld [vmem:[%s4234_s29 + $0x180] sm:$0xff]  ;;  %v13497_v24 = vld [vmem:[#allocation120_spill] sm:$0xff] }
 0x294   : > { %13463 = vst [vmem:[#allocation229_spill] sm:$0xff] %v8557_v58  ;;  %13465 = vst [vmem:[#allocation186_spill] sm:$0xff] %v8561_v41  ;;  %v8582_v41 = vmul.f32 %v8578_v2, %v13473_v42  ;;  %v8585_v58 = vld [vmem:[%s4234_s29 + $0x188] sm:$0xff]  ;;  %v13531_v20 = vld [vmem:[#allocation153_spill] sm:$0xff] }
 0x295   : > { %13466 = vst [vmem:[#allocation189_spill] sm:$0xff] %v8564_v26  ;;  %13468 = vst [vmem:[#allocation101_spill] sm:$0xff] %v8568_v54  ;;  %v8589_v54 = vmul.f32 %v8585_v58, %v13476_v38  ;;  %v8592_v26 = vld [vmem:[%s4234_s29 + $0x190] sm:$0xff]  ;;  %v13534_v9 = vld [vmem:[#allocation150_spill] sm:$0xff] }
 0x296   : > { %13469 = vst [vmem:[#allocation232_spill] sm:$0xff] %v8571_v52  ;;  %13471 = vst [vmem:[#allocation240_spill] sm:$0xff] %v8575_v13  ;;  %v8596_v13 = vmul.f32 %v8592_v26, %v13479_v35  ;;  %v8599_v52 = vld [vmem:[%s4234_s29 + $0x198] sm:$0xff]  ;;  %v13532_v25 = vld [vmem:[#allocation148_spill] sm:$0xff] }
 0x297   : > { %13472 = vst [vmem:[#allocation103_spill] sm:$0xff] %v8578_v2  ;;  %13474 = vst [vmem:[#allocation234_spill] sm:$0xff] %v8582_v41  ;;  %v8603_v41 = vmul.f32 %v8599_v52, %v13482_v55  ;;  %v8606_v2 = vld [vmem:[%s4234_s29 + $0x1a0] sm:$0xff]  ;;  %v13533_v50 = vld [vmem:[#allocation156_spill] sm:$0xff] }
 0x298   : > { %13475 = vst [vmem:[#allocation188_spill] sm:$0xff] %v8585_v58  ;;  %13477 = vst [vmem:[#allocation241_spill] sm:$0xff] %v8589_v54  ;;  %v8610_v54 = vmul.f32 %v8606_v2, %v13485_v56  ;;  %v8613_v58 = vld [vmem:[%s4234_s29 + $0x1a8] sm:$0xff]  ;;  %v13535_v6 = vld [vmem:[#allocation197_spill] sm:$0xff] }
 0x299   : > { %13478 = vst [vmem:[#allocation104_spill] sm:$0xff] %v8592_v26  ;;  %13480 = vst [vmem:[#allocation191_spill] sm:$0xff] %v8596_v13  ;;  %v8617_v13 = vmul.f32 %v8613_v58, %v13488_v4  ;;  %v8620_v26 = vld [vmem:[%s4234_s29 + $0x1b0] sm:$0xff]  ;;  %v13500_v4 = vld [vmem:[#allocation51_spill] sm:$0xff] }
 0x29a   : > { %13481 = vst [vmem:[#allocation236_spill] sm:$0xff] %v8599_v52  ;;  %13483 = vst [vmem:[#allocation207_spill] sm:$0xff] %v8603_v41  ;;  %v8624_v41 = vmul.f32 %v8620_v26, %v13491_v18  ;;  %v8627_v52 = vld [vmem:[%s4234_s29 + $0x1b8] sm:$0xff]  ;;  %v13536_v11 = vld [vmem:[#allocation151_spill] sm:$0xff] }
 0x29b   : > { %13484 = vst [vmem:[#allocation105_spill] sm:$0xff] %v8606_v2  ;;  %13486 = vst [vmem:[#allocation238_spill] sm:$0xff] %v8610_v54  ;;  %v8631_v54 = vmul.f32 %v8627_v52, %v13494_v51  ;;  %v8634_v2 = vld [vmem:[%s4234_s29 + $0x1c0] sm:$0xff]  ;;  %v13539_v35 = vld [vmem:[#allocation200_spill] sm:$0xff] }
 0x29c   : > { %13487 = vst [vmem:[#allocation237_spill] sm:$0xff] %v8613_v58  ;;  %13489 = vst [vmem:[#allocation244_spill] sm:$0xff] %v8617_v13  ;;  %v8638_v58 = vmul.f32 %v8634_v2, %v13497_v24  ;;  %v8641_v13 = vld [vmem:[%s4234_s29 + $0x1c8] sm:$0xff]  ;;  %v13537_v42 = vld [vmem:[#allocation158_spill] sm:$0xff] }
 0x29d   : > { %13490 = vst [vmem:[#allocation107_spill] sm:$0xff] %v8620_v26  ;;  %13492 = vst [vmem:[#allocation199_spill] sm:$0xff] %v8624_v41  ;;  %v8645_v56 = vmul.f32 %v8641_v13, %v13500_v4  ;;  %v8648_v41 = vld [vmem:[%s4234_s29 + $0x1d0] sm:$0xff]  ;;  %v13503_v26 = vld [vmem:[#allocation122_spill] sm:$0xff] }
 0x29e   : > { %13493 = vst [vmem:[#allocation195_spill] sm:$0xff] %v8627_v52  ;;  %13495 = vst [vmem:[#allocation215_spill] sm:$0xff] %v8631_v54  ;;  %v8652_v18 = vmul.f32 %v8648_v41, %v13503_v26  ;;  %v8655_v52 = vld [vmem:[%s4234_s29 + $0x1d8] sm:$0xff]  ;;  %v13506_v54 = vld [vmem:[#allocation124_spill] sm:$0xff] }
 0x29f   : > { %13496 = vst [vmem:[#allocation108_spill] sm:$0xff] %v8634_v2  ;;  %13498 = vst [vmem:[#allocation203_spill] sm:$0xff] %v8638_v58  ;;  %v8659_v51 = vmul.f32 %v8655_v52, %v13506_v54  ;;  %v8662_v2 = vld [vmem:[%s4234_s29 + $0x1e0] sm:$0xff]  ;;  %v13509_v58 = vld [vmem:[#allocation275_spill] sm:$0xff] }
 0x2a0   : > { %13499 = vst [vmem:[#allocation242_spill] sm:$0xff] %v8641_v13  ;;  %13501 = vst [vmem:[#allocation219_spill] sm:$0xff] %v8645_v56  ;;  %v8666_v24 = vmul.f32 %v8662_v2, %v13509_v58  ;;  %v8669_v13 = vld [vmem:[%s4234_s29 + $0x1e8] sm:$0xff]  ;;  %v13512_v56 = vld [vmem:[#allocation128_spill] sm:$0xff]  ;;  %v13591_v40 = vmov %v8662_v2  ;;  %v13597_v58 = vsub.f32 1.0, %v13532_v25 }
 0x2a1   : > { %13502 = vst [vmem:[#allocation110_spill] sm:$0xff] %v8648_v41  ;;  %13504 = vst [vmem:[#allocation211_spill] sm:$0xff] %v8652_v18  ;;  %v8673_v4 = vmul.f32 %v8669_v13, %v13512_v56  ;;  %v8676_v41 = vld [vmem:[%s4234_s29 + $0x1f0] sm:$0xff]  ;;  %v13515_v18 = vld [vmem:[#allocation62_spill] sm:$0xff]  ;;  %v13592_v15 = vmov %v8669_v13  ;;  %v13599_v56 = vsub.f32 1.0, %v13533_v50 }
 0x2a2   : > { %13505 = vst [vmem:[#allocation246_spill] sm:$0xff] %v8655_v52  ;;  %13507 = vst [vmem:[#allocation223_spill] sm:$0xff] %v8659_v51  ;;  %v8680_v26 = vmul.f32 %v8676_v41, %v13515_v18  ;;  %v8683_v52 = vld [vmem:[%s4234_s29 + $0x1f8] sm:$0xff]  ;;  %v13518_v51 = vld [vmem:[#allocation68_spill] sm:$0xff]  ;;  %v13593_v1 = vmov %v8676_v41  ;;  %v13594_v18 = vsub.f32 1.0, %v13329_v43  ;;  %v13601_v43 = vsub.f32 1.0, %v13534_v9 }
 0x2a3   : > { %13508 = vst [vmem:[#allocation318_spill] sm:$0xff] %v8662_v2  ;;  %13510 = vst [vmem:[#allocation231_spill] sm:$0xff] %v8666_v24  ;;  %v8687_v54 = vmul.f32 %v8683_v52, %v13518_v51  ;;  %v13538_v38 = vld [vmem:[#allocation358_spill] sm:$0xff]  ;;  %v13540_v55 = vld [vmem:[#allocation360_spill] sm:$0xff]  ;;  %v13596_v2 = vsub.f32 1.0, %v13332_v34  ;;  %v13603_v34 = vsub.f32 1.0, %v13535_v6 }
 0x2a4   : > { %13511 = vst [vmem:[#allocation111_spill] sm:$0xff] %v8669_v13  ;;  %13513 = vst [vmem:[#allocation248_spill] sm:$0xff] %v8673_v4  ;;  %v13541_v51 = vld [vmem:[#allocation361_spill] sm:$0xff]  ;;  %v13542_v36 = vld [vmem:[#allocation198_spill] sm:$0xff]  ;;  %v13598_v13 = vsub.f32 1.0, %v13335_v46  ;;  %v13605_v46 = vsub.f32 1.0, %v13536_v11 }
 0x2a5   : > { %13514 = vst [vmem:[#allocation239_spill] sm:$0xff] %v8676_v41  ;;  %13516 = vst [vmem:[#allocation321_spill] sm:$0xff] %v8680_v26  ;;  %v13543_v19 = vld [vmem:[#allocation161_spill] sm:$0xff]  ;;  %v13545_v53 = vld [vmem:[#allocation204_spill] sm:$0xff]  ;;  %v8827_v24 = vmul.f32 %v13597_v58, %v13596_v2  ;;  %v13600_v41 = vsub.f32 1.0, %v13338_v17  ;;  %v13604_v58 = vsub.f32 1.0, %v13344_v21 }
 0x2a6   : > { %13517 = vst [vmem:[#allocation227_spill] sm:$0xff] %v8683_v52  ;;  %13519 = vst [vmem:[#allocation250_spill] sm:$0xff] %v8687_v54  ;;  %v13544_v30 = vld [vmem:[#allocation201_spill] sm:$0xff]  ;;  %v13546_v8 = vld [vmem:[#allocation163_spill] sm:$0xff]  ;;  %v13595_v54 = vsub.f32 1.0, %v13531_v20  ;;  %v8833_v4 = vmul.f32 %v13599_v56, %v13598_v13  ;;  %v13606_v13 = vsub.f32 1.0, %v13347_v61 }
 0x2a7   : > { %v13547_v62 = vld [vmem:[#allocation208_spill] sm:$0xff]  ;;  %v13550_v57 = vld [vmem:[#allocation205_spill] sm:$0xff]  ;;  %v13551_v3 = vld [vmem:[#allocation210_spill] sm:$0xff]  ;;  %v8839_v26 = vmul.f32 %v13601_v43, %v13600_v41  ;;  %v8851_v2 = vmul.f32 %v13605_v46, %v13604_v58  ;;  %v13607_v17 = vsub.f32 1.0, %v13537_v42  ;;  %v13608_v41 = vsub.f32 1.0, %v13350_v0 }
 0x2a8   : > { %v13548_v5 = vld [vmem:[#allocation164_spill] sm:$0xff]  ;;  %v13583_v59 = vld [vmem:[#allocation105_spill] sm:$0xff]  ;;  %v13585_v16 = vld [vmem:[#allocation107_spill] sm:$0xff]  ;;  %v8821_v60 = vmul.f32 %v13595_v54, %v13594_v18  ;;  %v13602_v54 = vsub.f32 1.0, %v13341_v27  ;;  %v13609_v27 = vsub.f32 1.0, %v13538_v38  ;;  %v13611_v21 = vsub.f32 1.0, %v13539_v35 }
 0x2a9   : > { %v13549_v23 = vld [vmem:[#allocation168_spill] sm:$0xff]  ;;  %v13584_v47 = vld [vmem:[#allocation237_spill] sm:$0xff]  ;;  %v13588_v14 = vld [vmem:[#allocation242_spill] sm:$0xff]  ;;  %v8857_v56 = vmul.f32 %v13607_v17, %v13606_v13  ;;  %v13612_v58 = vsub.f32 1.0, %v13356_v39  ;;  %v13613_v61 = vsub.f32 1.0, %v13540_v55  ;;  %v13614_v13 = vsub.f32 1.0, %v13359_v28 }
 0x2aa   : > { %v13587_v22 = vld [vmem:[#allocation108_spill] sm:$0xff]  ;;  %v13589_v44 = vld [vmem:[#allocation110_spill] sm:$0xff]  ;;  %v8845_v18 = vmul.f32 %v13603_v34, %v13602_v54  ;;  %v8863_v43 = vmul.f32 %v13609_v27, %v13608_v41  ;;  %v13610_v54 = vsub.f32 1.0, %v13353_v37  ;;  %v13615_v0 = vsub.f32 1.0, %v13541_v51 }
 0x2ab   : > { %v13590_v29 = vld [vmem:[#allocation246_spill] sm:$0xff]  ;;  %v8875_v46 = vmul.f32 %v13613_v61, %v13612_v58  ;;  %v13616_v41 = vsub.f32 1.0, %v13362_v49  ;;  %v13617_v37 = vsub.f32 1.0, %v13542_v36  ;;  %v13619_v39 = vsub.f32 1.0, %v13543_v19 }
 0x2ac   : > { %v8869_v34 = vmul.f32 %v13611_v21, %v13610_v54  ;;  %v8881_v17 = vmul.f32 %v13615_v0, %v13614_v13  ;;  %v13618_v54 = vsub.f32 1.0, %v13365_v31  ;;  %v13620_v58 = vsub.f32 1.0, %v13368_v45 }
 0x2ad   : > { %v8887_v27 = vmul.f32 %v13617_v37, %v13616_v41  ;;  %v13621_v28 = vsub.f32 1.0, %v13544_v30  ;;  %v13622_v13 = vsub.f32 1.0, %v13371_v10  ;;  %v13623_v49 = vsub.f32 1.0, %v13545_v53 }
 0x2ae   : > { %v8893_v21 = vmul.f32 %v13619_v39, %v13618_v54  ;;  %v13624_v41 = vsub.f32 1.0, %v13374_v7  ;;  %v13625_v31 = vsub.f32 1.0, %v13546_v8  ;;  %v13626_v54 = vsub.f32 1.0, %v13377_v33 }
 0x2af   : > { %v8899_v61 = vmul.f32 %v13621_v28, %v13620_v58  ;;  %v8905_v0 = vmul.f32 %v13623_v49, %v13622_v13  ;;  %v13627_v45 = vsub.f32 1.0, %v13547_v62  ;;  %v13628_v58 = vsub.f32 1.0, %v13380_v12 }
 0x2b0   : > { %v8911_v37 = vmul.f32 %v13625_v31, %v13624_v41  ;;  %v13629_v10 = vsub.f32 1.0, %v13548_v5  ;;  %v13630_v13 = vsub.f32 1.0, %v13383_v48  ;;  %v13631_v7 = vsub.f32 1.0, %v13549_v23  ;;  %v13638_v5 = vld [vmem:[#allocation206_spill] sm:$0xff] }
 0x2b1   : > { %v8917_v39 = vmul.f32 %v13627_v45, %v13626_v54  ;;  %v13632_v41 = vsub.f32 1.0, %v13386_v32  ;;  %v13633_v33 = vsub.f32 1.0, %v13550_v57  ;;  %v13634_v54 = vsub.f32 1.0, %v13389_v63  ;;  %v13642_v23 = vld [vmem:[#allocation170_spill] sm:$0xff]  ;;  %v13646_v57 = vld [vmem:[#allocation167_spill] sm:$0xff] }
 0x2b2   : > { %v8923_v28 = vmul.f32 %v13629_v10, %v13628_v58  ;;  %v8929_v49 = vmul.f32 %v13631_v7, %v13630_v13  ;;  %v13635_v12 = vsub.f32 1.0, %v13551_v3  ;;  %v13636_v58 = vld [vmem:[#allocation305_spill] sm:$0xff]  ;;  %v13639_v48 = vsub.f32 1.0, %v13638_v5  ;;  %v13640_v13 = vld [vmem:[#allocation306_spill] sm:$0xff] }
 0x2b3   : > { %v8935_v31 = vmul.f32 %v13633_v33, %v13632_v41  ;;  %v13637_v10 = vsub.f32 1.0, %v13636_v58  ;;  %v13641_v7 = vsub.f32 1.0, %v13640_v13  ;;  %v13643_v32 = vsub.f32 1.0, %v13642_v23  ;;  %v13644_v41 = vld [vmem:[#allocation307_spill] sm:$0xff]  ;;  %v13650_v3 = vld [vmem:[#allocation214_spill] sm:$0xff]  ;;  %v13654_v5 = vld [vmem:[#allocation169_spill] sm:$0xff] }
 0x2b4   : > { %v8941_v45 = vmul.f32 %v13635_v12, %v13634_v54  ;;  %v13645_v33 = vsub.f32 1.0, %v13644_v41  ;;  %v13647_v63 = vsub.f32 1.0, %v13646_v57  ;;  %v13648_v54 = vld [vmem:[#allocation308_spill] sm:$0xff]  ;;  %v13651_v58 = vsub.f32 1.0, %v13650_v3  ;;  %v13658_v23 = vld [vmem:[#allocation174_spill] sm:$0xff]  ;;  %v13662_v57 = vld [vmem:[#allocation171_spill] sm:$0xff] }
 0x2b5   : > { %v8947_v62 = vmul.f32 %v13639_v48, %v13637_v10  ;;  %v8953_v8 = vmul.f32 %v13643_v32, %v13641_v7  ;;  %v13649_v12 = vsub.f32 1.0, %v13648_v54  ;;  %v13652_v10 = vld [vmem:[#allocation309_spill] sm:$0xff]  ;;  %v13655_v13 = vsub.f32 1.0, %v13654_v5  ;;  %v13656_v7 = vld [vmem:[#allocation310_spill] sm:$0xff]  ;;  %v13666_v3 = vld [vmem:[#allocation220_spill] sm:$0xff] }
 0x2b6   : > { %v8959_v53 = vmul.f32 %v13647_v63, %v13645_v33  ;;  %v13653_v48 = vsub.f32 1.0, %v13652_v10  ;;  %v13657_v32 = vsub.f32 1.0, %v13656_v7  ;;  %v13659_v41 = vsub.f32 1.0, %v13658_v23  ;;  %v13660_v33 = vld [vmem:[#allocation311_spill] sm:$0xff]  ;;  %v13670_v5 = vld [vmem:[#allocation216_spill] sm:$0xff]  ;;  %v13674_v23 = vld [vmem:[#allocation221_spill] sm:$0xff] }
 0x2b7   : > { %v8965_v30 = vmul.f32 %v13651_v58, %v13649_v12  ;;  %v13661_v63 = vsub.f32 1.0, %v13660_v33  ;;  %v13663_v54 = vsub.f32 1.0, %v13662_v57  ;;  %v13664_v12 = vld [vmem:[#allocation312_spill] sm:$0xff]  ;;  %v13667_v10 = vsub.f32 1.0, %v13666_v3  ;;  %v13678_v57 = vld [vmem:[#allocation173_spill] sm:$0xff]  ;;  %v13682_v3 = vld [vmem:[#allocation178_spill] sm:$0xff] }
 0x2b8   : > { %v8971_v19 = vmul.f32 %v13655_v13, %v13653_v48  ;;  %v8977_v36 = vmul.f32 %v13659_v41, %v13657_v32  ;;  %v13665_v58 = vsub.f32 1.0, %v13664_v12  ;;  %v13668_v48 = vld [vmem:[#allocation313_spill] sm:$0xff]  ;;  %v13671_v7 = vsub.f32 1.0, %v13670_v5  ;;  %v13672_v32 = vld [vmem:[#allocation314_spill] sm:$0xff]  ;;  %v13686_v5 = vld [vmem:[#allocation175_spill] sm:$0xff] }
 0x2b9   : > { %v8983_v51 = vmul.f32 %v13663_v54, %v13661_v63  ;;  %v13669_v13 = vsub.f32 1.0, %v13668_v48  ;;  %v13673_v41 = vsub.f32 1.0, %v13672_v32  ;;  %v13675_v33 = vsub.f32 1.0, %v13674_v23  ;;  %v13676_v63 = vld [vmem:[#allocation315_spill] sm:$0xff]  ;;  %v13690_v23 = vld [vmem:[#allocation180_spill] sm:$0xff] }
 0x2ba   : > { %v8989_v55 = vmul.f32 %v13667_v10, %v13665_v58  ;;  %v13677_v54 = vsub.f32 1.0, %v13676_v63  ;;  %v13679_v12 = vsub.f32 1.0, %v13678_v57  ;;  %v13680_v58 = vld [vmem:[#allocation316_spill] sm:$0xff]  ;;  %v13683_v48 = vsub.f32 1.0, %v13682_v3  ;;  %v13695_v57 = vld [vmem:[#allocation177_spill] sm:$0xff] }
 0x2bb   : > { %v8995_v35 = vmul.f32 %v13671_v7, %v13669_v13  ;;  %v9001_v38 = vmul.f32 %v13675_v33, %v13673_v41  ;;  %v13681_v10 = vsub.f32 1.0, %v13680_v58  ;;  %v13684_v13 = vld [vmem:[#allocation317_spill] sm:$0xff]  ;;  %v13687_v32 = vsub.f32 1.0, %v13686_v5  ;;  %v13688_v41 = vld [vmem:[#allocation319_spill] sm:$0xff]  ;;  %v13700_v3 = vld [vmem:[#allocation228_spill] sm:$0xff] }
 0x2bc   : > { %v9007_v42 = vmul.f32 %v13679_v12, %v13677_v54  ;;  %v13685_v7 = vsub.f32 1.0, %v13684_v13  ;;  %v13689_v33 = vsub.f32 1.0, %v13688_v41  ;;  %v13691_v63 = vsub.f32 1.0, %v13690_v23  ;;  %v13693_v54 = vld [vmem:[#allocation320_spill] sm:$0xff]  ;;  %v13705_v5 = vld [vmem:[#allocation179_spill] sm:$0xff]  ;;  %v13710_v23 = vld [vmem:[#allocation185_spill] sm:$0xff] }
 0x2bd   : > { %v9013_v11 = vmul.f32 %v13683_v48, %v13681_v10  ;;  %v13694_v12 = vsub.f32 1.0, %v13693_v54  ;;  %v13696_v58 = vsub.f32 1.0, %v13695_v57  ;;  %v13698_v10 = vld [vmem:[#allocation322_spill] sm:$0xff]  ;;  %v13701_v13 = vsub.f32 1.0, %v13700_v3  ;;  %v13715_v57 = vld [vmem:[#allocation224_spill] sm:$0xff] }
 0x2be   : > { %v9019_v6 = vmul.f32 %v13687_v32, %v13685_v7  ;;  %v9025_v9 = vmul.f32 %v13691_v63, %v13689_v33  ;;  %v13699_v48 = vsub.f32 1.0, %v13698_v10  ;;  %v13703_v7 = vld [vmem:[#allocation324_spill] sm:$0xff]  ;;  %v13706_v41 = vsub.f32 1.0, %v13705_v5  ;;  %v13708_v33 = vld [vmem:[#allocation326_spill] sm:$0xff]  ;;  %v13725_v5 = vld [vmem:[#allocation181_spill] sm:$0xff] }
 0x2bf   : > { %v9031_v50 = vmul.f32 %v13696_v58, %v13694_v12  ;;  %v13704_v32 = vsub.f32 1.0, %v13703_v7  ;;  %v13709_v63 = vsub.f32 1.0, %v13708_v33  ;;  %v13711_v54 = vsub.f32 1.0, %v13710_v23  ;;  %v13713_v12 = vld [vmem:[#allocation329_spill] sm:$0xff]  ;;  %v13720_v3 = vld [vmem:[#allocation230_spill] sm:$0xff]  ;;  %v13730_v23 = vld [vmem:[#allocation187_spill] sm:$0xff] }
 0x2c0   : > { %13692 = vst [vmem:[#allocation243_spill] sm:$0xff] %v9025_v9  ;;  %v9037_v25 = vmul.f32 %v13701_v13, %v13699_v48  ;;  %v13714_v58 = vsub.f32 1.0, %v13713_v12  ;;  %v13716_v10 = vsub.f32 1.0, %v13715_v57  ;;  %v13718_v48 = vld [vmem:[#allocation331_spill] sm:$0xff]  ;;  %v13721_v7 = vsub.f32 1.0, %v13720_v3  ;;  %v13735_v57 = vld [vmem:[#allocation184_spill] sm:$0xff] }
 0x2c1   : > { %13697 = vst [vmem:[#allocation113_spill] sm:$0xff] %v9031_v50  ;;  %v9043_v20 = vmul.f32 %v13706_v41, %v13704_v32  ;;  %v9049_v9 = vmul.f32 %v13711_v54, %v13709_v63  ;;  %v13719_v13 = vsub.f32 1.0, %v13718_v48  ;;  %v13723_v32 = vld [vmem:[#allocation332_spill] sm:$0xff]  ;;  %v13726_v33 = vsub.f32 1.0, %v13725_v5  ;;  %v13728_v63 = vld [vmem:[#allocation334_spill] sm:$0xff]  ;;  %v13740_v3 = vld [vmem:[#allocation233_spill] sm:$0xff] }
 0x2c2   : > { %13702 = vst [vmem:[#allocation254_spill] sm:$0xff] %v9037_v25  ;;  %v9055_v50 = vmul.f32 %v13716_v10, %v13714_v58  ;;  %v13724_v41 = vsub.f32 1.0, %v13723_v32  ;;  %v13729_v54 = vsub.f32 1.0, %v13728_v63  ;;  %v13731_v12 = vsub.f32 1.0, %v13730_v23  ;;  %v13733_v58 = vld [vmem:[#allocation335_spill] sm:$0xff]  ;;  %v13745_v5 = vld [vmem:[#allocation229_spill] sm:$0xff] }
 0x2c3   : > { %13707 = vst [vmem:[#allocation252_spill] sm:$0xff] %v9043_v20  ;;  %13712 = vst [vmem:[#allocation245_spill] sm:$0xff] %v9049_v9  ;;  %v9061_v25 = vmul.f32 %v13721_v7, %v13719_v13  ;;  %v13734_v10 = vsub.f32 1.0, %v13733_v58  ;;  %v13736_v48 = vsub.f32 1.0, %v13735_v57  ;;  %v13738_v13 = vld [vmem:[#allocation336_spill] sm:$0xff]  ;;  %v13741_v32 = vsub.f32 1.0, %v13740_v3 }
 0x2c4   : > { %13717 = vst [vmem:[#allocation323_spill] sm:$0xff] %v9055_v50  ;;  %v9067_v20 = vmul.f32 %v13726_v33, %v13724_v41  ;;  %v9073_v9 = vmul.f32 %v13731_v12, %v13729_v54  ;;  %v13739_v7 = vsub.f32 1.0, %v13738_v13  ;;  %v13743_v41 = vld [vmem:[#allocation338_spill] sm:$0xff]  ;;  %v13746_v63 = vsub.f32 1.0, %v13745_v5  ;;  %v13748_v54 = vld [vmem:[#allocation339_spill] sm:$0xff]  ;;  %v13750_v23 = vld [vmem:[#allocation189_spill] sm:$0xff] }
 0x2c5   : > { %13722 = vst [vmem:[#allocation235_spill] sm:$0xff] %v9061_v25  ;;  %v9079_v50 = vmul.f32 %v13736_v48, %v13734_v10  ;;  %v13744_v33 = vsub.f32 1.0, %v13743_v41  ;;  %v13749_v12 = vsub.f32 1.0, %v13748_v54  ;;  %v13751_v58 = vsub.f32 1.0, %v13750_v23  ;;  %v13753_v10 = vld [vmem:[#allocation341_spill] sm:$0xff]  ;;  %v13755_v57 = vld [vmem:[#allocation232_spill] sm:$0xff] }
 0x2c6   : > { %13727 = vst [vmem:[#allocation256_spill] sm:$0xff] %v9067_v20  ;;  %13732 = vst [vmem:[#allocation264_spill] sm:$0xff] %v9073_v9  ;;  %v9085_v25 = vmul.f32 %v13741_v32, %v13739_v7  ;;  %v13754_v48 = vsub.f32 1.0, %v13753_v10  ;;  %v13756_v13 = vsub.f32 1.0, %v13755_v57  ;;  %v13758_v7 = vld [vmem:[#allocation344_spill] sm:$0xff]  ;;  %v13760_v3 = vld [vmem:[#allocation103_spill] sm:$0xff] }
 0x2c7   : > { %13737 = vst [vmem:[#allocation114_spill] sm:$0xff] %v9079_v50  ;;  %v9091_v20 = vmul.f32 %v13746_v63, %v13744_v33  ;;  %v9097_v9 = vmul.f32 %v13751_v58, %v13749_v12  ;;  %v13759_v32 = vsub.f32 1.0, %v13758_v7  ;;  %v13761_v41 = vsub.f32 1.0, %v13760_v3  ;;  %v13762_v33 = vld [vmem:[#allocation347_spill] sm:$0xff]  ;;  %v13764_v5 = vld [vmem:[#allocation188_spill] sm:$0xff]  ;;  %v13766_v12 = vld [vmem:[#allocation350_spill] sm:$0xff] }
 0x2c8   : > { %13742 = vst [vmem:[#allocation258_spill] sm:$0xff] %v9085_v25  ;;  %v9103_v50 = vmul.f32 %v13756_v13, %v13754_v48  ;;  %v13763_v63 = vsub.f32 1.0, %v13762_v33  ;;  %v13765_v54 = vsub.f32 1.0, %v13764_v5  ;;  %v13767_v58 = vsub.f32 1.0, %v13766_v12  ;;  %v13768_v23 = vld [vmem:[#allocation104_spill] sm:$0xff]  ;;  %v13770_v48 = vld [vmem:[#allocation353_spill] sm:$0xff] }
 0x2c9   : > { %13747 = vst [vmem:[#allocation260_spill] sm:$0xff] %v9091_v20  ;;  %13752 = vst [vmem:[#allocation249_spill] sm:$0xff] %v9097_v9  ;;  %v9109_v25 = vmul.f32 %v13761_v41, %v13759_v32  ;;  %v13769_v10 = vsub.f32 1.0, %v13768_v23  ;;  %v13771_v13 = vsub.f32 1.0, %v13770_v48  ;;  %v13772_v57 = vld [vmem:[#allocation236_spill] sm:$0xff]  ;;  %v13775_v32 = vld [vmem:[#allocation355_spill] sm:$0xff] }
 0x2ca   : > { %13757 = vst [vmem:[#allocation325_spill] sm:$0xff] %v9103_v50  ;;  %v9115_v20 = vmul.f32 %v13765_v54, %v13763_v63  ;;  %v13773_v7 = vsub.f32 1.0, %v13772_v57  ;;  %v13776_v41 = vsub.f32 1.0, %v13775_v32  ;;  %v13777_v33 = vsub.f32 1.0, %v13583_v59  ;;  %v13778_v63 = vld [vmem:[#allocation357_spill] sm:$0xff]  ;;  %v13786_v57 = vld [vmem:[#allocation195_spill] sm:$0xff] }
 0x2cb   : > { %v9121_v9 = vmul.f32 %v13769_v10, %v13767_v58  ;;  %v13779_v54 = vsub.f32 1.0, %v13778_v63  ;;  %v13780_v12 = vsub.f32 1.0, %v13584_v47  ;;  %v13781_v58 = vld [vmem:[#allocation359_spill] sm:$0xff]  ;;  %v13783_v48 = vsub.f32 1.0, %v13585_v16 }
 0x2cc   : > { %v9127_v50 = vmul.f32 %v13773_v7, %v13771_v13  ;;  %v9133_v3 = vmul.f32 %v13777_v33, %v13776_v41  ;;  %v13782_v10 = vsub.f32 1.0, %v13781_v58  ;;  %v13784_v13 = vld [vmem:[#allocation267_spill] sm:$0xff]  ;;  %v13787_v32 = vsub.f32 1.0, %v13786_v57  ;;  %v13788_v41 = vld [vmem:[#allocation120_spill] sm:$0xff] }
 0x2cd   : > { %v9139_v5 = vmul.f32 %v13780_v12, %v13779_v54  ;;  %v13785_v7 = vsub.f32 1.0, %v13784_v13  ;;  %v13789_v33 = vsub.f32 1.0, %v13788_v41  ;;  %v13790_v63 = vsub.f32 1.0, %v13587_v22  ;;  %v13791_v54 = vld [vmem:[#allocation51_spill] sm:$0xff] }
 0x2ce   : > { %13774 = vst [vmem:[#allocation262_spill] sm:$0xff] %v9127_v50  ;;  %v9145_v23 = vmul.f32 %v13783_v48, %v13782_v10  ;;  %v13792_v12 = vsub.f32 1.0, %v13791_v54  ;;  %v13793_v58 = vsub.f32 1.0, %v13588_v14  ;;  %v13794_v10 = vld [vmem:[#allocation122_spill] sm:$0xff]  ;;  %v13796_v13 = vsub.f32 1.0, %v13589_v44 }
 0x2cf   : > { %v9151_v50 = vmul.f32 %v13787_v32, %v13785_v7  ;;  %v9157_v59 = vmul.f32 %v13790_v63, %v13789_v33  ;;  %v13795_v48 = vsub.f32 1.0, %v13794_v10  ;;  %v13797_v7 = vld [vmem:[#allocation124_spill] sm:$0xff]  ;;  %v13799_v41 = vsub.f32 1.0, %v13590_v29  ;;  %v13800_v33 = vld [vmem:[#allocation275_spill] sm:$0xff] }
 0x2d0   : > { %v9163_v47 = vmul.f32 %v13793_v58, %v13792_v12  ;;  %v13798_v32 = vsub.f32 1.0, %v13797_v7  ;;  %v13801_v63 = vsub.f32 1.0, %v13800_v33  ;;  %v13802_v54 = vsub.f32 1.0, %v13591_v40  ;;  %v13803_v12 = vld [vmem:[#allocation128_spill] sm:$0xff] }
 0x2d1   : > { %v9169_v16 = vmul.f32 %v13796_v13, %v13795_v48  ;;  %v13804_v58 = vsub.f32 1.0, %v13803_v12  ;;  %v13805_v10 = vsub.f32 1.0, %v13592_v15  ;;  %v13806_v48 = vld [vmem:[#allocation62_spill] sm:$0xff]  ;;  %v13808_v7 = vsub.f32 1.0, %v13593_v1  ;;  %v13813_v12 = vld [vmem:[#allocation152_spill] sm:$0xff]  ;;  %v13861_v1 = vld [vmem:[#allocation113_spill] sm:$0xff] }
 0x2d2   : > { %v9175_v57 = vmul.f32 %v13799_v41, %v13798_v32  ;;  %v9181_v22 = vmul.f32 %v13802_v54, %v13801_v63  ;;  %v13807_v13 = vsub.f32 1.0, %v13806_v48  ;;  %v13809_v32 = vld [vmem:[#allocation68_spill] sm:$0xff]  ;;  %v13811_v33 = vsub.f32 1.0, %v8683_v52  ;;  %v13812_v63 = vld [vmem:[#allocation69_spill] sm:$0xff]  ;;  %v13858_v52 = vld [vmem:[#allocation243_spill] sm:$0xff] }
 0x2d3   : > { %v9187_v14 = vmul.f32 %v13805_v10, %v13804_v58  ;;  %v13810_v41 = vsub.f32 1.0, %v13809_v32  ;;  %v9203_v54 = vadd.f32 %v8821_v60, %v13812_v63  ;;  %v9207_v58 = vadd.f32 %v8827_v24, %v13813_v12  ;;  %v13814_v10 = vld [vmem:[#allocation139_spill] sm:$0xff]  ;;  %v13816_v32 = vld [vmem:[#allocation70_spill] sm:$0xff]  ;;  %v13819_v12 = vld [vmem:[#allocation196_spill] sm:$0xff] }
 0x2d4   : > { %v9193_v44 = vmul.f32 %v13808_v7, %v13807_v13  ;;  %v9211_v48 = vadd.f32 %v8833_v4, %v13814_v10  ;;  %v13815_v13 = vld [vmem:[#allocation194_spill] sm:$0xff]  ;;  %v9231_v4 = vadd.f32 %v8863_v43, %v13819_v12  ;;  %v13820_v10 = vld [vmem:[#allocation75_spill] sm:$0xff]  ;;  %v13825_v12 = vld [vmem:[#allocation160_spill] sm:$0xff] }
 0x2d5   : > { %v9199_v29 = vmul.f32 %v13811_v33, %v13810_v41  ;;  %v9215_v7 = vadd.f32 %v8839_v26, %v13815_v13  ;;  %v9219_v41 = vadd.f32 %v8845_v18, %v13816_v32  ;;  %v13817_v33 = vld [vmem:[#allocation154_spill] sm:$0xff]  ;;  %v9235_v26 = vadd.f32 %v8869_v34, %v13820_v10  ;;  %v13821_v13 = vld [vmem:[#allocation155_spill] sm:$0xff]  ;;  %v13867_v40 = vld [vmem:[#allocation252_spill] sm:$0xff] }
 0x2d6   : > { %v9223_v60 = vadd.f32 %v8851_v2, %v13817_v33  ;;  %v13818_v63 = vld [vmem:[#allocation146_spill] sm:$0xff]  ;;  %v9239_v18 = vadd.f32 %v8875_v46, %v13821_v13  ;;  %v13822_v32 = vld [vmem:[#allocation159_spill] sm:$0xff]  ;;  %v13823_v33 = vld [vmem:[#allocation157_spill] sm:$0xff]  ;;  %v9255_v34 = vadd.f32 %v8899_v61, %v13825_v12 }
 0x2d7   : > { %v9227_v24 = vadd.f32 %v8857_v56, %v13818_v63  ;;  %v9243_v2 = vadd.f32 %v8881_v17, %v13822_v32  ;;  %v9247_v56 = vadd.f32 %v8887_v27, %v13823_v33  ;;  %v13824_v63 = vld [vmem:[#allocation76_spill] sm:$0xff]  ;;  %v13826_v10 = vld [vmem:[#allocation182_spill] sm:$0xff]  ;;  %v13828_v32 = vld [vmem:[#allocation77_spill] sm:$0xff] }
 0x2d8   : > { %v9251_v43 = vadd.f32 %v8893_v21, %v13824_v63  ;;  %v9259_v46 = vadd.f32 %v8905_v0, %v13826_v10  ;;  %v13827_v13 = vld [vmem:[#allocation162_spill] sm:$0xff]  ;;  %v9267_v27 = vadd.f32 %v8917_v39, %v13828_v32  ;;  %v13831_v12 = vld [vmem:[#allocation165_spill] sm:$0xff]  ;;  %v13832_v10 = vld [vmem:[#allocation83_spill] sm:$0xff] }
 0x2d9   : > { %v9263_v17 = vadd.f32 %v8911_v37, %v13827_v13  ;;  %v13829_v33 = vld [vmem:[#allocation202_spill] sm:$0xff]  ;;  %v9279_v0 = vadd.f32 %v8935_v31, %v13831_v12  ;;  %v9283_v37 = vadd.f32 %v8941_v45, %v13832_v10  ;;  %v13834_v32 = vld [vmem:[#allocation84_spill] sm:$0xff] }
 0x2da   : > { %v9271_v21 = vadd.f32 %v8923_v28, %v13829_v33  ;;  %v13830_v63 = vld [vmem:[#allocation82_spill] sm:$0xff]  ;;  %v9291_v28 = vadd.f32 %v8953_v8, %v13834_v32  ;;  %v13836_v33 = vld [vmem:[#allocation209_spill] sm:$0xff]  ;;  %v13840_v12 = vld [vmem:[#allocation212_spill] sm:$0xff] }
 0x2db   : > { %v9275_v61 = vadd.f32 %v8929_v49, %v13830_v63  ;;  %v13833_v13 = vld [vmem:[#allocation166_spill] sm:$0xff]  ;;  %v9295_v49 = vadd.f32 %v8959_v53, %v13836_v33  ;;  %v13838_v63 = vld [vmem:[#allocation87_spill] sm:$0xff]  ;;  %v9303_v45 = vadd.f32 %v8971_v19, %v13840_v12  ;;  %v13842_v10 = vld [vmem:[#allocation88_spill] sm:$0xff] }
 0x2dc   : > { %v9287_v39 = vadd.f32 %v8947_v62, %v13833_v13  ;;  %13835 = vst [vmem:[#allocation247_spill] sm:$0xff] %v9291_v28  ;;  %v9299_v31 = vadd.f32 %v8965_v30, %v13838_v63  ;;  %v9307_v62 = vadd.f32 %v8977_v36, %v13842_v10  ;;  %v13844_v13 = vld [vmem:[#allocation213_spill] sm:$0xff]  ;;  %v13848_v33 = vld [vmem:[#allocation172_spill] sm:$0xff]  ;;  %v13850_v63 = vld [vmem:[#allocation91_spill] sm:$0xff] }
 0x2dd   : > { %13837 = vst [vmem:[#allocation266_spill] sm:$0xff] %v9295_v49  ;;  %13841 = vst [vmem:[#allocation327_spill] sm:$0xff] %v9303_v45  ;;  %v9311_v8 = vadd.f32 %v8983_v51, %v13844_v13  ;;  %v13846_v32 = vld [vmem:[#allocation89_spill] sm:$0xff]  ;;  %v9319_v30 = vadd.f32 %v8995_v35, %v13848_v33  ;;  %v9323_v19 = vadd.f32 %v9001_v38, %v13850_v63  ;;  %v13853_v10 = vld [vmem:[#allocation92_spill] sm:$0xff] }
 0x2de   : > { %13839 = vst [vmem:[#allocation116_spill] sm:$0xff] %v9299_v31  ;;  %13843 = vst [vmem:[#allocation117_spill] sm:$0xff] %v9307_v62  ;;  %v9315_v53 = vadd.f32 %v8989_v55, %v13846_v32  ;;  %v13852_v12 = vld [vmem:[#allocation217_spill] sm:$0xff]  ;;  %v9331_v51 = vadd.f32 %v9013_v11, %v13853_v10  ;;  %v13855_v13 = vld [vmem:[#allocation218_spill] sm:$0xff] }
 0x2df   : > { %13845 = vst [vmem:[#allocation328_spill] sm:$0xff] %v9311_v8  ;;  %13849 = vst [vmem:[#allocation330_spill] sm:$0xff] %v9319_v30  ;;  %v9327_v36 = vadd.f32 %v9007_v42, %v13852_v12  ;;  %v9335_v55 = vadd.f32 %v9019_v6, %v13855_v13  ;;  %v13857_v32 = vld [vmem:[#allocation93_spill] sm:$0xff]  ;;  %v13860_v33 = vld [vmem:[#allocation176_spill] sm:$0xff] }
 0x2e0   : > { %13847 = vst [vmem:[#allocation119_spill] sm:$0xff] %v9315_v53  ;;  %13851 = vst [vmem:[#allocation121_spill] sm:$0xff] %v9323_v19  ;;  %v9339_v35 = vadd.f32 %v13858_v52, %v13857_v32  ;;  %v9343_v38 = vadd.f32 %v13861_v1, %v13860_v33  ;;  %v13863_v63 = vld [vmem:[#allocation95_spill] sm:$0xff]  ;;  %v13864_v15 = vld [vmem:[#allocation254_spill] sm:$0xff] }
 0x2e1   : > { %13854 = vst [vmem:[#allocation123_spill] sm:$0xff] %v9331_v51  ;;  %13856 = vst [vmem:[#allocation333_spill] sm:$0xff] %v9335_v55  ;;  %v9347_v42 = vadd.f32 %v13864_v15, %v13863_v63  ;;  %v13866_v12 = vld [vmem:[#allocation222_spill] sm:$0xff]  ;;  %v13869_v10 = vld [vmem:[#allocation96_spill] sm:$0xff] }
 0x2e2   : > { %13859 = vst [vmem:[#allocation125_spill] sm:$0xff] %v9339_v35  ;;  %13862 = vst [vmem:[#allocation127_spill] sm:$0xff] %v9343_v38  ;;  %v9351_v11 = vadd.f32 %v13867_v40, %v13866_v12  ;;  %v13870_v51 = vld [vmem:[#allocation245_spill] sm:$0xff]  ;;  %v13873_v55 = vld [vmem:[#allocation323_spill] sm:$0xff] }
 0x2e3   : > { %13865 = vst [vmem:[#allocation284_spill] sm:$0xff] %v9347_v42  ;;  %v9355_v6 = vadd.f32 %v13870_v51, %v13869_v10  ;;  %v13872_v13 = vld [vmem:[#allocation225_spill] sm:$0xff]  ;;  %v13876_v35 = vld [vmem:[#allocation235_spill] sm:$0xff]  ;;  %v13878_v33 = vld [vmem:[#allocation226_spill] sm:$0xff] }
 0x2e4   : > { %13868 = vst [vmem:[#allocation285_spill] sm:$0xff] %v9351_v11  ;;  %v9359_v52 = vadd.f32 %v13873_v55, %v13872_v13  ;;  %v13875_v32 = vld [vmem:[#allocation97_spill] sm:$0xff]  ;;  %v13879_v38 = vld [vmem:[#allocation256_spill] sm:$0xff]  ;;  %v13881_v63 = vld [vmem:[#allocation99_spill] sm:$0xff] }
 0x2e5   : > { %13871 = vst [vmem:[#allocation286_spill] sm:$0xff] %v9355_v6  ;;  %v9363_v1 = vadd.f32 %v13876_v35, %v13875_v32  ;;  %v9367_v15 = vadd.f32 %v13879_v38, %v13878_v33  ;;  %v13882_v42 = vld [vmem:[#allocation264_spill] sm:$0xff]  ;;  %v13883_v12 = vld [vmem:[#allocation183_spill] sm:$0xff]  ;;  %v13884_v11 = vld [vmem:[#allocation114_spill] sm:$0xff] }
 0x2e6   : > { %13874 = vst [vmem:[#allocation287_spill] sm:$0xff] %v9359_v52  ;;  %v9371_v40 = vadd.f32 %v13882_v42, %v13881_v63  ;;  %v9375_v51 = vadd.f32 %v13884_v11, %v13883_v12  ;;  %v13885_v10 = vld [vmem:[#allocation100_spill] sm:$0xff]  ;;  %v13886_v6 = vld [vmem:[#allocation258_spill] sm:$0xff]  ;;  %v13890_v32 = vld [vmem:[#allocation101_spill] sm:$0xff] }
 0x2e7   : > { %13877 = vst [vmem:[#allocation288_spill] sm:$0xff] %v9363_v1  ;;  %13880 = vst [vmem:[#allocation289_spill] sm:$0xff] %v9367_v15  ;;  %v9379_v55 = vadd.f32 %v13886_v6, %v13885_v10  ;;  %v13887_v13 = vld [vmem:[#allocation186_spill] sm:$0xff]  ;;  %v13888_v52 = vld [vmem:[#allocation260_spill] sm:$0xff] }
 0x2e8   : > { %v9383_v35 = vadd.f32 %v13888_v52, %v13887_v13  ;;  %v13891_v1 = vld [vmem:[#allocation249_spill] sm:$0xff]  ;;  %v13892_v33 = vld [vmem:[#allocation240_spill] sm:$0xff]  ;;  %v13894_v63 = vld [vmem:[#allocation234_spill] sm:$0xff] }
 0x2e9   : > { %v9387_v38 = vadd.f32 %v13891_v1, %v13890_v32  ;;  %v13893_v15 = vld [vmem:[#allocation325_spill] sm:$0xff]  ;;  %v9395_v11 = vadd.f32 %v9109_v25, %v13894_v63  ;;  %v13896_v10 = vld [vmem:[#allocation191_spill] sm:$0xff]  ;;  %v13899_v32 = vld [vmem:[#allocation238_spill] sm:$0xff] }
 0x2ea   : > { %13889 = vst [vmem:[#allocation290_spill] sm:$0xff] %v9383_v35  ;;  %v9391_v42 = vadd.f32 %v13893_v15, %v13892_v33  ;;  %v13895_v12 = vld [vmem:[#allocation241_spill] sm:$0xff]  ;;  %v9403_v52 = vadd.f32 %v9121_v9, %v13896_v10  ;;  %v13897_v13 = vld [vmem:[#allocation207_spill] sm:$0xff]  ;;  %v13898_v35 = vld [vmem:[#allocation262_spill] sm:$0xff]  ;;  %v9411_v15 = vadd.f32 %v9133_v3, %v13899_v32 }
 0x2eb   : > { %v9399_v6 = vadd.f32 %v9115_v20, %v13895_v12  ;;  %v9407_v1 = vadd.f32 %v13898_v35, %v13897_v13  ;;  %v13900_v33 = vld [vmem:[#allocation244_spill] sm:$0xff]  ;;  %v13901_v63 = vld [vmem:[#allocation199_spill] sm:$0xff]  ;;  %v13912_v28 = vld [vmem:[#allocation333_spill] sm:$0xff] }
 0x2ec   : > { %v9415_v25 = vadd.f32 %v9139_v5, %v13900_v33  ;;  %v9419_v20 = vadd.f32 %v9145_v23, %v13901_v63  ;;  %v13902_v12 = vld [vmem:[#allocation215_spill] sm:$0xff]  ;;  %v13915_v45 = vld [vmem:[#allocation284_spill] sm:$0xff]  ;;  %v13916_v62 = vld [vmem:[#allocation285_spill] sm:$0xff] }
 0x2ed   : > { %v9423_v9 = vadd.f32 %v9151_v50, %v13902_v12  ;;  %v13903_v10 = vld [vmem:[#allocation203_spill] sm:$0xff]  ;;  %v13908_v12 = vld [vmem:[#allocation248_spill] sm:$0xff]  ;;  %v13917_v8 = vld [vmem:[#allocation286_spill] sm:$0xff] }
 0x2ee   : > { %v9427_v35 = vadd.f32 %v9157_v59, %v13903_v10  ;;  %v13904_v13 = vld [vmem:[#allocation219_spill] sm:$0xff]  ;;  %v9447_v59 = vadd.f32 %v9187_v14, %v13908_v12  ;;  %v13909_v10 = vld [vmem:[#allocation321_spill] sm:$0xff]  ;;  %v13919_v30 = vld [vmem:[#allocation288_spill] sm:$0xff]  ;;  %v13923_v12 = vsub.f32 1.0, %v9207_v58  ;;  %v13927_v58 = vsub.f32 1.0, %v9223_v60 }
 0x2ef   : > { %v9431_v3 = vadd.f32 %v9163_v47, %v13904_v13  ;;  %v13905_v32 = vld [vmem:[#allocation211_spill] sm:$0xff]  ;;  %v9451_v47 = vadd.f32 %v9193_v44, %v13909_v10  ;;  %v13910_v13 = vld [vmem:[#allocation250_spill] sm:$0xff]  ;;  %v13920_v19 = vld [vmem:[#allocation289_spill] sm:$0xff]  ;;  %v13931_v60 = vsub.f32 1.0, %v9239_v18  ;;  %v13935_v18 = vsub.f32 1.0, %v9255_v34 }
 0x2f0   : > { %v9435_v5 = vadd.f32 %v9169_v16, %v13905_v32  ;;  %v13906_v33 = vld [vmem:[#allocation223_spill] sm:$0xff]  ;;  %v9455_v16 = vadd.f32 %v9199_v29, %v13910_v13  ;;  %v9529_v44 = vmul.f32 %v13923_v12, %v13923_v12  ;;  %v13924_v29 = vsub.f32 1.0, %v9211_v48  ;;  %v13950_v10 = vld [vmem:[#allocation266_spill] sm:$0xff] }
 0x2f1   : > { %v9439_v23 = vadd.f32 %v9175_v57, %v13906_v33  ;;  %v13907_v63 = vld [vmem:[#allocation231_spill] sm:$0xff]  ;;  %v13921_v49 = vld [vmem:[#allocation290_spill] sm:$0xff]  ;;  %v13925_v57 = vsub.f32 1.0, %v9215_v7  ;;  %v9549_v12 = vmul.f32 %v13927_v58, %v13927_v58  ;;  %v13928_v48 = vsub.f32 1.0, %v9227_v24 }
 0x2f2   : > { %v9443_v50 = vadd.f32 %v9181_v22, %v13907_v63  ;;  %v13911_v32 = vld [vmem:[#allocation123_spill] sm:$0xff]  ;;  %v13922_v63 = vsub.f32 1.0, %v9203_v54  ;;  %v9534_v13 = vmul.f32 %v13924_v29, %v13924_v29  ;;  %v13926_v54 = vsub.f32 1.0, %v9219_v41 }
 0x2f3   : > { %v13914_v31 = vld [vmem:[#allocation127_spill] sm:$0xff]  ;;  %v9539_v33 = vmul.f32 %v13925_v57, %v13925_v57  ;;  %v9554_v29 = vmul.f32 %v13928_v48, %v13928_v48  ;;  %v13929_v7 = vsub.f32 1.0, %v9231_v4  ;;  %v13930_v41 = vsub.f32 1.0, %v9235_v26 }
 0x2f4   : > { %v13918_v53 = vld [vmem:[#allocation287_spill] sm:$0xff]  ;;  %v9524_v14 = vmul.f32 %v13922_v63, %v13922_v63  ;;  %v9544_v63 = vmul.f32 %v13926_v54, %v13926_v54  ;;  %v9569_v58 = vmul.f32 %v13931_v60, %v13931_v60  ;;  %v13932_v24 = vsub.f32 1.0, %v9243_v2 }
 0x2f5   : > { %v9559_v57 = vmul.f32 %v13929_v7, %v13929_v7  ;;  %v9564_v54 = vmul.f32 %v13930_v41, %v13930_v41  ;;  %v13933_v4 = vsub.f32 1.0, %v9247_v56  ;;  %v13934_v26 = vsub.f32 1.0, %v9251_v43  ;;  %v13947_v22 = vld [vmem:[#allocation247_spill] sm:$0xff] }
 0x2f6   : > { %v9574_v48 = vmul.f32 %v13932_v24, %v13932_v24  ;;  %v9589_v60 = vmul.f32 %v13935_v18, %v13935_v18  ;;  %v13936_v2 = vsub.f32 1.0, %v9259_v46  ;;  %v13937_v56 = vsub.f32 1.0, %v9263_v17 }
 0x2f7   : > { %v9579_v7 = vmul.f32 %v13933_v4, %v13933_v4  ;;  %v9584_v41 = vmul.f32 %v13934_v26, %v13934_v26  ;;  %v13938_v43 = vsub.f32 1.0, %v9267_v27  ;;  %v13939_v34 = vsub.f32 1.0, %v9271_v21 }
 0x2f8   : > { %v9594_v24 = vmul.f32 %v13936_v2, %v13936_v2  ;;  %v9599_v4 = vmul.f32 %v13937_v56, %v13937_v56  ;;  %v13940_v46 = vsub.f32 1.0, %v9275_v61  ;;  %v13941_v17 = vsub.f32 1.0, %v9279_v0 }
 0x2f9   : > { %v9604_v26 = vmul.f32 %v13938_v43, %v13938_v43  ;;  %v9609_v18 = vmul.f32 %v13939_v34, %v13939_v34  ;;  %v13943_v27 = vsub.f32 1.0, %v9283_v37  ;;  %v13945_v21 = vsub.f32 1.0, %v9287_v39 }
 0x2fa   : > { %v9614_v2 = vmul.f32 %v13940_v46, %v13940_v46  ;;  %v9619_v56 = vmul.f32 %v13941_v17, %v13941_v17  ;;  %v13948_v61 = vsub.f32 1.0, %v13947_v22  ;;  %v13951_v0 = vsub.f32 1.0, %v13950_v10 }
 0x2fb   : > { %v9624_v43 = vmul.f32 %v13943_v27, %v13943_v27  ;;  %v9629_v34 = vmul.f32 %v13945_v21, %v13945_v21 }
 0x2fc   : > { %13942 = vst [vmem:[#allocation291_spill] sm:$0xff] %v9619_v56  ;;  %v9634_v46 = vmul.f32 %v13948_v61, %v13948_v61  ;;  %v9639_v17 = vmul.f32 %v13951_v0, %v13951_v0  ;;  %v13953_v56 = vld [vmem:[#allocation116_spill] sm:$0xff] }
 0x2fd   : > { %13944 = vst [vmem:[#allocation292_spill] sm:$0xff] %v9624_v43  ;;  %13946 = vst [vmem:[#allocation293_spill] sm:$0xff] %v9629_v34  ;;  %v13954_v37 = vsub.f32 1.0, %v13953_v56  ;;  %v13956_v43 = vld [vmem:[#allocation327_spill] sm:$0xff]  ;;  %v13959_v34 = vld [vmem:[#allocation117_spill] sm:$0xff] }
 0x2fe   : > { %13949 = vst [vmem:[#allocation294_spill] sm:$0xff] %v9634_v46  ;;  %13952 = vst [vmem:[#allocation295_spill] sm:$0xff] %v9639_v17  ;;  %v13957_v39 = vsub.f32 1.0, %v13956_v43  ;;  %v13960_v22 = vsub.f32 1.0, %v13959_v34  ;;  %v13961_v46 = vld [vmem:[#allocation328_spill] sm:$0xff]  ;;  %v13963_v17 = vld [vmem:[#allocation119_spill] sm:$0xff] }
 0x2ff   : > { %v9644_v27 = vmul.f32 %v13954_v37, %v13954_v37  ;;  %v13962_v10 = vsub.f32 1.0, %v13961_v46  ;;  %v13964_v56 = vsub.f32 1.0, %v13963_v17  ;;  %v13970_v46 = vsub.f32 1.0, %v9327_v36 }
 0x300   : > { %v9649_v21 = vmul.f32 %v13957_v39, %v13957_v39  ;;  %v9654_v61 = vmul.f32 %v13960_v22, %v13960_v22  ;;  %v13971_v17 = vsub.f32 1.0, %v13911_v32  ;;  %v13975_v36 = vsub.f32 1.0, %v13914_v31 }
 0x301   : > { %13955 = vst [vmem:[#allocation296_spill] sm:$0xff] %v9644_v27  ;;  %v9659_v0 = vmul.f32 %v13962_v10, %v13962_v10  ;;  %v9664_v37 = vmul.f32 %v13964_v56, %v13964_v56  ;;  %v13965_v27 = vld [vmem:[#allocation330_spill] sm:$0xff]  ;;  %v9679_v10 = vmul.f32 %v13970_v46, %v13970_v46  ;;  %v13976_v32 = vsub.f32 1.0, %v13915_v45 }
 0x302   : > { %13958 = vst [vmem:[#allocation297_spill] sm:$0xff] %v9649_v21  ;;  %v13966_v43 = vsub.f32 1.0, %v13965_v27  ;;  %v13968_v21 = vld [vmem:[#allocation121_spill] sm:$0xff]  ;;  %v9684_v56 = vmul.f32 %v13971_v17, %v13971_v17  ;;  %v13972_v27 = vsub.f32 1.0, %v13912_v28  ;;  %v9699_v46 = vmul.f32 %v13975_v36, %v13975_v36 }
 0x303   : > { %v13969_v34 = vsub.f32 1.0, %v13968_v21  ;;  %v9704_v17 = vmul.f32 %v13976_v32, %v13976_v32  ;;  %v13977_v28 = vsub.f32 1.0, %v13916_v62  ;;  %v13979_v31 = vsub.f32 1.0, %v13918_v53 }
 0x304   : > { %v9669_v39 = vmul.f32 %v13966_v43, %v13966_v43  ;;  %v9689_v43 = vmul.f32 %v13972_v27, %v13972_v27  ;;  %v13980_v45 = vsub.f32 1.0, %v13919_v30  ;;  %v13981_v62 = vsub.f32 1.0, %v13920_v19 }
 0x305   : > { %v9674_v22 = vmul.f32 %v13969_v34, %v13969_v34  ;;  %v9709_v27 = vmul.f32 %v13977_v28, %v13977_v28  ;;  %v9719_v36 = vmul.f32 %v13979_v31, %v13979_v31  ;;  %v13983_v53 = vsub.f32 1.0, %v9375_v51 }
 0x306   : > { %13967 = vst [vmem:[#allocation298_spill] sm:$0xff] %v9669_v39  ;;  %v13973_v39 = vld [vmem:[#allocation125_spill] sm:$0xff]  ;;  %v9724_v32 = vmul.f32 %v13980_v45, %v13980_v45  ;;  %v9729_v28 = vmul.f32 %v13981_v62, %v13981_v62  ;;  %v13984_v30 = vsub.f32 1.0, %v9379_v55  ;;  %v13985_v19 = vsub.f32 1.0, %v13921_v49 }
 0x307   : > { %v13974_v21 = vsub.f32 1.0, %v13973_v39  ;;  %v13978_v39 = vsub.f32 1.0, %v13917_v8  ;;  %v13982_v8 = vsub.f32 1.0, %v9371_v40  ;;  %v9739_v31 = vmul.f32 %v13983_v53, %v13983_v53 }
 0x308   : > { %v9744_v45 = vmul.f32 %v13984_v30, %v13984_v30  ;;  %v9749_v62 = vmul.f32 %v13985_v19, %v13985_v19  ;;  %v13986_v40 = vsub.f32 1.0, %v9387_v38  ;;  %v13987_v51 = vsub.f32 1.0, %v9391_v42 }
 0x309   : > { %v9694_v34 = vmul.f32 %v13974_v21, %v13974_v21  ;;  %v9714_v21 = vmul.f32 %v13978_v39, %v13978_v39  ;;  %v9734_v39 = vmul.f32 %v13982_v8, %v13982_v8  ;;  %v13988_v55 = vsub.f32 1.0, %v9395_v11 }
 0x30a   : > { %v9754_v8 = vmul.f32 %v13986_v40, %v13986_v40  ;;  %v9759_v53 = vmul.f32 %v13987_v51, %v13987_v51  ;;  %v13989_v49 = vsub.f32 1.0, %v9399_v6  ;;  %v13990_v38 = vsub.f32 1.0, %v9403_v52 }
 0x30b   : > { %v9764_v30 = vmul.f32 %v13988_v55, %v13988_v55  ;;  %v13991_v42 = vsub.f32 1.0, %v9407_v1  ;;  %v13992_v11 = vsub.f32 1.0, %v9411_v15  ;;  %v13993_v6 = vsub.f32 1.0, %v9415_v25 }
 0x30c   : > { %v9769_v19 = vmul.f32 %v13989_v49, %v13989_v49  ;;  %v9774_v40 = vmul.f32 %v13990_v38, %v13990_v38  ;;  %v13994_v52 = vsub.f32 1.0, %v9419_v20  ;;  %v13995_v1 = vsub.f32 1.0, %v9423_v9 }
 0x30d   : > { %v9779_v51 = vmul.f32 %v13991_v42, %v13991_v42  ;;  %v9784_v55 = vmul.f32 %v13992_v11, %v13992_v11  ;;  %v9789_v49 = vmul.f32 %v13993_v6, %v13993_v6  ;;  %v13996_v15 = vsub.f32 1.0, %v9427_v35 }
 0x30e   : > { %v9794_v38 = vmul.f32 %v13994_v52, %v13994_v52  ;;  %v9799_v42 = vmul.f32 %v13995_v1, %v13995_v1  ;;  %v13997_v25 = vsub.f32 1.0, %v9431_v3  ;;  %v13998_v20 = vsub.f32 1.0, %v9435_v5 }
 0x30f   : > { %v9804_v11 = vmul.f32 %v13996_v15, %v13996_v15  ;;  %v13999_v9 = vsub.f32 1.0, %v9439_v23  ;;  %v14001_v35 = vsub.f32 1.0, %v9443_v50  ;;  %v14002_v3 = vsub.f32 1.0, %v9447_v59 }
 0x310   : > { %v9809_v6 = vmul.f32 %v13997_v25, %v13997_v25  ;;  %v9814_v52 = vmul.f32 %v13998_v20, %v13998_v20  ;;  %v14004_v5 = vsub.f32 1.0, %v9451_v47  ;;  %v14006_v23 = vsub.f32 1.0, %v9455_v16  ;;  %v14011_v47 = vld [vmem:[#allocation270_spill] sm:$0xff]  ;;  %v14012_v16 = vld [vmem:[#allocation255_spill] sm:$0xff] }
 0x311   : > { %v9819_v1 = vmul.f32 %v13999_v9, %v13999_v9  ;;  %v9824_v15 = vmul.f32 %v14001_v35, %v14001_v35  ;;  %v9829_v25 = vmul.f32 %v14002_v3, %v14002_v3  ;;  %v14009_v35 = vld [vmem:[#allocation268_spill] sm:$0xff]  ;;  %v14010_v3 = vld [vmem:[#allocation253_spill] sm:$0xff] }
 0x312   : > { %v9834_v20 = vmul.f32 %v14004_v5, %v14004_v5  ;;  %v9839_v9 = vmul.f32 %v14006_v23, %v14006_v23  ;;  %v9847_v59 = vmul.f32 %v9529_v44, %v14009_v35  ;;  %v9855_v5 = vmul.f32 %v9539_v33, %v14011_v47  ;;  %v14015_v35 = vld [vmem:[#allocation274_spill] sm:$0xff]  ;;  %v14017_v47 = vld [vmem:[#allocation259_spill] sm:$0xff] }
 0x313   : > { %14000 = vst [vmem:[#allocation299_spill] sm:$0xff] %v9819_v1  ;;  %14003 = vst [vmem:[#allocation300_spill] sm:$0xff] %v9829_v25  ;;  %v14008_v1 = vld [vmem:[#allocation251_spill] sm:$0xff]  ;;  %v9851_v25 = vmul.f32 %v9534_v13, %v14010_v3  ;;  %v9859_v23 = vmul.f32 %v9544_v63, %v14012_v16  ;;  %v9871_v13 = vmul.f32 %v9559_v57, %v14015_v35  ;;  %v14016_v3 = vld [vmem:[#allocation276_spill] sm:$0xff] }
 0x314   : > { %14005 = vst [vmem:[#allocation301_spill] sm:$0xff] %v9834_v20  ;;  %14007 = vst [vmem:[#allocation302_spill] sm:$0xff] %v9839_v9  ;;  %v9843_v50 = vmul.f32 %v9524_v14, %v14008_v1  ;;  %v14013_v9 = vld [vmem:[#allocation272_spill] sm:$0xff]  ;;  %v14014_v1 = vld [vmem:[#allocation257_spill] sm:$0xff]  ;;  %v9875_v33 = vmul.f32 %v9564_v54, %v14016_v3  ;;  %v9879_v63 = vmul.f32 %v9569_v58, %v14017_v47 }
 0x315   : > { %v9863_v14 = vmul.f32 %v9549_v12, %v14013_v9  ;;  %v9867_v44 = vmul.f32 %v9554_v29, %v14014_v1  ;;  %v14018_v16 = vld [vmem:[#allocation277_spill] sm:$0xff]  ;;  %v14020_v1 = vld [vmem:[#allocation278_spill] sm:$0xff]  ;;  %v14021_v35 = vld [vmem:[#allocation263_spill] sm:$0xff] }
 0x316   : > { %v9883_v12 = vmul.f32 %v9574_v48, %v14018_v16  ;;  %v14019_v9 = vld [vmem:[#allocation261_spill] sm:$0xff]  ;;  %v9891_v57 = vmul.f32 %v9584_v41, %v14020_v1  ;;  %v9895_v54 = vmul.f32 %v9589_v60, %v14021_v35  ;;  %v14022_v3 = vld [vmem:[#allocation279_spill] sm:$0xff]  ;;  %v14026_v16 = vld [vmem:[#allocation280_spill] sm:$0xff] }
 0x317   : > { %v9887_v29 = vmul.f32 %v9579_v7, %v14019_v9  ;;  %v9899_v58 = vmul.f32 %v9594_v24, %v14022_v3  ;;  %v14024_v47 = vld [vmem:[#allocation265_spill] sm:$0xff]  ;;  %v9907_v7 = vmul.f32 %v9604_v26, %v14026_v16  ;;  %v14030_v1 = vld [vmem:[#allocation282_spill] sm:$0xff]  ;;  %v14032_v35 = vld [vmem:[#allocation271_spill] sm:$0xff] }
 0x318   : > { %v9903_v48 = vmul.f32 %v9599_v4, %v14024_v47  ;;  %v14028_v9 = vld [vmem:[#allocation281_spill] sm:$0xff]  ;;  %v9915_v60 = vmul.f32 %v9614_v2, %v14030_v1  ;;  %v14033_v20 = vld [vmem:[#allocation291_spill] sm:$0xff]  ;;  %v14037_v47 = vld [vmem:[#allocation118_spill] sm:$0xff] }
 0x319   : > { %14023 = vst [vmem:[#allocation303_spill] sm:$0xff] %v9899_v58  ;;  %14027 = vst [vmem:[#allocation305_spill] sm:$0xff] %v9907_v7  ;;  %v9911_v41 = vmul.f32 %v9609_v18, %v14028_v9  ;;  %v9919_v24 = vmul.f32 %v14033_v20, %v14032_v35  ;;  %v14035_v3 = vld [vmem:[#allocation283_spill] sm:$0xff]  ;;  %v14036_v58 = vld [vmem:[#allocation292_spill] sm:$0xff] }
 0x31a   : > { %14025 = vst [vmem:[#allocation304_spill] sm:$0xff] %v9903_v48  ;;  %14031 = vst [vmem:[#allocation307_spill] sm:$0xff] %v9915_v60  ;;  %v9923_v4 = vmul.f32 %v14036_v58, %v14035_v3  ;;  %v14038_v48 = vld [vmem:[#allocation293_spill] sm:$0xff]  ;;  %v14039_v16 = vld [vmem:[#allocation50_spill] sm:$0xff] }
 0x31b   : > { %14029 = vst [vmem:[#allocation306_spill] sm:$0xff] %v9911_v41  ;;  %14034 = vst [vmem:[#allocation308_spill] sm:$0xff] %v9919_v24  ;;  %v9927_v26 = vmul.f32 %v14038_v48, %v14037_v47  ;;  %v14040_v7 = vld [vmem:[#allocation294_spill] sm:$0xff]  ;;  %v14041_v9 = vld [vmem:[#allocation269_spill] sm:$0xff] }
 0x31c   : > { %v9931_v18 = vmul.f32 %v14040_v7, %v14039_v16  ;;  %v14042_v41 = vld [vmem:[#allocation295_spill] sm:$0xff]  ;;  %v14044_v1 = vld [vmem:[#allocation54_spill] sm:$0xff]  ;;  %v14045_v60 = vld [vmem:[#allocation296_spill] sm:$0xff] }
 0x31d   : > { %v9935_v2 = vmul.f32 %v14042_v41, %v14041_v9  ;;  %v9939_v20 = vmul.f32 %v14045_v60, %v14044_v1  ;;  %v14046_v35 = vld [vmem:[#allocation273_spill] sm:$0xff]  ;;  %v14050_v16 = vld [vmem:[#allocation343_spill] sm:$0xff] }
 0x31e   : > { %v14047_v24 = vld [vmem:[#allocation297_spill] sm:$0xff]  ;;  %v9955_v41 = vmul.f32 %v9664_v37, %v14050_v16  ;;  %v14051_v9 = vld [vmem:[#allocation55_spill] sm:$0xff]  ;;  %v14059_v16 = vld [vmem:[#allocation342_spill] sm:$0xff] }
 0x31f   : > { %14043 = vst [vmem:[#allocation309_spill] sm:$0xff] %v9935_v2  ;;  %v9943_v58 = vmul.f32 %v14047_v24, %v14046_v35  ;;  %v14048_v3 = vld [vmem:[#allocation129_spill] sm:$0xff]  ;;  %v14052_v2 = vld [vmem:[#allocation298_spill] sm:$0xff]  ;;  %v14054_v35 = vld [vmem:[#allocation340_spill] sm:$0xff] }
 0x320   : > { %v9947_v48 = vmul.f32 %v9654_v61, %v14048_v3  ;;  %v14049_v47 = vld [vmem:[#allocation337_spill] sm:$0xff]  ;;  %v9959_v60 = vmul.f32 %v14052_v2, %v14051_v9  ;;  %v9967_v61 = vmul.f32 %v9679_v10, %v14054_v35  ;;  %v9979_v2 = vmul.f32 %v9694_v34, %v14059_v16  ;;  %v14061_v9 = vld [vmem:[#allocation135_spill] sm:$0xff]  ;;  %v14065_v35 = vld [vmem:[#allocation56_spill] sm:$0xff] }
 0x321   : > { %v9951_v7 = vmul.f32 %v9659_v0, %v14049_v47  ;;  %v14053_v1 = vld [vmem:[#allocation133_spill] sm:$0xff]  ;;  %v14057_v47 = vld [vmem:[#allocation126_spill] sm:$0xff] }
 0x322   : > { %v9963_v24 = vmul.f32 %v9674_v22, %v14053_v1  ;;  %v14055_v3 = vld [vmem:[#allocation345_spill] sm:$0xff]  ;;  %v9975_v37 = vmul.f32 %v9689_v43, %v14057_v47  ;;  %14060 = vst [vmem:[#allocation312_spill] sm:$0xff] %v9979_v2  ;;  %v9983_v22 = vmul.f32 %v9699_v46, %v14061_v9  ;;  %v14063_v1 = vld [vmem:[#allocation140_spill] sm:$0xff]  ;;  %v14072_v9 = vld [vmem:[#allocation46_spill] sm:$0xff] }
 0x323   : > { %v9971_v0 = vmul.f32 %v9684_v56, %v14055_v3  ;;  %v9987_v10 = vmul.f32 %v9704_v17, %v14063_v1  ;;  %v9991_v56 = vmul.f32 %v9709_v27, %v14065_v35  ;;  %v14067_v3 = vld [vmem:[#allocation153_spill] sm:$0xff]  ;;  %v14068_v43 = vld [vmem:[#allocation148_spill] sm:$0xff]  ;;  %vm522_vm9 = vcmp.lt.s32.totalorder %v14072_v9, 1000  ;;  %v14075_v27 = vld [vmem:[#allocation190_spill] sm:$0xff] }
 0x324   : > { %14058 = vst [vmem:[#allocation311_spill] sm:$0xff] %v9975_v37  ;;  %14062 = vst [vmem:[#allocation313_spill] sm:$0xff] %v9983_v22  ;;  %v2570_v47 = vmul.f32 0.25, %v14068_v43  ;;  %v14069_v37 = vsub.f32 1.0, %v14067_v3  ;;  %v14070_v16 = vsub.f32 1.0, %v14068_v43  ;;  %v14071_v46 = vld [vmem:[#allocation45_spill] sm:$0xff]  ;;  %v10007_v35 = vmul.f32 %v9719_v36, %v14075_v27 }
 0x325   : > { %14056 = vst [vmem:[#allocation310_spill] sm:$0xff] %v9971_v0  ;;  %14064 = vst [vmem:[#allocation314_spill] sm:$0xff] %v9987_v10  ;;  %v2569_v0 = vmul.f32 0.25, %v14067_v3  ;;  %vm521_vm8 = vcmp.lt.s32.totalorder %v14071_v46, 1000  ;;  %v14073_v17 = vld [vmem:[#allocation136_spill] sm:$0xff]  ;;  %v14079_v43 = vld [vmem:[#allocation138_spill] sm:$0xff] }
 0x326   : > { %14066 = vst [vmem:[#allocation315_spill] sm:$0xff] %v9991_v56  ;;  %v2633_v34 = vmul.f32 0.75, %v14069_v37  ;;  %v2634_v2 = vmul.f32 0.75, %v14070_v16  ;;  %v10003_v1 = vmul.f32 %v9714_v21, %v14073_v17  ;;  %14076 = vst [vmem:[#allocation317_spill] sm:$0xff] %v10007_v35  ;;  %v14077_v56 = vld [vmem:[#allocation192_spill] sm:$0xff]  ;;  %v14078_v37 = vld [vmem:[#allocation61_spill] sm:$0xff]  ;;  %v10019_v16 = vmul.f32 %v9734_v39, %v14079_v43 }
 0x327   : > { %v10011_v10 = vmul.f32 %v9724_v32, %v14077_v56  ;;  %v10015_v3 = vmul.f32 %v9729_v28, %v14078_v37  ;;  %v14081_v22 = vld [vmem:[#allocation137_spill] sm:$0xff]  ;;  %v14083_v17 = vld [vmem:[#allocation156_spill] sm:$0xff]  ;;  %v14085_v35 = vld [vmem:[#allocation47_spill] sm:$0xff] }
 0x328   : > { %14074 = vst [vmem:[#allocation316_spill] sm:$0xff] %v10003_v1  ;;  %14080 = vst [vmem:[#allocation319_spill] sm:$0xff] %v10019_v16  ;;  %v10023_v21 = vmul.f32 %v9739_v31, %v14081_v22  ;;  %v2571_v1 = vmul.f32 0.25, %v14083_v17  ;;  %v14084_v36 = vsub.f32 1.0, %v14083_v17  ;;  %vm523_vm12 = vcmp.lt.s32.totalorder %v14085_v35, 1000  ;;  %v14086_v32 = vld [vmem:[#allocation143_spill] sm:$0xff] }
 0x329   : > { %v10031_v56 = vmul.f32 %v9744_v45, %v14086_v32  ;;  %v14088_v28 = vld [vmem:[#allocation130_spill] sm:$0xff]  ;;  %v2697_v45 = vadd.f32 %v2633_v34, %v2569_v0  ;;  %v2698_v32 = vadd.f32 %v2634_v2, %v2570_v47  ;;  %v14103_v47 = vld [vmem:[#allocation197_spill] sm:$0xff] }
 0x32a   : > { %14082 = vst [vmem:[#allocation320_spill] sm:$0xff] %v10023_v21  ;;  %v2635_v27 = vmul.f32 0.75, %v14084_v36  ;;  %v10035_v37 = vmul.f32 %v9749_v62, %v14088_v28  ;;  %v14090_v39 = vld [vmem:[#allocation150_spill] sm:$0xff]  ;;  %v14092_v21 = vld [vmem:[#allocation348_spill] sm:$0xff]  ;;  %v14095_v62 = vld [vmem:[#allocation145_spill] sm:$0xff]  ;;  %v2573_v34 = vmul.f32 0.25, %v14103_v47 }
 0x32b   : > { %14087 = vst [vmem:[#allocation322_spill] sm:$0xff] %v10031_v56  ;;  %v2572_v43 = vmul.f32 0.25, %v14090_v39  ;;  %v14091_v31 = vsub.f32 1.0, %v14090_v39  ;;  %v10042_v17 = vmul.f32 %v9754_v8, %v14092_v21  ;;  %v14093_v36 = vld [vmem:[#allocation346_spill] sm:$0xff]  ;;  %v14094_v56 = vld [vmem:[#allocation48_spill] sm:$0xff]  ;;  %v10051_v28 = vmul.f32 %v9764_v30, %v14095_v62  ;;  %v14099_v21 = vld [vmem:[#allocation141_spill] sm:$0xff] }
 0x32c   : > { %14089 = vst [vmem:[#allocation324_spill] sm:$0xff] %v10035_v37  ;;  %v10046_v16 = vmul.f32 %v9759_v53, %v14093_v36  ;;  %vm524_vm14 = vcmp.lt.s32.totalorder %v14094_v56, 1000  ;;  %v14096_v37 = vld [vmem:[#allocation131_spill] sm:$0xff]  ;;  %v10063_v53 = vmul.f32 %v9779_v51, %v14099_v21  ;;  %v14101_v0 = vld [vmem:[#allocation354_spill] sm:$0xff]  ;;  %v14104_v30 = vsub.f32 1.0, %v14103_v47 }
 0x32d   : > { %v2636_v22 = vmul.f32 0.75, %v14091_v31  ;;  %v10055_v39 = vmul.f32 %v9769_v19, %v14096_v37  ;;  %v14097_v31 = vld [vmem:[#allocation349_spill] sm:$0xff]  ;;  %v10067_v2 = vmul.f32 %v9784_v55, %v14101_v0  ;;  %v2699_v62 = vadd.f32 %v2635_v27, %v2571_v1  ;;  %v14106_v37 = vld [vmem:[#allocation63_spill] sm:$0xff]  ;;  %v3841_v56 = vld [vmem:[%s4234_s29 + $0x20] sm:$0xff] }
 0x32e   : > { %v10059_v8 = vmul.f32 %v9774_v40, %v14097_v31  ;;  %14100 = vst [vmem:[#allocation329_spill] sm:$0xff] %v10063_v53  ;;  %v2637_v36 = vmul.f32 0.75, %v14104_v30  ;;  %v14105_v19 = vld [vmem:[#allocation49_spill] sm:$0xff]  ;;  %v10075_v40 = vmul.f32 %v9789_v49, %v14106_v37  ;;  %v10078_v31 = vld [vmem:[%s4234_s29 + $0x28] sm:$0xff]  ;;  %v14110_v53 = vld [vmem:[#allocation142_spill] sm:$0xff]  ;;  %v2761_v49 = vmul.f32 %v2697_v45, %v9843_v50 }
 0x32f   : > { %14102 = vst [vmem:[#allocation331_spill] sm:$0xff] %v10067_v2  ;;  %vm525_vm13 = vcmp.lt.s32.totalorder %v14105_v19, 1000  ;;  %v2574_v51 = vmul.f32 0.25, %v10078_v31  ;;  %v14108_v21 = vld [vmem:[#allocation151_spill] sm:$0xff]  ;;  %v2700_v2 = vadd.f32 %v2636_v22, %v2572_v43  ;;  %v10085_v47 = vmul.f32 %v9794_v38, %v14110_v53  ;;  %v14114_v37 = vld [vmem:[#allocation52_spill] sm:$0xff] }
 0x330   : > { %14098 = vst [vmem:[#allocation326_spill] sm:$0xff] %v10059_v8  ;;  %14107 = vst [vmem:[#allocation332_spill] sm:$0xff] %v10075_v40  ;;  %v14109_v55 = vsub.f32 1.0, %v14108_v21  ;;  %v14112_v1 = vld [vmem:[#allocation351_spill] sm:$0xff]  ;;  %v2762_v30 = vmul.f32 %v2698_v32, %v9847_v59  ;;  %vm526_vm6 = vcmp.lt.s32.totalorder %v14114_v37, 1000  ;;  %v14117_v43 = vld [vmem:[#allocation132_spill] sm:$0xff] }
 0x331   : > { %14111 = vst [vmem:[#allocation334_spill] sm:$0xff] %v10085_v47  ;;  %v10089_v27 = vmul.f32 %v9799_v42, %v14112_v1  ;;  %v14115_v40 = vld [vmem:[#allocation147_spill] sm:$0xff]  ;;  %v10100_v22 = vmul.f32 %v9809_v6, %v14117_v43  ;;  %v14119_v38 = vld [vmem:[#allocation144_spill] sm:$0xff]  ;;  %v2701_v1 = vadd.f32 %v2637_v36, %v2573_v34  ;;  %v2763_v6 = vmul.f32 %v2699_v62, %v9851_v25  ;;  %v14126_v43 = vld [vmem:[#allocation53_spill] sm:$0xff] }
 0x332   : > { %v2638_v0 = vmul.f32 0.75, %v14109_v55  ;;  %v10096_v21 = vmul.f32 %v9804_v11, %v14115_v40  ;;  %v10104_v53 = vmul.f32 %v9814_v52, %v14119_v38  ;;  %v14121_v42 = vld [vmem:[#allocation352_spill] sm:$0xff]  ;;  %v14122_v55 = vld [vmem:[#allocation299_spill] sm:$0xff]  ;;  %v14124_v11 = vld [vmem:[#allocation158_spill] sm:$0xff]  ;;  %vm527_vm15 = vcmp.lt.s32.totalorder %v14126_v43, 1000 }
 0x333   : > { %14113 = vst [vmem:[#allocation335_spill] sm:$0xff] %v10089_v27  ;;  %14118 = vst [vmem:[#allocation338_spill] sm:$0xff] %v10100_v22  ;;  %v10108_v50 = vmul.f32 %v14122_v55, %v14121_v42  ;;  %v10111_v59 = vld [vmem:[%s4234_s29 + $0x30] sm:$0xff]  ;;  %v14125_v32 = vsub.f32 1.0, %v14124_v11  ;;  %v10119_v52 = vld [vmem:[%s4234_s29 + $0x38] sm:$0xff]  ;;  %v2764_v22 = vmul.f32 %v2700_v2, %v9855_v5  ;;  %v2825_v11 = vsel %vm521_vm8, %v2761_v49, 0.0 }
 0x334   : > { %14116 = vst [vmem:[#allocation336_spill] sm:$0xff] %v10096_v21  ;;  %14120 = vst [vmem:[#allocation339_spill] sm:$0xff] %v10104_v53  ;;  %v2575_v45 = vmul.f32 0.25, %v10111_v59  ;;  %v2576_v38 = vmul.f32 0.25, %v10119_v52  ;;  %v14127_v42 = vld [vmem:[#allocation358_spill] sm:$0xff]  ;;  %v2702_v53 = vadd.f32 %v2638_v0, %v2574_v51  ;;  %v2826_v25 = vsel %vm522_vm9, %v2762_v30, 0.0 }
 0x335   : > { %14123 = vst [vmem:[#allocation341_spill] sm:$0xff] %v10108_v50  ;;  %v2639_v40 = vmul.f32 0.75, %v14125_v32  ;;  %v14128_v55 = vsub.f32 1.0, %v14127_v42  ;;  %v3834_v34 = vld [vmem:[%s4234_s29] sm:$0xff]  ;;  %v3835_v62 = vld [vmem:[%s4234_s29 + $0x8] sm:$0xff]  ;;  %v14129_v42 = vld [vmem:[#allocation57_spill] sm:$0xff] }
 0x336   : > { %v2889_v36 = vsel %vm521_vm8, %v3834_v34, 0.0  ;;  %v2890_v32 = vsel %vm522_vm9, %v3835_v62, 0.0  ;;  %vm528_vm7 = vcmp.lt.s32.totalorder %v14129_v42, 1000  ;;  %v14130_v51 = vld [vmem:[#allocation356_spill] sm:$0xff]  ;;  %v14132_v2 = vld [vmem:[#allocation134_spill] sm:$0xff]  ;;  %v2765_v62 = vmul.f32 %v2701_v1, %v9859_v23  ;;  %v14140_v47 = vld [vmem:[#allocation59_spill] sm:$0xff] }
 0x337   : > { %v2640_v50 = vmul.f32 0.75, %v14128_v55  ;;  %v10138_v5 = vmul.f32 %v9824_v15, %v14130_v51  ;;  %v14133_v0 = vld [vmem:[#allocation300_spill] sm:$0xff]  ;;  %v10145_v30 = vld [vmem:[%s4234_s29 + $0x40] sm:$0xff]  ;;  %v2703_v9 = vadd.f32 %v2639_v40, %v2575_v45  ;;  %v2827_v15 = vsel %vm523_vm12, %v2763_v6, 0.0  ;;  %v3839_v6 = vld [vmem:[%s4234_s29 + $0x18] sm:$0xff] }
 0x338   : > { %v10142_v49 = vmul.f32 %v14133_v0, %v14132_v2  ;;  %v2577_v46 = vmul.f32 0.25, %v10145_v30  ;;  %v14135_v55 = vld [vmem:[#allocation200_spill] sm:$0xff]  ;;  %v14137_v0 = vld [vmem:[#allocation58_spill] sm:$0xff]  ;;  %v2953_v45 = vadd.f32 %v2826_v25, %v2825_v11  ;;  %v3016_v23 = vadd.f32 %v2890_v32, %v2889_v36  ;;  %v14141_v11 = vld [vmem:[#allocation361_spill] sm:$0xff] }
 0x339   : > { %14131 = vst [vmem:[#allocation344_spill] sm:$0xff] %v10138_v5  ;;  %v14136_v34 = vsub.f32 1.0, %v14135_v55  ;;  %v3837_v51 = vld [vmem:[%s4234_s29 + $0x10] sm:$0xff]  ;;  %vm529_vm1 = vcmp.lt.s32.totalorder %v14137_v0, 1000  ;;  %v2704_v40 = vadd.f32 %v2640_v50, %v2576_v38  ;;  %v2766_v1 = vmul.f32 %v2702_v53, %v9863_v14  ;;  %v14149_v37 = vld [vmem:[#allocation65_spill] sm:$0xff]  ;;  %v14152_v43 = vld [vmem:[#allocation66_spill] sm:$0xff] }
 0x33a   : > { %14134 = vst [vmem:[#allocation347_spill] sm:$0xff] %v10142_v49  ;;  %v2891_v2 = vsel %vm523_vm12, %v3837_v51, 0.0  ;;  %v10158_v49 = vld [vmem:[%s4234_s29 + $0x48] sm:$0xff]  ;;  %v14138_v55 = vld [vmem:[#allocation360_spill] sm:$0xff]  ;;  %v2828_v35 = vsel %vm524_vm14, %v2764_v22, 0.0  ;;  %v2892_v51 = vsel %vm524_vm14, %v3839_v6, 0.0  ;;  %v2954_v50 = vadd.f32 %v2953_v45, %v2827_v15 }
 0x33b   : > { %v2641_v21 = vmul.f32 0.75, %v14136_v34  ;;  %v2578_v5 = vmul.f32 0.25, %v10158_v49  ;;  %v14139_v27 = vsub.f32 1.0, %v14138_v55  ;;  %vm530_vm10 = vcmp.lt.s32.totalorder %v14140_v47, 1000  ;;  %v10171_v8 = vld [vmem:[%s4234_s29 + $0x50] sm:$0xff]  ;;  %v10184_v6 = vld [vmem:[%s4234_s29 + $0x58] sm:$0xff] }
 0x33c   : > { %v14142_v25 = vsub.f32 1.0, %v14141_v11  ;;  %v3017_v38 = vadd.f32 %v3016_v23, %v2891_v2  ;;  %v2767_v53 = vmul.f32 %v2703_v9, %v9867_v44  ;;  %v2829_v22 = vsel %vm525_vm13, %v2765_v62, 0.0  ;;  %v14143_v55 = vld [vmem:[#allocation60_spill] sm:$0xff]  ;;  %v10197_v23 = vld [vmem:[%s4234_s29 + $0x60] sm:$0xff]  ;;  %v14155_v42 = vld [vmem:[#allocation67_spill] sm:$0xff] }
 0x33d   : > { %v2642_v34 = vmul.f32 0.75, %v14139_v27  ;;  %v2579_v27 = vmul.f32 0.25, %v10171_v8  ;;  %v2705_v14 = vadd.f32 %v2641_v21, %v2577_v46  ;;  %v2893_v32 = vsel %vm525_vm13, %v3841_v56, 0.0  ;;  %v14146_v45 = vld [vmem:[#allocation64_spill] sm:$0xff]  ;;  %v14158_v0 = vld [vmem:[#allocation71_spill] sm:$0xff] }
 0x33e   : > { %v2643_v36 = vmul.f32 0.75, %v14142_v25  ;;  %vm531_vm2 = vcmp.lt.s32.totalorder %v14143_v55, 1000  ;;  %v2580_v11 = vmul.f32 0.25, %v10184_v6  ;;  %v14144_v25 = vld [vmem:[#allocation198_spill] sm:$0xff]  ;;  %v2955_v21 = vadd.f32 %v2954_v50, %v2828_v35  ;;  %v14164_v55 = vld [vmem:[#allocation73_spill] sm:$0xff] }
 0x33f   : > { %v14145_v15 = vsub.f32 1.0, %v14144_v25  ;;  %v3018_v46 = vadd.f32 %v3017_v38, %v2892_v51  ;;  %v2706_v44 = vadd.f32 %v2642_v34, %v2578_v5  ;;  %v2768_v9 = vmul.f32 %v2704_v40, %v9871_v13  ;;  %v14147_v25 = vld [vmem:[#allocation161_spill] sm:$0xff] }
 0x340   : > { %v2830_v62 = vsel %vm526_vm6, %v2766_v1, 0.0  ;;  %v2894_v19 = vsel %vm526_vm6, %v10078_v31, 0.0  ;;  %vm532_vm0 = vcmp.lt.s32.totalorder %v14146_v45, 1000  ;;  %v2581_v56 = vmul.f32 0.25, %v10197_v23  ;;  %v10210_v1 = vld [vmem:[%s4234_s29 + $0x68] sm:$0xff]  ;;  %v14168_v45 = vld [vmem:[#allocation74_spill] sm:$0xff] }
 0x341   : > { %v2644_v2 = vmul.f32 0.75, %v14145_v15  ;;  %v14148_v35 = vsub.f32 1.0, %v14147_v25  ;;  %v2956_v50 = vadd.f32 %v2955_v21, %v2829_v22  ;;  %v3019_v5 = vadd.f32 %v3018_v46, %v2893_v32  ;;  %v14150_v15 = vld [vmem:[#allocation201_spill] sm:$0xff]  ;;  %v14153_v25 = vld [vmem:[#allocation204_spill] sm:$0xff] }
 0x342   : > { %v2707_v13 = vadd.f32 %v2643_v36, %v2579_v27  ;;  %v2769_v34 = vmul.f32 %v2705_v14, %v9875_v33  ;;  %v2831_v40 = vsel %vm527_vm15, %v2767_v53, 0.0  ;;  %v2895_v31 = vsel %vm527_vm15, %v10111_v59, 0.0  ;;  %v10223_v53 = vld [vmem:[%s4234_s29 + $0x70] sm:$0xff] }
 0x343   : > { %v2645_v51 = vmul.f32 0.75, %v14148_v35  ;;  %vm533_vm3 = vcmp.lt.s32.totalorder %v14149_v37, 1000  ;;  %v2582_v38 = vmul.f32 0.25, %v10210_v1  ;;  %v14151_v22 = vsub.f32 1.0, %v14150_v15  ;;  %v14172_v37 = vld [vmem:[#allocation78_spill] sm:$0xff] }
 0x344   : > { %v2957_v21 = vadd.f32 %v2956_v50, %v2830_v62  ;;  %v3020_v27 = vadd.f32 %v3019_v5, %v2894_v19  ;;  %v2708_v33 = vadd.f32 %v2644_v2, %v2580_v11  ;;  %v2770_v36 = vmul.f32 %v2706_v44, %v9879_v63  ;;  %v14156_v5 = vld [vmem:[#allocation163_spill] sm:$0xff] }
 0x345   : > { %v2646_v32 = vmul.f32 0.75, %v14151_v22  ;;  %v2832_v14 = vsel %vm528_vm7, %v2768_v9, 0.0  ;;  %v2896_v59 = vsel %vm528_vm7, %v10119_v52, 0.0  ;;  %vm534_vm11 = vcmp.lt.s32.totalorder %v14152_v43, 1000  ;;  %v10236_v9 = vld [vmem:[%s4234_s29 + $0x78] sm:$0xff]  ;;  %v14176_v43 = vld [vmem:[#allocation79_spill] sm:$0xff] }
 0x346   : > { %v2583_v46 = vmul.f32 0.25, %v10223_v53  ;;  %v14154_v62 = vsub.f32 1.0, %v14153_v25  ;;  %v2958_v35 = vadd.f32 %v2957_v21, %v2831_v40  ;;  %v3021_v11 = vadd.f32 %v3020_v27, %v2895_v31  ;;  %v14159_v21 = vld [vmem:[#allocation208_spill] sm:$0xff] }
 0x347   : > { %v2709_v63 = vadd.f32 %v2645_v51, %v2581_v56  ;;  %v2771_v2 = vmul.f32 %v2707_v13, %v9883_v12  ;;  %v2833_v44 = vsel %vm529_vm1, %v2769_v34, 0.0  ;;  %v2897_v52 = vsel %vm529_vm1, %v10145_v30, 0.0  ;;  %v10249_v34 = vld [vmem:[%s4234_s29 + $0x80] sm:$0xff] }
 0x348   : > { %v2647_v19 = vmul.f32 0.75, %v14154_v62  ;;  %vm535_vm4 = vcmp.lt.s32.totalorder %v14155_v42, 1000  ;;  %v2584_v50 = vmul.f32 0.25, %v10236_v9  ;;  %v14157_v40 = vsub.f32 1.0, %v14156_v5  ;;  %v14162_v62 = vld [vmem:[#allocation164_spill] sm:$0xff] }
 0x349   : > { %v2959_v15 = vadd.f32 %v2958_v35, %v2832_v14  ;;  %v3022_v56 = vadd.f32 %v3021_v11, %v2896_v59  ;;  %v2710_v12 = vadd.f32 %v2646_v32, %v2582_v38  ;;  %v2772_v51 = vmul.f32 %v2708_v33, %v9887_v29  ;;  %v14165_v5 = vld [vmem:[#allocation168_spill] sm:$0xff] }
 0x34a   : > { %v2648_v31 = vmul.f32 0.75, %v14157_v40  ;;  %v2834_v13 = vsel %vm530_vm10, %v2770_v36, 0.0  ;;  %v2898_v30 = vsel %vm530_vm10, %v10158_v49, 0.0  ;;  %vm536_vm5 = vcmp.lt.s32.totalorder %v14158_v0, 1000  ;;  %v14161_v49 = vld [vmem:[#allocation72_spill] sm:$0xff]  ;;  %v10262_v36 = vld [vmem:[%s4234_s29 + $0x88] sm:$0xff] }
 0x34b   : > { %v2585_v22 = vmul.f32 0.25, %v10249_v34  ;;  %v14160_v27 = vsub.f32 1.0, %v14159_v21  ;;  %v2960_v59 = vadd.f32 %v2959_v15, %v2833_v44  ;;  %v3023_v38 = vadd.f32 %v3022_v56, %v2897_v52  ;;  %v14169_v21 = vld [vmem:[#allocation205_spill] sm:$0xff]  ;;  %v14180_v42 = vld [vmem:[#allocation80_spill] sm:$0xff] }
 0x34c   : > { %v2711_v29 = vadd.f32 %v2647_v19, %v2583_v46  ;;  %v2773_v32 = vmul.f32 %v2709_v63, %v9891_v57  ;;  %v2835_v33 = vsel %vm531_vm2, %v2771_v2, 0.0  ;;  %v2899_v47 = vsel %vm531_vm2, %v10171_v8, 0.0  ;;  %v10275_v2 = vld [vmem:[%s4234_s29 + $0x90] sm:$0xff]  ;;  %v14184_v0 = vld [vmem:[#allocation81_spill] sm:$0xff] }
 0x34d   : > { %v2649_v14 = vmul.f32 0.75, %v14160_v27  ;;  %vm537_vm8 = vcmp.lt.s32.totalorder %v14161_v49, 1000  ;;  %v2586_v25 = vmul.f32 0.25, %v10262_v36  ;;  %v14163_v35 = vsub.f32 1.0, %v14162_v62  ;;  %v14188_v49 = vld [vmem:[#allocation85_spill] sm:$0xff] }
 0x34e   : > { %v2961_v44 = vadd.f32 %v2960_v59, %v2834_v13  ;;  %v3024_v46 = vadd.f32 %v3023_v38, %v2898_v30  ;;  %v2712_v57 = vadd.f32 %v2648_v31, %v2584_v50  ;;  %v2774_v19 = vmul.f32 %v2710_v12, %v9895_v54  ;;  %v14167_v31 = vld [vmem:[#allocation303_spill] sm:$0xff]  ;;  %v10288_v13 = vld [vmem:[%s4234_s29 + $0x98] sm:$0xff] }
 0x34f   : > { %v2650_v11 = vmul.f32 0.75, %v14163_v35  ;;  %v2836_v63 = vsel %vm532_vm0, %v2772_v51, 0.0  ;;  %v2900_v8 = vsel %vm532_vm0, %v10184_v6, 0.0  ;;  %vm538_vm9 = vcmp.lt.s32.totalorder %v14164_v55, 1000  ;;  %v14173_v35 = vld [vmem:[#allocation210_spill] sm:$0xff] }
 0x350   : > { %v2587_v52 = vmul.f32 0.25, %v10275_v2  ;;  %v14166_v40 = vsub.f32 1.0, %v14165_v5  ;;  %v2962_v56 = vadd.f32 %v2961_v44, %v2835_v33  ;;  %v3025_v50 = vadd.f32 %v3024_v46, %v2899_v47  ;;  %v10301_v47 = vld [vmem:[%s4234_s29 + $0xa0] sm:$0xff]  ;;  %v10314_v5 = vld [vmem:[%s4234_s29 + $0xa8] sm:$0xff] }
 0x351   : > { %v2713_v54 = vadd.f32 %v2649_v14, %v2585_v22  ;;  %v2775_v12 = vmul.f32 %v2711_v29, %v14167_v31  ;;  %v2837_v51 = vsel %vm533_vm3, %v2773_v32, 0.0  ;;  %v2901_v6 = vsel %vm533_vm3, %v10197_v23, 0.0  ;;  %v14171_v29 = vld [vmem:[#allocation304_spill] sm:$0xff]  ;;  %v14191_v55 = vld [vmem:[#allocation86_spill] sm:$0xff] }
 0x352   : > { %v2651_v15 = vmul.f32 0.75, %v14166_v40  ;;  %vm539_vm12 = vcmp.lt.s32.totalorder %v14168_v45, 1000  ;;  %v2588_v30 = vmul.f32 0.25, %v10288_v13  ;;  %v14170_v27 = vsub.f32 1.0, %v14169_v21  ;;  %v10327_v21 = vld [vmem:[%s4234_s29 + $0xb0] sm:$0xff]  ;;  %v14194_v45 = vld [vmem:[#allocation90_spill] sm:$0xff] }
 0x353   : > { %v2963_v38 = vadd.f32 %v2962_v56, %v2836_v63  ;;  %v3026_v22 = vadd.f32 %v3025_v50, %v2900_v8  ;;  %v2714_v14 = vadd.f32 %v2650_v11, %v2586_v25  ;;  %v2776_v33 = vmul.f32 %v2712_v57, %v14171_v29  ;;  %v14175_v57 = vld [vmem:[#allocation305_spill] sm:$0xff]  ;;  %v14177_v56 = vld [vmem:[#allocation206_spill] sm:$0xff] }
 0x354   : > { %v2652_v59 = vmul.f32 0.75, %v14170_v27  ;;  %v2838_v32 = vsel %vm534_vm11, %v2774_v19, 0.0  ;;  %v2902_v23 = vsel %vm534_vm11, %v10210_v1, 0.0  ;;  %vm540_vm14 = vcmp.lt.s32.totalorder %v14172_v37, 1000  ;;  %v14197_v37 = vld [vmem:[#allocation94_spill] sm:$0xff] }
 0x355   : > { %v2589_v62 = vmul.f32 0.25, %v10301_v47  ;;  %v14174_v44 = vsub.f32 1.0, %v14173_v35  ;;  %v2964_v63 = vadd.f32 %v2963_v38, %v2837_v51  ;;  %v3027_v25 = vadd.f32 %v3026_v22, %v2901_v6  ;;  %v14181_v38 = vld [vmem:[#allocation170_spill] sm:$0xff]  ;;  %v10340_v35 = vld [vmem:[%s4234_s29 + $0xb8] sm:$0xff] }
 0x356   : > { %v2715_v11 = vadd.f32 %v2651_v15, %v2587_v52  ;;  %v2777_v8 = vmul.f32 %v2713_v54, %v14175_v57  ;;  %v2839_v19 = vsel %vm535_vm4, %v2775_v12, 0.0  ;;  %v2903_v1 = vsel %vm535_vm4, %v10223_v53, 0.0  ;;  %v14179_v54 = vld [vmem:[#allocation306_spill] sm:$0xff] }
 0x357   : > { %v2653_v46 = vmul.f32 0.75, %v14174_v44  ;;  %vm541_vm13 = vcmp.lt.s32.totalorder %v14176_v43, 1000  ;;  %v2590_v40 = vmul.f32 0.25, %v10314_v5  ;;  %v14178_v50 = vsub.f32 1.0, %v14177_v56  ;;  %v10353_v56 = vld [vmem:[%s4234_s29 + $0xc0] sm:$0xff] }
 0x358   : > { %v2965_v51 = vadd.f32 %v2964_v63, %v2838_v32  ;;  %v3028_v52 = vadd.f32 %v3027_v25, %v2902_v23  ;;  %v2716_v15 = vadd.f32 %v2652_v59, %v2588_v30  ;;  %v2778_v6 = vmul.f32 %v2714_v14, %v14179_v54  ;;  %v14183_v14 = vld [vmem:[#allocation307_spill] sm:$0xff]  ;;  %v14201_v43 = vld [vmem:[#allocation98_spill] sm:$0xff] }
 0x359   : > { %v2654_v31 = vmul.f32 0.75, %v14178_v50  ;;  %v2840_v12 = vsel %vm536_vm5, %v2776_v33, 0.0  ;;  %v2904_v53 = vsel %vm536_vm5, %v10236_v9, 0.0  ;;  %vm542_vm6 = vcmp.lt.s32.totalorder %v14180_v42, 1000  ;;  %v14185_v63 = vld [vmem:[#allocation167_spill] sm:$0xff]  ;;  %v14204_v42 = vld [vmem:[#allocation102_spill] sm:$0xff] }
 0x35a   : > { %v2591_v27 = vmul.f32 0.25, %v10327_v21  ;;  %v14182_v22 = vsub.f32 1.0, %v14181_v38  ;;  %v2966_v32 = vadd.f32 %v2965_v51, %v2839_v19  ;;  %v3029_v30 = vadd.f32 %v3028_v52, %v2903_v1  ;;  %v14189_v51 = vld [vmem:[#allocation214_spill] sm:$0xff] }
 0x35b   : > { %v2717_v59 = vadd.f32 %v2653_v46, %v2589_v62  ;;  %v2779_v23 = vmul.f32 %v2715_v11, %v14183_v14  ;;  %v2841_v33 = vsel %vm537_vm8, %v2777_v8, 0.0  ;;  %v2905_v9 = vsel %vm537_vm8, %v10249_v34, 0.0  ;;  %v14187_v11 = vld [vmem:[#allocation308_spill] sm:$0xff] }
 0x35c   : > { %v2655_v29 = vmul.f32 0.75, %v14182_v22  ;;  %vm543_vm15 = vcmp.lt.s32.totalorder %v14184_v0, 1000  ;;  %v2592_v44 = vmul.f32 0.25, %v10340_v35  ;;  %v14186_v25 = vsub.f32 1.0, %v14185_v63  ;;  %v14192_v22 = vld [vmem:[#allocation169_spill] sm:$0xff]  ;;  %v14207_v0 = vld [vmem:[#allocation106_spill] sm:$0xff] }
 0x35d   : > { %v2967_v19 = vadd.f32 %v2966_v32, %v2840_v12  ;;  %v3030_v62 = vadd.f32 %v3029_v30, %v2904_v53  ;;  %v2718_v46 = vadd.f32 %v2654_v31, %v2590_v40  ;;  %v2780_v1 = vmul.f32 %v2716_v15, %v14187_v11  ;;  %v10366_v53 = vld [vmem:[%s4234_s29 + $0xc8] sm:$0xff] }
 0x35e   : > { %v2656_v57 = vmul.f32 0.75, %v14186_v25  ;;  %v2842_v8 = vsel %vm538_vm9, %v2778_v6, 0.0  ;;  %v2906_v34 = vsel %vm538_vm9, %v10262_v36, 0.0  ;;  %vm544_vm7 = vcmp.lt.s32.totalorder %v14188_v49, 1000  ;;  %v14210_v49 = vld [vmem:[#allocation109_spill] sm:$0xff] }
 0x35f   : > { %v2593_v50 = vmul.f32 0.25, %v10353_v56  ;;  %v14190_v52 = vsub.f32 1.0, %v14189_v51  ;;  %v2968_v12 = vadd.f32 %v2967_v19, %v2841_v33  ;;  %v3031_v40 = vadd.f32 %v3030_v62, %v2905_v9  ;;  %v14195_v9 = vld [vmem:[#allocation174_spill] sm:$0xff] }
 0x360   : > { %v2719_v31 = vadd.f32 %v2655_v29, %v2591_v27  ;;  %v2781_v15 = vmul.f32 %v2717_v59, %v9923_v4  ;;  %v2843_v6 = vsel %vm539_vm12, %v2779_v23, 0.0  ;;  %v2907_v36 = vsel %vm539_vm12, %v10275_v2, 0.0  ;;  %v10379_v23 = vld [vmem:[%s4234_s29 + $0xd0] sm:$0xff] }
 0x361   : > { %v2657_v54 = vmul.f32 0.75, %v14190_v52  ;;  %vm545_vm1 = vcmp.lt.s32.totalorder %v14191_v55, 1000  ;;  %v2594_v38 = vmul.f32 0.25, %v10366_v53  ;;  %v14193_v32 = vsub.f32 1.0, %v14192_v22  ;;  %v14200_v52 = vld [vmem:[#allocation309_spill] sm:$0xff]  ;;  %v14213_v55 = vld [vmem:[#allocation112_spill] sm:$0xff] }
 0x362   : > { %v2969_v14 = vadd.f32 %v2968_v12, %v2842_v8  ;;  %v3032_v27 = vadd.f32 %v3031_v40, %v2906_v34  ;;  %v2720_v4 = vadd.f32 %v2656_v57, %v2592_v44  ;;  %v2782_v29 = vmul.f32 %v2718_v46, %v9927_v26  ;;  %v10392_v46 = vld [vmem:[%s4234_s29 + $0xd8] sm:$0xff]  ;;  %v10405_v40 = vld [vmem:[%s4234_s29 + $0xe0] sm:$0xff] }
 0x363   : > { %v2658_v30 = vmul.f32 0.75, %v14193_v32  ;;  %v2844_v59 = vsel %vm540_vm14, %v2780_v1, 0.0  ;;  %v2908_v2 = vsel %vm540_vm14, %v10288_v13, 0.0  ;;  %vm546_vm10 = vcmp.lt.s32.totalorder %v14194_v45, 1000  ;;  %v14198_v1 = vld [vmem:[#allocation171_spill] sm:$0xff] }
 0x364   : > { %v2595_v33 = vmul.f32 0.25, %v10379_v23  ;;  %v14196_v63 = vsub.f32 1.0, %v14195_v9  ;;  %v2970_v19 = vadd.f32 %v2969_v14, %v2843_v6  ;;  %v3033_v44 = vadd.f32 %v3032_v27, %v2907_v36  ;;  %v10418_v27 = vld [vmem:[%s4234_s29 + $0xe8] sm:$0xff] }
 0x365   : > { %v2721_v26 = vadd.f32 %v2657_v54, %v2593_v50  ;;  %v2783_v57 = vmul.f32 %v2719_v31, %v9931_v18  ;;  %v2845_v62 = vsel %vm541_vm13, %v2781_v15, 0.0  ;;  %v2909_v13 = vsel %vm541_vm13, %v10301_v47, 0.0  ;;  %v14202_v15 = vld [vmem:[#allocation220_spill] sm:$0xff]  ;;  %v14216_v45 = vld [vmem:[#allocation115_spill] sm:$0xff] }
 0x366   : > { %v2659_v25 = vmul.f32 0.75, %v14196_v63  ;;  %vm547_vm2 = vcmp.lt.s32.totalorder %v14197_v37, 1000  ;;  %v2596_v11 = vmul.f32 0.25, %v10392_v46  ;;  %v14199_v8 = vsub.f32 1.0, %v14198_v1  ;;  %v14219_v37 = vld [vmem:[#allocation14_spill] sm:$0xff] }
 0x367   : > { %v2971_v51 = vadd.f32 %v2970_v19, %v2844_v59  ;;  %v3034_v50 = vadd.f32 %v3033_v44, %v2908_v2  ;;  %v2722_v18 = vadd.f32 %v2658_v30, %v2594_v38  ;;  %v2784_v54 = vmul.f32 %v2720_v4, %v14200_v52  ;;  %v10431_v19 = vld [vmem:[%s4234_s29 + $0xf0] sm:$0xff] }
 0x368   : > { %v2660_v34 = vmul.f32 0.75, %v14199_v8  ;;  %v2846_v12 = vsel %vm542_vm6, %v2782_v29, 0.0  ;;  %v2910_v47 = vsel %vm542_vm6, %v10314_v5, 0.0  ;;  %vm548_vm0 = vcmp.lt.s32.totalorder %v14201_v43, 1000  ;;  %v14205_v29 = vld [vmem:[#allocation216_spill] sm:$0xff]  ;;  %v14222_v43 = vld [vmem:[#allocation15_spill] sm:$0xff] }
 0x369   : > { %v2597_v31 = vmul.f32 0.25, %v10405_v40  ;;  %v14203_v6 = vsub.f32 1.0, %v14202_v15  ;;  %v2972_v22 = vadd.f32 %v2971_v51, %v2845_v62  ;;  %v3035_v38 = vadd.f32 %v3034_v50, %v2909_v13  ;;  %v14211_v50 = vld [vmem:[#allocation173_spill] sm:$0xff]  ;;  %v10457_v15 = vld [vmem:[%s4234_s29 + $0x100] sm:$0xff] }
 0x36a   : > { %v2723_v32 = vadd.f32 %v2659_v25, %v2595_v33  ;;  %v2785_v30 = vmul.f32 %v2721_v26, %v9939_v20  ;;  %v2847_v14 = vsel %vm543_vm15, %v2783_v57, 0.0  ;;  %v2911_v5 = vsel %vm543_vm15, %v10327_v21, 0.0  ;;  %v14208_v26 = vld [vmem:[#allocation221_spill] sm:$0xff] }
 0x36b   : > { %v2661_v36 = vmul.f32 0.75, %v14203_v6  ;;  %vm549_vm3 = vcmp.lt.s32.totalorder %v14204_v42, 1000  ;;  %v2598_v4 = vmul.f32 0.25, %v10418_v27  ;;  %v14206_v59 = vsub.f32 1.0, %v14205_v29  ;;  %v14225_v42 = vld [vmem:[#allocation16_spill] sm:$0xff] }
 0x36c   : > { %v2973_v9 = vadd.f32 %v2972_v22, %v2846_v12  ;;  %v3036_v33 = vadd.f32 %v3035_v38, %v2910_v47  ;;  %v2724_v20 = vadd.f32 %v2660_v34, %v2596_v11  ;;  %v2786_v63 = vmul.f32 %v2722_v18, %v9943_v58  ;;  %v10444_v34 = vld [vmem:[%s4234_s29 + $0xf8] sm:$0xff] }
 0x36d   : > { %v2662_v2 = vmul.f32 0.75, %v14206_v59  ;;  %v2848_v25 = vsel %vm544_vm7, %v2784_v54, 0.0  ;;  %v2912_v21 = vsel %vm544_vm7, %v10340_v35, 0.0  ;;  %vm550_vm11 = vcmp.lt.s32.totalorder %v14207_v0, 1000  ;;  %v14217_v59 = vld [vmem:[#allocation175_spill] sm:$0xff]  ;;  %v14229_v0 = vld [vmem:[#allocation17_spill] sm:$0xff] }
 0x36e   : > { %v2599_v44 = vmul.f32 0.25, %v10431_v19  ;;  %v14209_v57 = vsub.f32 1.0, %v14208_v26  ;;  %v2974_v13 = vadd.f32 %v2973_v9, %v2847_v14  ;;  %v3037_v11 = vadd.f32 %v3036_v33, %v2911_v5  ;;  %v14220_v26 = vld [vmem:[#allocation180_spill] sm:$0xff] }
 0x36f   : > { %v2725_v58 = vadd.f32 %v2661_v36, %v2597_v31  ;;  %v2787_v1 = vmul.f32 %v2723_v32, %v9947_v48  ;;  %v2849_v8 = vsel %vm545_vm1, %v2785_v30, 0.0  ;;  %v2913_v35 = vsel %vm545_vm1, %v10353_v56, 0.0  ;;  %v14214_v36 = vld [vmem:[#allocation178_spill] sm:$0xff] }
 0x370   : > { %v2663_v62 = vmul.f32 0.75, %v14209_v57  ;;  %vm551_vm4 = vcmp.lt.s32.totalorder %v14210_v49, 1000  ;;  %v2600_v51 = vmul.f32 0.25, %v10444_v34  ;;  %v14212_v18 = vsub.f32 1.0, %v14211_v50  ;;  %v14233_v49 = vld [vmem:[#allocation18_spill] sm:$0xff] }
 0x371   : > { %v2975_v54 = vadd.f32 %v2974_v13, %v2848_v25  ;;  %v3038_v12 = vadd.f32 %v3037_v11, %v2912_v21  ;;  %v2726_v48 = vadd.f32 %v2662_v2, %v2598_v4  ;;  %v2788_v47 = vmul.f32 %v2724_v20, %v9951_v7  ;;  %v10470_v4 = vld [vmem:[%s4234_s29 + $0x108] sm:$0xff]  ;;  %v10483_v21 = vld [vmem:[%s4234_s29 + $0x110] sm:$0xff] }
 0x372   : > { %v2664_v52 = vmul.f32 0.75, %v14212_v18  ;;  %v2850_v31 = vsel %vm546_vm10, %v2786_v63, 0.0  ;;  %v2914_v56 = vsel %vm546_vm10, %v10366_v53, 0.0  ;;  %vm552_vm5 = vcmp.lt.s32.totalorder %v14213_v55, 1000  ;;  %v14237_v55 = vld [vmem:[#allocation19_spill] sm:$0xff] }
 0x373   : > { %v2601_v6 = vmul.f32 0.25, %v10457_v15  ;;  %v14215_v22 = vsub.f32 1.0, %v14214_v36  ;;  %v2976_v32 = vadd.f32 %v2975_v54, %v2849_v8  ;;  %v3039_v30 = vadd.f32 %v3038_v12, %v2913_v35  ;;  %v10496_v8 = vld [vmem:[%s4234_s29 + $0x118] sm:$0xff] }
 0x374   : > { %v2727_v7 = vadd.f32 %v2663_v62, %v2599_v44  ;;  %v2789_v14 = vmul.f32 %v2725_v58, %v9955_v41  ;;  %v2851_v5 = vsel %vm547_vm2, %v2787_v1, 0.0  ;;  %v2915_v53 = vsel %vm547_vm2, %v10379_v23, 0.0 }
 0x375   : > { %v2665_v38 = vmul.f32 0.75, %v14215_v22  ;;  %vm553_vm8 = vcmp.lt.s32.totalorder %v14216_v45, 1000  ;;  %v2602_v29 = vmul.f32 0.25, %v10470_v4  ;;  %v14218_v2 = vsub.f32 1.0, %v14217_v59  ;;  %v14241_v45 = vld [vmem:[#allocation20_spill] sm:$0xff] }
 0x376   : > { %v2977_v33 = vadd.f32 %v2976_v32, %v2850_v31  ;;  %v3040_v20 = vadd.f32 %v3039_v30, %v2914_v56  ;;  %v2728_v41 = vadd.f32 %v2664_v52, %v2600_v51  ;;  %v2790_v63 = vmul.f32 %v2726_v48, %v9959_v60  ;;  %v14223_v51 = vld [vmem:[#allocation177_spill] sm:$0xff]  ;;  %v14226_v56 = vld [vmem:[#allocation228_spill] sm:$0xff]  ;;  %v14228_v32 = vld [vmem:[#allocation310_spill] sm:$0xff] }
 0x377   : > { %v2666_v9 = vmul.f32 0.75, %v14218_v2  ;;  %v2852_v25 = vsel %vm548_vm0, %v2788_v47, 0.0  ;;  %v2916_v23 = vsel %vm548_vm0, %v10392_v46, 0.0  ;;  %vm554_vm9 = vcmp.lt.s32.totalorder %v14219_v37, 1000  ;;  %v10509_v47 = vld [vmem:[%s4234_s29 + $0x120] sm:$0xff]  ;;  %v14245_v37 = vld [vmem:[#allocation21_spill] sm:$0xff] }
 0x378   : > { %v2603_v44 = vmul.f32 0.25, %v10483_v21  ;;  %v14221_v57 = vsub.f32 1.0, %v14220_v26  ;;  %v2978_v13 = vadd.f32 %v2977_v33, %v2851_v5  ;;  %v3041_v11 = vadd.f32 %v3040_v20, %v2915_v53  ;;  %v14230_v53 = vld [vmem:[#allocation179_spill] sm:$0xff] }
 0x379   : > { %v2729_v60 = vadd.f32 %v2665_v38, %v2601_v6  ;;  %v2791_v58 = vmul.f32 %v2727_v7, %v9963_v24  ;;  %v2853_v1 = vsel %vm549_vm3, %v2789_v14, 0.0  ;;  %v2917_v46 = vsel %vm549_vm3, %v10405_v40, 0.0  ;;  %v10522_v14 = vld [vmem:[%s4234_s29 + $0x128] sm:$0xff] }
 0x37a   : > { %v2667_v62 = vmul.f32 0.75, %v14221_v57  ;;  %vm555_vm12 = vcmp.lt.s32.totalorder %v14222_v43, 1000  ;;  %v2604_v35 = vmul.f32 0.25, %v10496_v8  ;;  %v14224_v50 = vsub.f32 1.0, %v14223_v51  ;;  %v14232_v20 = vld [vmem:[#allocation311_spill] sm:$0xff]  ;;  %v14238_v51 = vld [vmem:[#allocation224_spill] sm:$0xff] }
 0x37b   : > { %v2979_v52 = vadd.f32 %v2978_v13, %v2852_v25  ;;  %v3042_v54 = vadd.f32 %v3041_v11, %v2916_v23  ;;  %v2730_v24 = vadd.f32 %v2666_v9, %v2602_v29  ;;  %v2792_v12 = vmul.f32 %v2728_v41, %v9967_v61  ;;  %v10535_v25 = vld [vmem:[%s4234_s29 + $0x130] sm:$0xff]  ;;  %v14249_v43 = vld [vmem:[#allocation22_spill] sm:$0xff] }
 0x37c   : > { %v2668_v18 = vmul.f32 0.75, %v14224_v50  ;;  %v2854_v48 = vsel %vm550_vm11, %v2790_v63, 0.0  ;;  %v2918_v40 = vsel %vm550_vm11, %v10418_v27, 0.0  ;;  %vm556_vm14 = vcmp.lt.s32.totalorder %v14225_v42, 1000  ;;  %v14253_v42 = vld [vmem:[#allocation23_spill] sm:$0xff] }
 0x37d   : > { %v2605_v31 = vmul.f32 0.25, %v10509_v47  ;;  %v14227_v6 = vsub.f32 1.0, %v14226_v56  ;;  %v2980_v22 = vadd.f32 %v2979_v52, %v2853_v1  ;;  %v3043_v38 = vadd.f32 %v3042_v54, %v2917_v46  ;;  %v10548_v46 = vld [vmem:[%s4234_s29 + $0x138] sm:$0xff] }
 0x37e   : > { %v2731_v61 = vadd.f32 %v2667_v62, %v2603_v44  ;;  %v2793_v30 = vmul.f32 %v2729_v60, %v14228_v32  ;;  %v2855_v7 = vsel %vm551_vm4, %v2791_v58, 0.0  ;;  %v2919_v27 = vsel %vm551_vm4, %v10431_v19, 0.0  ;;  %v14234_v44 = vld [vmem:[#allocation185_spill] sm:$0xff]  ;;  %v14236_v60 = vld [vmem:[#allocation312_spill] sm:$0xff] }
 0x37f   : > { %v2669_v36 = vmul.f32 0.75, %v14227_v6  ;;  %vm557_vm13 = vcmp.lt.s32.totalorder %v14229_v0, 1000  ;;  %v2606_v5 = vmul.f32 0.25, %v10522_v14  ;;  %v14231_v29 = vsub.f32 1.0, %v14230_v53  ;;  %v14242_v6 = vld [vmem:[#allocation230_spill] sm:$0xff]  ;;  %v14257_v0 = vld [vmem:[#allocation24_spill] sm:$0xff] }
 0x380   : > { %v2981_v2 = vadd.f32 %v2980_v22, %v2854_v48  ;;  %v3044_v9 = vadd.f32 %v3043_v38, %v2918_v40  ;;  %v2732_v33 = vadd.f32 %v2668_v18, %v2604_v35  ;;  %v2794_v41 = vmul.f32 %v2730_v24, %v14232_v20 }
 0x381   : > { %v2670_v59 = vmul.f32 0.75, %v14231_v29  ;;  %v2856_v63 = vsel %vm552_vm5, %v2792_v12, 0.0  ;;  %v2920_v19 = vsel %vm552_vm5, %v10444_v34, 0.0  ;;  %vm558_vm6 = vcmp.lt.s32.totalorder %v14233_v49, 1000  ;;  %v14240_v12 = vld [vmem:[#allocation313_spill] sm:$0xff] }
 0x382   : > { %v2607_v23 = vmul.f32 0.25, %v10535_v25  ;;  %v14235_v26 = vsub.f32 1.0, %v14234_v44  ;;  %v2982_v62 = vadd.f32 %v2981_v2, %v2855_v7  ;;  %v3045_v13 = vadd.f32 %v3044_v9, %v2919_v27  ;;  %v14246_v29 = vld [vmem:[#allocation181_spill] sm:$0xff] }
 0x383   : > { %v2733_v11 = vadd.f32 %v2669_v36, %v2605_v31  ;;  %v2795_v58 = vmul.f32 %v2731_v61, %v14236_v60  ;;  %v2857_v1 = vsel %vm553_vm8, %v2793_v30, 0.0  ;;  %v2921_v34 = vsel %vm553_vm8, %v10457_v15, 0.0  ;;  %v10561_v31 = vld [vmem:[%s4234_s29 + $0x140] sm:$0xff]  ;;  %v14260_v49 = vld [vmem:[#allocation25_spill] sm:$0xff] }
 0x384   : > { %v2671_v57 = vmul.f32 0.75, %v14235_v26  ;;  %vm559_vm15 = vcmp.lt.s32.totalorder %v14237_v55, 1000  ;;  %v2608_v35 = vmul.f32 0.25, %v10548_v46  ;;  %v14239_v50 = vsub.f32 1.0, %v14238_v51  ;;  %v14244_v30 = vld [vmem:[#allocation314_spill] sm:$0xff]  ;;  %v14250_v26 = vld [vmem:[#allocation187_spill] sm:$0xff] }
 0x385   : > { %v2983_v52 = vadd.f32 %v2982_v62, %v2856_v63  ;;  %v3046_v54 = vadd.f32 %v3045_v13, %v2920_v19  ;;  %v2734_v24 = vadd.f32 %v2670_v59, %v2606_v5  ;;  %v2796_v48 = vmul.f32 %v2732_v33, %v14240_v12  ;;  %v10574_v5 = vld [vmem:[%s4234_s29 + $0x148] sm:$0xff]  ;;  %v14263_v55 = vld [vmem:[#allocation26_spill] sm:$0xff] }
 0x386   : > { %v2672_v18 = vmul.f32 0.75, %v14239_v50  ;;  %v2858_v40 = vsel %vm554_vm9, %v2794_v41, 0.0  ;;  %v2922_v15 = vsel %vm554_vm9, %v10470_v4, 0.0  ;;  %vm560_vm7 = vcmp.lt.s32.totalorder %v14241_v45, 1000  ;;  %v14248_v41 = vld [vmem:[#allocation315_spill] sm:$0xff]  ;;  %v14254_v50 = vld [vmem:[#allocation184_spill] sm:$0xff] }
 0x387   : > { %v2609_v56 = vmul.f32 0.25, %v10561_v31  ;;  %v14243_v36 = vsub.f32 1.0, %v14242_v6  ;;  %v2984_v38 = vadd.f32 %v2983_v52, %v2857_v1  ;;  %v3047_v61 = vadd.f32 %v3046_v54, %v2921_v34  ;;  %v14267_v45 = vld [vmem:[#allocation27_spill] sm:$0xff] }
 0x388   : > { %v2735_v32 = vadd.f32 %v2671_v57, %v2607_v23  ;;  %v2797_v7 = vmul.f32 %v2733_v11, %v14244_v30  ;;  %v2859_v27 = vsel %vm555_vm12, %v2795_v58, 0.0  ;;  %v2923_v4 = vsel %vm555_vm12, %v10483_v21, 0.0  ;;  %v10587_v23 = vld [vmem:[%s4234_s29 + $0x150] sm:$0xff] }
 0x389   : > { %v2673_v22 = vmul.f32 0.75, %v14243_v36  ;;  %vm561_vm1 = vcmp.lt.s32.totalorder %v14245_v37, 1000  ;;  %v2610_v53 = vmul.f32 0.25, %v10574_v5  ;;  %v14247_v59 = vsub.f32 1.0, %v14246_v29  ;;  %v14252_v58 = vld [vmem:[#allocation316_spill] sm:$0xff]  ;;  %v14258_v36 = vld [vmem:[#allocation233_spill] sm:$0xff] }
 0x38a   : > { %v2985_v9 = vadd.f32 %v2984_v38, %v2858_v40  ;;  %v3048_v33 = vadd.f32 %v3047_v61, %v2922_v15  ;;  %v2736_v20 = vadd.f32 %v2672_v18, %v2608_v35  ;;  %v2798_v63 = vmul.f32 %v2734_v24, %v14248_v41  ;;  %v10600_v35 = vld [vmem:[%s4234_s29 + $0x158] sm:$0xff]  ;;  %v14271_v37 = vld [vmem:[#allocation28_spill] sm:$0xff] }
 0x38b   : > { %v2674_v2 = vmul.f32 0.75, %v14247_v59  ;;  %v2860_v19 = vsel %vm556_vm14, %v2796_v48, 0.0  ;;  %v2924_v21 = vsel %vm556_vm14, %v10496_v8, 0.0  ;;  %vm562_vm10 = vcmp.lt.s32.totalorder %v14249_v43, 1000  ;;  %v14256_v48 = vld [vmem:[#allocation317_spill] sm:$0xff] }
 0x38c   : > { %v2611_v44 = vmul.f32 0.25, %v10587_v23  ;;  %v14251_v57 = vsub.f32 1.0, %v14250_v26  ;;  %v2986_v13 = vadd.f32 %v2985_v9, %v2859_v27  ;;  %v3049_v11 = vadd.f32 %v3048_v33, %v2923_v4  ;;  %v10626_v4 = vld [vmem:[%s4234_s29 + $0x168] sm:$0xff]  ;;  %v14261_v29 = vld [vmem:[#allocation229_spill] sm:$0xff] }
 0x38d   : > { %v2737_v60 = vadd.f32 %v2673_v22, %v2609_v56  ;;  %v2799_v1 = vmul.f32 %v2735_v32, %v14252_v58  ;;  %v2861_v34 = vsel %vm557_vm13, %v2797_v7, 0.0  ;;  %v2925_v8 = vsel %vm557_vm13, %v10509_v47, 0.0  ;;  %v10613_v56 = vld [vmem:[%s4234_s29 + $0x160] sm:$0xff]  ;;  %v10652_v58 = vld [vmem:[%s4234_s29 + $0x178] sm:$0xff] }
 0x38e   : > { %v2675_v62 = vmul.f32 0.75, %v14251_v57  ;;  %vm563_vm2 = vcmp.lt.s32.totalorder %v14253_v42, 1000  ;;  %v2612_v51 = vmul.f32 0.25, %v10600_v35  ;;  %v14255_v18 = vsub.f32 1.0, %v14254_v50  ;;  %v14275_v43 = vld [vmem:[#allocation29_spill] sm:$0xff]  ;;  %v14279_v42 = vld [vmem:[#allocation30_spill] sm:$0xff] }
 0x38f   : > { %v2987_v54 = vadd.f32 %v2986_v13, %v2860_v19  ;;  %v3050_v24 = vadd.f32 %v3049_v11, %v2924_v21  ;;  %v2738_v12 = vadd.f32 %v2674_v2, %v2610_v53  ;;  %v2800_v40 = vmul.f32 %v2736_v20, %v14256_v48  ;;  %v14264_v21 = vld [vmem:[#allocation189_spill] sm:$0xff]  ;;  %v14266_v13 = vld [vmem:[#allocation319_spill] sm:$0xff]  ;;  %v10665_v48 = vld [vmem:[%s4234_s29 + $0x180] sm:$0xff] }
 0x390   : > { %v2676_v52 = vmul.f32 0.75, %v14255_v18  ;;  %v2862_v15 = vsel %vm558_vm6, %v2798_v63, 0.0  ;;  %v2926_v47 = vsel %vm558_vm6, %v10522_v14, 0.0  ;;  %vm564_vm0 = vcmp.lt.s32.totalorder %v14257_v0, 1000  ;;  %v10639_v63 = vld [vmem:[%s4234_s29 + $0x170] sm:$0xff]  ;;  %v14282_v0 = vld [vmem:[#allocation31_spill] sm:$0xff] }
 0x391   : > { %v2613_v6 = vmul.f32 0.25, %v10613_v56  ;;  %v14259_v22 = vsub.f32 1.0, %v14258_v36  ;;  %v2988_v61 = vadd.f32 %v2987_v54, %v2861_v34  ;;  %v3051_v32 = vadd.f32 %v3050_v24, %v2925_v8  ;;  %v14268_v34 = vld [vmem:[#allocation232_spill] sm:$0xff] }
 0x392   : > { %v2739_v30 = vadd.f32 %v2675_v62, %v2611_v44  ;;  %v2801_v7 = vmul.f32 %v2737_v60, %v10011_v10  ;;  %v2863_v27 = vsel %vm559_vm15, %v2799_v1, 0.0  ;;  %v2927_v14 = vsel %vm559_vm15, %v10535_v25, 0.0  ;;  %v14270_v54 = vld [vmem:[#allocation320_spill] sm:$0xff] }
 0x393   : > { %v2677_v38 = vmul.f32 0.75, %v14259_v22  ;;  %vm565_vm3 = vcmp.lt.s32.totalorder %v14260_v49, 1000  ;;  %v2614_v53 = vmul.f32 0.25, %v10626_v4  ;;  %v14262_v59 = vsub.f32 1.0, %v14261_v29  ;;  %v14285_v49 = vld [vmem:[#allocation32_spill] sm:$0xff] }
 0x394   : > { %v2989_v9 = vadd.f32 %v2988_v61, %v2862_v15  ;;  %v3052_v33 = vadd.f32 %v3051_v32, %v2926_v47  ;;  %v2740_v10 = vadd.f32 %v2676_v52, %v2612_v51  ;;  %v2802_v20 = vmul.f32 %v2738_v12, %v10015_v3  ;;  %v14272_v15 = vld [vmem:[#allocation103_spill] sm:$0xff]  ;;  %v14274_v61 = vld [vmem:[#allocation322_spill] sm:$0xff] }
 0x395   : > { %v2678_v2 = vmul.f32 0.75, %v14262_v59  ;;  %v2864_v41 = vsel %vm560_vm7, %v2800_v40, 0.0  ;;  %v2928_v25 = vsel %vm560_vm7, %v10548_v46, 0.0  ;;  %vm566_vm11 = vcmp.lt.s32.totalorder %v14263_v55, 1000  ;;  %v14288_v55 = vld [vmem:[#allocation33_spill] sm:$0xff] }
 0x396   : > { %v2615_v19 = vmul.f32 0.25, %v10639_v63  ;;  %v14265_v44 = vsub.f32 1.0, %v14264_v21  ;;  %v2990_v57 = vadd.f32 %v2989_v9, %v2863_v27  ;;  %v3053_v62 = vadd.f32 %v3052_v33, %v2927_v14  ;;  %v14276_v14 = vld [vmem:[#allocation188_spill] sm:$0xff] }
 0x397   : > { %v2741_v3 = vadd.f32 %v2677_v38, %v2613_v6  ;;  %v2803_v11 = vmul.f32 %v2739_v30, %v14266_v13  ;;  %v2865_v60 = vsel %vm561_vm1, %v2801_v7, 0.0  ;;  %v2929_v46 = vsel %vm561_vm1, %v10561_v31, 0.0  ;;  %v10678_v7 = vld [vmem:[%s4234_s29 + $0x188] sm:$0xff]  ;;  %v14278_v33 = vld [vmem:[#allocation324_spill] sm:$0xff] }
 0x398   : > { %v2679_v26 = vmul.f32 0.75, %v14265_v44  ;;  %vm567_vm4 = vcmp.lt.s32.totalorder %v14267_v45, 1000  ;;  %v2616_v1 = vmul.f32 0.25, %v10652_v58  ;;  %v14269_v8 = vsub.f32 1.0, %v14268_v34  ;;  %v14291_v45 = vld [vmem:[#allocation34_spill] sm:$0xff] }
 0x399   : > { %v2991_v50 = vadd.f32 %v2990_v57, %v2864_v41  ;;  %v3054_v18 = vadd.f32 %v3053_v62, %v2928_v25  ;;  %v2742_v52 = vadd.f32 %v2678_v2, %v2614_v53  ;;  %v2804_v24 = vmul.f32 %v2740_v10, %v14270_v54  ;;  %v10691_v41 = vld [vmem:[%s4234_s29 + $0x190] sm:$0xff] }
 0x39a   : > { %v2680_v51 = vmul.f32 0.75, %v14269_v8  ;;  %v2866_v12 = vsel %vm562_vm10, %v2802_v20, 0.0  ;;  %v2930_v31 = vsel %vm562_vm10, %v10574_v5, 0.0  ;;  %vm568_vm5 = vcmp.lt.s32.totalorder %v14271_v37, 1000  ;;  %v14295_v37 = vld [vmem:[#allocation35_spill] sm:$0xff] }
 0x39b   : > { %v2617_v40 = vmul.f32 0.25, %v10665_v48  ;;  %v14273_v47 = vsub.f32 1.0, %v14272_v15  ;;  %v2992_v36 = vadd.f32 %v2991_v50, %v2865_v60  ;;  %v3055_v22 = vadd.f32 %v3054_v18, %v2929_v46  ;;  %v14283_v46 = vld [vmem:[#allocation236_spill] sm:$0xff] }
 0x39c   : > { %v2743_v38 = vadd.f32 %v2679_v26, %v2615_v19  ;;  %v2805_v32 = vmul.f32 %v2741_v3, %v14274_v61  ;;  %v2867_v30 = vsel %vm563_vm2, %v2803_v11, 0.0  ;;  %v2931_v5 = vsel %vm563_vm2, %v10587_v23, 0.0  ;;  %v14280_v19 = vld [vmem:[#allocation104_spill] sm:$0xff]  ;;  %v10704_v11 = vld [vmem:[%s4234_s29 + $0x198] sm:$0xff] }
 0x39d   : > { %v2681_v6 = vmul.f32 0.75, %v14273_v47  ;;  %vm569_vm8 = vcmp.lt.s32.totalorder %v14275_v43, 1000  ;;  %v2618_v27 = vmul.f32 0.25, %v10678_v7  ;;  %v14277_v53 = vsub.f32 1.0, %v14276_v14  ;;  %v14299_v43 = vld [vmem:[#allocation36_spill] sm:$0xff] }
 0x39e   : > { %v2993_v59 = vadd.f32 %v2992_v36, %v2866_v12  ;;  %v3056_v2 = vadd.f32 %v3055_v22, %v2930_v31  ;;  %v2744_v9 = vadd.f32 %v2680_v51, %v2616_v1  ;;  %v2806_v10 = vmul.f32 %v2742_v52, %v14278_v33  ;;  %v10717_v52 = vld [vmem:[%s4234_s29 + $0x1a0] sm:$0xff]  ;;  %v10730_v36 = vld [vmem:[%s4234_s29 + $0x1a8] sm:$0xff] }
 0x39f   : > { %v2682_v29 = vmul.f32 0.75, %v14277_v53  ;;  %v2868_v20 = vsel %vm564_vm0, %v2804_v24, 0.0  ;;  %v2932_v23 = vsel %vm564_vm0, %v10600_v35, 0.0  ;;  %vm570_vm9 = vcmp.lt.s32.totalorder %v14279_v42, 1000  ;;  %v14286_v24 = vld [vmem:[#allocation105_spill] sm:$0xff]  ;;  %v10743_v53 = vld [vmem:[%s4234_s29 + $0x1b0] sm:$0xff] }
 0x3a0   : > { %v2619_v25 = vmul.f32 0.25, %v10691_v41  ;;  %v14281_v21 = vsub.f32 1.0, %v14280_v19  ;;  %v2994_v26 = vadd.f32 %v2993_v59, %v2867_v30  ;;  %v3057_v57 = vadd.f32 %v3056_v2, %v2931_v5  ;;  %v14292_v59 = vld [vmem:[#allocation107_spill] sm:$0xff]  ;;  %v10756_v19 = vld [vmem:[%s4234_s29 + $0x1b8] sm:$0xff] }
 0x3a1   : > { %v2745_v62 = vadd.f32 %v2681_v6, %v2617_v40  ;;  %v2807_v3 = vmul.f32 %v2743_v38, %v10042_v17  ;;  %v2869_v13 = vsel %vm565_vm3, %v2805_v32, 0.0  ;;  %v2933_v35 = vsel %vm565_vm3, %v10613_v56, 0.0  ;;  %v14289_v38 = vld [vmem:[#allocation237_spill] sm:$0xff] }
 0x3a2   : > { %v2683_v44 = vmul.f32 0.75, %v14281_v21  ;;  %vm571_vm12 = vcmp.lt.s32.totalorder %v14282_v0, 1000  ;;  %v2620_v60 = vmul.f32 0.25, %v10704_v11  ;;  %v14284_v1 = vsub.f32 1.0, %v14283_v46  ;;  %v14303_v42 = vld [vmem:[#allocation37_spill] sm:$0xff]  ;;  %v14307_v0 = vld [vmem:[#allocation38_spill] sm:$0xff] }
 0x3a3   : > { %v2995_v8 = vadd.f32 %v2994_v26, %v2868_v20  ;;  %v3058_v51 = vadd.f32 %v3057_v57, %v2932_v23  ;;  %v2746_v17 = vadd.f32 %v2682_v29, %v2618_v27  ;;  %v2808_v50 = vmul.f32 %v2744_v9, %v10046_v16  ;;  %v14294_v20 = vld [vmem:[#allocation326_spill] sm:$0xff] }
 0x3a4   : > { %v2684_v34 = vmul.f32 0.75, %v14284_v1  ;;  %v2870_v18 = vsel %vm566_vm11, %v2806_v10, 0.0  ;;  %v2934_v56 = vsel %vm566_vm11, %v10626_v4, 0.0  ;;  %vm572_vm14 = vcmp.lt.s32.totalorder %v14285_v49, 1000  ;;  %v10769_v1 = vld [vmem:[%s4234_s29 + $0x1c0] sm:$0xff]  ;;  %v14311_v49 = vld [vmem:[#allocation39_spill] sm:$0xff] }
 0x3a5   : > { %v2621_v54 = vmul.f32 0.25, %v10717_v52  ;;  %v14287_v12 = vsub.f32 1.0, %v14286_v24  ;;  %v2996_v40 = vadd.f32 %v2995_v8, %v2869_v13  ;;  %v3059_v15 = vadd.f32 %v3058_v51, %v2933_v35  ;;  %v14298_v35 = vld [vmem:[#allocation329_spill] sm:$0xff]  ;;  %v14300_v8 = vld [vmem:[#allocation108_spill] sm:$0xff] }
 0x3a6   : > { %v2747_v16 = vadd.f32 %v2683_v44, %v2619_v25  ;;  %v2809_v47 = vmul.f32 %v2745_v62, %v10051_v28  ;;  %v2871_v6 = vsel %vm567_vm4, %v2807_v3, 0.0  ;;  %v2935_v4 = vsel %vm567_vm4, %v10639_v63, 0.0  ;;  %v14296_v44 = vld [vmem:[#allocation195_spill] sm:$0xff] }
 0x3a7   : > { %v2685_v31 = vmul.f32 0.75, %v14287_v12  ;;  %vm573_vm13 = vcmp.lt.s32.totalorder %v14288_v55, 1000  ;;  %v2622_v22 = vmul.f32 0.25, %v10730_v36  ;;  %v14290_v61 = vsub.f32 1.0, %v14289_v38  ;;  %v14306_v38 = vld [vmem:[#allocation332_spill] sm:$0xff]  ;;  %v3891_v55 = vld [vmem:[%s4234_s29 + $0x1e0] sm:$0xff] }
 0x3a8   : > { %v2997_v30 = vadd.f32 %v2996_v40, %v2870_v18  ;;  %v3060_v5 = vadd.f32 %v3059_v15, %v2934_v56  ;;  %v2748_v28 = vadd.f32 %v2684_v34, %v2620_v60  ;;  %v2810_v27 = vmul.f32 %v2746_v17, %v10055_v39  ;;  %v14304_v15 = vld [vmem:[#allocation242_spill] sm:$0xff] }
 0x3a9   : > { %v2686_v32 = vmul.f32 0.75, %v14290_v61  ;;  %v2872_v14 = vsel %vm568_vm5, %v2808_v50, 0.0  ;;  %v2936_v63 = vsel %vm568_vm5, %v10652_v58, 0.0  ;;  %vm574_vm6 = vcmp.lt.s32.totalorder %v14291_v45, 1000  ;;  %v3892_v45 = vld [vmem:[%s4234_s29 + $0x1e8] sm:$0xff] }
 0x3aa   : > { %v2623_v29 = vmul.f32 0.25, %v10743_v53  ;;  %v14293_v2 = vsub.f32 1.0, %v14292_v59  ;;  %v2998_v33 = vadd.f32 %v2997_v30, %v2871_v6  ;;  %v3061_v10 = vadd.f32 %v3060_v5, %v2935_v4  ;;  %v3889_v30 = vld [vmem:[%s4234_s29 + $0x1d0] sm:$0xff] }
 0x3ab   : > { %v2749_v39 = vadd.f32 %v2685_v31, %v2621_v54  ;;  %v2811_v23 = vmul.f32 %v2747_v16, %v14294_v20  ;;  %v2873_v25 = vsel %vm569_vm8, %v2809_v47, 0.0  ;;  %v2937_v58 = vsel %vm569_vm8, %v10665_v48, 0.0  ;;  %v14302_v54 = vld [vmem:[#allocation331_spill] sm:$0xff]  ;;  %v14312_v20 = vld [vmem:[#allocation246_spill] sm:$0xff] }
 0x3ac   : > { %v2687_v9 = vmul.f32 0.75, %v14293_v2  ;;  %vm575_vm15 = vcmp.lt.s32.totalorder %v14295_v37, 1000  ;;  %v2624_v21 = vmul.f32 0.25, %v10756_v19  ;;  %v14297_v26 = vsub.f32 1.0, %v14296_v44  ;;  %v10782_v31 = vld [vmem:[%s4234_s29 + $0x1c8] sm:$0xff]  ;;  %v14310_v2 = vld [vmem:[#allocation334_spill] sm:$0xff] }
 0x3ad   : > { %v2999_v62 = vadd.f32 %v2998_v33, %v2872_v14  ;;  %v3062_v3 = vadd.f32 %v3061_v10, %v2936_v63  ;;  %v2750_v13 = vadd.f32 %v2686_v32, %v2622_v22  ;;  %v2812_v60 = vmul.f32 %v2748_v28, %v14298_v35  ;;  %v14308_v28 = vld [vmem:[#allocation110_spill] sm:$0xff]  ;;  %v3890_v10 = vld [vmem:[%s4234_s29 + $0x1d8] sm:$0xff]  ;;  %v3893_v37 = vld [vmem:[%s4234_s29 + $0x1f0] sm:$0xff] }
 0x3ae   : > { %v2688_v57 = vmul.f32 0.75, %v14297_v26  ;;  %v2874_v46 = vsel %vm570_vm9, %v2810_v27, 0.0  ;;  %v2938_v48 = vsel %vm570_vm9, %v10678_v7, 0.0  ;;  %vm576_vm7 = vcmp.lt.s32.totalorder %v14299_v43, 1000  ;;  %v14314_v26 = vld [vmem:[#allocation335_spill] sm:$0xff] }
 0x3af   : > { %v2625_v34 = vmul.f32 0.25, %v10769_v1  ;;  %v14301_v51 = vsub.f32 1.0, %v14300_v8  ;;  %v3000_v50 = vadd.f32 %v2999_v62, %v2873_v25  ;;  %v3063_v18 = vadd.f32 %v3062_v3, %v2937_v58  ;;  %v14317_v8 = vld [vmem:[#allocation336_spill] sm:$0xff] }
 0x3b0   : > { %v2751_v56 = vadd.f32 %v2687_v9, %v2623_v29  ;;  %v2813_v24 = vmul.f32 %v2749_v39, %v14302_v54  ;;  %v2875_v12 = vsel %vm571_vm12, %v2811_v23, 0.0  ;;  %v2939_v7 = vsel %vm571_vm12, %v10691_v41, 0.0 }
 0x3b1   : > { %v2689_v17 = vmul.f32 0.75, %v14301_v51  ;;  %vm577_vm1 = vcmp.lt.s32.totalorder %v14303_v42, 1000  ;;  %v2626_v40 = vmul.f32 0.25, %v10782_v31  ;;  %v14305_v16 = vsub.f32 1.0, %v14304_v15  ;;  %v14329_v42 = vld [vmem:[#allocation301_spill] sm:$0xff] }
 0x3b2   : > { %v3001_v6 = vadd.f32 %v3000_v50, %v2874_v46  ;;  %v3064_v4 = vadd.f32 %v3063_v18, %v2938_v48  ;;  %v2752_v22 = vadd.f32 %v2688_v57, %v2624_v21  ;;  %v2814_v61 = vmul.f32 %v2750_v13, %v14306_v38  ;;  %v14315_v13 = vld [vmem:[#allocation318_spill] sm:$0xff]  ;;  %v14318_v18 = vld [vmem:[#allocation111_spill] sm:$0xff] }
 0x3b3   : > { %v2690_v47 = vmul.f32 0.75, %v14305_v16  ;;  %v2876_v32 = vsel %vm572_vm14, %v2812_v60, 0.0  ;;  %v2940_v41 = vsel %vm572_vm14, %v10704_v11, 0.0  ;;  %vm578_vm10 = vcmp.lt.s32.totalorder %v14307_v0, 1000  ;;  %v14333_v0 = vld [vmem:[#allocation302_spill] sm:$0xff] }
 0x3b4   : > { %v2627_v5 = vmul.f32 0.25, %v3889_v30  ;;  %v14309_v27 = vsub.f32 1.0, %v14308_v28  ;;  %v3002_v63 = vadd.f32 %v3001_v6, %v2875_v12  ;;  %v3065_v29 = vadd.f32 %v3064_v4, %v2939_v7  ;;  %v14321_v6 = vld [vmem:[#allocation239_spill] sm:$0xff] }
 0x3b5   : > { %v2753_v59 = vadd.f32 %v2689_v17, %v2625_v34  ;;  %v2815_v9 = vmul.f32 %v2751_v56, %v14310_v2  ;;  %v2877_v33 = vsel %vm573_vm13, %v2813_v24, 0.0  ;;  %v2941_v11 = vsel %vm573_vm13, %v10717_v52, 0.0 }
 0x3b6   : > { %v2691_v14 = vmul.f32 0.75, %v14309_v27  ;;  %vm579_vm2 = vcmp.lt.s32.totalorder %v14311_v49, 1000  ;;  %v2628_v39 = vmul.f32 0.25, %v3890_v10  ;;  %v14313_v23 = vsub.f32 1.0, %v14312_v20 }
 0x3b7   : > { %v3003_v58 = vadd.f32 %v3002_v63, %v2876_v32  ;;  %v3066_v21 = vadd.f32 %v3065_v29, %v2940_v41  ;;  %v2754_v44 = vadd.f32 %v2690_v47, %v2626_v40  ;;  %v2816_v57 = vmul.f32 %v2752_v22, %v14314_v26  ;;  %v14320_v40 = vld [vmem:[#allocation338_spill] sm:$0xff]  ;;  %v14323_v41 = vld [vmem:[#allocation339_spill] sm:$0xff]  ;;  %v14330_v26 = vld [vmem:[#allocation344_spill] sm:$0xff] }
 0x3b8   : > { %v2692_v25 = vmul.f32 0.75, %v14313_v23  ;;  %v2878_v62 = vsel %vm574_vm6, %v2814_v61, 0.0  ;;  %v2942_v52 = vsel %vm574_vm6, %v10730_v36, 0.0  ;;  %v2629_v3 = vmul.f32 0.25, %v3891_v55  ;;  %v14327_v23 = vld [vmem:[#allocation40_spill] sm:$0xff] }
 0x3b9   : > { %v14316_v35 = vsub.f32 1.0, %v14315_v13  ;;  %v3004_v46 = vadd.f32 %v3003_v58, %v2877_v33  ;;  %v3067_v48 = vadd.f32 %v3066_v21, %v2941_v11  ;;  %v2755_v34 = vadd.f32 %v2691_v14, %v2627_v5  ;;  %v3894_v14 = vld [vmem:[%s4234_s29 + $0x1f8] sm:$0xff]  ;;  %s3953_s29 = scalar_lea.vmem %s3952_s27, 256 }
 0x3ba   : > { %v2817_v51 = vmul.f32 %v2753_v59, %v14317_v8  ;;  %v2879_v17 = vsel %vm575_vm15, %v2815_v9, 0.0  ;;  %v2943_v50 = vsel %vm575_vm15, %v10743_v53, 0.0  ;;  %v2630_v36 = vmul.f32 0.25, %v3892_v45  ;;  %v14326_v33 = vld [vmem:[#allocation341_spill] sm:$0xff]  ;;  %p3955_p0 = scmp.lt.s32.totalorder %s3953_s29, %s3947_s7 }
 0x3bb   : > { %v2693_v60 = vmul.f32 0.75, %v14316_v35  ;;  %v14319_v56 = vsub.f32 1.0, %v14318_v18  ;;  %v3005_v24 = vadd.f32 %v3004_v46, %v2878_v62  ;;  %v3068_v12 = vadd.f32 %v3067_v48, %v2942_v52  ;;  %v14334_v48 = vld [vmem:[#allocation347_spill] sm:$0xff] }
 0x3bc   : > { %v2756_v7 = vadd.f32 %v2692_v25, %v2628_v39  ;;  %v2818_v15 = vmul.f32 %v2754_v44, %v14320_v40  ;;  %v2880_v16 = vsel %vm576_vm7, %v2816_v57, 0.0  ;;  %v2944_v47 = vsel %vm576_vm7, %v10756_v19, 0.0  ;;  %v14324_v19 = vld [vmem:[#allocation227_spill] sm:$0xff]  ;;  %p3956_p1 = por %p3955_p0, %p3954_p12 }
 0x3bd   : > { %v2694_v54 = vmul.f32 0.75, %v14319_v56  ;;  %v2631_v53 = vmul.f32 0.25, %v3893_v37  ;;  %v14322_v4 = vsub.f32 1.0, %v14321_v6  ;;  %v3006_v38 = vadd.f32 %v3005_v24, %v2879_v17  ;;  %v14335_v17 = vld [vmem:[#allocation42_spill] sm:$0xff]  ;;  %v14336_v56 = vld [vmem:[#allocation43_spill] sm:$0xff] }
 0x3be   : > { %v3069_v61 = vadd.f32 %v3068_v12, %v2943_v50  ;;  %v2757_v32 = vadd.f32 %v2693_v60, %v2629_v3  ;;  %v2819_v5 = vmul.f32 %v2755_v34, %v14323_v41  ;;  %v2881_v28 = vsel %vm577_vm1, %v2817_v51, 0.0  ;;  %v14331_v3 = vld [vmem:[#allocation41_spill] sm:$0xff]  ;;  %p3957_p3 = pnand %p3956_p1, %p3950_p8 }
 0x3bf   : > { %v2695_v22 = vmul.f32 0.75, %v14322_v4  ;;  %v2945_v27 = vsel %vm577_vm1, %v10769_v1, 0.0  ;;  %v2632_v43 = vmul.f32 0.25, %v3894_v14  ;;  %v14325_v63 = vsub.f32 1.0, %v14324_v19  ;;  %v14328_v1 = vld [vmem:[#allocation193_spill] sm:$0xff] }
 0x3c0   : > { %v3007_v59 = vadd.f32 %v3006_v38, %v2880_v16  ;;  %v3070_v2 = vadd.f32 %v3069_v61, %v2944_v47  ;;  %v2758_v9 = vadd.f32 %v2694_v54, %v2630_v36  ;;  %v2820_v11 = vmul.f32 %v2756_v7, %v14326_v33 }
 0x3c1   : > { %v2696_v29 = vmul.f32 0.75, %v14325_v63  ;;  %v2882_v39 = vsel %vm578_vm10, %v2818_v15, 0.0  ;;  %v2946_v20 = vsel %vm578_vm10, %v10782_v31, 0.0  ;;  %vm580_vm0 = vcmp.lt.s32.totalorder %v14327_v23, 1000  ;;  %v14332_v31 = vld [vmem:[#allocation149_spill] sm:$0xff]  ;;  %v14337_v15 = vld [vmem:[#allocation44_spill] sm:$0xff] }
 0x3c2   : > { %v2567_v25 = vmul.f32 %v14329_v42, %v14328_v1  ;;  %v3008_v58 = vadd.f32 %v3007_v59, %v2881_v28  ;;  %v3071_v21 = vadd.f32 %v3070_v2, %v2945_v27  ;;  %v2759_v44 = vadd.f32 %v2695_v22, %v2631_v53 }
 0x3c3   : > { %v2821_v57 = vmul.f32 %v2757_v32, %v14330_v26  ;;  %v2883_v62 = vsel %vm579_vm2, %v2819_v5, 0.0  ;;  %v2947_v52 = vsel %vm579_vm2, %v3889_v30, 0.0  ;;  %vm581_vm3 = vcmp.lt.s32.totalorder %v14331_v3, 1000 }
 0x3c4   : > { %v2568_v13 = vmul.f32 %v14333_v0, %v14332_v31  ;;  %v3009_v35 = vadd.f32 %v3008_v58, %v2882_v39  ;;  %v3072_v60 = vadd.f32 %v3071_v21, %v2946_v20  ;;  %v2760_v46 = vadd.f32 %v2696_v29, %v2632_v43 }
 0x3c5   : > { %v2822_v34 = vmul.f32 %v2758_v9, %v14334_v48  ;;  %v2884_v8 = vsel %vm580_vm0, %v2820_v11, 0.0  ;;  %v2948_v51 = vsel %vm580_vm0, %v3890_v10, 0.0  ;;  %vm582_vm11 = vcmp.lt.s32.totalorder %v14335_v17, 1000 }
 0x3c6   : > { %v3010_v50 = vadd.f32 %v3009_v35, %v2883_v62  ;;  %v3073_v36 = vadd.f32 %v3072_v60, %v2947_v52  ;;  %v2823_v18 = vmul.f32 %v2759_v44, %v2567_v25  ;;  %v2885_v49 = vsel %vm581_vm3, %v2821_v57, 0.0 }
 0x3c7   : > { %v2949_v30 = vsel %vm581_vm3, %v3891_v55, 0.0  ;;  %vm583_vm4 = vcmp.lt.s32.totalorder %v14336_v56, 1000  ;;  %v2824_v12 = vmul.f32 %v2760_v46, %v2568_v13  ;;  %v2886_v7 = vsel %vm582_vm11, %v2822_v34, 0.0 }
 0x3c8   : > { %v3011_v54 = vadd.f32 %v3010_v50, %v2884_v8  ;;  %v3074_v24 = vadd.f32 %v3073_v36, %v2948_v51  ;;  %v2950_v40 = vsel %vm582_vm11, %v3892_v45, 0.0  ;;  %vm584_vm5 = vcmp.lt.s32.totalorder %v14337_v15, 1000 }
 0x3c9   : > { %v2887_v47 = vsel %vm583_vm4, %v2823_v18, 0.0  ;;  %v2951_v53 = vsel %vm583_vm4, %v3893_v37, 0.0  ;;  %v2888_v22 = vsel %vm584_vm5, %v2824_v12, 0.0  ;;  %v2952_v38 = vsel %vm584_vm5, %v3894_v14, 0.0 }
 0x3ca   : > { %v3012_v16 = vadd.f32 %v3011_v54, %v2885_v49  ;;  %v3075_v10 = vadd.f32 %v3074_v24, %v2949_v30 }
 0x3cc   : > { %v3013_v6 = vadd.f32 %v3012_v16, %v2886_v7  ;;  %v3076_v4 = vadd.f32 %v3075_v10, %v2950_v40 }
 0x3ce   : > { %v3014_v55 = vadd.f32 %v3013_v6, %v2887_v47  ;;  %v3077_v61 = vadd.f32 %v3076_v4, %v2951_v53 }
 0x3d0   : > { %v3015_v45 = vadd.f32 %v3014_v55, %v2888_v22  ;;  %v3078_v32 = vadd.f32 %v3077_v61, %v2952_v38 }
 0x3d2   : > { %3079 = vst [vmem:[%s244_s9] sm:$0xff] %v3015_v45  ;;  %3080 = vst [vmem:[%s251_s19] sm:$0xff] %v3078_v32 }
 0x3d3   : > { %3960 = shalt.err (!%p3957_p3)
}
 0x3d4   : > { %s3961_s11 = scalar_lea.hbm %s10869_s30, 128  ;;  %s3965_s9 = scalar_lea.hbm %s10942_s2, 256 }
 0x3d5   : > { %p3962_p9 = scmp.ne.s32.totalorder %s10869_s30, %s3961_s11  ;;  %p3966_p13 = scmp.lt.s32.totalorder %s10869_s30, %s10942_s2 }
 0x3d6   : > { %p3967_p2 = scmp.lt.s32.totalorder %s3965_s9, %s3961_s11 }
 0x3d7   : > { %p3963_p10 = pnand %p3962_p9, %p14338_p5 }
 0x3d8   : > { %p3968_p4 = por %p3967_p2, %p3966_p13 }
 0x3d9   : > { %p3964_p11 = pneg %p3963_p10 }
 0x3db   : > { %p3969_p6 = pnand %p3968_p4, %p3964_p11 }
 0x3dd   : > { %3972 = shalt.err (!%p3969_p6)
}
 0x3de   : > { %3271 = dma.vmem_to_hbm [thread:$0]  (%p14338_p5), %s10871_s17, 128, %s10869_s30, %s3082_s6  }
 0x3df   : > { %s3087_s28 = scalar_lea.sflag [#allocation9], %s4223_s10  ;;  %s3973_s22 = scalar_lea.vmem %s10878_s20, 128 }
 0x3e0   : > { %p3974_p7 = scmp.ne.s32.totalorder %s10878_s20, %s3973_s22  ;;  %s4054_s5 = smov [#allocation8]  }
 0x3e1   : > { %s3977_s7 = sshll.u32 %s4054_s5, 4  ;;  %s3978_s7 = int_to_ptr.vmem [resolvable:$false] %s3977_s7 }
 0x3e2   : > { %p3975_p8 = pnand %p3974_p7, %p14338_p5  ;;  %s3979_s8 = scalar_lea.vmem %s3978_s7, 256 }
 0x3e3   : > { %p3980_p0 = scmp.lt.s32.totalorder %s10878_s20, %s3978_s7  ;;  %p3981_p1 = scmp.lt.s32.totalorder %s3979_s8, %s3973_s22 }
 0x3e4   : > { %p3976_p12 = pneg %p3975_p8 }
 0x3e5   : > { %p3982_p3 = por %p3981_p1, %p3980_p0 }
 0x3e7   : > { %p3983_p9 = pnand %p3982_p3, %p3976_p12 }
 0x3e9   : > { %3986 = shalt.err (!%p3983_p9)
}
 0x3ea   : > { %s3987_s17 = scalar_lea.hbm %s10876_s16, 128  ;;  %s3991_s6 = scalar_lea.hbm %s10943_s3, 256 }
 0x3eb   : > { %p3988_p10 = scmp.ne.s32.totalorder %s10876_s16, %s3987_s17  ;;  %p3992_p2 = scmp.lt.s32.totalorder %s10876_s16, %s10943_s3 }
 0x3ec   : > { %p3993_p4 = scmp.lt.s32.totalorder %s3991_s6, %s3987_s17 }
 0x3ed   : > { %p3989_p11 = pnand %p3988_p10, %p14338_p5 }
 0x3ee   : > { %p3994_p6 = por %p3993_p4, %p3992_p2 }
 0x3ef   : > { %p3990_p13 = pneg %p3989_p11 }
 0x3f1   : > { %p3995_p7 = pnand %p3994_p6, %p3990_p13 }
 0x3f3   : > { %3998 = shalt.err (!%p3995_p7)
}
 0x3f4   : > { %3272 = dma.vmem_to_hbm [thread:$0]  (%p14338_p5), %s10878_s20, 128, %s10876_s16, %s3087_s28  }
 0x3f5 PF: > { %s3125_s11 = sand.u32 1, %s4033_s12   ;;  %p14339_p8 = scmp.ne.s32.totalorder %s11782_s25, 0 }
 0x3f6   : > { %p14340_p12 = scmp.ge.s32.totalorder %s4045_s15, 2  ;;  %s3126_s23 = scalar_lea.sflag [#allocation4], %s3125_s11 }
 0x3f8   : > { %p3276_p0 = pnand %p14340_p12, %p14339_p8 }
 0x3fa   : > { %p3277_p1 = pneg %p3276_p0 }
 0x3fc   : > { %4024 = dma.done.wait (%p3277_p1), %s3126_s23, 128  }
 0x3fd   : > { %4026 = vsyncadd (%p3277_p1), %s3126_s23, 4294967168  ;;  %s3135_s4 = scalar_lea.sflag [#allocation9], %s3125_s11 }
 0x3fe   : > { %4028 = dma.done.wait (%p3277_p1), %s3135_s4, 128  }
 0x3ff   : > { %4030 = vsyncadd (%p3277_p1), %s3135_s4, 4294967168  ;;  %p23_p5 = scmp.ge.s32.totalorder %s4100_s18, 4   ;;  %s14341_s12 = smov %s4037_s13 }
 0x400   : > { %s14342_s13 = smov %s4041_s14  ;;  %s14343_s14 = smov %s4112_s21 }
 0x401   : > { %s14344_s15 = smov %s4100_s18  ;;  %25 = sbr.rel (!%p23_p5) target bundleno = 9 (0x9), region = 103 }
 0x406   :  { %3140 = vsyncpa [#allocation3], 1 }
 0x407   :  { %3142 = vsyncpa [#allocation3 + $0x1], 1 }
 0x408   :  { %3143 = vsyncpa [#allocation6], 1 }
 0x409   :  { %3145 = vsyncpa [#allocation6 + $0x1], 1 }
 0x40a   :  { %3146 = vsyncpa [#allocation4], 1 }
 0x40b   :  { %3148 = vsyncpa [#allocation4 + $0x1], 1 }
 0x40c   :  { %3149 = vsyncpa [#allocation9], 1 }
 0x40d   :  { %3151 = vsyncpa [#allocation9 + $0x1], 1 }

</bundles_post_ra>
